<compile_context>
chip_gen: v6e
topology: v6e:2x2x1
jax: 0.10.0
libtpu: 0.0.40
codegen_flags: <defaults>
</compile_context>

<pallas_src>
import functools

import jax
import jax.numpy as jnp
from jax.experimental import pallas as pl
from jax.experimental.pallas import tpu as pltpu


def _round_up(n, m):
    return ((n + m - 1) // m) * m


def _largest_divisor_leq(n, cap):
    cap = max(1, min(n, cap))
    for d in range(cap, 0, -1):
        if n % d == 0:
            return d
    return 1


# ----------------------------------------------------------------------------
# Kernel 1: fused linear  out = maybe_relu(x @ W + b [+ add])
# Used for fc0 and the shared-trunk 1x1 conv path fused with the spectral add.
# ----------------------------------------------------------------------------
def pallas_linear(x, w, b, add=None, relu=False, tile_n=1024):
    N, Cin = x.shape
    Cout = w.shape[1]
    tn = min(tile_n, _round_up(N, 8))
    Np = _round_up(N, tn)
    if Np != N:
        x = jnp.pad(x, ((0, Np - N), (0, 0)))
        if add is not None:
            add = jnp.pad(add, ((0, Np - N), (0, 0)))
    has_add = add is not None

    def kernel(*refs):
        if has_add:
            x_ref, w_ref, b_ref, a_ref, o_ref = refs
        else:
            x_ref, w_ref, b_ref, o_ref = refs
        y = jnp.dot(x_ref[...], w_ref[...], preferred_element_type=jnp.float32)
        y = y + b_ref[...]
        if has_add:
            y = y + a_ref[...]
        if relu:
            y = jnp.maximum(y, 0.0)
        o_ref[...] = y.astype(o_ref.dtype)

    in_specs = [
        pl.BlockSpec((tn, Cin), lambda i: (i, 0)),
        pl.BlockSpec((Cin, Cout), lambda i: (0, 0)),
        pl.BlockSpec((1, Cout), lambda i: (0, 0)),
    ]
    args = [x, w, b]
    if has_add:
        in_specs.append(pl.BlockSpec((tn, Cout), lambda i: (i, 0)))
        args.append(add)

    out = pl.pallas_call(
        kernel,
        out_shape=jax.ShapeDtypeStruct((Np, Cout), jnp.float32),
        grid=(Np // tn,),
        in_specs=in_specs,
        out_specs=pl.BlockSpec((tn, Cout), lambda i: (i, 0)),
        compiler_params=pltpu.CompilerParams(dimension_semantics=("parallel",)),
    )(*args)
    return out[:N] if Np != N else out


# ----------------------------------------------------------------------------
# Kernel 2: heads-batched fused 1x1-conv + spectral add (+ relu)
#   out[h] = maybe_relu(x[h] @ w[h] + b[h] + add[h]) for every head h
# ----------------------------------------------------------------------------
def pallas_head_linear(x, w, b, add, relu=False, shared_x=False, tile_n=1024):
    """x: (N,C) if shared_x else (Hh,N,C); w: (Hh,C,C); b: (Hh,1,C); add: (Hh,N,C)."""
    Hh, N, C = add.shape
    tn = min(tile_n, _round_up(N, 8))
    Np = _round_up(N, tn)
    if Np != N:
        add = jnp.pad(add, ((0, 0), (0, Np - N), (0, 0)))
        if shared_x:
            x = jnp.pad(x, ((0, Np - N), (0, 0)))
        else:
            x = jnp.pad(x, ((0, 0), (0, Np - N), (0, 0)))

    def kernel(x_ref, w_ref, b_ref, a_ref, o_ref):
        xv = x_ref[...] if shared_x else x_ref[0]
        y = jnp.dot(xv, w_ref[0], preferred_element_type=jnp.float32)
        y = y + b_ref[0] + a_ref[0]
        if relu:
            y = jnp.maximum(y, 0.0)
        o_ref[0] = y.astype(o_ref.dtype)

    if shared_x:
        x_spec = pl.BlockSpec((tn, C), lambda h, i: (i, 0))
    else:
        x_spec = pl.BlockSpec((1, tn, C), lambda h, i: (h, i, 0))

    out = pl.pallas_call(
        kernel,
        out_shape=jax.ShapeDtypeStruct((Hh, Np, C), jnp.float32),
        grid=(Hh, Np // tn),
        in_specs=[
            x_spec,
            pl.BlockSpec((1, C, C), lambda h, i: (h, 0, 0)),
            pl.BlockSpec((1, 1, C), lambda h, i: (h, 0, 0)),
            pl.BlockSpec((1, tn, C), lambda h, i: (h, i, 0)),
        ],
        out_specs=pl.BlockSpec((1, tn, C), lambda h, i: (h, i, 0)),
        compiler_params=pltpu.CompilerParams(
            dimension_semantics=("parallel", "parallel")),
    )(x, w, b, add)
    return out[:, :N] if Np != N else out


# ----------------------------------------------------------------------------
# Kernel 3: spectral mode mixing, all modes (and heads) per call.
#   Real-block complex matmul: [xr|xi] @ [[wr,wi],[-wi,wr]] = [real|imag]
# ----------------------------------------------------------------------------
def pallas_spectral_mul(xp, wp, max_chunk_bytes=2 * 1024 * 1024):
    """xp: (Mt,B,2C), wp: (Mt,2C,2C) -> (Mt,B,2C), one batched dot per chunk."""
    Mt, B, C2 = xp.shape
    per_mode_bytes = (C2 * C2 + 2 * B * C2) * 4
    mc = _largest_divisor_leq(Mt, max(1, max_chunk_bytes // per_mode_bytes))

    def kernel(x_ref, w_ref, o_ref):
        y = jax.lax.dot_general(
            x_ref[...], w_ref[...],
            dimension_numbers=(((2,), (1,)), ((0,), (0,))),
            preferred_element_type=jnp.float32)
        o_ref[...] = y.astype(o_ref.dtype)

    return pl.pallas_call(
        kernel,
        out_shape=jax.ShapeDtypeStruct((Mt, B, C2), jnp.float32),
        grid=(Mt // mc,),
        in_specs=[
            pl.BlockSpec((mc, B, C2), lambda m: (m, 0, 0)),
            pl.BlockSpec((mc, C2, C2), lambda m: (m, 0, 0)),
        ],
        out_specs=pl.BlockSpec((mc, B, C2), lambda m: (m, 0, 0)),
        compiler_params=pltpu.CompilerParams(dimension_semantics=("parallel",)),
    )(xp, wp)


# ----------------------------------------------------------------------------
# Kernel 4: fused per-head projection fc1 -> relu -> fc2, lane-packed output.
# ----------------------------------------------------------------------------
def pallas_project_heads(x, w1, b1, w2_blk, b2, tile_n=1024):
    """x: (Hh,N,C); w1: (Hh,C,128); b1: (Hh,1,128);
    w2_blk: (Hh*128,Hh) block-diag of per-head (128,1) fc2 weights; b2: (1,Hh).
    Returns (N, Hh)."""
    Hh, N, C = x.shape
    Dh = w1.shape[2]
    tn = min(tile_n, _round_up(N, 8))
    Np = _round_up(N, tn)
    if Np != N:
        x = jnp.pad(x, ((0, 0), (0, Np - N), (0, 0)))

    def kernel(x_ref, w1_ref, b1_ref, w2_ref, b2_ref, o_ref):
        ys = []
        for h in range(Hh):                      # static unroll over heads
            y = jnp.dot(x_ref[h], w1_ref[h],
                        preferred_element_type=jnp.float32) + b1_ref[h]
            ys.append(jnp.maximum(y, 0.0))
        ybig = jnp.concatenate(ys, axis=-1)      # (tn, Hh*128), stays in VMEM
        z = jnp.dot(ybig, w2_ref[...], preferred_element_type=jnp.float32)
        o_ref[...] = (z + b2_ref[...]).astype(o_ref.dtype)

    out = pl.pallas_call(
        kernel,
        out_shape=jax.ShapeDtypeStruct((Np, Hh), jnp.float32),
        grid=(Np // tn,),
        in_specs=[
            pl.BlockSpec((Hh, tn, C), lambda i: (0, i, 0)),
            pl.BlockSpec((Hh, C, Dh), lambda i: (0, 0, 0)),
            pl.BlockSpec((Hh, 1, Dh), lambda i: (0, 0, 0)),
            pl.BlockSpec((Hh * Dh, Hh), lambda i: (0, 0)),
            pl.BlockSpec((1, Hh), lambda i: (0, 0)),
        ],
        out_specs=pl.BlockSpec((tn, Hh), lambda i: (i, 0)),
        compiler_params=pltpu.CompilerParams(dimension_semantics=("parallel",)),
    )(x, w1, b1, w2_blk, b2)
    return out[:N] if Np != N else out


# ----------------------------------------------------------------------------
# SpectralConv2d (grouped over heads), channel-last:
#   rfft2 -> (Pallas) packed complex mode mixing -> irfft2
# ----------------------------------------------------------------------------
def spectral_conv_grouped(x, wp, modes1, modes2):
    """x: (Gx,B,H,W,C) real with Gx in {1,G} (Gx==1 => input shared by groups);
    wp: (G, M, 2C, 2C) packed weights, M = 2*modes1*modes2. Returns (G,B,H,W,C)."""
    Gx, B, H, W, C = x.shape
    G, M, C2, _ = wp.shape
    assert Gx in (1, G)
    m1, m2 = modes1, modes2
    Wf = W // 2 + 1

    # TODO(synk): FFTs stay in plain JAX — no Pallas FFT primitive on TPU.
    x_ft = jnp.fft.rfft2(x, axes=(2, 3))                         # (Gx,B,H,Wf,C)
    z = jnp.concatenate([x_ft[:, :, :m1, :m2, :],
                         x_ft[:, :, H - m1:, :m2, :]], axis=2)   # (Gx,B,2m1,m2,C)
    z = jnp.transpose(z, (0, 2, 3, 1, 4)).reshape(Gx, M, B, C)   # mode-major
    xp = jnp.concatenate([z.real, z.imag], axis=-1).astype(jnp.float32)
    if Gx != G:                                                  # shared input
        xp = jnp.broadcast_to(xp, (G, M, B, 2 * C))

    yp = pallas_spectral_mul(xp.reshape(G * M, B, 2 * C),
                             wp.reshape(G * M, C2, C2))
    yp = yp.reshape(G, M, B, 2 * C)
    y = yp[..., :C] + 1j * yp[..., C:]                           # (G,M,B,C) complex
    y = jnp.transpose(y.reshape(G, 2 * m1, m2, B, C), (0, 3, 1, 2, 4))

    out_ft = jnp.zeros((G, B, H, Wf, C), jnp.complex64)
    out_ft = out_ft.at[:, :, :m1, :m2, :].set(y[:, :, :m1])
    out_ft = out_ft.at[:, :, H - m1:, :m2, :].set(y[:, :, m1:])
    return jnp.fft.irfft2(out_ft, axes=(2, 3), s=(H, W))         # (G,B,H,W,C)


# ----------------------------------------------------------------------------
# Full forward pass (matches FNOBlock2d_from_thirdFL.forward semantics)
# ----------------------------------------------------------------------------
def fno_forward(x, params, *, modes1, modes2, width, num_heads):
    B, Cin, H, W = x.shape
    N = B * H * W
    Hh = num_heads
    C = width

    # one NCHW -> NHWC transpose at the boundary; channel-last everywhere else
    v = jnp.transpose(x, (0, 2, 3, 1)).reshape(N, Cin)
    v = pallas_linear(v, params["fc0_w"], params["fc0_b"])               # lift

    # ---- shared Fourier layers 0, 1 (relu after both) ----
    for wp_name, w_name, b_name in (("conv0_wp", "w0_w", "w0_b"),
                                    ("conv1_wp", "w1_w", "w1_b")):
        k = spectral_conv_grouped(v.reshape(1, B, H, W, C), params[wp_name],
                                  modes1, modes2)                        # K(u)
        v = pallas_linear(v, params[w_name], params[b_name],
                          add=k.reshape(N, C), relu=True)                # W(u)+K(u)

    # ---- head layer 2: shared input, per-head weights, relu ----
    k = spectral_conv_grouped(v.reshape(1, B, H, W, C), params["conv2_wp"],
                              modes1, modes2)                            # (Hh,B,H,W,C)
    y = pallas_head_linear(v, params["w2_w"], params["w2_b"],
                           add=k.reshape(Hh, N, C), relu=True,
                           shared_x=True)                                # (Hh,N,C)

    # ---- head layer 3: per-head input, per-head weights, NO relu ----
    k = spectral_conv_grouped(y.reshape(Hh, B, H, W, C), params["conv3_wp"],
                              modes1, modes2)
    y = pallas_head_linear(y, params["w3_w"], params["w3_b"],
                           add=k.reshape(Hh, N, C), relu=False,
                           shared_x=False)                               # (Hh,N,C)

    # ---- fused projection fc1(+relu)+fc2 of all heads, (N, Hh) output ----
    out = pallas_project_heads(y, params["fc1_w"], params["fc1_b"],
                               params["fc2_wblk"], params["fc2_b"])      # (N,Hh)
    return jnp.transpose(out.reshape(B, H, W, Hh), (0, 3, 1, 2))         # (B,Hh,H,W)


# ----------------------------------------------------------------------------
# Parameter construction (deterministic synthetic; packed once, outside jit)
# ----------------------------------------------------------------------------
def _pack_spectral(w1r, w1i, w2r, w2i):
    """SpectralConv2d weights (Cin,Cout,m1,m2) real/imag -> (2*m1*m2, 2C, 2C)
    real-block packed [[wr, wi], [-wi, wr]]; weights1 (low modes) first."""
    C = w1r.shape[0]

    def block(wr, wi):
        wr = jnp.transpose(wr, (2, 3, 0, 1)).reshape(-1, C, C)
        wi = jnp.transpose(wi, (2, 3, 0, 1)).reshape(-1, C, C)
        top = jnp.concatenate([wr, wi], axis=-1)      # (m, C, 2C)
        bot = jnp.concatenate([-wi, wr], axis=-1)     # (m, C, 2C)
        return jnp.concatenate([top, bot], axis=1)    # (m, 2C, 2C)

    return jnp.concatenate([block(w1r, w1i), block(w2r, w2i)], axis=0)


def _block_diag_cols(cols):
    """List of (D,1) fc2 weights -> (Hh*D, Hh) block-diagonal matrix."""
    Hh, D = len(cols), cols[0].shape[0]
    out = jnp.zeros((Hh * D, Hh), jnp.float32)
    for h, c in enumerate(cols):
        out = out.at[h * D:(h + 1) * D, h].set(c[:, 0])
    return out


def init_params(key, in_ch, width, modes1, modes2, num_heads):
    C = width
    keys = iter(jax.random.split(key, 64))
    nxt = lambda: next(keys)
    scale = 1.0 / (C * C)

    def spectral_packed():
        w1r = scale * jax.random.uniform(nxt(), (C, C, modes1, modes2), jnp.float32)
        w1i = scale * jax.random.uniform(nxt(), (C, C, modes1, modes2), jnp.float32)
        w2r = scale * jax.random.uniform(nxt(), (C, C, modes1, modes2), jnp.float32)
        w2i = scale * jax.random.uniform(nxt(), (C, C, modes1, modes2), jnp.float32)
        return _pack_spectral(w1r, w1i, w2r, w2i)     # (2*m1*m2, 2C, 2C)

    def conv1x1():
        # nn.Conv1d(C, C, 1): weight (out,in,1) -> stored transposed (in,out)
        return (0.1 * jax.random.normal(nxt(), (C, C), jnp.float32),
                0.1 * jax.random.normal(nxt(), (1, C), jnp.float32))

    params = {
        # nn.Linear(inputHeads, width): stored transposed (in,out) for x @ W
        "fc0_w": 0.1 * jax.random.normal(nxt(), (in_ch, C), jnp.float32),
        "fc0_b": 0.1 * jax.random.normal(nxt(), (1, C), jnp.float32),
        "conv0_wp": spectral_packed()[None],          # (1, M, 2C, 2C)
    }
    params["w0_w"], params["w0_b"] = conv1x1()
    params["conv1_wp"] = spectral_packed()[None]
    params["w1_w"], params["w1_b"] = conv1x1()

    c2, c3, w2w, w2b, w3w, w3b, f1w, f1b, f2c, f2b = ([] for _ in range(10))
    for _ in range(num_heads):
        c2.append(spectral_packed())
        c3.append(spectral_packed())
        w, b = conv1x1(); w2w.append(w); w2b.append(b)
        w, b = conv1x1(); w3w.append(w); w3b.append(b)
        f1w.append(0.05 * jax.random.normal(nxt(), (C, 128), jnp.float32))
        f1b.append(0.05 * jax.random.normal(nxt(), (1, 128), jnp.float32))
        f2c.append(0.05 * jax.random.normal(nxt(), (128, 1), jnp.float32))
        f2b.append(0.05 * jax.random.normal(nxt(), (1,), jnp.float32))

    params.update(
        conv2_wp=jnp.stack(c2), conv3_wp=jnp.stack(c3),   # (Hh, M, 2C, 2C)
        w2_w=jnp.stack(w2w), w2_b=jnp.stack(w2b),          # (Hh, C, C)/(Hh,1,C)
        w3_w=jnp.stack(w3w), w3_b=jnp.stack(w3b),
        fc1_w=jnp.stack(f1w), fc1_b=jnp.stack(f1b),        # (Hh,C,128)/(Hh,1,128)
        fc2_wblk=_block_diag_cols(f2c),                    # (Hh*128, Hh)
        fc2_b=jnp.concatenate(f2b).reshape(1, num_heads),  # (1, Hh)
    )
    return params


if __name__ == "__main__":
    B, in_ch, H, W = 2, 3, 16, 16      # (batch, inputHeads=3, dimx, dimy)
    modes1 = modes2 = 4
    width = 32
    num_heads = 2

    key = jax.random.PRNGKey(0)
    kx, kp = jax.random.split(key)
    x = jax.random.normal(kx, (B, in_ch, H, W), jnp.float32)
    params = init_params(kp, in_ch, width, modes1, modes2, num_heads)

    fwd = jax.jit(functools.partial(fno_forward, modes1=modes1, modes2=modes2,
                                    width=width, num_heads=num_heads))
    out = fwd(x, params)
    jax.block_until_ready(out)
    assert out.shape == (B, num_heads, H, W), out.shape
    assert out.dtype == jnp.float32
    print("KERNEL_OK")
</pallas_src>

<mosaic_0001>
module attributes {stable_mosaic.version = 11 : i64} {
  func.func @kernel(%arg0: i32, %arg1: memref<512x3xf32, #tpu.memory_space<vmem>>, %arg2: memref<3x32xf32, #tpu.memory_space<vmem>>, %arg3: memref<1x32xf32, #tpu.memory_space<vmem>>, %arg4: memref<512x32xf32, #tpu.memory_space<vmem>>) attributes {dimension_semantics = [#tpu.dimension_semantics<parallel>], iteration_bounds = array<i64: 1>, scalar_prefetch = 0 : i64, scratch_operands = 0 : i64, tpu.core_type = #tpu.core_type<tc>, window_params = [{transform_indices = @transform_0, window_bounds = array<i64: 512, 3>}, {pipeline_mode = #tpu.pipeline_mode<synchronous>, transform_indices = @transform_1, window_bounds = array<i64: 3, 32>}, {pipeline_mode = #tpu.pipeline_mode<synchronous>, transform_indices = @transform_2, window_bounds = array<i64: 1, 32>}, {transform_indices = @transform_3, window_bounds = array<i64: 512, 32>}]} {
    %c0 = arith.constant 0 : index
    %c0_0 = arith.constant 0 : index
    %0 = vector.load %arg1[%c0, %c0_0] : memref<512x3xf32, #tpu.memory_space<vmem>>, vector<512x3xf32>
    %c0_1 = arith.constant 0 : index
    %c0_2 = arith.constant 0 : index
    %1 = vector.load %arg2[%c0_1, %c0_2] : memref<3x32xf32, #tpu.memory_space<vmem>>, vector<3x32xf32>
    %cst = arith.constant dense<0.000000e+00> : vector<512x32xf32>
    %2 = tpu.matmul %0, %1, %cst {dimension_numbers = #tpu.dot_dimension_numbers<[1], [0], [0], [1], [0, 0, 1, 1], [], []>} : vector<512x3xf32>, vector<3x32xf32>, vector<512x32xf32> -> vector<512x32xf32>
    %c0_3 = arith.constant 0 : index
    %c0_4 = arith.constant 0 : index
    %3 = vector.load %arg3[%c0_3, %c0_4] : memref<1x32xf32, #tpu.memory_space<vmem>>, vector<1x32xf32>
    %4 = vector.broadcast %3 : vector<1x32xf32> to vector<512x32xf32>
    %5 = arith.addf %2, %4 : vector<512x32xf32>
    %c0_5 = arith.constant 0 : index
    %c0_6 = arith.constant 0 : index
    %6 = vector.load %arg4[%c0_5, %c0_6] : memref<512x32xf32, #tpu.memory_space<vmem>>, vector<512x32xf32>
    tpu.vector_store %arg4[%c0_5, %c0_6], %5 {strides = array<i32>} : memref<512x32xf32, #tpu.memory_space<vmem>>, vector<512x32xf32>,
    return
  }
  func.func @transform_0(%arg0: i32) -> (i32, i32) {
    %c0_i32 = arith.constant 0 : i32
    %c0_i32_0 = arith.constant 0 : i32
    return %arg0, %c0_i32 : i32, i32
  }
  func.func @transform_1(%arg0: i32) -> (i32, i32) {
    %c0_i32 = arith.constant 0 : i32
    %c0_i32_0 = arith.constant 0 : i32
    %c0_i32_1 = arith.constant 0 : i32
    return %c0_i32, %c0_i32_0 : i32, i32
  }
  func.func @transform_2(%arg0: i32) -> (i32, i32) {
    %c0_i32 = arith.constant 0 : i32
    %c0_i32_0 = arith.constant 0 : i32
    %c0_i32_1 = arith.constant 0 : i32
    return %c0_i32, %c0_i32_0 : i32, i32
  }
  func.func @transform_3(%arg0: i32) -> (i32, i32) {
    %c0_i32 = arith.constant 0 : i32
    %c0_i32_0 = arith.constant 0 : i32
    return %arg0, %c0_i32 : i32, i32
  }
}

module attributes {stable_mosaic.version = 11 : i64} {
  func.func @kernel(%arg0: i32, %arg1: memref<32x2x64xf32, #tpu.memory_space<vmem>>, %arg2: memref<32x64x64xf32, #tpu.memory_space<vmem>>, %arg3: memref<32x2x64xf32, #tpu.memory_space<vmem>>) attributes {dimension_semantics = [#tpu.dimension_semantics<parallel>], iteration_bounds = array<i64: 1>, scalar_prefetch = 0 : i64, scratch_operands = 0 : i64, tpu.core_type = #tpu.core_type<tc>, window_params = [{transform_indices = @transform_0, window_bounds = array<i64: 32, 2, 64>}, {transform_indices = @transform_1, window_bounds = array<i64: 32, 64, 64>}, {transform_indices = @transform_2, window_bounds = array<i64: 32, 2, 64>}]} {
    %c0 = arith.constant 0 : index
    %c0_0 = arith.constant 0 : index
    %c0_1 = arith.constant 0 : index
    %0 = vector.load %arg1[%c0, %c0_0, %c0_1] : memref<32x2x64xf32, #tpu.memory_space<vmem>>, vector<32x2x64xf32>
    %c0_2 = arith.constant 0 : index
    %c0_3 = arith.constant 0 : index
    %c0_4 = arith.constant 0 : index
    %1 = vector.load %arg2[%c0_2, %c0_3, %c0_4] : memref<32x64x64xf32, #tpu.memory_space<vmem>>, vector<32x64x64xf32>
    %cst = arith.constant dense<0.000000e+00> : vector<32x2x64xf32>
    %2 = tpu.matmul %0, %1, %cst {dimension_numbers = #tpu.dot_dimension_numbers<[2], [1], [1], [2], [0, 0, 0, 1, 1, 2], [0], [0]>} : vector<32x2x64xf32>, vector<32x64x64xf32>, vector<32x2x64xf32> -> vector<32x2x64xf32>
    %c0_5 = arith.constant 0 : index
    %c0_6 = arith.constant 0 : index
    %c0_7 = arith.constant 0 : index
    %3 = vector.load %arg3[%c0_5, %c0_6, %c0_7] : memref<32x2x64xf32, #tpu.memory_space<vmem>>, vector<32x2x64xf32>
    tpu.vector_store %arg3[%c0_5, %c0_6, %c0_7], %2 {strides = array<i32>} : memref<32x2x64xf32, #tpu.memory_space<vmem>>, vector<32x2x64xf32>,
    return
  }
  func.func @transform_0(%arg0: i32) -> (i32, i32, i32) {
    %c0_i32 = arith.constant 0 : i32
    %c0_i32_0 = arith.constant 0 : i32
    %c0_i32_1 = arith.constant 0 : i32
    return %arg0, %c0_i32, %c0_i32_0 : i32, i32, i32
  }
  func.func @transform_1(%arg0: i32) -> (i32, i32, i32) {
    %c0_i32 = arith.constant 0 : i32
    %c0_i32_0 = arith.constant 0 : i32
    %c0_i32_1 = arith.constant 0 : i32
    return %arg0, %c0_i32, %c0_i32_0 : i32, i32, i32
  }
  func.func @transform_2(%arg0: i32) -> (i32, i32, i32) {
    %c0_i32 = arith.constant 0 : i32
    %c0_i32_0 = arith.constant 0 : i32
    %c0_i32_1 = arith.constant 0 : i32
    return %arg0, %c0_i32, %c0_i32_0 : i32, i32, i32
  }
}

module attributes {stable_mosaic.version = 11 : i64} {
  func.func @kernel(%arg0: i32, %arg1: memref<512x32xf32, #tpu.memory_space<vmem>>, %arg2: memref<32x32xf32, #tpu.memory_space<vmem>>, %arg3: memref<1x32xf32, #tpu.memory_space<vmem>>, %arg4: memref<512x32xf32, #tpu.memory_space<vmem>>, %arg5: memref<512x32xf32, #tpu.memory_space<vmem>>) attributes {dimension_semantics = [#tpu.dimension_semantics<parallel>], iteration_bounds = array<i64: 1>, scalar_prefetch = 0 : i64, scratch_operands = 0 : i64, tpu.core_type = #tpu.core_type<tc>, window_params = [{transform_indices = @transform_0, window_bounds = array<i64: 512, 32>}, {pipeline_mode = #tpu.pipeline_mode<synchronous>, transform_indices = @transform_1, window_bounds = array<i64: 32, 32>}, {pipeline_mode = #tpu.pipeline_mode<synchronous>, transform_indices = @transform_2, window_bounds = array<i64: 1, 32>}, {transform_indices = @transform_3, window_bounds = array<i64: 512, 32>}, {transform_indices = @transform_4, window_bounds = array<i64: 512, 32>}]} {
    %c0 = arith.constant 0 : index
    %c0_0 = arith.constant 0 : index
    %0 = vector.load %arg1[%c0, %c0_0] : memref<512x32xf32, #tpu.memory_space<vmem>>, vector<512x32xf32>
    %c0_1 = arith.constant 0 : index
    %c0_2 = arith.constant 0 : index
    %1 = vector.load %arg2[%c0_1, %c0_2] : memref<32x32xf32, #tpu.memory_space<vmem>>, vector<32x32xf32>
    %cst = arith.constant dense<0.000000e+00> : vector<512x32xf32>
    %2 = tpu.matmul %0, %1, %cst {dimension_numbers = #tpu.dot_dimension_numbers<[1], [0], [0], [1], [0, 0, 1, 1], [], []>} : vector<512x32xf32>, vector<32x32xf32>, vector<512x32xf32> -> vector<512x32xf32>
    %c0_3 = arith.constant 0 : index
    %c0_4 = arith.constant 0 : index
    %3 = vector.load %arg3[%c0_3, %c0_4] : memref<1x32xf32, #tpu.memory_space<vmem>>, vector<1x32xf32>
    %4 = vector.broadcast %3 : vector<1x32xf32> to vector<512x32xf32>
    %5 = arith.addf %2, %4 : vector<512x32xf32>
    %c0_5 = arith.constant 0 : index
    %c0_6 = arith.constant 0 : index
    %6 = vector.load %arg4[%c0_5, %c0_6] : memref<512x32xf32, #tpu.memory_space<vmem>>, vector<512x32xf32>
    %7 = arith.addf %5, %6 : vector<512x32xf32>
    %cst_7 = arith.constant 0.000000e+00 : f32
    %8 = vector.broadcast %cst_7 : f32 to vector<512x32xf32>
    %9 = arith.maximumf %7, %8 : vector<512x32xf32>
    %c0_8 = arith.constant 0 : index
    %c0_9 = arith.constant 0 : index
    %10 = vector.load %arg5[%c0_8, %c0_9] : memref<512x32xf32, #tpu.memory_space<vmem>>, vector<512x32xf32>
    tpu.vector_store %arg5[%c0_8, %c0_9], %9 {strides = array<i32>} : memref<512x32xf32, #tpu.memory_space<vmem>>, vector<512x32xf32>,
    return
  }
  func.func @transform_0(%arg0: i32) -> (i32, i32) {
    %c0_i32 = arith.constant 0 : i32
    %c0_i32_0 = arith.constant 0 : i32
    return %arg0, %c0_i32 : i32, i32
  }
  func.func @transform_1(%arg0: i32) -> (i32, i32) {
    %c0_i32 = arith.constant 0 : i32
    %c0_i32_0 = arith.constant 0 : i32
    %c0_i32_1 = arith.constant 0 : i32
    return %c0_i32, %c0_i32_0 : i32, i32
  }
  func.func @transform_2(%arg0: i32) -> (i32, i32) {
    %c0_i32 = arith.constant 0 : i32
    %c0_i32_0 = arith.constant 0 : i32
    %c0_i32_1 = arith.constant 0 : i32
    return %c0_i32, %c0_i32_0 : i32, i32
  }
  func.func @transform_3(%arg0: i32) -> (i32, i32) {
    %c0_i32 = arith.constant 0 : i32
    %c0_i32_0 = arith.constant 0 : i32
    return %arg0, %c0_i32 : i32, i32
  }
  func.func @transform_4(%arg0: i32) -> (i32, i32) {
    %c0_i32 = arith.constant 0 : i32
    %c0_i32_0 = arith.constant 0 : i32
    return %arg0, %c0_i32 : i32, i32
  }
}

module attributes {stable_mosaic.version = 11 : i64} {
  func.func @kernel(%arg0: i32, %arg1: memref<64x2x64xf32, #tpu.memory_space<vmem>>, %arg2: memref<64x64x64xf32, #tpu.memory_space<vmem>>, %arg3: memref<64x2x64xf32, #tpu.memory_space<vmem>>) attributes {dimension_semantics = [#tpu.dimension_semantics<parallel>], iteration_bounds = array<i64: 1>, scalar_prefetch = 0 : i64, scratch_operands = 0 : i64, tpu.core_type = #tpu.core_type<tc>, window_params = [{transform_indices = @transform_0, window_bounds = array<i64: 64, 2, 64>}, {transform_indices = @transform_1, window_bounds = array<i64: 64, 64, 64>}, {transform_indices = @transform_2, window_bounds = array<i64: 64, 2, 64>}]} {
    %c0 = arith.constant 0 : index
    %c0_0 = arith.constant 0 : index
    %c0_1 = arith.constant 0 : index
    %0 = vector.load %arg1[%c0, %c0_0, %c0_1] : memref<64x2x64xf32, #tpu.memory_space<vmem>>, vector<64x2x64xf32>
    %c0_2 = arith.constant 0 : index
    %c0_3 = arith.constant 0 : index
    %c0_4 = arith.constant 0 : index
    %1 = vector.load %arg2[%c0_2, %c0_3, %c0_4] : memref<64x64x64xf32, #tpu.memory_space<vmem>>, vector<64x64x64xf32>
    %cst = arith.constant dense<0.000000e+00> : vector<64x2x64xf32>
    %2 = tpu.matmul %0, %1, %cst {dimension_numbers = #tpu.dot_dimension_numbers<[2], [1], [1], [2], [0, 0, 0, 1, 1, 2], [0], [0]>} : vector<64x2x64xf32>, vector<64x64x64xf32>, vector<64x2x64xf32> -> vector<64x2x64xf32>
    %c0_5 = arith.constant 0 : index
    %c0_6 = arith.constant 0 : index
    %c0_7 = arith.constant 0 : index
    %3 = vector.load %arg3[%c0_5, %c0_6, %c0_7] : memref<64x2x64xf32, #tpu.memory_space<vmem>>, vector<64x2x64xf32>
    tpu.vector_store %arg3[%c0_5, %c0_6, %c0_7], %2 {strides = array<i32>} : memref<64x2x64xf32, #tpu.memory_space<vmem>>, vector<64x2x64xf32>,
    return
  }
  func.func @transform_0(%arg0: i32) -> (i32, i32, i32) {
    %c0_i32 = arith.constant 0 : i32
    %c0_i32_0 = arith.constant 0 : i32
    %c0_i32_1 = arith.constant 0 : i32
    return %arg0, %c0_i32, %c0_i32_0 : i32, i32, i32
  }
  func.func @transform_1(%arg0: i32) -> (i32, i32, i32) {
    %c0_i32 = arith.constant 0 : i32
    %c0_i32_0 = arith.constant 0 : i32
    %c0_i32_1 = arith.constant 0 : i32
    return %arg0, %c0_i32, %c0_i32_0 : i32, i32, i32
  }
  func.func @transform_2(%arg0: i32) -> (i32, i32, i32) {
    %c0_i32 = arith.constant 0 : i32
    %c0_i32_0 = arith.constant 0 : i32
    %c0_i32_1 = arith.constant 0 : i32
    return %arg0, %c0_i32, %c0_i32_0 : i32, i32, i32
  }
}

module attributes {stable_mosaic.version = 11 : i64} {
  func.func @kernel(%arg0: i32, %arg1: i32, %arg2: memref<512x32xf32, #tpu.memory_space<vmem>>, %arg3: memref<1x32x32xf32, #tpu.memory_space<vmem>>, %arg4: memref<1x1x32xf32, #tpu.memory_space<vmem>>, %arg5: memref<1x512x32xf32, #tpu.memory_space<vmem>>, %arg6: memref<1x512x32xf32, #tpu.memory_space<vmem>>) attributes {dimension_semantics = [#tpu.dimension_semantics<parallel>, #tpu.dimension_semantics<parallel>], iteration_bounds = array<i64: 2, 1>, scalar_prefetch = 0 : i64, scratch_operands = 0 : i64, tpu.core_type = #tpu.core_type<tc>, window_params = [{transform_indices = @transform_0, window_bounds = array<i64: 512, 32>}, {transform_indices = @transform_1, window_bounds = array<i64: 1, 32, 32>}, {transform_indices = @transform_2, window_bounds = array<i64: 1, 1, 32>}, {transform_indices = @transform_3, window_bounds = array<i64: 1, 512, 32>}, {transform_indices = @transform_4, window_bounds = array<i64: 1, 512, 32>}]} {
    %c0 = arith.constant 0 : index
    %c0_0 = arith.constant 0 : index
    %0 = vector.load %arg2[%c0, %c0_0] : memref<512x32xf32, #tpu.memory_space<vmem>>, vector<512x32xf32>
    %c0_1 = arith.constant 0 : index
    %c0_2 = arith.constant 0 : index
    %c0_3 = arith.constant 0 : index
    %1 = vector.load %arg3[%c0_1, %c0_2, %c0_3] : memref<1x32x32xf32, #tpu.memory_space<vmem>>, vector<1x32x32xf32>
    %2 = vector.shape_cast %1 : vector<1x32x32xf32> to vector<32x32xf32>
    %cst = arith.constant dense<0.000000e+00> : vector<512x32xf32>
    %3 = tpu.matmul %0, %2, %cst {dimension_numbers = #tpu.dot_dimension_numbers<[1], [0], [0], [1], [0, 0, 1, 1], [], []>} : vector<512x32xf32>, vector<32x32xf32>, vector<512x32xf32> -> vector<512x32xf32>
    %c0_4 = arith.constant 0 : index
    %c0_5 = arith.constant 0 : index
    %c0_6 = arith.constant 0 : index
    %4 = vector.load %arg4[%c0_4, %c0_5, %c0_6] : memref<1x1x32xf32, #tpu.memory_space<vmem>>, vector<1x1x32xf32>
    %5 = vector.shape_cast %4 : vector<1x1x32xf32> to vector<1x32xf32>
    %6 = vector.broadcast %5 : vector<1x32xf32> to vector<512x32xf32>
    %7 = arith.addf %3, %6 : vector<512x32xf32>
    %c0_7 = arith.constant 0 : index
    %c0_8 = arith.constant 0 : index
    %c0_9 = arith.constant 0 : index
    %8 = vector.load %arg5[%c0_7, %c0_8, %c0_9] : memref<1x512x32xf32, #tpu.memory_space<vmem>>, vector<1x512x32xf32>
    %9 = vector.shape_cast %8 : vector<1x512x32xf32> to vector<512x32xf32>
    %10 = arith.addf %7, %9 : vector<512x32xf32>
    %cst_10 = arith.constant 0.000000e+00 : f32
    %11 = vector.broadcast %cst_10 : f32 to vector<512x32xf32>
    %12 = arith.maximumf %10, %11 : vector<512x32xf32>
    %c0_11 = arith.constant 0 : index
    %c0_12 = arith.constant 0 : index
    %c0_13 = arith.constant 0 : index
    %13 = vector.load %arg6[%c0_11, %c0_12, %c0_13] : memref<1x512x32xf32, #tpu.memory_space<vmem>>, vector<1x512x32xf32>
    %14 = vector.shape_cast %13 : vector<1x512x32xf32> to vector<512x32xf32>
    %15 = vector.shape_cast %12 : vector<512x32xf32> to vector<1x512x32xf32>
    tpu.vector_store %arg6[%c0_11, %c0_12, %c0_13], %15 {strides = array<i32>} : memref<1x512x32xf32, #tpu.memory_space<vmem>>, vector<1x512x32xf32>,
    return
  }
  func.func @transform_0(%arg0: i32, %arg1: i32) -> (i32, i32) {
    %c0_i32 = arith.constant 0 : i32
    %c0_i32_0 = arith.constant 0 : i32
    return %arg1, %c0_i32 : i32, i32
  }
  func.func @transform_1(%arg0: i32, %arg1: i32) -> (i32, i32, i32) {
    %c0_i32 = arith.constant 0 : i32
    %c0_i32_0 = arith.constant 0 : i32
    %c0_i32_1 = arith.constant 0 : i32
    return %arg0, %c0_i32, %c0_i32_0 : i32, i32, i32
  }
  func.func @transform_2(%arg0: i32, %arg1: i32) -> (i32, i32, i32) {
    %c0_i32 = arith.constant 0 : i32
    %c0_i32_0 = arith.constant 0 : i32
    %c0_i32_1 = arith.constant 0 : i32
    return %arg0, %c0_i32, %c0_i32_0 : i32, i32, i32
  }
  func.func @transform_3(%arg0: i32, %arg1: i32) -> (i32, i32, i32) {
    %c0_i32 = arith.constant 0 : i32
    %c0_i32_0 = arith.constant 0 : i32
    return %arg0, %arg1, %c0_i32 : i32, i32, i32
  }
  func.func @transform_4(%arg0: i32, %arg1: i32) -> (i32, i32, i32) {
    %c0_i32 = arith.constant 0 : i32
    %c0_i32_0 = arith.constant 0 : i32
    return %arg0, %arg1, %c0_i32 : i32, i32, i32
  }
}

module attributes {stable_mosaic.version = 11 : i64} {
  func.func @kernel(%arg0: i32, %arg1: i32, %arg2: memref<1x512x32xf32, #tpu.memory_space<vmem>>, %arg3: memref<1x32x32xf32, #tpu.memory_space<vmem>>, %arg4: memref<1x1x32xf32, #tpu.memory_space<vmem>>, %arg5: memref<1x512x32xf32, #tpu.memory_space<vmem>>, %arg6: memref<1x512x32xf32, #tpu.memory_space<vmem>>) attributes {dimension_semantics = [#tpu.dimension_semantics<parallel>, #tpu.dimension_semantics<parallel>], iteration_bounds = array<i64: 2, 1>, scalar_prefetch = 0 : i64, scratch_operands = 0 : i64, tpu.core_type = #tpu.core_type<tc>, window_params = [{transform_indices = @transform_0, window_bounds = array<i64: 1, 512, 32>}, {transform_indices = @transform_1, window_bounds = array<i64: 1, 32, 32>}, {transform_indices = @transform_2, window_bounds = array<i64: 1, 1, 32>}, {transform_indices = @transform_3, window_bounds = array<i64: 1, 512, 32>}, {transform_indices = @transform_4, window_bounds = array<i64: 1, 512, 32>}]} {
    %c0 = arith.constant 0 : index
    %c0_0 = arith.constant 0 : index
    %c0_1 = arith.constant 0 : index
    %0 = vector.load %arg2[%c0, %c0_0, %c0_1] : memref<1x512x32xf32, #tpu.memory_space<vmem>>, vector<1x512x32xf32>
    %1 = vector.shape_cast %0 : vector<1x512x32xf32> to vector<512x32xf32>
    %c0_2 = arith.constant 0 : index
    %c0_3 = arith.constant 0 : index
    %c0_4 = arith.constant 0 : index
    %2 = vector.load %arg3[%c0_2, %c0_3, %c0_4] : memref<1x32x32xf32, #tpu.memory_space<vmem>>, vector<1x32x32xf32>
    %3 = vector.shape_cast %2 : vector<1x32x32xf32> to vector<32x32xf32>
    %cst = arith.constant dense<0.000000e+00> : vector<512x32xf32>
    %4 = tpu.matmul %1, %3, %cst {dimension_numbers = #tpu.dot_dimension_numbers<[1], [0], [0], [1], [0, 0, 1, 1], [], []>} : vector<512x32xf32>, vector<32x32xf32>, vector<512x32xf32> -> vector<512x32xf32>
    %c0_5 = arith.constant 0 : index
    %c0_6 = arith.constant 0 : index
    %c0_7 = arith.constant 0 : index
    %5 = vector.load %arg4[%c0_5, %c0_6, %c0_7] : memref<1x1x32xf32, #tpu.memory_space<vmem>>, vector<1x1x32xf32>
    %6 = vector.shape_cast %5 : vector<1x1x32xf32> to vector<1x32xf32>
    %7 = vector.broadcast %6 : vector<1x32xf32> to vector<512x32xf32>
    %8 = arith.addf %4, %7 : vector<512x32xf32>
    %c0_8 = arith.constant 0 : index
    %c0_9 = arith.constant 0 : index
    %c0_10 = arith.constant 0 : index
    %9 = vector.load %arg5[%c0_8, %c0_9, %c0_10] : memref<1x512x32xf32, #tpu.memory_space<vmem>>, vector<1x512x32xf32>
    %10 = vector.shape_cast %9 : vector<1x512x32xf32> to vector<512x32xf32>
    %11 = arith.addf %8, %10 : vector<512x32xf32>
    %c0_11 = arith.constant 0 : index
    %c0_12 = arith.constant 0 : index
    %c0_13 = arith.constant 0 : index
    %12 = vector.load %arg6[%c0_11, %c0_12, %c0_13] : memref<1x512x32xf32, #tpu.memory_space<vmem>>, vector<1x512x32xf32>
    %13 = vector.shape_cast %12 : vector<1x512x32xf32> to vector<512x32xf32>
    %14 = vector.shape_cast %11 : vector<512x32xf32> to vector<1x512x32xf32>
    tpu.vector_store %arg6[%c0_11, %c0_12, %c0_13], %14 {strides = array<i32>} : memref<1x512x32xf32, #tpu.memory_space<vmem>>, vector<1x512x32xf32>,
    return
  }
  func.func @transform_0(%arg0: i32, %arg1: i32) -> (i32, i32, i32) {
    %c0_i32 = arith.constant 0 : i32
    %c0_i32_0 = arith.constant 0 : i32
    return %arg0, %arg1, %c0_i32 : i32, i32, i32
  }
  func.func @transform_1(%arg0: i32, %arg1: i32) -> (i32, i32, i32) {
    %c0_i32 = arith.constant 0 : i32
    %c0_i32_0 = arith.constant 0 : i32
    %c0_i32_1 = arith.constant 0 : i32
    return %arg0, %c0_i32, %c0_i32_0 : i32, i32, i32
  }
  func.func @transform_2(%arg0: i32, %arg1: i32) -> (i32, i32, i32) {
    %c0_i32 = arith.constant 0 : i32
    %c0_i32_0 = arith.constant 0 : i32
    %c0_i32_1 = arith.constant 0 : i32
    return %arg0, %c0_i32, %c0_i32_0 : i32, i32, i32
  }
  func.func @transform_3(%arg0: i32, %arg1: i32) -> (i32, i32, i32) {
    %c0_i32 = arith.constant 0 : i32
    %c0_i32_0 = arith.constant 0 : i32
    return %arg0, %arg1, %c0_i32 : i32, i32, i32
  }
  func.func @transform_4(%arg0: i32, %arg1: i32) -> (i32, i32, i32) {
    %c0_i32 = arith.constant 0 : i32
    %c0_i32_0 = arith.constant 0 : i32
    return %arg0, %arg1, %c0_i32 : i32, i32, i32
  }
}

module attributes {stable_mosaic.version = 11 : i64} {
  func.func @kernel(%arg0: i32, %arg1: memref<2x512x32xf32, #tpu.memory_space<vmem>>, %arg2: memref<2x32x128xf32, #tpu.memory_space<vmem>>, %arg3: memref<2x1x128xf32, #tpu.memory_space<vmem>>, %arg4: memref<256x2xf32, #tpu.memory_space<vmem>>, %arg5: memref<1x2xf32, #tpu.memory_space<vmem>>, %arg6: memref<512x2xf32, #tpu.memory_space<vmem>>) attributes {dimension_semantics = [#tpu.dimension_semantics<parallel>], iteration_bounds = array<i64: 1>, scalar_prefetch = 0 : i64, scratch_operands = 0 : i64, tpu.core_type = #tpu.core_type<tc>, window_params = [{transform_indices = @transform_0, window_bounds = array<i64: 2, 512, 32>}, {pipeline_mode = #tpu.pipeline_mode<synchronous>, transform_indices = @transform_1, window_bounds = array<i64: 2, 32, 128>}, {pipeline_mode = #tpu.pipeline_mode<synchronous>, transform_indices = @transform_2, window_bounds = array<i64: 2, 1, 128>}, {pipeline_mode = #tpu.pipeline_mode<synchronous>, transform_indices = @transform_3, window_bounds = array<i64: 256, 2>}, {pipeline_mode = #tpu.pipeline_mode<synchronous>, transform_indices = @transform_4, window_bounds = array<i64: 1, 2>}, {transform_indices = @transform_5, window_bounds = array<i64: 512, 2>}]} {
    %c0 = arith.constant 0 : index
    %c0_0 = arith.constant 0 : index
    %c0_1 = arith.constant 0 : index
    %0 = vector.load %arg1[%c0, %c0_0, %c0_1] : memref<2x512x32xf32, #tpu.memory_space<vmem>>, vector<1x512x32xf32>
    %1 = vector.shape_cast %0 : vector<1x512x32xf32> to vector<512x32xf32>
    %c0_2 = arith.constant 0 : index
    %c0_3 = arith.constant 0 : index
    %c0_4 = arith.constant 0 : index
    %2 = vector.load %arg2[%c0_2, %c0_3, %c0_4] : memref<2x32x128xf32, #tpu.memory_space<vmem>>, vector<1x32x128xf32>
    %3 = vector.shape_cast %2 : vector<1x32x128xf32> to vector<32x128xf32>
    %cst = arith.constant dense<0.000000e+00> : vector<512x128xf32>
    %4 = tpu.matmul %1, %3, %cst {dimension_numbers = #tpu.dot_dimension_numbers<[1], [0], [0], [1], [0, 0, 1, 1], [], []>} : vector<512x32xf32>, vector<32x128xf32>, vector<512x128xf32> -> vector<512x128xf32>
    %c0_5 = arith.constant 0 : index
    %c0_6 = arith.constant 0 : index
    %c0_7 = arith.constant 0 : index
    %5 = vector.load %arg3[%c0_5, %c0_6, %c0_7] : memref<2x1x128xf32, #tpu.memory_space<vmem>>, vector<1x1x128xf32>
    %6 = vector.shape_cast %5 : vector<1x1x128xf32> to vector<1x128xf32>
    %7 = vector.broadcast %6 : vector<1x128xf32> to vector<512x128xf32>
    %8 = arith.addf %4, %7 : vector<512x128xf32>
    %cst_8 = arith.constant 0.000000e+00 : f32
    %9 = vector.broadcast %cst_8 : f32 to vector<512x128xf32>
    %10 = arith.maximumf %8, %9 : vector<512x128xf32>
    %c1 = arith.constant 1 : index
    %c0_9 = arith.constant 0 : index
    %c0_10 = arith.constant 0 : index
    %11 = vector.load %arg1[%c1, %c0_9, %c0_10] : memref<2x512x32xf32, #tpu.memory_space<vmem>>, vector<1x512x32xf32>
    %12 = vector.shape_cast %11 : vector<1x512x32xf32> to vector<512x32xf32>
    %c1_11 = arith.constant 1 : index
    %c0_12 = arith.constant 0 : index
    %c0_13 = arith.constant 0 : index
    %13 = vector.load %arg2[%c1_11, %c0_12, %c0_13] : memref<2x32x128xf32, #tpu.memory_space<vmem>>, vector<1x32x128xf32>
    %14 = vector.shape_cast %13 : vector<1x32x128xf32> to vector<32x128xf32>
    %cst_14 = arith.constant dense<0.000000e+00> : vector<512x128xf32>
    %15 = tpu.matmul %12, %14, %cst_14 {dimension_numbers = #tpu.dot_dimension_numbers<[1], [0], [0], [1], [0, 0, 1, 1], [], []>} : vector<512x32xf32>, vector<32x128xf32>, vector<512x128xf32> -> vector<512x128xf32>
    %c1_15 = arith.constant 1 : index
    %c0_16 = arith.constant 0 : index
    %c0_17 = arith.constant 0 : index
    %16 = vector.load %arg3[%c1_15, %c0_16, %c0_17] : memref<2x1x128xf32, #tpu.memory_space<vmem>>, vector<1x1x128xf32>
    %17 = vector.shape_cast %16 : vector<1x1x128xf32> to vector<1x128xf32>
    %18 = vector.broadcast %17 : vector<1x128xf32> to vector<512x128xf32>
    %19 = arith.addf %15, %18 : vector<512x128xf32>
    %cst_18 = arith.constant 0.000000e+00 : f32
    %20 = vector.broadcast %cst_18 : f32 to vector<512x128xf32>
    %21 = arith.maximumf %19, %20 : vector<512x128xf32>
    %22 = tpu.concatenate %10, %21 in 1 : vector<512x128xf32>, vector<512x128xf32> -> vector<512x256xf32>
    %c0_19 = arith.constant 0 : index
    %c0_20 = arith.constant 0 : index
    %23 = vector.load %arg4[%c0_19, %c0_20] : memref<256x2xf32, #tpu.memory_space<vmem>>, vector<256x2xf32>
    %cst_21 = arith.constant dense<0.000000e+00> : vector<512x2xf32>
    %24 = tpu.matmul %22, %23, %cst_21 {dimension_numbers = #tpu.dot_dimension_numbers<[1], [0], [0], [1], [0, 0, 1, 1], [], []>} : vector<512x256xf32>, vector<256x2xf32>, vector<512x2xf32> -> vector<512x2xf32>
    %c0_22 = arith.constant 0 : index
    %c0_23 = arith.constant 0 : index
    %25 = vector.load %arg5[%c0_22, %c0_23] : memref<1x2xf32, #tpu.memory_space<vmem>>, vector<1x2xf32>
    %26 = vector.broadcast %25 : vector<1x2xf32> to vector<512x2xf32>
    %27 = arith.addf %24, %26 : vector<512x2xf32>
    %c0_24 = arith.constant 0 : index
    %c0_25 = arith.constant 0 : index
    %28 = vector.load %arg6[%c0_24, %c0_25] : memref<512x2xf32, #tpu.memory_space<vmem>>, vector<512x2xf32>
    tpu.vector_store %arg6[%c0_24, %c0_25], %27 {strides = array<i32>} : memref<512x2xf32, #tpu.memory_space<vmem>>, vector<512x2xf32>,
    return
  }
  func.func @transform_0(%arg0: i32) -> (i32, i32, i32) {
    %c0_i32 = arith.constant 0 : i32
    %c0_i32_0 = arith.constant 0 : i32
    %c0_i32_1 = arith.constant 0 : i32
    return %c0_i32, %arg0, %c0_i32_0 : i32, i32, i32
  }
  func.func @transform_1(%arg0: i32) -> (i32, i32, i32) {
    %c0_i32 = arith.constant 0 : i32
    %c0_i32_0 = arith.constant 0 : i32
    %c0_i32_1 = arith.constant 0 : i32
    %c0_i32_2 = arith.constant 0 : i32
    return %c0_i32, %c0_i32_0, %c0_i32_1 : i32, i32, i32
  }
  func.func @transform_2(%arg0: i32) -> (i32, i32, i32) {
    %c0_i32 = arith.constant 0 : i32
    %c0_i32_0 = arith.constant 0 : i32
    %c0_i32_1 = arith.constant 0 : i32
    %c0_i32_2 = arith.constant 0 : i32
    return %c0_i32, %c0_i32_0, %c0_i32_1 : i32, i32, i32
  }
  func.func @transform_3(%arg0: i32) -> (i32, i32) {
    %c0_i32 = arith.constant 0 : i32
    %c0_i32_0 = arith.constant 0 : i32
    %c0_i32_1 = arith.constant 0 : i32
    return %c0_i32, %c0_i32_0 : i32, i32
  }
  func.func @transform_4(%arg0: i32) -> (i32, i32) {
    %c0_i32 = arith.constant 0 : i32
    %c0_i32_0 = arith.constant 0 : i32
    %c0_i32_1 = arith.constant 0 : i32
    return %c0_i32, %c0_i32_0 : i32, i32
  }
  func.func @transform_5(%arg0: i32) -> (i32, i32) {
    %c0_i32 = arith.constant 0 : i32
    %c0_i32_0 = arith.constant 0 : i32
    return %arg0, %c0_i32 : i32, i32
  }
}

</mosaic_0001>

<bundles_post_ra>
// kernel: fno_forward.10
= control target key start
LH: loop header
LB: loop body
LE: loop exit
PB: predicated region body
PF: predicated region fallthrough
CT: control target
= control target key end

     0   :  { %8 = vsyncpa [#allocation3], 0  ;;  %s1646_s0 = inlined_call_operand.vmem [shape: f32[512,3], index: 0, kind: input, shape index: {}]   ;;  %s1647_s1 = inlined_call_operand.hbm [shape: f32[3,32], index: 1, kind: input, shape index: {}]   ;;  %s1648_s2 = inlined_call_operand.hbm [shape: f32[1,32], index: 2, kind: input, shape index: {}]   ;;  %s1649_s3 = inlined_call_operand.vmem [shape: f32[512,32], index: 3, kind: output, shape index: {}]  }
   0x1   :  { %9 = vsyncpa [#allocation5], 0  ;;  %s1040_s12 = smov [#allocation2]   ;;  %s1041_s14 = smov [#allocation4]  }
   0x2   :  { %s18_s13 = sshll.u32 %s1040_s12, 4  ;;  %s28_s15 = sshll.u32 %s1041_s14, 4  ;;  %s19_s13 = int_to_ptr.vmem [resolvable:$true] %s18_s13  ;;  %s29_s15 = int_to_ptr.vmem [resolvable:$true] %s28_s15 }
   0x3   :  { %s1004_s16 = scalar_lea.vmem %s19_s13, 64  ;;  %p1009_p1 = scmp.lt.s32.totalorder %s19_s13, %s19_s13 }
   0x4   :  { %p1005_p0 = scmp.ne.s32.totalorder %s19_s13, %s1004_s16  ;;  %p1010_p2 = scmp.lt.s32.totalorder %s1004_s16, %s1004_s16 }
   0x6   :  { %p1011_p3 = por %p1010_p2, %p1009_p1 }
   0x8   :  { %p1012_p4 = pnand %p1011_p3, %p1005_p0 }
   0xa   :  { %1015 = shalt.err (!%p1012_p4)
}
   0xb   :  { %21 = dma.hbm_to_vmem [thread:$0]  %s1647_s1, 64, %s19_s13, [#allocation3]  }
   0xc   :  { %s1024_s19 = scalar_lea.vmem %s29_s15, 16  ;;  %s1028_s20 = scalar_lea.vmem %s29_s15, 32 }
   0xd   :  { %p1025_p5 = scmp.ne.s32.totalorder %s29_s15, %s1024_s19  ;;  %p1029_p6 = scmp.lt.s32.totalorder %s29_s15, %s29_s15 }
   0xe   :  { %p1030_p7 = scmp.lt.s32.totalorder %s1028_s20, %s1024_s19 }
  0x10   :  { %p1031_p8 = por %p1030_p7, %p1029_p6 }
  0x12   :  { %p1032_p9 = pnand %p1031_p8, %p1025_p5 }
  0x14   :  { %1035 = shalt.err (!%p1032_p9)
}
  0x15   :  { %31 = dma.hbm_to_vmem [thread:$0]  %s1648_s2, 16, %s29_s15, [#allocation5]  }
  0x16   :  { %1036 = dma.done.wait [#allocation3], 64  }
  0x17   :  { %1037 = vsyncadd [#allocation3], 4294967232 }
  0x18   :  { %1038 = dma.done.wait [#allocation5], 16  }
  0x19   :  { %1039 = vsyncadd [#allocation5], 4294967280  ;;  %vm303_vm0 = vcmask 1042432   ;;  %v102_v0 = vld [vmem:[#allocation2] sm:$0x7]  ;;  %vm110_vm1 = vcmask 23552  }
  0x1a   :  { %v38_v1 = vld [vmem:[%s1646_s0] sm:$0xff]  ;;  %894 = vmatprep.subr.msk.mxu0 %vm303_vm0, %v102_v0  ;;  %992 = vmatprep.subr.msk.mxu1 %vm303_vm0, %v102_v0  ;;  %v39_v3 = vld [vmem:[%s1646_s0 + $0x8] sm:$0xff]  ;;  %v40_v5 = vld [vmem:[%s1646_s0 + $0x10] sm:$0xff]  ;;  %vm692_vm2 = vcmask 261120  }
  0x1b   :  { %v70_v2 = vld [vmem:[%s1646_s0 + $0x100] sm:$0xff]  ;;  %v71_v4 = vld [vmem:[%s1646_s0 + $0x108] sm:$0xff]  ;;  %895 = vmatpush3.msk.msra.mxu0 %vm303_vm0, %v102_v0  ;;  %993 = vmatpush3.msk.msra.mxu1 %vm303_vm0, %v102_v0  ;;  %v72_v6 = vld [vmem:[%s1646_s0 + $0x110] sm:$0xff] }
  0x1c   :  { %896 = vmatprep.mubr.msk.f32.mxu0 %vm110_vm1, %v38_v1  ;;  %944 = vmatprep.mubr.msk.f32.mxu1 %vm110_vm1, %v70_v2  ;;  %v41_v7 = vld [vmem:[%s1646_s0 + $0x18] sm:$0xff]  ;;  %v42_v9 = vld [vmem:[%s1646_s0 + $0x20] sm:$0xff]  ;;  %v43_v11 = vld [vmem:[%s1646_s0 + $0x28] sm:$0xff] }
  0x1d   :  { %897 = vmatmul.mubr.msk.f32.vlgmr.msra.gmra.mxu0 %vm110_vm1, %v39_v3  ;;  %945 = vmatmul.mubr.msk.f32.vlgmr.msra.gmra.mxu1 %vm110_vm1, %v71_v4  ;;  %v73_v8 = vld [vmem:[%s1646_s0 + $0x118] sm:$0xff]  ;;  %v74_v10 = vld [vmem:[%s1646_s0 + $0x120] sm:$0xff]  ;;  %v75_v12 = vld [vmem:[%s1646_s0 + $0x128] sm:$0xff] }
  0x1e   :  { %899 = vmatprep.mubr.msk.f32.mxu0 %vm110_vm1, %v40_v5  ;;  %947 = vmatprep.mubr.msk.f32.mxu1 %vm110_vm1, %v72_v6  ;;  %v44_v13 = vld [vmem:[%s1646_s0 + $0x30] sm:$0xff]  ;;  %v45_v15 = vld [vmem:[%s1646_s0 + $0x38] sm:$0xff]  ;;  %v46_v17 = vld [vmem:[%s1646_s0 + $0x40] sm:$0xff] }
  0x1f   :  { %v76_v14 = vld [vmem:[%s1646_s0 + $0x130] sm:$0xff]  ;;  %v77_v16 = vld [vmem:[%s1646_s0 + $0x138] sm:$0xff]  ;;  %v78_v18 = vld [vmem:[%s1646_s0 + $0x140] sm:$0xff] }
  0x20   :  { %v47_v19 = vld [vmem:[%s1646_s0 + $0x48] sm:$0xff]  ;;  %v48_v21 = vld [vmem:[%s1646_s0 + $0x50] sm:$0xff]  ;;  %v49_v23 = vld [vmem:[%s1646_s0 + $0x58] sm:$0xff] }
  0x21   :  { %900 = vmatmul.mubr.msk.f32.gmra.mxu0 %vm110_vm1, %v41_v7  ;;  %948 = vmatmul.mubr.msk.f32.gmra.mxu1 %vm110_vm1, %v73_v8  ;;  %v79_v20 = vld [vmem:[%s1646_s0 + $0x148] sm:$0xff]  ;;  %v80_v22 = vld [vmem:[%s1646_s0 + $0x150] sm:$0xff]  ;;  %v81_v24 = vld [vmem:[%s1646_s0 + $0x158] sm:$0xff] }
  0x22   :  { %902 = vmatprep.mubr.msk.f32.mxu0 %vm110_vm1, %v42_v9  ;;  %950 = vmatprep.mubr.msk.f32.mxu1 %vm110_vm1, %v74_v10  ;;  %v50_v25 = vld [vmem:[%s1646_s0 + $0x60] sm:$0xff]  ;;  %v51_v27 = vld [vmem:[%s1646_s0 + $0x68] sm:$0xff]  ;;  %v52_v29 = vld [vmem:[%s1646_s0 + $0x70] sm:$0xff] }
  0x23   :  { %v82_v26 = vld [vmem:[%s1646_s0 + $0x160] sm:$0xff]  ;;  %v83_v28 = vld [vmem:[%s1646_s0 + $0x168] sm:$0xff]  ;;  %v84_v30 = vld [vmem:[%s1646_s0 + $0x170] sm:$0xff] }
  0x24   :  { %v53_v31 = vld [vmem:[%s1646_s0 + $0x78] sm:$0xff]  ;;  %v54_v33 = vld [vmem:[%s1646_s0 + $0x80] sm:$0xff]  ;;  %v55_v35 = vld [vmem:[%s1646_s0 + $0x88] sm:$0xff] }
  0x25   :  { %903 = vmatmul.mubr.msk.f32.gmra.mxu0 %vm110_vm1, %v43_v11  ;;  %951 = vmatmul.mubr.msk.f32.gmra.mxu1 %vm110_vm1, %v75_v12  ;;  %v85_v32 = vld [vmem:[%s1646_s0 + $0x178] sm:$0xff]  ;;  %v86_v34 = vld [vmem:[%s1646_s0 + $0x180] sm:$0xff]  ;;  %v87_v36 = vld [vmem:[%s1646_s0 + $0x188] sm:$0xff] }
  0x26   :  { %905 = vmatprep.mubr.msk.f32.mxu0 %vm110_vm1, %v44_v13  ;;  %953 = vmatprep.mubr.msk.f32.mxu1 %vm110_vm1, %v76_v14  ;;  %v56_v37 = vld [vmem:[%s1646_s0 + $0x90] sm:$0xff]  ;;  %v57_v39 = vld [vmem:[%s1646_s0 + $0x98] sm:$0xff]  ;;  %v58_v41 = vld [vmem:[%s1646_s0 + $0xa0] sm:$0xff] }
  0x27   :  { %v88_v38 = vld [vmem:[%s1646_s0 + $0x190] sm:$0xff]  ;;  %v89_v40 = vld [vmem:[%s1646_s0 + $0x198] sm:$0xff]  ;;  %v90_v42 = vld [vmem:[%s1646_s0 + $0x1a0] sm:$0xff] }
  0x28   :  { %v59_v43 = vld [vmem:[%s1646_s0 + $0xa8] sm:$0xff]  ;;  %v60_v45 = vld [vmem:[%s1646_s0 + $0xb0] sm:$0xff]  ;;  %v61_v47 = vld [vmem:[%s1646_s0 + $0xb8] sm:$0xff] }
  0x29   :  { %906 = vmatmul.mubr.msk.f32.gmra.mxu0 %vm110_vm1, %v45_v15  ;;  %954 = vmatmul.mubr.msk.f32.gmra.mxu1 %vm110_vm1, %v77_v16  ;;  %v91_v44 = vld [vmem:[%s1646_s0 + $0x1a8] sm:$0xff]  ;;  %v92_v46 = vld [vmem:[%s1646_s0 + $0x1b0] sm:$0xff]  ;;  %v93_v48 = vld [vmem:[%s1646_s0 + $0x1b8] sm:$0xff] }
  0x2a   :  { %908 = vmatprep.mubr.msk.f32.mxu0 %vm110_vm1, %v46_v17  ;;  %956 = vmatprep.mubr.msk.f32.mxu1 %vm110_vm1, %v78_v18  ;;  %v62_v49 = vld [vmem:[%s1646_s0 + $0xc0] sm:$0xff]  ;;  %v63_v51 = vld [vmem:[%s1646_s0 + $0xc8] sm:$0xff]  ;;  %v64_v53 = vld [vmem:[%s1646_s0 + $0xd0] sm:$0xff] }
  0x2b   :  { %v94_v50 = vld [vmem:[%s1646_s0 + $0x1c0] sm:$0xff]  ;;  %v95_v52 = vld [vmem:[%s1646_s0 + $0x1c8] sm:$0xff]  ;;  %v96_v54 = vld [vmem:[%s1646_s0 + $0x1d0] sm:$0xff] }
  0x2c   :  { %v65_v55 = vld [vmem:[%s1646_s0 + $0xd8] sm:$0xff]  ;;  %v66_v57 = vld [vmem:[%s1646_s0 + $0xe0] sm:$0xff]  ;;  %v67_v59 = vld [vmem:[%s1646_s0 + $0xe8] sm:$0xff] }
  0x2d   :  { %909 = vmatmul.mubr.msk.f32.gmra.mxu0 %vm110_vm1, %v47_v19  ;;  %957 = vmatmul.mubr.msk.f32.gmra.mxu1 %vm110_vm1, %v79_v20  ;;  %v97_v56 = vld [vmem:[%s1646_s0 + $0x1d8] sm:$0xff]  ;;  %v98_v58 = vld [vmem:[%s1646_s0 + $0x1e0] sm:$0xff]  ;;  %v99_v60 = vld [vmem:[%s1646_s0 + $0x1e8] sm:$0xff] }
  0x2e   :  { %911 = vmatprep.mubr.msk.f32.mxu0 %vm110_vm1, %v48_v21  ;;  %959 = vmatprep.mubr.msk.f32.mxu1 %vm110_vm1, %v80_v22  ;;  %v68_v61 = vld [vmem:[%s1646_s0 + $0xf0] sm:$0xff]  ;;  %v69_v63 = vld [vmem:[%s1646_s0 + $0xf8] sm:$0xff]  ;;  %v1324_v1 = vld [vmem:[#allocation4] ss:$0 sm:$0xff] }
  0x2f   :  { %v100_v62 = vld [vmem:[%s1646_s0 + $0x1f0] sm:$0xff]  ;;  %v101_v0 = vld [vmem:[%s1646_s0 + $0x1f8] sm:$0xff] }
  0x31   :  { %912 = vmatmul.mubr.msk.f32.gmra.mxu0 %vm110_vm1, %v49_v23  ;;  %960 = vmatmul.mubr.msk.f32.gmra.mxu1 %vm110_vm1, %v81_v24 }
  0x32   :  { %914 = vmatprep.mubr.msk.f32.mxu0 %vm110_vm1, %v50_v25  ;;  %962 = vmatprep.mubr.msk.f32.mxu1 %vm110_vm1, %v82_v26 }
  0x35   :  { %915 = vmatmul.mubr.msk.f32.gmra.mxu0 %vm110_vm1, %v51_v27  ;;  %963 = vmatmul.mubr.msk.f32.gmra.mxu1 %vm110_vm1, %v83_v28 }
  0x36   :  { %917 = vmatprep.mubr.msk.f32.mxu0 %vm110_vm1, %v52_v29  ;;  %965 = vmatprep.mubr.msk.f32.mxu1 %vm110_vm1, %v84_v30 }
  0x39   :  { %918 = vmatmul.mubr.msk.f32.gmra.mxu0 %vm110_vm1, %v53_v31  ;;  %966 = vmatmul.mubr.msk.f32.gmra.mxu1 %vm110_vm1, %v85_v32 }
  0x3a   :  { %920 = vmatprep.mubr.msk.f32.mxu0 %vm110_vm1, %v54_v33  ;;  %968 = vmatprep.mubr.msk.f32.mxu1 %vm110_vm1, %v86_v34 }
  0x3d   :  { %921 = vmatmul.mubr.msk.f32.gmra.mxu0 %vm110_vm1, %v55_v35  ;;  %969 = vmatmul.mubr.msk.f32.gmra.mxu1 %vm110_vm1, %v87_v36 }
  0x3e   :  { %923 = vmatprep.mubr.msk.f32.mxu0 %vm110_vm1, %v56_v37  ;;  %971 = vmatprep.mubr.msk.f32.mxu1 %vm110_vm1, %v88_v38 }
  0x41   :  { %924 = vmatmul.mubr.msk.f32.gmra.mxu0 %vm110_vm1, %v57_v39  ;;  %972 = vmatmul.mubr.msk.f32.gmra.mxu1 %vm110_vm1, %v89_v40 }
  0x42   :  { %926 = vmatprep.mubr.msk.f32.mxu0 %vm110_vm1, %v58_v41  ;;  %974 = vmatprep.mubr.msk.f32.mxu1 %vm110_vm1, %v90_v42 }
  0x45   :  { %927 = vmatmul.mubr.msk.f32.gmra.mxu0 %vm110_vm1, %v59_v43  ;;  %975 = vmatmul.mubr.msk.f32.gmra.mxu1 %vm110_vm1, %v91_v44 }
  0x46   :  { %929 = vmatprep.mubr.msk.f32.mxu0 %vm110_vm1, %v60_v45  ;;  %977 = vmatprep.mubr.msk.f32.mxu1 %vm110_vm1, %v92_v46 }
  0x49   :  { %930 = vmatmul.mubr.msk.f32.gmra.mxu0 %vm110_vm1, %v61_v47  ;;  %978 = vmatmul.mubr.msk.f32.gmra.mxu1 %vm110_vm1, %v93_v48 }
  0x4a   :  { %932 = vmatprep.mubr.msk.f32.mxu0 %vm110_vm1, %v62_v49  ;;  %980 = vmatprep.mubr.msk.f32.mxu1 %vm110_vm1, %v94_v50 }
  0x4d   :  { %933 = vmatmul.mubr.msk.f32.gmra.mxu0 %vm110_vm1, %v63_v51  ;;  %981 = vmatmul.mubr.msk.f32.gmra.mxu1 %vm110_vm1, %v95_v52 }
  0x4e   :  { %935 = vmatprep.mubr.msk.f32.mxu0 %vm110_vm1, %v64_v53  ;;  %983 = vmatprep.mubr.msk.f32.mxu1 %vm110_vm1, %v96_v54 }
  0x51   :  { %936 = vmatmul.mubr.msk.f32.gmra.mxu0 %vm110_vm1, %v65_v55  ;;  %984 = vmatmul.mubr.msk.f32.gmra.mxu1 %vm110_vm1, %v97_v56 }
  0x52   :  { %938 = vmatprep.mubr.msk.f32.mxu0 %vm110_vm1, %v66_v57  ;;  %986 = vmatprep.mubr.msk.f32.mxu1 %vm110_vm1, %v98_v58 }
  0x55   :  { %939 = vmatmul.mubr.msk.f32.gmra.mxu0 %vm110_vm1, %v67_v59  ;;  %987 = vmatmul.mubr.msk.f32.gmra.mxu1 %vm110_vm1, %v99_v60 }
  0x56   :  { %941 = vmatprep.mubr.msk.f32.mxu0 %vm110_vm1, %v68_v61  ;;  %989 = vmatprep.mubr.msk.f32.mxu1 %vm110_vm1, %v100_v62 }
  0x59   :  { %942 = vmatmul.mubr.msk.f32.gmra.mxu0 %vm110_vm1, %v69_v63  ;;  %990 = vmatmul.mubr.msk.f32.gmra.mxu1 %vm110_vm1, %v101_v0 }
  0xdd   :  { %v898_v2 = vpop.f32.mrf.mxu0  ;;  %v946_v3 = vpop.f32.mrf.mxu1 }
  0xde   :  { %v379_v4 = vadd.f32 %v898_v2, %v1324_v1  ;;  %v539_v5 = vadd.f32 %v946_v3, %v1324_v1 }
  0xdf   :  { %v373_v6 = vpop.f32.mrf.mxu0  ;;  %v533_v7 = vpop.f32.mrf.mxu1 }
  0xe0   :  { %694 = vst.msk [vmem:[%s1649_s3 + $0x8] sm:$0xff] %vm692_vm2, %v379_v4  ;;  %726 = vst.msk [vmem:[%s1649_s3 + $0x108] sm:$0xff] %vm692_vm2, %v539_v5  ;;  %v374_v8 = vadd.f32 %v1324_v1, %v373_v6  ;;  %v534_v9 = vadd.f32 %v1324_v1, %v533_v7 }
  0xe1   :  { %v901_v10 = vpop.f32.mrf.mxu0  ;;  %v949_v11 = vpop.f32.mrf.mxu1 }
  0xe2   :  { %693 = vst.msk [vmem:[%s1649_s3] sm:$0xff] %vm692_vm2, %v374_v8  ;;  %725 = vst.msk [vmem:[%s1649_s3 + $0x100] sm:$0xff] %vm692_vm2, %v534_v9  ;;  %v389_v12 = vadd.f32 %v901_v10, %v1324_v1  ;;  %v549_v13 = vadd.f32 %v949_v11, %v1324_v1 }
  0xe3   :  { %v383_v14 = vpop.f32.mrf.mxu0  ;;  %v543_v15 = vpop.f32.mrf.mxu1 }
  0xe4   :  { %696 = vst.msk [vmem:[%s1649_s3 + $0x18] sm:$0xff] %vm692_vm2, %v389_v12  ;;  %728 = vst.msk [vmem:[%s1649_s3 + $0x118] sm:$0xff] %vm692_vm2, %v549_v13  ;;  %v384_v16 = vadd.f32 %v1324_v1, %v383_v14  ;;  %v544_v17 = vadd.f32 %v1324_v1, %v543_v15 }
  0xe5   :  { %v904_v18 = vpop.f32.mrf.mxu0  ;;  %v952_v19 = vpop.f32.mrf.mxu1 }
  0xe6   :  { %695 = vst.msk [vmem:[%s1649_s3 + $0x10] sm:$0xff] %vm692_vm2, %v384_v16  ;;  %727 = vst.msk [vmem:[%s1649_s3 + $0x110] sm:$0xff] %vm692_vm2, %v544_v17  ;;  %v399_v20 = vadd.f32 %v904_v18, %v1324_v1  ;;  %v559_v21 = vadd.f32 %v952_v19, %v1324_v1 }
  0xe7   :  { %v393_v22 = vpop.f32.mrf.mxu0  ;;  %v553_v23 = vpop.f32.mrf.mxu1 }
  0xe8   :  { %698 = vst.msk [vmem:[%s1649_s3 + $0x28] sm:$0xff] %vm692_vm2, %v399_v20  ;;  %730 = vst.msk [vmem:[%s1649_s3 + $0x128] sm:$0xff] %vm692_vm2, %v559_v21  ;;  %v394_v24 = vadd.f32 %v1324_v1, %v393_v22  ;;  %v554_v25 = vadd.f32 %v1324_v1, %v553_v23 }
  0xe9   :  { %v907_v26 = vpop.f32.mrf.mxu0  ;;  %v955_v27 = vpop.f32.mrf.mxu1 }
  0xea   :  { %697 = vst.msk [vmem:[%s1649_s3 + $0x20] sm:$0xff] %vm692_vm2, %v394_v24  ;;  %729 = vst.msk [vmem:[%s1649_s3 + $0x120] sm:$0xff] %vm692_vm2, %v554_v25  ;;  %v409_v28 = vadd.f32 %v907_v26, %v1324_v1  ;;  %v569_v29 = vadd.f32 %v955_v27, %v1324_v1 }
  0xeb   :  { %v403_v30 = vpop.f32.mrf.mxu0  ;;  %v563_v31 = vpop.f32.mrf.mxu1 }
  0xec   :  { %700 = vst.msk [vmem:[%s1649_s3 + $0x38] sm:$0xff] %vm692_vm2, %v409_v28  ;;  %732 = vst.msk [vmem:[%s1649_s3 + $0x138] sm:$0xff] %vm692_vm2, %v569_v29  ;;  %v404_v32 = vadd.f32 %v1324_v1, %v403_v30  ;;  %v564_v33 = vadd.f32 %v1324_v1, %v563_v31 }
  0xed   :  { %v910_v34 = vpop.f32.mrf.mxu0  ;;  %v958_v35 = vpop.f32.mrf.mxu1 }
  0xee   :  { %699 = vst.msk [vmem:[%s1649_s3 + $0x30] sm:$0xff] %vm692_vm2, %v404_v32  ;;  %731 = vst.msk [vmem:[%s1649_s3 + $0x130] sm:$0xff] %vm692_vm2, %v564_v33  ;;  %v419_v36 = vadd.f32 %v910_v34, %v1324_v1  ;;  %v579_v37 = vadd.f32 %v958_v35, %v1324_v1 }
  0xef   :  { %v413_v38 = vpop.f32.mrf.mxu0  ;;  %v573_v39 = vpop.f32.mrf.mxu1 }
  0xf0   :  { %702 = vst.msk [vmem:[%s1649_s3 + $0x48] sm:$0xff] %vm692_vm2, %v419_v36  ;;  %734 = vst.msk [vmem:[%s1649_s3 + $0x148] sm:$0xff] %vm692_vm2, %v579_v37  ;;  %v414_v40 = vadd.f32 %v1324_v1, %v413_v38  ;;  %v574_v41 = vadd.f32 %v1324_v1, %v573_v39 }
  0xf1   :  { %v913_v42 = vpop.f32.mrf.mxu0  ;;  %v961_v43 = vpop.f32.mrf.mxu1 }
  0xf2   :  { %701 = vst.msk [vmem:[%s1649_s3 + $0x40] sm:$0xff] %vm692_vm2, %v414_v40  ;;  %733 = vst.msk [vmem:[%s1649_s3 + $0x140] sm:$0xff] %vm692_vm2, %v574_v41  ;;  %v429_v44 = vadd.f32 %v913_v42, %v1324_v1  ;;  %v589_v45 = vadd.f32 %v961_v43, %v1324_v1 }
  0xf3   :  { %v423_v46 = vpop.f32.mrf.mxu0  ;;  %v583_v47 = vpop.f32.mrf.mxu1 }
  0xf4   :  { %704 = vst.msk [vmem:[%s1649_s3 + $0x58] sm:$0xff] %vm692_vm2, %v429_v44  ;;  %736 = vst.msk [vmem:[%s1649_s3 + $0x158] sm:$0xff] %vm692_vm2, %v589_v45  ;;  %v424_v48 = vadd.f32 %v1324_v1, %v423_v46  ;;  %v584_v49 = vadd.f32 %v1324_v1, %v583_v47 }
  0xf5   :  { %v916_v50 = vpop.f32.mrf.mxu0  ;;  %v964_v51 = vpop.f32.mrf.mxu1 }
  0xf6   :  { %703 = vst.msk [vmem:[%s1649_s3 + $0x50] sm:$0xff] %vm692_vm2, %v424_v48  ;;  %735 = vst.msk [vmem:[%s1649_s3 + $0x150] sm:$0xff] %vm692_vm2, %v584_v49  ;;  %v439_v52 = vadd.f32 %v916_v50, %v1324_v1  ;;  %v599_v53 = vadd.f32 %v964_v51, %v1324_v1 }
  0xf7   :  { %v433_v54 = vpop.f32.mrf.mxu0  ;;  %v593_v55 = vpop.f32.mrf.mxu1 }
  0xf8   :  { %706 = vst.msk [vmem:[%s1649_s3 + $0x68] sm:$0xff] %vm692_vm2, %v439_v52  ;;  %738 = vst.msk [vmem:[%s1649_s3 + $0x168] sm:$0xff] %vm692_vm2, %v599_v53  ;;  %v434_v56 = vadd.f32 %v1324_v1, %v433_v54  ;;  %v594_v57 = vadd.f32 %v1324_v1, %v593_v55 }
  0xf9   :  { %v919_v58 = vpop.f32.mrf.mxu0  ;;  %v967_v59 = vpop.f32.mrf.mxu1 }
  0xfa   :  { %705 = vst.msk [vmem:[%s1649_s3 + $0x60] sm:$0xff] %vm692_vm2, %v434_v56  ;;  %737 = vst.msk [vmem:[%s1649_s3 + $0x160] sm:$0xff] %vm692_vm2, %v594_v57  ;;  %v449_v60 = vadd.f32 %v919_v58, %v1324_v1  ;;  %v609_v61 = vadd.f32 %v967_v59, %v1324_v1 }
  0xfb   :  { %v443_v62 = vpop.f32.mrf.mxu0  ;;  %v603_v63 = vpop.f32.mrf.mxu1 }
  0xfc   :  { %708 = vst.msk [vmem:[%s1649_s3 + $0x78] sm:$0xff] %vm692_vm2, %v449_v60  ;;  %740 = vst.msk [vmem:[%s1649_s3 + $0x178] sm:$0xff] %vm692_vm2, %v609_v61  ;;  %v444_v0 = vadd.f32 %v1324_v1, %v443_v62  ;;  %v604_v2 = vadd.f32 %v1324_v1, %v603_v63 }
  0xfd   :  { %v922_v3 = vpop.f32.mrf.mxu0  ;;  %v970_v4 = vpop.f32.mrf.mxu1 }
  0xfe   :  { %707 = vst.msk [vmem:[%s1649_s3 + $0x70] sm:$0xff] %vm692_vm2, %v444_v0  ;;  %739 = vst.msk [vmem:[%s1649_s3 + $0x170] sm:$0xff] %vm692_vm2, %v604_v2  ;;  %v459_v5 = vadd.f32 %v922_v3, %v1324_v1  ;;  %v619_v6 = vadd.f32 %v970_v4, %v1324_v1 }
  0xff   :  { %v453_v7 = vpop.f32.mrf.mxu0  ;;  %v613_v8 = vpop.f32.mrf.mxu1 }
 0x100   :  { %710 = vst.msk [vmem:[%s1649_s3 + $0x88] sm:$0xff] %vm692_vm2, %v459_v5  ;;  %742 = vst.msk [vmem:[%s1649_s3 + $0x188] sm:$0xff] %vm692_vm2, %v619_v6  ;;  %v454_v9 = vadd.f32 %v1324_v1, %v453_v7  ;;  %v614_v10 = vadd.f32 %v1324_v1, %v613_v8 }
 0x101   :  { %v925_v11 = vpop.f32.mrf.mxu0  ;;  %v973_v12 = vpop.f32.mrf.mxu1 }
 0x102   :  { %709 = vst.msk [vmem:[%s1649_s3 + $0x80] sm:$0xff] %vm692_vm2, %v454_v9  ;;  %741 = vst.msk [vmem:[%s1649_s3 + $0x180] sm:$0xff] %vm692_vm2, %v614_v10  ;;  %v469_v13 = vadd.f32 %v925_v11, %v1324_v1  ;;  %v629_v14 = vadd.f32 %v973_v12, %v1324_v1 }
 0x103   :  { %v463_v15 = vpop.f32.mrf.mxu0  ;;  %v623_v16 = vpop.f32.mrf.mxu1 }
 0x104   :  { %712 = vst.msk [vmem:[%s1649_s3 + $0x98] sm:$0xff] %vm692_vm2, %v469_v13  ;;  %744 = vst.msk [vmem:[%s1649_s3 + $0x198] sm:$0xff] %vm692_vm2, %v629_v14  ;;  %v464_v17 = vadd.f32 %v1324_v1, %v463_v15  ;;  %v624_v18 = vadd.f32 %v1324_v1, %v623_v16 }
 0x105   :  { %v928_v19 = vpop.f32.mrf.mxu0  ;;  %v976_v20 = vpop.f32.mrf.mxu1 }
 0x106   :  { %711 = vst.msk [vmem:[%s1649_s3 + $0x90] sm:$0xff] %vm692_vm2, %v464_v17  ;;  %743 = vst.msk [vmem:[%s1649_s3 + $0x190] sm:$0xff] %vm692_vm2, %v624_v18  ;;  %v479_v21 = vadd.f32 %v928_v19, %v1324_v1  ;;  %v639_v22 = vadd.f32 %v976_v20, %v1324_v1 }
 0x107   :  { %v473_v23 = vpop.f32.mrf.mxu0  ;;  %v633_v24 = vpop.f32.mrf.mxu1 }
 0x108   :  { %714 = vst.msk [vmem:[%s1649_s3 + $0xa8] sm:$0xff] %vm692_vm2, %v479_v21  ;;  %746 = vst.msk [vmem:[%s1649_s3 + $0x1a8] sm:$0xff] %vm692_vm2, %v639_v22  ;;  %v474_v25 = vadd.f32 %v1324_v1, %v473_v23  ;;  %v634_v26 = vadd.f32 %v1324_v1, %v633_v24 }
 0x109   :  { %v931_v27 = vpop.f32.mrf.mxu0  ;;  %v979_v28 = vpop.f32.mrf.mxu1 }
 0x10a   :  { %713 = vst.msk [vmem:[%s1649_s3 + $0xa0] sm:$0xff] %vm692_vm2, %v474_v25  ;;  %745 = vst.msk [vmem:[%s1649_s3 + $0x1a0] sm:$0xff] %vm692_vm2, %v634_v26  ;;  %v489_v29 = vadd.f32 %v931_v27, %v1324_v1  ;;  %v649_v30 = vadd.f32 %v979_v28, %v1324_v1 }
 0x10b   :  { %v483_v31 = vpop.f32.mrf.mxu0  ;;  %v643_v32 = vpop.f32.mrf.mxu1 }
 0x10c   :  { %716 = vst.msk [vmem:[%s1649_s3 + $0xb8] sm:$0xff] %vm692_vm2, %v489_v29  ;;  %748 = vst.msk [vmem:[%s1649_s3 + $0x1b8] sm:$0xff] %vm692_vm2, %v649_v30  ;;  %v484_v33 = vadd.f32 %v1324_v1, %v483_v31  ;;  %v644_v34 = vadd.f32 %v1324_v1, %v643_v32 }
 0x10d   :  { %v934_v35 = vpop.f32.mrf.mxu0  ;;  %v982_v36 = vpop.f32.mrf.mxu1 }
 0x10e   :  { %715 = vst.msk [vmem:[%s1649_s3 + $0xb0] sm:$0xff] %vm692_vm2, %v484_v33  ;;  %747 = vst.msk [vmem:[%s1649_s3 + $0x1b0] sm:$0xff] %vm692_vm2, %v644_v34  ;;  %v499_v37 = vadd.f32 %v934_v35, %v1324_v1  ;;  %v659_v38 = vadd.f32 %v982_v36, %v1324_v1 }
 0x10f   :  { %v493_v39 = vpop.f32.mrf.mxu0  ;;  %v653_v40 = vpop.f32.mrf.mxu1 }
 0x110   :  { %718 = vst.msk [vmem:[%s1649_s3 + $0xc8] sm:$0xff] %vm692_vm2, %v499_v37  ;;  %750 = vst.msk [vmem:[%s1649_s3 + $0x1c8] sm:$0xff] %vm692_vm2, %v659_v38  ;;  %v494_v41 = vadd.f32 %v1324_v1, %v493_v39  ;;  %v654_v42 = vadd.f32 %v1324_v1, %v653_v40 }
 0x111   :  { %v937_v43 = vpop.f32.mrf.mxu0  ;;  %v985_v44 = vpop.f32.mrf.mxu1 }
 0x112   :  { %717 = vst.msk [vmem:[%s1649_s3 + $0xc0] sm:$0xff] %vm692_vm2, %v494_v41  ;;  %749 = vst.msk [vmem:[%s1649_s3 + $0x1c0] sm:$0xff] %vm692_vm2, %v654_v42  ;;  %v509_v45 = vadd.f32 %v937_v43, %v1324_v1  ;;  %v669_v46 = vadd.f32 %v985_v44, %v1324_v1 }
 0x113   :  { %v503_v47 = vpop.f32.mrf.mxu0  ;;  %v663_v48 = vpop.f32.mrf.mxu1 }
 0x114   :  { %720 = vst.msk [vmem:[%s1649_s3 + $0xd8] sm:$0xff] %vm692_vm2, %v509_v45  ;;  %752 = vst.msk [vmem:[%s1649_s3 + $0x1d8] sm:$0xff] %vm692_vm2, %v669_v46  ;;  %v504_v49 = vadd.f32 %v1324_v1, %v503_v47  ;;  %v664_v50 = vadd.f32 %v1324_v1, %v663_v48 }
 0x115   :  { %v940_v51 = vpop.f32.mrf.mxu0  ;;  %v988_v52 = vpop.f32.mrf.mxu1 }
 0x116   :  { %719 = vst.msk [vmem:[%s1649_s3 + $0xd0] sm:$0xff] %vm692_vm2, %v504_v49  ;;  %751 = vst.msk [vmem:[%s1649_s3 + $0x1d0] sm:$0xff] %vm692_vm2, %v664_v50  ;;  %v519_v53 = vadd.f32 %v940_v51, %v1324_v1  ;;  %v679_v54 = vadd.f32 %v988_v52, %v1324_v1 }
 0x117   :  { %v513_v55 = vpop.f32.mrf.mxu0  ;;  %v673_v56 = vpop.f32.mrf.mxu1 }
 0x118   :  { %722 = vst.msk [vmem:[%s1649_s3 + $0xe8] sm:$0xff] %vm692_vm2, %v519_v53  ;;  %754 = vst.msk [vmem:[%s1649_s3 + $0x1e8] sm:$0xff] %vm692_vm2, %v679_v54  ;;  %v514_v57 = vadd.f32 %v1324_v1, %v513_v55  ;;  %v674_v58 = vadd.f32 %v1324_v1, %v673_v56 }
 0x119   :  { %v943_v59 = vpop.f32.mrf.mxu0  ;;  %v991_v60 = vpop.f32.mrf.mxu1 }
 0x11a   :  { %721 = vst.msk [vmem:[%s1649_s3 + $0xe0] sm:$0xff] %vm692_vm2, %v514_v57  ;;  %753 = vst.msk [vmem:[%s1649_s3 + $0x1e0] sm:$0xff] %vm692_vm2, %v674_v58  ;;  %v529_v61 = vadd.f32 %v943_v59, %v1324_v1  ;;  %v689_v62 = vadd.f32 %v991_v60, %v1324_v1 }
 0x11b   :  { %v523_v63 = vpop.f32.mrf.mxu0  ;;  %v683_v0 = vpop.f32.mrf.mxu1 }
 0x11c   :  { %724 = vst.msk [vmem:[%s1649_s3 + $0xf8] sm:$0xff] %vm692_vm2, %v529_v61  ;;  %756 = vst.msk [vmem:[%s1649_s3 + $0x1f8] sm:$0xff] %vm692_vm2, %v689_v62  ;;  %v524_v2 = vadd.f32 %v1324_v1, %v523_v63  ;;  %v684_v3 = vadd.f32 %v1324_v1, %v683_v0 }
 0x11e   :  { %723 = vst.msk [vmem:[%s1649_s3 + $0xf0] sm:$0xff] %vm692_vm2, %v524_v2  ;;  %755 = vst.msk [vmem:[%s1649_s3 + $0x1f0] sm:$0xff] %vm692_vm2, %v684_v3 }
 0x11f   :  { %761 = vsyncpa [#allocation3], 1 }
 0x120   :  { %762 = vsyncpa [#allocation5], 1 }

// kernel: reverse.8
= control target key start
LH: loop header
LB: loop body
LE: loop exit
PB: predicated region body
PF: predicated region fallthrough
CT: control target
= control target key end

     0   :  { %s344_s0 = inlined_call_operand.vmem [shape: f32[1,2,32,16,7], index: 0, kind: input, shape index: {}]   ;;  %s345_s1 = inlined_call_operand.vmem [shape: f32[1,2,32,16,7], index: 1, kind: output, shape index: {}]  }
   0x1   :  { %v112_v0 = vld [vmem:[%s344_s0 + $0x60] sm:$0xff]  ;;  %v113_v1 = vld [vmem:[%s344_s0 + $0xd0] sm:$0xff]  ;;  %v138_v14 = vld [vmem:[%s344_s0 + $0x68] sm:$0xff] }
   0x2   :  { %v115_v2 = vld [vmem:[%s344_s0 + $0x50] sm:$0xff]  ;;  %4 = vst [vmem:[%s345_s1] sm:$0xff] %v112_v0  ;;  %114 = vst [vmem:[%s345_s1 + $0x70] sm:$0xff] %v113_v1  ;;  %v117_v3 = vld [vmem:[%s344_s0 + $0xc0] sm:$0xff] }
   0x3   :  { %116 = vst [vmem:[%s345_s1 + $0x10] sm:$0xff] %v115_v2  ;;  %v119_v4 = vld [vmem:[%s344_s0 + $0x40] sm:$0xff]  ;;  %v121_v5 = vld [vmem:[%s344_s0 + $0xb0] sm:$0xff]  ;;  %118 = vst [vmem:[%s345_s1 + $0x80] sm:$0xff] %v117_v3 }
   0x4   :  { %120 = vst [vmem:[%s345_s1 + $0x20] sm:$0xff] %v119_v4  ;;  %122 = vst [vmem:[%s345_s1 + $0x90] sm:$0xff] %v121_v5  ;;  %v123_v6 = vld [vmem:[%s344_s0 + $0x30] sm:$0xff]  ;;  %v125_v7 = vld [vmem:[%s344_s0 + $0xa0] sm:$0xff] }
   0x5   :  { %v127_v8 = vld [vmem:[%s344_s0 + $0x20] sm:$0xff]  ;;  %124 = vst [vmem:[%s345_s1 + $0x30] sm:$0xff] %v123_v6  ;;  %126 = vst [vmem:[%s345_s1 + $0xa0] sm:$0xff] %v125_v7  ;;  %v129_v9 = vld [vmem:[%s344_s0 + $0x90] sm:$0xff] }
   0x6   :  { %128 = vst [vmem:[%s345_s1 + $0x40] sm:$0xff] %v127_v8  ;;  %v131_v10 = vld [vmem:[%s344_s0 + $0x10] sm:$0xff]  ;;  %v133_v11 = vld [vmem:[%s344_s0 + $0x80] sm:$0xff]  ;;  %130 = vst [vmem:[%s345_s1 + $0xb0] sm:$0xff] %v129_v9 }
   0x7   :  { %132 = vst [vmem:[%s345_s1 + $0x50] sm:$0xff] %v131_v10  ;;  %134 = vst [vmem:[%s345_s1 + $0xc0] sm:$0xff] %v133_v11  ;;  %v49_v12 = vld [vmem:[%s344_s0] sm:$0xff]  ;;  %v136_v13 = vld [vmem:[%s344_s0 + $0x70] sm:$0xff] }
   0x8   :  { %135 = vst [vmem:[%s345_s1 + $0x60] sm:$0xff] %v49_v12  ;;  %137 = vst [vmem:[%s345_s1 + $0xd0] sm:$0xff] %v136_v13  ;;  %v140_v15 = vld [vmem:[%s344_s0 + $0xd8] sm:$0xff]  ;;  %v144_v17 = vld [vmem:[%s344_s0 + $0xc8] sm:$0xff] }
   0x9   :  { %139 = vst [vmem:[%s345_s1 + $0x8] sm:$0xff] %v138_v14  ;;  %v142_v16 = vld [vmem:[%s344_s0 + $0x58] sm:$0xff]  ;;  %141 = vst [vmem:[%s345_s1 + $0x78] sm:$0xff] %v140_v15  ;;  %v146_v18 = vld [vmem:[%s344_s0 + $0x48] sm:$0xff] }
   0xa   :  { %143 = vst [vmem:[%s345_s1 + $0x18] sm:$0xff] %v142_v16  ;;  %145 = vst [vmem:[%s345_s1 + $0x88] sm:$0xff] %v144_v17  ;;  %v148_v19 = vld [vmem:[%s344_s0 + $0xb8] sm:$0xff]  ;;  %v152_v21 = vld [vmem:[%s344_s0 + $0xa8] sm:$0xff] }
   0xb   :  { %v150_v20 = vld [vmem:[%s344_s0 + $0x38] sm:$0xff]  ;;  %147 = vst [vmem:[%s345_s1 + $0x28] sm:$0xff] %v146_v18  ;;  %149 = vst [vmem:[%s345_s1 + $0x98] sm:$0xff] %v148_v19  ;;  %v154_v22 = vld [vmem:[%s344_s0 + $0x28] sm:$0xff] }
   0xc   :  { %151 = vst [vmem:[%s345_s1 + $0x38] sm:$0xff] %v150_v20  ;;  %v156_v23 = vld [vmem:[%s344_s0 + $0x98] sm:$0xff]  ;;  %153 = vst [vmem:[%s345_s1 + $0xa8] sm:$0xff] %v152_v21  ;;  %v160_v25 = vld [vmem:[%s344_s0 + $0x88] sm:$0xff] }
   0xd   :  { %155 = vst [vmem:[%s345_s1 + $0x48] sm:$0xff] %v154_v22  ;;  %157 = vst [vmem:[%s345_s1 + $0xb8] sm:$0xff] %v156_v23  ;;  %v158_v24 = vld [vmem:[%s344_s0 + $0x18] sm:$0xff]  ;;  %v162_v26 = vld [vmem:[%s344_s0 + $0x8] sm:$0xff] }
   0xe   :  { %159 = vst [vmem:[%s345_s1 + $0x58] sm:$0xff] %v158_v24  ;;  %161 = vst [vmem:[%s345_s1 + $0xc8] sm:$0xff] %v160_v25  ;;  %v164_v27 = vld [vmem:[%s344_s0 + $0x78] sm:$0xff] }
   0xf   :  { %163 = vst [vmem:[%s345_s1 + $0x68] sm:$0xff] %v162_v26  ;;  %165 = vst [vmem:[%s345_s1 + $0xd8] sm:$0xff] %v164_v27 }

// kernel: fno_forward.11
= control target key start
LH: loop header
LB: loop body
LE: loop exit
PB: predicated region body
PF: predicated region fallthrough
CT: control target
= control target key end

     0   :  { %v3603_v0 = vmov 0.0   ;;  %vm299_vm0 = vcmask 523264   ;;  %vm3604_vm1 = vmmov 0   ;;  %vm2636_vm2 = vcmask 517120   ;;  %s4964_s1 = inlined_call_operand.vmem [shape: f32[32,64,64], index: 1, kind: input, shape index: {}]   ;;  %s4965_s0 = inlined_call_operand.vmem [shape: f32[32,2,64], index: 0, kind: input, shape index: {}]   ;;  %s4966_s2 = inlined_call_operand.vmem [shape: f32[32,2,64], index: 2, kind: output, shape index: {}]  }
   0x1   :  { %2993 = vmatprep.subr.mxu0 %v3603_v0  ;;  %3012 = vmatprep.subr.mxu1 %v3603_v0  ;;  %v50_v1 = vld [vmem:[%s4964_s1 + $0x38] sm:$0xff]  ;;  %v49_v3 = vld [vmem:[%s4964_s1 + $0x30] sm:$0xff]  ;;  %v48_v5 = vld [vmem:[%s4964_s1 + $0x28] sm:$0xff] }
   0x2   :  { %v58_v2 = vld [vmem:[%s4964_s1 + $0x78] sm:$0xff]  ;;  %2994 = vmatpush3.msra.mxu0 %v50_v1  ;;  %v57_v4 = vld [vmem:[%s4964_s1 + $0x70] sm:$0xff]  ;;  %v56_v6 = vld [vmem:[%s4964_s1 + $0x68] sm:$0xff]  ;;  %3009 = vmatprep.mubr.msk.f32.mxu0 %vm3604_vm1, %v3603_v0 }
   0x3   :  { %3013 = vmatpush3.msra.mxu1 %v58_v2  ;;  %2995 = vmatprep.subr.mxu0 %v3603_v0  ;;  %v47_v7 = vld [vmem:[%s4964_s1 + $0x20] sm:$0xff]  ;;  %v46_v9 = vld [vmem:[%s4964_s1 + $0x18] sm:$0xff]  ;;  %v45_v11 = vld [vmem:[%s4964_s1 + $0x10] sm:$0xff] }
   0x4   :  { %3014 = vmatprep.subr.mxu1 %v3603_v0  ;;  %2996 = vmatpush3.msra.mxu0 %v49_v3  ;;  %v55_v8 = vld [vmem:[%s4964_s1 + $0x60] sm:$0xff]  ;;  %v54_v10 = vld [vmem:[%s4964_s1 + $0x58] sm:$0xff]  ;;  %v53_v12 = vld [vmem:[%s4964_s1 + $0x50] sm:$0xff] }
   0x5   :  { %3015 = vmatpush3.msra.mxu1 %v57_v4  ;;  %2997 = vmatprep.subr.mxu0 %v3603_v0  ;;  %v44_v13 = vld [vmem:[%s4964_s1 + $0x8] sm:$0xff]  ;;  %v43_v15 = vld [vmem:[%s4964_s1] sm:$0xff]  ;;  %v66_v19 = vld [vmem:[%s4964_s1 + $0xb8] sm:$0xff] }
   0x6   :  { %3016 = vmatprep.subr.mxu1 %v3603_v0  ;;  %2998 = vmatpush3.msra.mxu0 %v48_v5  ;;  %v52_v14 = vld [vmem:[%s4964_s1 + $0x48] sm:$0xff]  ;;  %v51_v16 = vld [vmem:[%s4964_s1 + $0x40] sm:$0xff]  ;;  %v74_v20 = vld [vmem:[%s4964_s1 + $0xf8] sm:$0xff] }
   0x7   :  { %3017 = vmatpush3.msra.mxu1 %v56_v6  ;;  %2999 = vmatprep.subr.mxu0 %v3603_v0  ;;  %v11_v17 = vld [vmem:[%s4965_s0] sm:$0x3]  ;;  %v12_v18 = vld [vmem:[%s4965_s0 + $0x2] sm:$0x3]  ;;  %v65_v21 = vld [vmem:[%s4964_s1 + $0xb0] sm:$0xff] }
   0x8   :  { %3018 = vmatprep.subr.mxu1 %v3603_v0  ;;  %3000 = vmatpush3.msra.mxu0 %v47_v7  ;;  %v73_v22 = vld [vmem:[%s4964_s1 + $0xf0] sm:$0xff]  ;;  %v64_v23 = vld [vmem:[%s4964_s1 + $0xa8] sm:$0xff]  ;;  %v63_v25 = vld [vmem:[%s4964_s1 + $0xa0] sm:$0xff] }
   0x9   :  { %3019 = vmatpush3.msra.mxu1 %v55_v8  ;;  %3001 = vmatprep.subr.mxu0 %v3603_v0  ;;  %v72_v24 = vld [vmem:[%s4964_s1 + $0xe8] sm:$0xff]  ;;  %v71_v26 = vld [vmem:[%s4964_s1 + $0xe0] sm:$0xff]  ;;  %v62_v27 = vld [vmem:[%s4964_s1 + $0x98] sm:$0xff] }
   0xa   :  { %3020 = vmatprep.subr.mxu1 %v3603_v0  ;;  %3002 = vmatpush3.msra.mxu0 %v46_v9  ;;  %v70_v28 = vld [vmem:[%s4964_s1 + $0xd8] sm:$0xff]  ;;  %v61_v29 = vld [vmem:[%s4964_s1 + $0x90] sm:$0xff]  ;;  %v60_v31 = vld [vmem:[%s4964_s1 + $0x88] sm:$0xff] }
   0xb   :  { %3021 = vmatpush3.msra.mxu1 %v54_v10  ;;  %3003 = vmatprep.subr.mxu0 %v3603_v0  ;;  %v69_v30 = vld [vmem:[%s4964_s1 + $0xd0] sm:$0xff]  ;;  %v68_v32 = vld [vmem:[%s4964_s1 + $0xc8] sm:$0xff]  ;;  %v59_v33 = vld [vmem:[%s4964_s1 + $0x80] sm:$0xff] }
   0xc   :  { %3022 = vmatprep.subr.mxu1 %v3603_v0  ;;  %3004 = vmatpush3.msra.mxu0 %v45_v11  ;;  %v67_v34 = vld [vmem:[%s4964_s1 + $0xc0] sm:$0xff]  ;;  %v82_v37 = vld [vmem:[%s4964_s1 + $0x138] sm:$0xff]  ;;  %v81_v39 = vld [vmem:[%s4964_s1 + $0x130] sm:$0xff] }
   0xd   :  { %3023 = vmatpush3.msra.mxu1 %v53_v12  ;;  %3005 = vmatprep.subr.mxu0 %v3603_v0  ;;  %v13_v35 = vld [vmem:[%s4965_s0 + $0x4] sm:$0x3]  ;;  %v14_v36 = vld [vmem:[%s4965_s0 + $0x6] sm:$0x3]  ;;  %v90_v38 = vld [vmem:[%s4964_s1 + $0x178] sm:$0xff] }
   0xe   :  { %3024 = vmatprep.subr.mxu1 %v3603_v0  ;;  %3006 = vmatpush3.msra.mxu0 %v44_v13  ;;  %v89_v40 = vld [vmem:[%s4964_s1 + $0x170] sm:$0xff]  ;;  %v80_v41 = vld [vmem:[%s4964_s1 + $0x128] sm:$0xff]  ;;  %v79_v43 = vld [vmem:[%s4964_s1 + $0x120] sm:$0xff] }
   0xf   :  { %3025 = vmatpush3.msra.mxu1 %v52_v14  ;;  %3007 = vmatprep.subr.mxu0 %v3603_v0  ;;  %v88_v42 = vld [vmem:[%s4964_s1 + $0x168] sm:$0xff]  ;;  %v87_v44 = vld [vmem:[%s4964_s1 + $0x160] sm:$0xff]  ;;  %v78_v45 = vld [vmem:[%s4964_s1 + $0x118] sm:$0xff] }
  0x10   :  { %3026 = vmatprep.subr.mxu1 %v3603_v0  ;;  %3008 = vmatpush3.msra.mxu0 %v43_v15  ;;  %v86_v46 = vld [vmem:[%s4964_s1 + $0x158] sm:$0xff]  ;;  %v77_v47 = vld [vmem:[%s4964_s1 + $0x110] sm:$0xff]  ;;  %v76_v49 = vld [vmem:[%s4964_s1 + $0x108] sm:$0xff] }
  0x11   :  { %3027 = vmatpush3.msra.mxu1 %v51_v16  ;;  %3028 = vmatprep.mubr.msk.f32.mxu1 %vm3604_vm1, %v3603_v0  ;;  %v85_v48 = vld [vmem:[%s4964_s1 + $0x150] sm:$0xff]  ;;  %v84_v50 = vld [vmem:[%s4964_s1 + $0x148] sm:$0xff]  ;;  %v75_v51 = vld [vmem:[%s4964_s1 + $0x100] sm:$0xff] }
  0x12   :  { %3010 = vmatmul.mubr.msk.f32.vlgmr.msra.gmra.mxu0 %vm299_vm0, %v11_v17  ;;  %3029 = vmatmul.mubr.msk.f32.vlgmr.msra.gmra.mxu1 %vm299_vm0, %v12_v18  ;;  %v83_v52 = vld [vmem:[%s4964_s1 + $0x140] sm:$0xff]  ;;  %v15_v53 = vld [vmem:[%s4965_s0 + $0x8] sm:$0x3]  ;;  %v16_v54 = vld [vmem:[%s4965_s0 + $0xa] sm:$0x3] }
  0x13   :  { %3031 = vmatprep.subr.mxu0 %v3603_v0  ;;  %3050 = vmatprep.subr.mxu1 %v3603_v0  ;;  %v98_v55 = vld [vmem:[%s4964_s1 + $0x1b8] sm:$0xff]  ;;  %v97_v57 = vld [vmem:[%s4964_s1 + $0x1b0] sm:$0xff]  ;;  %v96_v59 = vld [vmem:[%s4964_s1 + $0x1a8] sm:$0xff] }
  0x14   :  { %3032 = vmatpush3.msra.mxu0 %v66_v19  ;;  %3051 = vmatpush3.msra.mxu1 %v74_v20  ;;  %v106_v56 = vld [vmem:[%s4964_s1 + $0x1f8] sm:$0xff]  ;;  %v105_v58 = vld [vmem:[%s4964_s1 + $0x1f0] sm:$0xff]  ;;  %v104_v60 = vld [vmem:[%s4964_s1 + $0x1e8] sm:$0xff] }
  0x15   :  { %3033 = vmatprep.subr.mxu0 %v3603_v0  ;;  %3052 = vmatprep.subr.mxu1 %v3603_v0  ;;  %v95_v61 = vld [vmem:[%s4964_s1 + $0x1a0] sm:$0xff]  ;;  %v94_v63 = vld [vmem:[%s4964_s1 + $0x198] sm:$0xff]  ;;  %v93_v2 = vld [vmem:[%s4964_s1 + $0x190] sm:$0xff] }
  0x16   :  { %3034 = vmatpush3.msra.mxu0 %v65_v21  ;;  %3053 = vmatpush3.msra.mxu1 %v73_v22  ;;  %v103_v62 = vld [vmem:[%s4964_s1 + $0x1e0] sm:$0xff]  ;;  %v102_v1 = vld [vmem:[%s4964_s1 + $0x1d8] sm:$0xff]  ;;  %v101_v3 = vld [vmem:[%s4964_s1 + $0x1d0] sm:$0xff] }
  0x17   :  { %3035 = vmatprep.subr.mxu0 %v3603_v0  ;;  %3054 = vmatprep.subr.mxu1 %v3603_v0  ;;  %v92_v4 = vld [vmem:[%s4964_s1 + $0x188] sm:$0xff]  ;;  %v91_v6 = vld [vmem:[%s4964_s1 + $0x180] sm:$0xff]  ;;  %v114_v10 = vld [vmem:[%s4964_s1 + $0x238] sm:$0xff] }
  0x18   :  { %3036 = vmatpush3.msra.mxu0 %v64_v23  ;;  %3055 = vmatpush3.msra.mxu1 %v72_v24  ;;  %v100_v5 = vld [vmem:[%s4964_s1 + $0x1c8] sm:$0xff]  ;;  %v99_v7 = vld [vmem:[%s4964_s1 + $0x1c0] sm:$0xff]  ;;  %v122_v11 = vld [vmem:[%s4964_s1 + $0x278] sm:$0xff] }
  0x19   :  { %3037 = vmatprep.subr.mxu0 %v3603_v0  ;;  %3056 = vmatprep.subr.mxu1 %v3603_v0  ;;  %v17_v8 = vld [vmem:[%s4965_s0 + $0xc] sm:$0x3]  ;;  %v18_v9 = vld [vmem:[%s4965_s0 + $0xe] sm:$0x3]  ;;  %v113_v12 = vld [vmem:[%s4964_s1 + $0x230] sm:$0xff] }
  0x1a   :  { %3038 = vmatpush3.msra.mxu0 %v63_v25  ;;  %3057 = vmatpush3.msra.mxu1 %v71_v26  ;;  %v121_v13 = vld [vmem:[%s4964_s1 + $0x270] sm:$0xff]  ;;  %v112_v14 = vld [vmem:[%s4964_s1 + $0x228] sm:$0xff]  ;;  %v111_v16 = vld [vmem:[%s4964_s1 + $0x220] sm:$0xff] }
  0x1b   :  { %3039 = vmatprep.subr.mxu0 %v3603_v0  ;;  %3058 = vmatprep.subr.mxu1 %v3603_v0  ;;  %v120_v15 = vld [vmem:[%s4964_s1 + $0x268] sm:$0xff]  ;;  %v119_v17 = vld [vmem:[%s4964_s1 + $0x260] sm:$0xff]  ;;  %v110_v18 = vld [vmem:[%s4964_s1 + $0x218] sm:$0xff] }
  0x1c   :  { %3040 = vmatpush3.msra.mxu0 %v62_v27  ;;  %3059 = vmatpush3.msra.mxu1 %v70_v28  ;;  %v118_v19 = vld [vmem:[%s4964_s1 + $0x258] sm:$0xff]  ;;  %v109_v20 = vld [vmem:[%s4964_s1 + $0x210] sm:$0xff]  ;;  %v108_v22 = vld [vmem:[%s4964_s1 + $0x208] sm:$0xff] }
  0x1d   :  { %3041 = vmatprep.subr.mxu0 %v3603_v0  ;;  %3060 = vmatprep.subr.mxu1 %v3603_v0  ;;  %v117_v21 = vld [vmem:[%s4964_s1 + $0x250] sm:$0xff]  ;;  %v116_v23 = vld [vmem:[%s4964_s1 + $0x248] sm:$0xff]  ;;  %v107_v24 = vld [vmem:[%s4964_s1 + $0x200] sm:$0xff] }
  0x1e   :  { %3042 = vmatpush3.msra.mxu0 %v61_v29  ;;  %3061 = vmatpush3.msra.mxu1 %v69_v30  ;;  %v115_v25 = vld [vmem:[%s4964_s1 + $0x240] sm:$0xff]  ;;  %v19_v26 = vld [vmem:[%s4965_s0 + $0x10] sm:$0x3]  ;;  %v20_v27 = vld [vmem:[%s4965_s0 + $0x12] sm:$0x3] }
  0x1f   :  { %3043 = vmatprep.subr.mxu0 %v3603_v0  ;;  %3062 = vmatprep.subr.mxu1 %v3603_v0  ;;  %v130_v28 = vld [vmem:[%s4964_s1 + $0x2b8] sm:$0xff]  ;;  %v129_v30 = vld [vmem:[%s4964_s1 + $0x2b0] sm:$0xff] }
  0x20   :  { %3044 = vmatpush3.msra.mxu0 %v60_v31  ;;  %3063 = vmatpush3.msra.mxu1 %v68_v32  ;;  %v138_v29 = vld [vmem:[%s4964_s1 + $0x2f8] sm:$0xff]  ;;  %v137_v31 = vld [vmem:[%s4964_s1 + $0x2f0] sm:$0xff]  ;;  %v128_v32 = vld [vmem:[%s4964_s1 + $0x2a8] sm:$0xff] }
  0x21   :  { %3045 = vmatprep.subr.mxu0 %v3603_v0  ;;  %3064 = vmatprep.subr.mxu1 %v3603_v0 }
  0x22   :  { %3046 = vmatpush3.msra.mxu0 %v59_v33  ;;  %3047 = vmatprep.mubr.msk.f32.mxu0 %vm3604_vm1, %v3603_v0  ;;  %v136_v33 = vld [vmem:[%s4964_s1 + $0x2e8] sm:$0xff] }
  0x23   :  { %3065 = vmatpush3.msra.mxu1 %v67_v34  ;;  %3066 = vmatprep.mubr.msk.f32.mxu1 %vm3604_vm1, %v3603_v0  ;;  %v127_v34 = vld [vmem:[%s4964_s1 + $0x2a0] sm:$0xff] }
  0x24   :  { %3048 = vmatmul.mubr.msk.f32.vlgmr.msra.gmra.mxu0 %vm299_vm0, %v13_v35  ;;  %3067 = vmatmul.mubr.msk.f32.vlgmr.msra.gmra.mxu1 %vm299_vm0, %v14_v36  ;;  %v135_v35 = vld [vmem:[%s4964_s1 + $0x2e0] sm:$0xff]  ;;  %v126_v36 = vld [vmem:[%s4964_s1 + $0x298] sm:$0xff] }
  0x25   :  { %3069 = vmatprep.subr.mxu0 %v3603_v0  ;;  %3088 = vmatprep.subr.mxu1 %v3603_v0 }
  0x26   :  { %3070 = vmatpush3.msra.mxu0 %v82_v37  ;;  %3089 = vmatpush3.msra.mxu1 %v90_v38  ;;  %v134_v37 = vld [vmem:[%s4964_s1 + $0x2d8] sm:$0xff]  ;;  %v125_v38 = vld [vmem:[%s4964_s1 + $0x290] sm:$0xff] }
  0x27   :  { %3071 = vmatprep.subr.mxu0 %v3603_v0  ;;  %3090 = vmatprep.subr.mxu1 %v3603_v0 }
  0x28   :  { %3072 = vmatpush3.msra.mxu0 %v81_v39  ;;  %3091 = vmatpush3.msra.mxu1 %v89_v40  ;;  %v133_v39 = vld [vmem:[%s4964_s1 + $0x2d0] sm:$0xff]  ;;  %v124_v40 = vld [vmem:[%s4964_s1 + $0x288] sm:$0xff] }
  0x29   :  { %3073 = vmatprep.subr.mxu0 %v3603_v0  ;;  %3092 = vmatprep.subr.mxu1 %v3603_v0 }
  0x2a   :  { %3074 = vmatpush3.msra.mxu0 %v80_v41  ;;  %3093 = vmatpush3.msra.mxu1 %v88_v42  ;;  %v132_v41 = vld [vmem:[%s4964_s1 + $0x2c8] sm:$0xff]  ;;  %v123_v42 = vld [vmem:[%s4964_s1 + $0x280] sm:$0xff] }
  0x2b   :  { %3075 = vmatprep.subr.mxu0 %v3603_v0  ;;  %3094 = vmatprep.subr.mxu1 %v3603_v0 }
  0x2c   :  { %3076 = vmatpush3.msra.mxu0 %v79_v43  ;;  %3095 = vmatpush3.msra.mxu1 %v87_v44  ;;  %v131_v43 = vld [vmem:[%s4964_s1 + $0x2c0] sm:$0xff]  ;;  %v21_v44 = vld [vmem:[%s4965_s0 + $0x14] sm:$0x3] }
  0x2d   :  { %3077 = vmatprep.subr.mxu0 %v3603_v0  ;;  %3096 = vmatprep.subr.mxu1 %v3603_v0 }
  0x2e   :  { %3078 = vmatpush3.msra.mxu0 %v78_v45  ;;  %3097 = vmatpush3.msra.mxu1 %v86_v46  ;;  %v22_v45 = vld [vmem:[%s4965_s0 + $0x16] sm:$0x3]  ;;  %v146_v46 = vld [vmem:[%s4964_s1 + $0x338] sm:$0xff] }
  0x2f   :  { %3079 = vmatprep.subr.mxu0 %v3603_v0  ;;  %3098 = vmatprep.subr.mxu1 %v3603_v0 }
  0x30   :  { %3080 = vmatpush3.msra.mxu0 %v77_v47  ;;  %3099 = vmatpush3.msra.mxu1 %v85_v48  ;;  %v154_v47 = vld [vmem:[%s4964_s1 + $0x378] sm:$0xff]  ;;  %v145_v48 = vld [vmem:[%s4964_s1 + $0x330] sm:$0xff] }
  0x31   :  { %3081 = vmatprep.subr.mxu0 %v3603_v0  ;;  %3100 = vmatprep.subr.mxu1 %v3603_v0 }
  0x32   :  { %3082 = vmatpush3.msra.mxu0 %v76_v49  ;;  %3101 = vmatpush3.msra.mxu1 %v84_v50  ;;  %v153_v49 = vld [vmem:[%s4964_s1 + $0x370] sm:$0xff]  ;;  %v144_v50 = vld [vmem:[%s4964_s1 + $0x328] sm:$0xff] }
  0x33   :  { %3083 = vmatprep.subr.mxu0 %v3603_v0  ;;  %3102 = vmatprep.subr.mxu1 %v3603_v0 }
  0x34   :  { %3084 = vmatpush3.msra.mxu0 %v75_v51  ;;  %3085 = vmatprep.mubr.msk.f32.mxu0 %vm3604_vm1, %v3603_v0  ;;  %v152_v51 = vld [vmem:[%s4964_s1 + $0x368] sm:$0xff] }
  0x35   :  { %3103 = vmatpush3.msra.mxu1 %v83_v52  ;;  %3104 = vmatprep.mubr.msk.f32.mxu1 %vm3604_vm1, %v3603_v0  ;;  %v143_v52 = vld [vmem:[%s4964_s1 + $0x320] sm:$0xff] }
  0x36   :  { %3086 = vmatmul.mubr.msk.f32.vlgmr.msra.gmra.mxu0 %vm299_vm0, %v15_v53  ;;  %3105 = vmatmul.mubr.msk.f32.vlgmr.msra.gmra.mxu1 %vm299_vm0, %v16_v54  ;;  %v151_v53 = vld [vmem:[%s4964_s1 + $0x360] sm:$0xff]  ;;  %v142_v54 = vld [vmem:[%s4964_s1 + $0x318] sm:$0xff] }
  0x37   :  { %3107 = vmatprep.subr.mxu0 %v3603_v0  ;;  %3126 = vmatprep.subr.mxu1 %v3603_v0 }
  0x38   :  { %3108 = vmatpush3.msra.mxu0 %v98_v55  ;;  %3127 = vmatpush3.msra.mxu1 %v106_v56  ;;  %v150_v55 = vld [vmem:[%s4964_s1 + $0x358] sm:$0xff]  ;;  %v141_v56 = vld [vmem:[%s4964_s1 + $0x310] sm:$0xff] }
  0x39   :  { %3109 = vmatprep.subr.mxu0 %v3603_v0  ;;  %3128 = vmatprep.subr.mxu1 %v3603_v0 }
  0x3a   :  { %3110 = vmatpush3.msra.mxu0 %v97_v57  ;;  %3129 = vmatpush3.msra.mxu1 %v105_v58  ;;  %v149_v57 = vld [vmem:[%s4964_s1 + $0x350] sm:$0xff]  ;;  %v140_v58 = vld [vmem:[%s4964_s1 + $0x308] sm:$0xff] }
  0x3b   :  { %3111 = vmatprep.subr.mxu0 %v3603_v0  ;;  %3130 = vmatprep.subr.mxu1 %v3603_v0 }
  0x3c   :  { %3112 = vmatpush3.msra.mxu0 %v96_v59  ;;  %3131 = vmatpush3.msra.mxu1 %v104_v60  ;;  %v148_v59 = vld [vmem:[%s4964_s1 + $0x348] sm:$0xff]  ;;  %v139_v60 = vld [vmem:[%s4964_s1 + $0x300] sm:$0xff] }
  0x3d   :  { %3113 = vmatprep.subr.mxu0 %v3603_v0  ;;  %3132 = vmatprep.subr.mxu1 %v3603_v0 }
  0x3e   :  { %3114 = vmatpush3.msra.mxu0 %v95_v61  ;;  %3133 = vmatpush3.msra.mxu1 %v103_v62  ;;  %v147_v61 = vld [vmem:[%s4964_s1 + $0x340] sm:$0xff]  ;;  %v23_v62 = vld [vmem:[%s4965_s0 + $0x18] sm:$0x3] }
  0x3f   :  { %3115 = vmatprep.subr.mxu0 %v3603_v0  ;;  %3134 = vmatprep.subr.mxu1 %v3603_v0 }
  0x40   :  { %3116 = vmatpush3.msra.mxu0 %v94_v63  ;;  %3135 = vmatpush3.msra.mxu1 %v102_v1  ;;  %v24_v63 = vld [vmem:[%s4965_s0 + $0x1a] sm:$0x3] }
  0x41   :  { %3117 = vmatprep.subr.mxu0 %v3603_v0  ;;  %3136 = vmatprep.subr.mxu1 %v3603_v0  ;;  %v162_v1 = vld [vmem:[%s4964_s1 + $0x3b8] sm:$0xff] }
  0x42   :  { %3118 = vmatpush3.msra.mxu0 %v93_v2  ;;  %3137 = vmatpush3.msra.mxu1 %v101_v3  ;;  %v170_v2 = vld [vmem:[%s4964_s1 + $0x3f8] sm:$0xff]  ;;  %v161_v3 = vld [vmem:[%s4964_s1 + $0x3b0] sm:$0xff] }
  0x43   :  { %3119 = vmatprep.subr.mxu0 %v3603_v0  ;;  %3138 = vmatprep.subr.mxu1 %v3603_v0 }
  0x44   :  { %3120 = vmatpush3.msra.mxu0 %v92_v4  ;;  %3139 = vmatpush3.msra.mxu1 %v100_v5  ;;  %v169_v4 = vld [vmem:[%s4964_s1 + $0x3f0] sm:$0xff]  ;;  %v160_v5 = vld [vmem:[%s4964_s1 + $0x3a8] sm:$0xff] }
  0x45   :  { %3121 = vmatprep.subr.mxu0 %v3603_v0  ;;  %3140 = vmatprep.subr.mxu1 %v3603_v0 }
  0x46   :  { %3122 = vmatpush3.msra.mxu0 %v91_v6  ;;  %3123 = vmatprep.mubr.msk.f32.mxu0 %vm3604_vm1, %v3603_v0  ;;  %v168_v6 = vld [vmem:[%s4964_s1 + $0x3e8] sm:$0xff] }
  0x47   :  { %3141 = vmatpush3.msra.mxu1 %v99_v7  ;;  %3142 = vmatprep.mubr.msk.f32.mxu1 %vm3604_vm1, %v3603_v0  ;;  %v159_v7 = vld [vmem:[%s4964_s1 + $0x3a0] sm:$0xff] }
  0x48   :  { %3124 = vmatmul.mubr.msk.f32.vlgmr.msra.gmra.mxu0 %vm299_vm0, %v17_v8  ;;  %3143 = vmatmul.mubr.msk.f32.vlgmr.msra.gmra.mxu1 %vm299_vm0, %v18_v9  ;;  %v167_v8 = vld [vmem:[%s4964_s1 + $0x3e0] sm:$0xff]  ;;  %v158_v9 = vld [vmem:[%s4964_s1 + $0x398] sm:$0xff] }
  0x49   :  { %3145 = vmatprep.subr.mxu0 %v3603_v0  ;;  %3164 = vmatprep.subr.mxu1 %v3603_v0 }
  0x4a   :  { %3146 = vmatpush3.msra.mxu0 %v114_v10  ;;  %3165 = vmatpush3.msra.mxu1 %v122_v11  ;;  %v166_v10 = vld [vmem:[%s4964_s1 + $0x3d8] sm:$0xff]  ;;  %v157_v11 = vld [vmem:[%s4964_s1 + $0x390] sm:$0xff] }
  0x4b   :  { %3147 = vmatprep.subr.mxu0 %v3603_v0  ;;  %3166 = vmatprep.subr.mxu1 %v3603_v0 }
  0x4c   :  { %3148 = vmatpush3.msra.mxu0 %v113_v12  ;;  %3167 = vmatpush3.msra.mxu1 %v121_v13  ;;  %v165_v12 = vld [vmem:[%s4964_s1 + $0x3d0] sm:$0xff]  ;;  %v156_v13 = vld [vmem:[%s4964_s1 + $0x388] sm:$0xff] }
  0x4d   :  { %3149 = vmatprep.subr.mxu0 %v3603_v0  ;;  %3168 = vmatprep.subr.mxu1 %v3603_v0 }
  0x4e   :  { %3150 = vmatpush3.msra.mxu0 %v112_v14  ;;  %3169 = vmatpush3.msra.mxu1 %v120_v15  ;;  %v164_v14 = vld [vmem:[%s4964_s1 + $0x3c8] sm:$0xff]  ;;  %v155_v15 = vld [vmem:[%s4964_s1 + $0x380] sm:$0xff] }
  0x4f   :  { %3151 = vmatprep.subr.mxu0 %v3603_v0  ;;  %3170 = vmatprep.subr.mxu1 %v3603_v0 }
  0x50   :  { %3152 = vmatpush3.msra.mxu0 %v111_v16  ;;  %3171 = vmatpush3.msra.mxu1 %v119_v17  ;;  %v163_v16 = vld [vmem:[%s4964_s1 + $0x3c0] sm:$0xff]  ;;  %v25_v17 = vld [vmem:[%s4965_s0 + $0x1c] sm:$0x3] }
  0x51   :  { %3153 = vmatprep.subr.mxu0 %v3603_v0  ;;  %3172 = vmatprep.subr.mxu1 %v3603_v0 }
  0x52   :  { %3154 = vmatpush3.msra.mxu0 %v110_v18  ;;  %3173 = vmatpush3.msra.mxu1 %v118_v19  ;;  %v26_v18 = vld [vmem:[%s4965_s0 + $0x1e] sm:$0x3] }
  0x53   :  { %3155 = vmatprep.subr.mxu0 %v3603_v0  ;;  %3174 = vmatprep.subr.mxu1 %v3603_v0  ;;  %v178_v19 = vld [vmem:[%s4964_s1 + $0x438] sm:$0xff] }
  0x54   :  { %3156 = vmatpush3.msra.mxu0 %v109_v20  ;;  %3175 = vmatpush3.msra.mxu1 %v117_v21  ;;  %v186_v20 = vld [vmem:[%s4964_s1 + $0x478] sm:$0xff]  ;;  %v177_v21 = vld [vmem:[%s4964_s1 + $0x430] sm:$0xff] }
  0x55   :  { %3157 = vmatprep.subr.mxu0 %v3603_v0  ;;  %3176 = vmatprep.subr.mxu1 %v3603_v0 }
  0x56   :  { %3158 = vmatpush3.msra.mxu0 %v108_v22  ;;  %3177 = vmatpush3.msra.mxu1 %v116_v23  ;;  %v185_v22 = vld [vmem:[%s4964_s1 + $0x470] sm:$0xff]  ;;  %v176_v23 = vld [vmem:[%s4964_s1 + $0x428] sm:$0xff] }
  0x57   :  { %3159 = vmatprep.subr.mxu0 %v3603_v0  ;;  %3178 = vmatprep.subr.mxu1 %v3603_v0 }
  0x58   :  { %3160 = vmatpush3.msra.mxu0 %v107_v24  ;;  %3161 = vmatprep.mubr.msk.f32.mxu0 %vm3604_vm1, %v3603_v0  ;;  %v184_v24 = vld [vmem:[%s4964_s1 + $0x468] sm:$0xff] }
  0x59   :  { %3179 = vmatpush3.msra.mxu1 %v115_v25  ;;  %3180 = vmatprep.mubr.msk.f32.mxu1 %vm3604_vm1, %v3603_v0  ;;  %v175_v25 = vld [vmem:[%s4964_s1 + $0x420] sm:$0xff] }
  0x5a   :  { %3162 = vmatmul.mubr.msk.f32.vlgmr.msra.gmra.mxu0 %vm299_vm0, %v19_v26  ;;  %3181 = vmatmul.mubr.msk.f32.vlgmr.msra.gmra.mxu1 %vm299_vm0, %v20_v27  ;;  %v183_v26 = vld [vmem:[%s4964_s1 + $0x460] sm:$0xff]  ;;  %v174_v27 = vld [vmem:[%s4964_s1 + $0x418] sm:$0xff] }
  0x5b   :  { %3183 = vmatprep.subr.mxu0 %v3603_v0  ;;  %3202 = vmatprep.subr.mxu1 %v3603_v0 }
  0x5c   :  { %3184 = vmatpush3.msra.mxu0 %v130_v28  ;;  %3203 = vmatpush3.msra.mxu1 %v138_v29  ;;  %v182_v28 = vld [vmem:[%s4964_s1 + $0x458] sm:$0xff]  ;;  %v173_v29 = vld [vmem:[%s4964_s1 + $0x410] sm:$0xff] }
  0x5d   :  { %3185 = vmatprep.subr.mxu0 %v3603_v0  ;;  %3204 = vmatprep.subr.mxu1 %v3603_v0 }
  0x5e   :  { %3186 = vmatpush3.msra.mxu0 %v129_v30  ;;  %3205 = vmatpush3.msra.mxu1 %v137_v31  ;;  %v181_v30 = vld [vmem:[%s4964_s1 + $0x450] sm:$0xff]  ;;  %v172_v31 = vld [vmem:[%s4964_s1 + $0x408] sm:$0xff] }
  0x5f   :  { %3187 = vmatprep.subr.mxu0 %v3603_v0  ;;  %3206 = vmatprep.subr.mxu1 %v3603_v0 }
  0x60   :  { %3188 = vmatpush3.msra.mxu0 %v128_v32  ;;  %3207 = vmatpush3.msra.mxu1 %v136_v33  ;;  %v180_v32 = vld [vmem:[%s4964_s1 + $0x448] sm:$0xff]  ;;  %v171_v33 = vld [vmem:[%s4964_s1 + $0x400] sm:$0xff] }
  0x61   :  { %3189 = vmatprep.subr.mxu0 %v3603_v0  ;;  %3208 = vmatprep.subr.mxu1 %v3603_v0 }
  0x62   :  { %3190 = vmatpush3.msra.mxu0 %v127_v34  ;;  %3209 = vmatpush3.msra.mxu1 %v135_v35  ;;  %v179_v34 = vld [vmem:[%s4964_s1 + $0x440] sm:$0xff] }
  0x63   :  { %3191 = vmatprep.subr.mxu0 %v3603_v0  ;;  %3210 = vmatprep.subr.mxu1 %v3603_v0  ;;  %v27_v35 = vld [vmem:[%s4965_s0 + $0x20] sm:$0x3] }
  0x64   :  { %3192 = vmatpush3.msra.mxu0 %v126_v36  ;;  %3211 = vmatpush3.msra.mxu1 %v134_v37  ;;  %v28_v36 = vld [vmem:[%s4965_s0 + $0x22] sm:$0x3]  ;;  %v194_v37 = vld [vmem:[%s4964_s1 + $0x4b8] sm:$0xff] }
  0x65   :  { %3193 = vmatprep.subr.mxu0 %v3603_v0  ;;  %3212 = vmatprep.subr.mxu1 %v3603_v0 }
  0x66   :  { %3194 = vmatpush3.msra.mxu0 %v125_v38  ;;  %3213 = vmatpush3.msra.mxu1 %v133_v39  ;;  %v202_v38 = vld [vmem:[%s4964_s1 + $0x4f8] sm:$0xff]  ;;  %v193_v39 = vld [vmem:[%s4964_s1 + $0x4b0] sm:$0xff] }
  0x67   :  { %3195 = vmatprep.subr.mxu0 %v3603_v0  ;;  %3214 = vmatprep.subr.mxu1 %v3603_v0 }
  0x68   :  { %3196 = vmatpush3.msra.mxu0 %v124_v40  ;;  %3215 = vmatpush3.msra.mxu1 %v132_v41  ;;  %v201_v40 = vld [vmem:[%s4964_s1 + $0x4f0] sm:$0xff]  ;;  %v192_v41 = vld [vmem:[%s4964_s1 + $0x4a8] sm:$0xff] }
  0x69   :  { %3197 = vmatprep.subr.mxu0 %v3603_v0  ;;  %3216 = vmatprep.subr.mxu1 %v3603_v0 }
  0x6a   :  { %3198 = vmatpush3.msra.mxu0 %v123_v42  ;;  %3199 = vmatprep.mubr.msk.f32.mxu0 %vm3604_vm1, %v3603_v0  ;;  %v200_v42 = vld [vmem:[%s4964_s1 + $0x4e8] sm:$0xff] }
  0x6b   :  { %3217 = vmatpush3.msra.mxu1 %v131_v43  ;;  %3218 = vmatprep.mubr.msk.f32.mxu1 %vm3604_vm1, %v3603_v0  ;;  %v191_v43 = vld [vmem:[%s4964_s1 + $0x4a0] sm:$0xff] }
  0x6c   :  { %3200 = vmatmul.mubr.msk.f32.vlgmr.msra.gmra.mxu0 %vm299_vm0, %v21_v44  ;;  %3219 = vmatmul.mubr.msk.f32.vlgmr.msra.gmra.mxu1 %vm299_vm0, %v22_v45  ;;  %v199_v44 = vld [vmem:[%s4964_s1 + $0x4e0] sm:$0xff]  ;;  %v190_v45 = vld [vmem:[%s4964_s1 + $0x498] sm:$0xff] }
  0x6d   :  { %3221 = vmatprep.subr.mxu0 %v3603_v0  ;;  %3240 = vmatprep.subr.mxu1 %v3603_v0 }
  0x6e   :  { %3222 = vmatpush3.msra.mxu0 %v146_v46  ;;  %3241 = vmatpush3.msra.mxu1 %v154_v47  ;;  %v198_v46 = vld [vmem:[%s4964_s1 + $0x4d8] sm:$0xff]  ;;  %v189_v47 = vld [vmem:[%s4964_s1 + $0x490] sm:$0xff] }
  0x6f   :  { %3223 = vmatprep.subr.mxu0 %v3603_v0  ;;  %3242 = vmatprep.subr.mxu1 %v3603_v0 }
  0x70   :  { %3224 = vmatpush3.msra.mxu0 %v145_v48  ;;  %3243 = vmatpush3.msra.mxu1 %v153_v49  ;;  %v197_v48 = vld [vmem:[%s4964_s1 + $0x4d0] sm:$0xff]  ;;  %v188_v49 = vld [vmem:[%s4964_s1 + $0x488] sm:$0xff] }
  0x71   :  { %3225 = vmatprep.subr.mxu0 %v3603_v0  ;;  %3244 = vmatprep.subr.mxu1 %v3603_v0 }
  0x72   :  { %3226 = vmatpush3.msra.mxu0 %v144_v50  ;;  %3245 = vmatpush3.msra.mxu1 %v152_v51  ;;  %v196_v50 = vld [vmem:[%s4964_s1 + $0x4c8] sm:$0xff]  ;;  %v187_v51 = vld [vmem:[%s4964_s1 + $0x480] sm:$0xff] }
  0x73   :  { %3227 = vmatprep.subr.mxu0 %v3603_v0  ;;  %3246 = vmatprep.subr.mxu1 %v3603_v0 }
  0x74   :  { %3228 = vmatpush3.msra.mxu0 %v143_v52  ;;  %3247 = vmatpush3.msra.mxu1 %v151_v53  ;;  %v195_v52 = vld [vmem:[%s4964_s1 + $0x4c0] sm:$0xff] }
  0x75   :  { %3229 = vmatprep.subr.mxu0 %v3603_v0  ;;  %3248 = vmatprep.subr.mxu1 %v3603_v0  ;;  %v29_v53 = vld [vmem:[%s4965_s0 + $0x24] sm:$0x3] }
  0x76   :  { %3230 = vmatpush3.msra.mxu0 %v142_v54  ;;  %3249 = vmatpush3.msra.mxu1 %v150_v55  ;;  %v30_v54 = vld [vmem:[%s4965_s0 + $0x26] sm:$0x3]  ;;  %v210_v55 = vld [vmem:[%s4964_s1 + $0x538] sm:$0xff] }
  0x77   :  { %3231 = vmatprep.subr.mxu0 %v3603_v0  ;;  %3250 = vmatprep.subr.mxu1 %v3603_v0 }
  0x78   :  { %3232 = vmatpush3.msra.mxu0 %v141_v56  ;;  %3251 = vmatpush3.msra.mxu1 %v149_v57  ;;  %v218_v56 = vld [vmem:[%s4964_s1 + $0x578] sm:$0xff]  ;;  %v209_v57 = vld [vmem:[%s4964_s1 + $0x530] sm:$0xff] }
  0x79   :  { %3233 = vmatprep.subr.mxu0 %v3603_v0  ;;  %3252 = vmatprep.subr.mxu1 %v3603_v0 }
  0x7a   :  { %3234 = vmatpush3.msra.mxu0 %v140_v58  ;;  %3253 = vmatpush3.msra.mxu1 %v148_v59  ;;  %v217_v58 = vld [vmem:[%s4964_s1 + $0x570] sm:$0xff]  ;;  %v208_v59 = vld [vmem:[%s4964_s1 + $0x528] sm:$0xff] }
  0x7b   :  { %3235 = vmatprep.subr.mxu0 %v3603_v0  ;;  %3254 = vmatprep.subr.mxu1 %v3603_v0 }
  0x7c   :  { %3236 = vmatpush3.msra.mxu0 %v139_v60  ;;  %3237 = vmatprep.mubr.msk.f32.mxu0 %vm3604_vm1, %v3603_v0  ;;  %v216_v60 = vld [vmem:[%s4964_s1 + $0x568] sm:$0xff] }
  0x7d   :  { %3255 = vmatpush3.msra.mxu1 %v147_v61  ;;  %3256 = vmatprep.mubr.msk.f32.mxu1 %vm3604_vm1, %v3603_v0  ;;  %v207_v61 = vld [vmem:[%s4964_s1 + $0x520] sm:$0xff] }
  0x7e   :  { %3238 = vmatmul.mubr.msk.f32.vlgmr.msra.gmra.mxu0 %vm299_vm0, %v23_v62  ;;  %3257 = vmatmul.mubr.msk.f32.vlgmr.msra.gmra.mxu1 %vm299_vm0, %v24_v63  ;;  %v215_v62 = vld [vmem:[%s4964_s1 + $0x560] sm:$0xff]  ;;  %v206_v63 = vld [vmem:[%s4964_s1 + $0x518] sm:$0xff] }
  0x7f   :  { %3259 = vmatprep.subr.mxu0 %v3603_v0  ;;  %3278 = vmatprep.subr.mxu1 %v3603_v0 }
  0x80   :  { %3260 = vmatpush3.msra.mxu0 %v162_v1  ;;  %3279 = vmatpush3.msra.mxu1 %v170_v2  ;;  %v214_v1 = vld [vmem:[%s4964_s1 + $0x558] sm:$0xff]  ;;  %v205_v2 = vld [vmem:[%s4964_s1 + $0x510] sm:$0xff] }
  0x81   :  { %3261 = vmatprep.subr.mxu0 %v3603_v0  ;;  %3280 = vmatprep.subr.mxu1 %v3603_v0 }
  0x82   :  { %3262 = vmatpush3.msra.mxu0 %v161_v3  ;;  %3281 = vmatpush3.msra.mxu1 %v169_v4  ;;  %v213_v3 = vld [vmem:[%s4964_s1 + $0x550] sm:$0xff]  ;;  %v204_v4 = vld [vmem:[%s4964_s1 + $0x508] sm:$0xff] }
  0x83   :  { %3263 = vmatprep.subr.mxu0 %v3603_v0  ;;  %3282 = vmatprep.subr.mxu1 %v3603_v0 }
  0x84   :  { %3264 = vmatpush3.msra.mxu0 %v160_v5  ;;  %3283 = vmatpush3.msra.mxu1 %v168_v6  ;;  %v212_v5 = vld [vmem:[%s4964_s1 + $0x548] sm:$0xff]  ;;  %v203_v6 = vld [vmem:[%s4964_s1 + $0x500] sm:$0xff] }
  0x85   :  { %3265 = vmatprep.subr.mxu0 %v3603_v0  ;;  %3284 = vmatprep.subr.mxu1 %v3603_v0 }
  0x86   :  { %3266 = vmatpush3.msra.mxu0 %v159_v7  ;;  %3285 = vmatpush3.msra.mxu1 %v167_v8  ;;  %v211_v7 = vld [vmem:[%s4964_s1 + $0x540] sm:$0xff]  ;;  %v31_v8 = vld [vmem:[%s4965_s0 + $0x28] sm:$0x3] }
  0x87   :  { %3267 = vmatprep.subr.mxu0 %v3603_v0  ;;  %3286 = vmatprep.subr.mxu1 %v3603_v0 }
  0x88   :  { %3268 = vmatpush3.msra.mxu0 %v158_v9  ;;  %3287 = vmatpush3.msra.mxu1 %v166_v10  ;;  %v32_v9 = vld [vmem:[%s4965_s0 + $0x2a] sm:$0x3]  ;;  %v226_v10 = vld [vmem:[%s4964_s1 + $0x5b8] sm:$0xff] }
  0x89   :  { %3269 = vmatprep.subr.mxu0 %v3603_v0  ;;  %3288 = vmatprep.subr.mxu1 %v3603_v0 }
  0x8a   :  { %3270 = vmatpush3.msra.mxu0 %v157_v11  ;;  %3289 = vmatpush3.msra.mxu1 %v165_v12  ;;  %v234_v11 = vld [vmem:[%s4964_s1 + $0x5f8] sm:$0xff]  ;;  %v225_v12 = vld [vmem:[%s4964_s1 + $0x5b0] sm:$0xff] }
  0x8b   :  { %3271 = vmatprep.subr.mxu0 %v3603_v0  ;;  %3290 = vmatprep.subr.mxu1 %v3603_v0 }
  0x8c   :  { %3272 = vmatpush3.msra.mxu0 %v156_v13  ;;  %3291 = vmatpush3.msra.mxu1 %v164_v14  ;;  %v233_v13 = vld [vmem:[%s4964_s1 + $0x5f0] sm:$0xff]  ;;  %v224_v14 = vld [vmem:[%s4964_s1 + $0x5a8] sm:$0xff] }
  0x8d   :  { %3273 = vmatprep.subr.mxu0 %v3603_v0  ;;  %3292 = vmatprep.subr.mxu1 %v3603_v0 }
  0x8e   :  { %3274 = vmatpush3.msra.mxu0 %v155_v15  ;;  %3275 = vmatprep.mubr.msk.f32.mxu0 %vm3604_vm1, %v3603_v0  ;;  %v232_v15 = vld [vmem:[%s4964_s1 + $0x5e8] sm:$0xff] }
  0x8f   :  { %3293 = vmatpush3.msra.mxu1 %v163_v16  ;;  %3294 = vmatprep.mubr.msk.f32.mxu1 %vm3604_vm1, %v3603_v0  ;;  %v223_v16 = vld [vmem:[%s4964_s1 + $0x5a0] sm:$0xff] }
  0x90   :  { %3276 = vmatmul.mubr.msk.f32.vlgmr.msra.gmra.mxu0 %vm299_vm0, %v25_v17  ;;  %3295 = vmatmul.mubr.msk.f32.vlgmr.msra.gmra.mxu1 %vm299_vm0, %v26_v18  ;;  %v231_v17 = vld [vmem:[%s4964_s1 + $0x5e0] sm:$0xff]  ;;  %v222_v18 = vld [vmem:[%s4964_s1 + $0x598] sm:$0xff] }
  0x91   :  { %3297 = vmatprep.subr.mxu0 %v3603_v0  ;;  %3316 = vmatprep.subr.mxu1 %v3603_v0 }
  0x92   :  { %3298 = vmatpush3.msra.mxu0 %v178_v19  ;;  %3317 = vmatpush3.msra.mxu1 %v186_v20  ;;  %v230_v19 = vld [vmem:[%s4964_s1 + $0x5d8] sm:$0xff]  ;;  %v221_v20 = vld [vmem:[%s4964_s1 + $0x590] sm:$0xff] }
  0x93   :  { %3299 = vmatprep.subr.mxu0 %v3603_v0  ;;  %3318 = vmatprep.subr.mxu1 %v3603_v0 }
  0x94   :  { %3300 = vmatpush3.msra.mxu0 %v177_v21  ;;  %3319 = vmatpush3.msra.mxu1 %v185_v22  ;;  %v229_v21 = vld [vmem:[%s4964_s1 + $0x5d0] sm:$0xff]  ;;  %v220_v22 = vld [vmem:[%s4964_s1 + $0x588] sm:$0xff] }
  0x95   :  { %3301 = vmatprep.subr.mxu0 %v3603_v0  ;;  %3320 = vmatprep.subr.mxu1 %v3603_v0 }
  0x96   :  { %3302 = vmatpush3.msra.mxu0 %v176_v23  ;;  %3321 = vmatpush3.msra.mxu1 %v184_v24  ;;  %v228_v23 = vld [vmem:[%s4964_s1 + $0x5c8] sm:$0xff] }
  0x97   :  { %3303 = vmatprep.subr.mxu0 %v3603_v0  ;;  %3322 = vmatprep.subr.mxu1 %v3603_v0 }
  0x98   :  { %3304 = vmatpush3.msra.mxu0 %v175_v25  ;;  %3323 = vmatpush3.msra.mxu1 %v183_v26  ;;  %v219_v26 = vld [vmem:[%s4964_s1 + $0x580] sm:$0xff] }
  0x99   :  { %3305 = vmatprep.subr.mxu0 %v3603_v0  ;;  %3324 = vmatprep.subr.mxu1 %v3603_v0 }
  0x9a   :  { %3306 = vmatpush3.msra.mxu0 %v174_v27  ;;  %3325 = vmatpush3.msra.mxu1 %v182_v28  ;;  %v227_v27 = vld [vmem:[%s4964_s1 + $0x5c0] sm:$0xff] }
  0x9b   :  { %3307 = vmatprep.subr.mxu0 %v3603_v0  ;;  %3326 = vmatprep.subr.mxu1 %v3603_v0 }
  0x9c   :  { %3308 = vmatpush3.msra.mxu0 %v173_v29  ;;  %3327 = vmatpush3.msra.mxu1 %v181_v30  ;;  %v33_v30 = vld [vmem:[%s4965_s0 + $0x2c] sm:$0x3] }
  0x9d   :  { %3309 = vmatprep.subr.mxu0 %v3603_v0  ;;  %3328 = vmatprep.subr.mxu1 %v3603_v0 }
  0x9e   :  { %3310 = vmatpush3.msra.mxu0 %v172_v31  ;;  %3329 = vmatpush3.msra.mxu1 %v180_v32  ;;  %v34_v31 = vld [vmem:[%s4965_s0 + $0x2e] sm:$0x3]  ;;  %v242_v32 = vld [vmem:[%s4964_s1 + $0x638] sm:$0xff] }
  0x9f   :  { %3311 = vmatprep.subr.mxu0 %v3603_v0  ;;  %3330 = vmatprep.subr.mxu1 %v3603_v0 }
  0xa0   :  { %3312 = vmatpush3.msra.mxu0 %v171_v33  ;;  %3313 = vmatprep.mubr.msk.f32.mxu0 %vm3604_vm1, %v3603_v0  ;;  %v250_v33 = vld [vmem:[%s4964_s1 + $0x678] sm:$0xff] }
  0xa1   :  { %3331 = vmatpush3.msra.mxu1 %v179_v34  ;;  %3332 = vmatprep.mubr.msk.f32.mxu1 %vm3604_vm1, %v3603_v0  ;;  %v241_v34 = vld [vmem:[%s4964_s1 + $0x630] sm:$0xff] }
  0xa2   :  { %3314 = vmatmul.mubr.msk.f32.vlgmr.msra.gmra.mxu0 %vm299_vm0, %v27_v35  ;;  %3333 = vmatmul.mubr.msk.f32.vlgmr.msra.gmra.mxu1 %vm299_vm0, %v28_v36  ;;  %v249_v35 = vld [vmem:[%s4964_s1 + $0x670] sm:$0xff]  ;;  %v240_v36 = vld [vmem:[%s4964_s1 + $0x628] sm:$0xff] }
  0xa3   :  { %3335 = vmatprep.subr.mxu0 %v3603_v0  ;;  %3354 = vmatprep.subr.mxu1 %v3603_v0 }
  0xa4   :  { %3336 = vmatpush3.msra.mxu0 %v194_v37  ;;  %3355 = vmatpush3.msra.mxu1 %v202_v38  ;;  %v248_v37 = vld [vmem:[%s4964_s1 + $0x668] sm:$0xff]  ;;  %v239_v38 = vld [vmem:[%s4964_s1 + $0x620] sm:$0xff] }
  0xa5   :  { %3337 = vmatprep.subr.mxu0 %v3603_v0  ;;  %3356 = vmatprep.subr.mxu1 %v3603_v0 }
  0xa6   :  { %3338 = vmatpush3.msra.mxu0 %v193_v39  ;;  %3357 = vmatpush3.msra.mxu1 %v201_v40  ;;  %v247_v39 = vld [vmem:[%s4964_s1 + $0x660] sm:$0xff]  ;;  %v238_v40 = vld [vmem:[%s4964_s1 + $0x618] sm:$0xff] }
  0xa7   :  { %3339 = vmatprep.subr.mxu0 %v3603_v0  ;;  %3358 = vmatprep.subr.mxu1 %v3603_v0 }
  0xa8   :  { %3340 = vmatpush3.msra.mxu0 %v192_v41  ;;  %3359 = vmatpush3.msra.mxu1 %v200_v42  ;;  %v246_v41 = vld [vmem:[%s4964_s1 + $0x658] sm:$0xff]  ;;  %v237_v42 = vld [vmem:[%s4964_s1 + $0x610] sm:$0xff] }
  0xa9   :  { %3341 = vmatprep.subr.mxu0 %v3603_v0  ;;  %3360 = vmatprep.subr.mxu1 %v3603_v0 }
  0xaa   :  { %3342 = vmatpush3.msra.mxu0 %v191_v43  ;;  %3361 = vmatpush3.msra.mxu1 %v199_v44  ;;  %v245_v43 = vld [vmem:[%s4964_s1 + $0x650] sm:$0xff]  ;;  %v236_v44 = vld [vmem:[%s4964_s1 + $0x608] sm:$0xff] }
  0xab   :  { %3343 = vmatprep.subr.mxu0 %v3603_v0  ;;  %3362 = vmatprep.subr.mxu1 %v3603_v0 }
  0xac   :  { %3344 = vmatpush3.msra.mxu0 %v190_v45  ;;  %3363 = vmatpush3.msra.mxu1 %v198_v46  ;;  %v244_v45 = vld [vmem:[%s4964_s1 + $0x648] sm:$0xff] }
  0xad   :  { %3345 = vmatprep.subr.mxu0 %v3603_v0  ;;  %3364 = vmatprep.subr.mxu1 %v3603_v0 }
  0xae   :  { %3346 = vmatpush3.msra.mxu0 %v189_v47  ;;  %3365 = vmatpush3.msra.mxu1 %v197_v48  ;;  %v235_v48 = vld [vmem:[%s4964_s1 + $0x600] sm:$0xff] }
  0xaf   :  { %3347 = vmatprep.subr.mxu0 %v3603_v0  ;;  %3366 = vmatprep.subr.mxu1 %v3603_v0 }
  0xb0   :  { %3348 = vmatpush3.msra.mxu0 %v188_v49  ;;  %3367 = vmatpush3.msra.mxu1 %v196_v50  ;;  %v243_v49 = vld [vmem:[%s4964_s1 + $0x640] sm:$0xff] }
  0xb1   :  { %3349 = vmatprep.subr.mxu0 %v3603_v0  ;;  %3368 = vmatprep.subr.mxu1 %v3603_v0 }
  0xb2   :  { %3350 = vmatpush3.msra.mxu0 %v187_v51  ;;  %3351 = vmatprep.mubr.msk.f32.mxu0 %vm3604_vm1, %v3603_v0 }
  0xb3   :  { %3369 = vmatpush3.msra.mxu1 %v195_v52  ;;  %3370 = vmatprep.mubr.msk.f32.mxu1 %vm3604_vm1, %v3603_v0  ;;  %v35_v52 = vld [vmem:[%s4965_s0 + $0x30] sm:$0x3] }
  0xb4   :  { %3352 = vmatmul.mubr.msk.f32.vlgmr.msra.gmra.mxu0 %vm299_vm0, %v29_v53  ;;  %3371 = vmatmul.mubr.msk.f32.vlgmr.msra.gmra.mxu1 %vm299_vm0, %v30_v54  ;;  %v36_v53 = vld [vmem:[%s4965_s0 + $0x32] sm:$0x3]  ;;  %v258_v54 = vld [vmem:[%s4964_s1 + $0x6b8] sm:$0xff] }
  0xb5   :  { %3373 = vmatprep.subr.mxu0 %v3603_v0  ;;  %3392 = vmatprep.subr.mxu1 %v3603_v0 }
  0xb6   :  { %3374 = vmatpush3.msra.mxu0 %v210_v55  ;;  %3393 = vmatpush3.msra.mxu1 %v218_v56  ;;  %v266_v55 = vld [vmem:[%s4964_s1 + $0x6f8] sm:$0xff]  ;;  %v257_v56 = vld [vmem:[%s4964_s1 + $0x6b0] sm:$0xff] }
  0xb7   :  { %3375 = vmatprep.subr.mxu0 %v3603_v0  ;;  %3394 = vmatprep.subr.mxu1 %v3603_v0 }
  0xb8   :  { %3376 = vmatpush3.msra.mxu0 %v209_v57  ;;  %3395 = vmatpush3.msra.mxu1 %v217_v58  ;;  %v265_v57 = vld [vmem:[%s4964_s1 + $0x6f0] sm:$0xff]  ;;  %v256_v58 = vld [vmem:[%s4964_s1 + $0x6a8] sm:$0xff] }
  0xb9   :  { %3377 = vmatprep.subr.mxu0 %v3603_v0  ;;  %3396 = vmatprep.subr.mxu1 %v3603_v0 }
  0xba   :  { %3378 = vmatpush3.msra.mxu0 %v208_v59  ;;  %3397 = vmatpush3.msra.mxu1 %v216_v60  ;;  %v264_v59 = vld [vmem:[%s4964_s1 + $0x6e8] sm:$0xff]  ;;  %v255_v60 = vld [vmem:[%s4964_s1 + $0x6a0] sm:$0xff] }
  0xbb   :  { %3379 = vmatprep.subr.mxu0 %v3603_v0  ;;  %3398 = vmatprep.subr.mxu1 %v3603_v0 }
  0xbc   :  { %3380 = vmatpush3.msra.mxu0 %v207_v61  ;;  %3399 = vmatpush3.msra.mxu1 %v215_v62  ;;  %v263_v61 = vld [vmem:[%s4964_s1 + $0x6e0] sm:$0xff]  ;;  %v254_v62 = vld [vmem:[%s4964_s1 + $0x698] sm:$0xff] }
  0xbd   :  { %3381 = vmatprep.subr.mxu0 %v3603_v0  ;;  %3400 = vmatprep.subr.mxu1 %v3603_v0 }
  0xbe   :  { %3382 = vmatpush3.msra.mxu0 %v206_v63  ;;  %3401 = vmatpush3.msra.mxu1 %v214_v1  ;;  %v262_v63 = vld [vmem:[%s4964_s1 + $0x6d8] sm:$0xff]  ;;  %v253_v1 = vld [vmem:[%s4964_s1 + $0x690] sm:$0xff] }
  0xbf   :  { %3383 = vmatprep.subr.mxu0 %v3603_v0  ;;  %3402 = vmatprep.subr.mxu1 %v3603_v0 }
  0xc0   :  { %3384 = vmatpush3.msra.mxu0 %v205_v2  ;;  %3403 = vmatpush3.msra.mxu1 %v213_v3  ;;  %v261_v2 = vld [vmem:[%s4964_s1 + $0x6d0] sm:$0xff]  ;;  %v252_v3 = vld [vmem:[%s4964_s1 + $0x688] sm:$0xff] }
  0xc1   :  { %3385 = vmatprep.subr.mxu0 %v3603_v0  ;;  %3404 = vmatprep.subr.mxu1 %v3603_v0 }
  0xc2   :  { %3386 = vmatpush3.msra.mxu0 %v204_v4  ;;  %3405 = vmatpush3.msra.mxu1 %v212_v5  ;;  %v260_v4 = vld [vmem:[%s4964_s1 + $0x6c8] sm:$0xff] }
  0xc3   :  { %3387 = vmatprep.subr.mxu0 %v3603_v0  ;;  %3406 = vmatprep.subr.mxu1 %v3603_v0 }
  0xc4   :  { %3388 = vmatpush3.msra.mxu0 %v203_v6  ;;  %3389 = vmatprep.mubr.msk.f32.mxu0 %vm3604_vm1, %v3603_v0 }
  0xc5   :  { %3407 = vmatpush3.msra.mxu1 %v211_v7  ;;  %3408 = vmatprep.mubr.msk.f32.mxu1 %vm3604_vm1, %v3603_v0  ;;  %v251_v7 = vld [vmem:[%s4964_s1 + $0x680] sm:$0xff] }
  0xc6   :  { %3390 = vmatmul.mubr.msk.f32.vlgmr.msra.gmra.mxu0 %vm299_vm0, %v31_v8  ;;  %3409 = vmatmul.mubr.msk.f32.vlgmr.msra.gmra.mxu1 %vm299_vm0, %v32_v9  ;;  %v259_v8 = vld [vmem:[%s4964_s1 + $0x6c0] sm:$0xff] }
  0xc7   :  { %3411 = vmatprep.subr.mxu0 %v3603_v0  ;;  %3430 = vmatprep.subr.mxu1 %v3603_v0 }
  0xc8   :  { %3412 = vmatpush3.msra.mxu0 %v226_v10  ;;  %3431 = vmatpush3.msra.mxu1 %v234_v11  ;;  %v37_v11 = vld [vmem:[%s4965_s0 + $0x34] sm:$0x3] }
  0xc9   :  { %3413 = vmatprep.subr.mxu0 %v3603_v0  ;;  %3432 = vmatprep.subr.mxu1 %v3603_v0 }
  0xca   :  { %3414 = vmatpush3.msra.mxu0 %v225_v12  ;;  %3433 = vmatpush3.msra.mxu1 %v233_v13  ;;  %v38_v12 = vld [vmem:[%s4965_s0 + $0x36] sm:$0x3]  ;;  %v274_v13 = vld [vmem:[%s4964_s1 + $0x738] sm:$0xff] }
  0xcb   :  { %3415 = vmatprep.subr.mxu0 %v3603_v0  ;;  %3434 = vmatprep.subr.mxu1 %v3603_v0 }
  0xcc   :  { %3416 = vmatpush3.msra.mxu0 %v224_v14  ;;  %3435 = vmatpush3.msra.mxu1 %v232_v15  ;;  %v282_v14 = vld [vmem:[%s4964_s1 + $0x778] sm:$0xff]  ;;  %v273_v15 = vld [vmem:[%s4964_s1 + $0x730] sm:$0xff] }
  0xcd   :  { %3417 = vmatprep.subr.mxu0 %v3603_v0  ;;  %3436 = vmatprep.subr.mxu1 %v3603_v0 }
  0xce   :  { %3418 = vmatpush3.msra.mxu0 %v223_v16  ;;  %3437 = vmatpush3.msra.mxu1 %v231_v17  ;;  %v281_v16 = vld [vmem:[%s4964_s1 + $0x770] sm:$0xff]  ;;  %v272_v17 = vld [vmem:[%s4964_s1 + $0x728] sm:$0xff] }
  0xcf   :  { %3419 = vmatprep.subr.mxu0 %v3603_v0  ;;  %3438 = vmatprep.subr.mxu1 %v3603_v0 }
  0xd0   :  { %3420 = vmatpush3.msra.mxu0 %v222_v18  ;;  %3439 = vmatpush3.msra.mxu1 %v230_v19  ;;  %v280_v18 = vld [vmem:[%s4964_s1 + $0x768] sm:$0xff]  ;;  %v271_v19 = vld [vmem:[%s4964_s1 + $0x720] sm:$0xff] }
  0xd1   :  { %3421 = vmatprep.subr.mxu0 %v3603_v0  ;;  %3440 = vmatprep.subr.mxu1 %v3603_v0 }
  0xd2   :  { %3422 = vmatpush3.msra.mxu0 %v221_v20  ;;  %3441 = vmatpush3.msra.mxu1 %v229_v21  ;;  %v369_v24 = vpop.f32.mrf.mxu0  ;;  %v442_v25 = vpop.f32.mrf.mxu1  ;;  %v279_v20 = vld [vmem:[%s4964_s1 + $0x760] sm:$0xff]  ;;  %v270_v21 = vld [vmem:[%s4964_s1 + $0x718] sm:$0xff] }
  0xd3   :  { %3423 = vmatprep.subr.mxu0 %v3603_v0  ;;  %3442 = vmatprep.subr.mxu1 %v3603_v0  ;;  %2637 = vst.msk [vmem:[%s4966_s2] sm:$0x3] %vm2636_vm2, %v369_v24  ;;  %2638 = vst.msk [vmem:[%s4966_s2 + $0x2] sm:$0x3] %vm2636_vm2, %v442_v25  ;;  %v277_v24 = vld [vmem:[%s4964_s1 + $0x750] sm:$0xff]  ;;  %v268_v25 = vld [vmem:[%s4964_s1 + $0x708] sm:$0xff] }
  0xd4   :  { %3424 = vmatpush3.msra.mxu0 %v220_v22  ;;  %3443 = vmatpush3.msra.mxu1 %v228_v23  ;;  %v3011_v28 = vpop.f32.mrf.mxu0  ;;  %v3030_v29 = vpop.f32.mrf.mxu1  ;;  %v278_v22 = vld [vmem:[%s4964_s1 + $0x758] sm:$0xff]  ;;  %v269_v23 = vld [vmem:[%s4964_s1 + $0x710] sm:$0xff] }
  0xd5   :  { %3425 = vmatprep.subr.mxu0 %v3603_v0  ;;  %3444 = vmatprep.subr.mxu1 %v3603_v0  ;;  %v267_v29 = vld [vmem:[%s4964_s1 + $0x700] sm:$0xff] }
  0xd6   :  { %3426 = vmatpush3.msra.mxu0 %v219_v26  ;;  %3427 = vmatprep.mubr.msk.f32.mxu0 %vm3604_vm1, %v3603_v0  ;;  %v276_v26 = vld [vmem:[%s4964_s1 + $0x748] sm:$0xff] }
  0xd7   :  { %3445 = vmatpush3.msra.mxu1 %v227_v27  ;;  %3446 = vmatprep.mubr.msk.f32.mxu1 %vm3604_vm1, %v3603_v0 }
  0xd8   :  { %3428 = vmatmul.mubr.msk.f32.vlgmr.msra.gmra.mxu0 %vm299_vm0, %v33_v30  ;;  %3447 = vmatmul.mubr.msk.f32.vlgmr.msra.gmra.mxu1 %vm299_vm0, %v34_v31  ;;  %v275_v30 = vld [vmem:[%s4964_s1 + $0x740] sm:$0xff] }
  0xd9   :  { %3449 = vmatprep.subr.mxu0 %v3603_v0  ;;  %3468 = vmatprep.subr.mxu1 %v3603_v0 }
  0xda   :  { %3450 = vmatpush3.msra.mxu0 %v242_v32  ;;  %3469 = vmatpush3.msra.mxu1 %v250_v33  ;;  %v39_v33 = vld [vmem:[%s4965_s0 + $0x38] sm:$0x3] }
  0xdb   :  { %3451 = vmatprep.subr.mxu0 %v3603_v0  ;;  %3470 = vmatprep.subr.mxu1 %v3603_v0 }
  0xdc   :  { %3452 = vmatpush3.msra.mxu0 %v241_v34  ;;  %3471 = vmatpush3.msra.mxu1 %v249_v35  ;;  %v40_v34 = vld [vmem:[%s4965_s0 + $0x3a] sm:$0x3] }
  0xdd   :  { %3453 = vmatprep.subr.mxu0 %v3603_v0  ;;  %3472 = vmatprep.subr.mxu1 %v3603_v0  ;;  %v290_v35 = vld [vmem:[%s4964_s1 + $0x7b8] sm:$0xff] }
  0xde   :  { %3454 = vmatpush3.msra.mxu0 %v240_v36  ;;  %3473 = vmatpush3.msra.mxu1 %v248_v37  ;;  %v298_v36 = vld [vmem:[%s4964_s1 + $0x7f8] sm:$0xff]  ;;  %v289_v37 = vld [vmem:[%s4964_s1 + $0x7b0] sm:$0xff] }
  0xdf   :  { %3455 = vmatprep.subr.mxu0 %v3603_v0  ;;  %3474 = vmatprep.subr.mxu1 %v3603_v0 }
  0xe0   :  { %3456 = vmatpush3.msra.mxu0 %v239_v38  ;;  %3475 = vmatpush3.msra.mxu1 %v247_v39  ;;  %v297_v38 = vld [vmem:[%s4964_s1 + $0x7f0] sm:$0xff]  ;;  %v288_v39 = vld [vmem:[%s4964_s1 + $0x7a8] sm:$0xff] }
  0xe1   :  { %3457 = vmatprep.subr.mxu0 %v3603_v0  ;;  %3476 = vmatprep.subr.mxu1 %v3603_v0 }
  0xe2   :  { %3458 = vmatpush3.msra.mxu0 %v238_v40  ;;  %3477 = vmatpush3.msra.mxu1 %v246_v41  ;;  %v296_v40 = vld [vmem:[%s4964_s1 + $0x7e8] sm:$0xff]  ;;  %v287_v41 = vld [vmem:[%s4964_s1 + $0x7a0] sm:$0xff] }
  0xe3   :  { %3459 = vmatprep.subr.mxu0 %v3603_v0  ;;  %3478 = vmatprep.subr.mxu1 %v3603_v0 }
  0xe4   :  { %3460 = vmatpush3.msra.mxu0 %v237_v42  ;;  %3479 = vmatpush3.msra.mxu1 %v245_v43  ;;  %v515_v46 = vpop.f32.mrf.mxu0  ;;  %v588_v47 = vpop.f32.mrf.mxu1  ;;  %v295_v42 = vld [vmem:[%s4964_s1 + $0x7e0] sm:$0xff]  ;;  %v286_v43 = vld [vmem:[%s4964_s1 + $0x798] sm:$0xff] }
  0xe5   :  { %3461 = vmatprep.subr.mxu0 %v3603_v0  ;;  %3480 = vmatprep.subr.mxu1 %v3603_v0  ;;  %2639 = vst.msk [vmem:[%s4966_s2 + $0x4] sm:$0x3] %vm2636_vm2, %v515_v46  ;;  %2640 = vst.msk [vmem:[%s4966_s2 + $0x6] sm:$0x3] %vm2636_vm2, %v588_v47  ;;  %v293_v46 = vld [vmem:[%s4964_s1 + $0x7d0] sm:$0xff]  ;;  %v284_v47 = vld [vmem:[%s4964_s1 + $0x788] sm:$0xff] }
  0xe6   :  { %3462 = vmatpush3.msra.mxu0 %v236_v44  ;;  %3481 = vmatpush3.msra.mxu1 %v244_v45  ;;  %v3049_v50 = vpop.f32.mrf.mxu0  ;;  %v3068_v51 = vpop.f32.mrf.mxu1  ;;  %v294_v44 = vld [vmem:[%s4964_s1 + $0x7d8] sm:$0xff]  ;;  %v285_v45 = vld [vmem:[%s4964_s1 + $0x790] sm:$0xff] }
  0xe7   :  { %3463 = vmatprep.subr.mxu0 %v3603_v0  ;;  %3482 = vmatprep.subr.mxu1 %v3603_v0  ;;  %v283_v51 = vld [vmem:[%s4964_s1 + $0x780] sm:$0xff] }
  0xe8   :  { %3464 = vmatpush3.msra.mxu0 %v235_v48  ;;  %3465 = vmatprep.mubr.msk.f32.mxu0 %vm3604_vm1, %v3603_v0  ;;  %v292_v48 = vld [vmem:[%s4964_s1 + $0x7c8] sm:$0xff] }
  0xe9   :  { %3483 = vmatpush3.msra.mxu1 %v243_v49  ;;  %3484 = vmatprep.mubr.msk.f32.mxu1 %vm3604_vm1, %v3603_v0 }
  0xea   :  { %3466 = vmatmul.mubr.msk.f32.vlgmr.msra.gmra.mxu0 %vm299_vm0, %v35_v52  ;;  %3485 = vmatmul.mubr.msk.f32.vlgmr.msra.gmra.mxu1 %vm299_vm0, %v36_v53  ;;  %v291_v52 = vld [vmem:[%s4964_s1 + $0x7c0] sm:$0xff] }
  0xeb   :  { %3487 = vmatprep.subr.mxu0 %v3603_v0  ;;  %3506 = vmatprep.subr.mxu1 %v3603_v0 }
  0xec   :  { %3488 = vmatpush3.msra.mxu0 %v258_v54  ;;  %3507 = vmatpush3.msra.mxu1 %v266_v55  ;;  %v41_v55 = vld [vmem:[%s4965_s0 + $0x3c] sm:$0x3] }
  0xed   :  { %3489 = vmatprep.subr.mxu0 %v3603_v0  ;;  %3508 = vmatprep.subr.mxu1 %v3603_v0 }
  0xee   :  { %3490 = vmatpush3.msra.mxu0 %v257_v56  ;;  %3509 = vmatpush3.msra.mxu1 %v265_v57  ;;  %v42_v56 = vld [vmem:[%s4965_s0 + $0x3e] sm:$0x3] }
  0xef   :  { %3491 = vmatprep.subr.mxu0 %v3603_v0  ;;  %3510 = vmatprep.subr.mxu1 %v3603_v0 }
  0xf0   :  { %3492 = vmatpush3.msra.mxu0 %v256_v58  ;;  %3511 = vmatpush3.msra.mxu1 %v264_v59 }
  0xf1   :  { %3493 = vmatprep.subr.mxu0 %v3603_v0  ;;  %3512 = vmatprep.subr.mxu1 %v3603_v0 }
  0xf2   :  { %3494 = vmatpush3.msra.mxu0 %v255_v60  ;;  %3513 = vmatpush3.msra.mxu1 %v263_v61 }
  0xf3   :  { %3495 = vmatprep.subr.mxu0 %v3603_v0  ;;  %3514 = vmatprep.subr.mxu1 %v3603_v0 }
  0xf4   :  { %3496 = vmatpush3.msra.mxu0 %v254_v62  ;;  %3515 = vmatpush3.msra.mxu1 %v262_v63 }
  0xf5   :  { %3497 = vmatprep.subr.mxu0 %v3603_v0  ;;  %3516 = vmatprep.subr.mxu1 %v3603_v0 }
  0xf6   :  { %3498 = vmatpush3.msra.mxu0 %v253_v1  ;;  %3517 = vmatpush3.msra.mxu1 %v261_v2  ;;  %v661_v5 = vpop.f32.mrf.mxu0  ;;  %v734_v6 = vpop.f32.mrf.mxu1 }
  0xf7   :  { %3499 = vmatprep.subr.mxu0 %v3603_v0  ;;  %3518 = vmatprep.subr.mxu1 %v3603_v0  ;;  %2641 = vst.msk [vmem:[%s4966_s2 + $0x8] sm:$0x3] %vm2636_vm2, %v661_v5  ;;  %2642 = vst.msk [vmem:[%s4966_s2 + $0xa] sm:$0x3] %vm2636_vm2, %v734_v6 }
  0xf8   :  { %3500 = vmatpush3.msra.mxu0 %v252_v3  ;;  %3519 = vmatpush3.msra.mxu1 %v260_v4  ;;  %v3087_v9 = vpop.f32.mrf.mxu0  ;;  %v3106_v10 = vpop.f32.mrf.mxu1 }
  0xf9   :  { %3501 = vmatprep.subr.mxu0 %v3603_v0  ;;  %3520 = vmatprep.subr.mxu1 %v3603_v0 }
  0xfa   :  { %3502 = vmatpush3.msra.mxu0 %v251_v7  ;;  %3503 = vmatprep.mubr.msk.f32.mxu0 %vm3604_vm1, %v3603_v0 }
  0xfb   :  { %3521 = vmatpush3.msra.mxu1 %v259_v8  ;;  %3522 = vmatprep.mubr.msk.f32.mxu1 %vm3604_vm1, %v3603_v0 }
  0xfc   :  { %3504 = vmatmul.mubr.msk.f32.vlgmr.msra.gmra.mxu0 %vm299_vm0, %v37_v11  ;;  %3523 = vmatmul.mubr.msk.f32.vlgmr.msra.gmra.mxu1 %vm299_vm0, %v38_v12 }
  0xfd   :  { %3525 = vmatprep.subr.mxu0 %v3603_v0  ;;  %3544 = vmatprep.subr.mxu1 %v3603_v0 }
  0xfe   :  { %3526 = vmatpush3.msra.mxu0 %v274_v13  ;;  %3545 = vmatpush3.msra.mxu1 %v282_v14 }
  0xff   :  { %3527 = vmatprep.subr.mxu0 %v3603_v0  ;;  %3546 = vmatprep.subr.mxu1 %v3603_v0 }
 0x100   :  { %3528 = vmatpush3.msra.mxu0 %v273_v15  ;;  %3547 = vmatpush3.msra.mxu1 %v281_v16 }
 0x101   :  { %3529 = vmatprep.subr.mxu0 %v3603_v0  ;;  %3548 = vmatprep.subr.mxu1 %v3603_v0 }
 0x102   :  { %3530 = vmatpush3.msra.mxu0 %v272_v17  ;;  %3549 = vmatpush3.msra.mxu1 %v280_v18 }
 0x103   :  { %3531 = vmatprep.subr.mxu0 %v3603_v0  ;;  %3550 = vmatprep.subr.mxu1 %v3603_v0 }
 0x104   :  { %3532 = vmatpush3.msra.mxu0 %v271_v19  ;;  %3551 = vmatpush3.msra.mxu1 %v279_v20 }
 0x105   :  { %3533 = vmatprep.subr.mxu0 %v3603_v0  ;;  %3552 = vmatprep.subr.mxu1 %v3603_v0 }
 0x106   :  { %3534 = vmatpush3.msra.mxu0 %v270_v21  ;;  %3553 = vmatpush3.msra.mxu1 %v278_v22 }
 0x107   :  { %3535 = vmatprep.subr.mxu0 %v3603_v0  ;;  %3554 = vmatprep.subr.mxu1 %v3603_v0 }
 0x108   :  { %3536 = vmatpush3.msra.mxu0 %v269_v23  ;;  %3555 = vmatpush3.msra.mxu1 %v277_v24  ;;  %v807_v27 = vpop.f32.mrf.mxu0  ;;  %v880_v28 = vpop.f32.mrf.mxu1 }
 0x109   :  { %3537 = vmatprep.subr.mxu0 %v3603_v0  ;;  %3556 = vmatprep.subr.mxu1 %v3603_v0  ;;  %2643 = vst.msk [vmem:[%s4966_s2 + $0xc] sm:$0x3] %vm2636_vm2, %v807_v27  ;;  %2644 = vst.msk [vmem:[%s4966_s2 + $0xe] sm:$0x3] %vm2636_vm2, %v880_v28 }
 0x10a   :  { %3538 = vmatpush3.msra.mxu0 %v268_v25  ;;  %3557 = vmatpush3.msra.mxu1 %v276_v26  ;;  %v3125_v31 = vpop.f32.mrf.mxu0  ;;  %v3144_v32 = vpop.f32.mrf.mxu1 }
 0x10b   :  { %3539 = vmatprep.subr.mxu0 %v3603_v0  ;;  %3558 = vmatprep.subr.mxu1 %v3603_v0 }
 0x10c   :  { %3540 = vmatpush3.msra.mxu0 %v267_v29  ;;  %3541 = vmatprep.mubr.msk.f32.mxu0 %vm3604_vm1, %v3603_v0 }
 0x10d   :  { %3559 = vmatpush3.msra.mxu1 %v275_v30  ;;  %3560 = vmatprep.mubr.msk.f32.mxu1 %vm3604_vm1, %v3603_v0 }
 0x10e   :  { %3542 = vmatmul.mubr.msk.f32.vlgmr.msra.gmra.mxu0 %vm299_vm0, %v39_v33  ;;  %3561 = vmatmul.mubr.msk.f32.vlgmr.msra.gmra.mxu1 %vm299_vm0, %v40_v34 }
 0x10f   :  { %3563 = vmatprep.subr.mxu0 %v3603_v0  ;;  %3582 = vmatprep.subr.mxu1 %v3603_v0 }
 0x110   :  { %3564 = vmatpush3.msra.mxu0 %v290_v35  ;;  %3583 = vmatpush3.msra.mxu1 %v298_v36 }
 0x111   :  { %3565 = vmatprep.subr.mxu0 %v3603_v0  ;;  %3584 = vmatprep.subr.mxu1 %v3603_v0 }
 0x112   :  { %3566 = vmatpush3.msra.mxu0 %v289_v37  ;;  %3585 = vmatpush3.msra.mxu1 %v297_v38 }
 0x113   :  { %3567 = vmatprep.subr.mxu0 %v3603_v0  ;;  %3586 = vmatprep.subr.mxu1 %v3603_v0 }
 0x114   :  { %3568 = vmatpush3.msra.mxu0 %v288_v39  ;;  %3587 = vmatpush3.msra.mxu1 %v296_v40 }
 0x115   :  { %3569 = vmatprep.subr.mxu0 %v3603_v0  ;;  %3588 = vmatprep.subr.mxu1 %v3603_v0 }
 0x116   :  { %3570 = vmatpush3.msra.mxu0 %v287_v41  ;;  %3589 = vmatpush3.msra.mxu1 %v295_v42 }
 0x117   :  { %3571 = vmatprep.subr.mxu0 %v3603_v0  ;;  %3590 = vmatprep.subr.mxu1 %v3603_v0 }
 0x118   :  { %3572 = vmatpush3.msra.mxu0 %v286_v43  ;;  %3591 = vmatpush3.msra.mxu1 %v294_v44 }
 0x119   :  { %3573 = vmatprep.subr.mxu0 %v3603_v0  ;;  %3592 = vmatprep.subr.mxu1 %v3603_v0 }
 0x11a   :  { %3574 = vmatpush3.msra.mxu0 %v285_v45  ;;  %3593 = vmatpush3.msra.mxu1 %v293_v46  ;;  %v953_v49 = vpop.f32.mrf.mxu0  ;;  %v1026_v50 = vpop.f32.mrf.mxu1 }
 0x11b   :  { %3575 = vmatprep.subr.mxu0 %v3603_v0  ;;  %3594 = vmatprep.subr.mxu1 %v3603_v0  ;;  %2645 = vst.msk [vmem:[%s4966_s2 + $0x10] sm:$0x3] %vm2636_vm2, %v953_v49  ;;  %2646 = vst.msk [vmem:[%s4966_s2 + $0x12] sm:$0x3] %vm2636_vm2, %v1026_v50 }
 0x11c   :  { %3576 = vmatpush3.msra.mxu0 %v284_v47  ;;  %3595 = vmatpush3.msra.mxu1 %v292_v48  ;;  %v3163_v53 = vpop.f32.mrf.mxu0  ;;  %v3182_v54 = vpop.f32.mrf.mxu1 }
 0x11d   :  { %3577 = vmatprep.subr.mxu0 %v3603_v0  ;;  %3596 = vmatprep.subr.mxu1 %v3603_v0 }
 0x11e   :  { %3578 = vmatpush3.msra.mxu0 %v283_v51  ;;  %3579 = vmatprep.mubr.msk.f32.mxu0 %vm3604_vm1, %v3603_v0 }
 0x11f   :  { %3597 = vmatpush3.msra.mxu1 %v291_v52  ;;  %3598 = vmatprep.mubr.msk.f32.mxu1 %vm3604_vm1, %v3603_v0 }
 0x120   :  { %3580 = vmatmul.mubr.msk.f32.vlgmr.msra.gmra.mxu0 %vm299_vm0, %v41_v55  ;;  %3599 = vmatmul.mubr.msk.f32.vlgmr.msra.gmra.mxu1 %vm299_vm0, %v42_v56 }
 0x12c   :  { %v1099_v57 = vpop.f32.mrf.mxu0  ;;  %v1172_v58 = vpop.f32.mrf.mxu1 }
 0x12d   :  { %2647 = vst.msk [vmem:[%s4966_s2 + $0x14] sm:$0x3] %vm2636_vm2, %v1099_v57  ;;  %2648 = vst.msk [vmem:[%s4966_s2 + $0x16] sm:$0x3] %vm2636_vm2, %v1172_v58 }
 0x12e   :  { %v3201_v59 = vpop.f32.mrf.mxu0  ;;  %v3220_v60 = vpop.f32.mrf.mxu1 }
 0x13e   :  { %v1245_v61 = vpop.f32.mrf.mxu0  ;;  %v1318_v0 = vpop.f32.mrf.mxu1 }
 0x13f   :  { %2649 = vst.msk [vmem:[%s4966_s2 + $0x18] sm:$0x3] %vm2636_vm2, %v1245_v61  ;;  %2650 = vst.msk [vmem:[%s4966_s2 + $0x1a] sm:$0x3] %vm2636_vm2, %v1318_v0 }
 0x140   :  { %v3239_v62 = vpop.f32.mrf.mxu0  ;;  %v3258_v63 = vpop.f32.mrf.mxu1 }
 0x150   :  { %v1391_v1 = vpop.f32.mrf.mxu0  ;;  %v1464_v2 = vpop.f32.mrf.mxu1 }
 0x151   :  { %2651 = vst.msk [vmem:[%s4966_s2 + $0x1c] sm:$0x3] %vm2636_vm2, %v1391_v1  ;;  %2652 = vst.msk [vmem:[%s4966_s2 + $0x1e] sm:$0x3] %vm2636_vm2, %v1464_v2 }
 0x152   :  { %v3277_v3 = vpop.f32.mrf.mxu0  ;;  %v3296_v4 = vpop.f32.mrf.mxu1 }
 0x162   :  { %v1537_v5 = vpop.f32.mrf.mxu0  ;;  %v1610_v6 = vpop.f32.mrf.mxu1 }
 0x163   :  { %2653 = vst.msk [vmem:[%s4966_s2 + $0x20] sm:$0x3] %vm2636_vm2, %v1537_v5  ;;  %2654 = vst.msk [vmem:[%s4966_s2 + $0x22] sm:$0x3] %vm2636_vm2, %v1610_v6 }
 0x164   :  { %v3315_v7 = vpop.f32.mrf.mxu0  ;;  %v3334_v8 = vpop.f32.mrf.mxu1 }
 0x174   :  { %v1683_v9 = vpop.f32.mrf.mxu0  ;;  %v1756_v10 = vpop.f32.mrf.mxu1 }
 0x175   :  { %2655 = vst.msk [vmem:[%s4966_s2 + $0x24] sm:$0x3] %vm2636_vm2, %v1683_v9  ;;  %2656 = vst.msk [vmem:[%s4966_s2 + $0x26] sm:$0x3] %vm2636_vm2, %v1756_v10 }
 0x176   :  { %v3353_v11 = vpop.f32.mrf.mxu0  ;;  %v3372_v12 = vpop.f32.mrf.mxu1 }
 0x186   :  { %v1829_v13 = vpop.f32.mrf.mxu0  ;;  %v1902_v14 = vpop.f32.mrf.mxu1 }
 0x187   :  { %2657 = vst.msk [vmem:[%s4966_s2 + $0x28] sm:$0x3] %vm2636_vm2, %v1829_v13  ;;  %2658 = vst.msk [vmem:[%s4966_s2 + $0x2a] sm:$0x3] %vm2636_vm2, %v1902_v14 }
 0x188   :  { %v3391_v15 = vpop.f32.mrf.mxu0  ;;  %v3410_v16 = vpop.f32.mrf.mxu1 }
 0x198   :  { %v1975_v17 = vpop.f32.mrf.mxu0  ;;  %v2048_v18 = vpop.f32.mrf.mxu1 }
 0x199   :  { %2659 = vst.msk [vmem:[%s4966_s2 + $0x2c] sm:$0x3] %vm2636_vm2, %v1975_v17  ;;  %2660 = vst.msk [vmem:[%s4966_s2 + $0x2e] sm:$0x3] %vm2636_vm2, %v2048_v18 }
 0x19a   :  { %v3429_v19 = vpop.f32.mrf.mxu0  ;;  %v3448_v20 = vpop.f32.mrf.mxu1 }
 0x1aa   :  { %v2121_v21 = vpop.f32.mrf.mxu0  ;;  %v2194_v22 = vpop.f32.mrf.mxu1 }
 0x1ab   :  { %2661 = vst.msk [vmem:[%s4966_s2 + $0x30] sm:$0x3] %vm2636_vm2, %v2121_v21  ;;  %2662 = vst.msk [vmem:[%s4966_s2 + $0x32] sm:$0x3] %vm2636_vm2, %v2194_v22 }
 0x1ac   :  { %v3467_v23 = vpop.f32.mrf.mxu0  ;;  %v3486_v24 = vpop.f32.mrf.mxu1 }
 0x1bc   :  { %v2267_v25 = vpop.f32.mrf.mxu0  ;;  %v2340_v26 = vpop.f32.mrf.mxu1 }
 0x1bd   :  { %2663 = vst.msk [vmem:[%s4966_s2 + $0x34] sm:$0x3] %vm2636_vm2, %v2267_v25  ;;  %2664 = vst.msk [vmem:[%s4966_s2 + $0x36] sm:$0x3] %vm2636_vm2, %v2340_v26 }
 0x1be   :  { %v3505_v27 = vpop.f32.mrf.mxu0  ;;  %v3524_v28 = vpop.f32.mrf.mxu1 }
 0x1ce   :  { %v2413_v29 = vpop.f32.mrf.mxu0  ;;  %v2486_v30 = vpop.f32.mrf.mxu1 }
 0x1cf   :  { %2665 = vst.msk [vmem:[%s4966_s2 + $0x38] sm:$0x3] %vm2636_vm2, %v2413_v29  ;;  %2666 = vst.msk [vmem:[%s4966_s2 + $0x3a] sm:$0x3] %vm2636_vm2, %v2486_v30 }
 0x1d0   :  { %v3543_v31 = vpop.f32.mrf.mxu0  ;;  %v3562_v32 = vpop.f32.mrf.mxu1 }
 0x1e0   :  { %v2559_v33 = vpop.f32.mrf.mxu0  ;;  %v2632_v34 = vpop.f32.mrf.mxu1 }
 0x1e1   :  { %2667 = vst.msk [vmem:[%s4966_s2 + $0x3c] sm:$0x3] %vm2636_vm2, %v2559_v33  ;;  %2668 = vst.msk [vmem:[%s4966_s2 + $0x3e] sm:$0x3] %vm2636_vm2, %v2632_v34 }
 0x1e2   :  { %v3581_v35 = vpop.f32.mrf.mxu0  ;;  %v3600_v36 = vpop.f32.mrf.mxu1 }

// kernel: fno_forward.12
= control target key start
LH: loop header
LB: loop body
LE: loop exit
PB: predicated region body
PF: predicated region fallthrough
CT: control target
= control target key end

     0   :  { %vm92_vm0 = vcmask 261120   ;;  %s1985_s1 = inlined_call_operand.vmem [shape: f32[32,32], index: 1, kind: input, shape index: {}]   ;;  %s1986_s0 = inlined_call_operand.vmem [shape: f32[512,32], index: 0, kind: input, shape index: {}]   ;;  %s1987_s2 = inlined_call_operand.vmem [shape: f32[1,32], index: 2, kind: input, shape index: {}]   ;;  %s1988_s3 = inlined_call_operand.vmem [shape: f32[512,32], index: 3, kind: input, shape index: {}]   ;;  %s1989_s4 = inlined_call_operand.vmem [shape: f32[512,32], index: 4, kind: output, shape index: {}]  }
   0x1   :  { %v84_v0 = vld [vmem:[%s1985_s1 + $0x18] sm:$0xff]  ;;  %v83_v1 = vld [vmem:[%s1985_s1 + $0x10] sm:$0xff]  ;;  %v82_v2 = vld [vmem:[%s1985_s1 + $0x8] sm:$0xff] }
   0x2   :  { %1063 = vmatprep.subr.mxu0 %v84_v0  ;;  %1167 = vmatprep.subr.mxu1 %v84_v0  ;;  %v81_v3 = vld [vmem:[%s1985_s1] sm:$0xff]  ;;  %v18_v6 = vld [vmem:[%s1986_s0 + $0x8] sm:$0xff]  ;;  %v19_v8 = vld [vmem:[%s1986_s0 + $0x10] sm:$0xff] }
   0x3   :  { %1064 = vmatpush3.msra.mxu0 %v84_v0  ;;  %1171 = vmatpush3.msra.mxu1 %v84_v0  ;;  %v17_v4 = vld [vmem:[%s1986_s0] sm:$0xff]  ;;  %v50_v7 = vld [vmem:[%s1986_s0 + $0x108] sm:$0xff]  ;;  %v51_v9 = vld [vmem:[%s1986_s0 + $0x110] sm:$0xff] }
   0x4   :  { %1065 = vmatprep.subr.mxu0 %v83_v1  ;;  %1168 = vmatprep.subr.mxu1 %v83_v1  ;;  %v49_v5 = vld [vmem:[%s1986_s0 + $0x100] sm:$0xff]  ;;  %v20_v10 = vld [vmem:[%s1986_s0 + $0x18] sm:$0xff]  ;;  %v22_v14 = vld [vmem:[%s1986_s0 + $0x28] sm:$0xff] }
   0x5   :  { %1066 = vmatpush3.msra.mxu0 %v83_v1  ;;  %1172 = vmatpush3.msra.mxu1 %v83_v1  ;;  %v52_v11 = vld [vmem:[%s1986_s0 + $0x118] sm:$0xff]  ;;  %v21_v12 = vld [vmem:[%s1986_s0 + $0x20] sm:$0xff]  ;;  %v54_v15 = vld [vmem:[%s1986_s0 + $0x128] sm:$0xff] }
   0x6   :  { %1067 = vmatprep.subr.mxu0 %v82_v2  ;;  %1169 = vmatprep.subr.mxu1 %v82_v2  ;;  %v53_v13 = vld [vmem:[%s1986_s0 + $0x120] sm:$0xff]  ;;  %v23_v16 = vld [vmem:[%s1986_s0 + $0x30] sm:$0xff]  ;;  %v24_v18 = vld [vmem:[%s1986_s0 + $0x38] sm:$0xff] }
   0x7   :  { %1068 = vmatpush3.msra.mxu0 %v82_v2  ;;  %1173 = vmatpush3.msra.mxu1 %v82_v2  ;;  %v55_v17 = vld [vmem:[%s1986_s0 + $0x130] sm:$0xff]  ;;  %v56_v19 = vld [vmem:[%s1986_s0 + $0x138] sm:$0xff]  ;;  %v25_v20 = vld [vmem:[%s1986_s0 + $0x40] sm:$0xff] }
   0x8   :  { %1069 = vmatprep.subr.mxu0 %v81_v3  ;;  %1170 = vmatprep.subr.mxu1 %v81_v3  ;;  %v57_v21 = vld [vmem:[%s1986_s0 + $0x140] sm:$0xff]  ;;  %v26_v22 = vld [vmem:[%s1986_s0 + $0x48] sm:$0xff]  ;;  %v27_v24 = vld [vmem:[%s1986_s0 + $0x50] sm:$0xff] }
   0x9   :  { %1070 = vmatpush3.msra.mxu0 %v81_v3  ;;  %1174 = vmatpush3.msra.mxu1 %v81_v3  ;;  %v58_v23 = vld [vmem:[%s1986_s0 + $0x148] sm:$0xff]  ;;  %v59_v25 = vld [vmem:[%s1986_s0 + $0x150] sm:$0xff]  ;;  %v28_v26 = vld [vmem:[%s1986_s0 + $0x58] sm:$0xff] }
   0xa   :  { %1071 = vmatprep.mubr.msk.f32.mxu0 %vm92_vm0, %v17_v4  ;;  %1119 = vmatprep.mubr.msk.f32.mxu1 %vm92_vm0, %v49_v5  ;;  %v60_v27 = vld [vmem:[%s1986_s0 + $0x158] sm:$0xff]  ;;  %v29_v28 = vld [vmem:[%s1986_s0 + $0x60] sm:$0xff]  ;;  %v30_v30 = vld [vmem:[%s1986_s0 + $0x68] sm:$0xff] }
   0xb   :  { %1072 = vmatmul.mubr.msk.f32.vlgmr.msra.gmra.mxu0 %vm92_vm0, %v18_v6  ;;  %1120 = vmatmul.mubr.msk.f32.vlgmr.msra.gmra.mxu1 %vm92_vm0, %v50_v7  ;;  %v61_v29 = vld [vmem:[%s1986_s0 + $0x160] sm:$0xff]  ;;  %v62_v31 = vld [vmem:[%s1986_s0 + $0x168] sm:$0xff]  ;;  %v31_v32 = vld [vmem:[%s1986_s0 + $0x70] sm:$0xff] }
   0xc   :  { %1074 = vmatprep.mubr.msk.f32.mxu0 %vm92_vm0, %v19_v8  ;;  %1122 = vmatprep.mubr.msk.f32.mxu1 %vm92_vm0, %v51_v9  ;;  %v63_v33 = vld [vmem:[%s1986_s0 + $0x170] sm:$0xff]  ;;  %v32_v34 = vld [vmem:[%s1986_s0 + $0x78] sm:$0xff]  ;;  %v33_v36 = vld [vmem:[%s1986_s0 + $0x80] sm:$0xff] }
   0xd   :  { %v64_v35 = vld [vmem:[%s1986_s0 + $0x178] sm:$0xff]  ;;  %v65_v37 = vld [vmem:[%s1986_s0 + $0x180] sm:$0xff]  ;;  %v34_v38 = vld [vmem:[%s1986_s0 + $0x88] sm:$0xff] }
   0xe   :  { %v66_v39 = vld [vmem:[%s1986_s0 + $0x188] sm:$0xff]  ;;  %v35_v40 = vld [vmem:[%s1986_s0 + $0x90] sm:$0xff]  ;;  %v36_v42 = vld [vmem:[%s1986_s0 + $0x98] sm:$0xff] }
   0xf   :  { %1075 = vmatmul.mubr.msk.f32.gmra.mxu0 %vm92_vm0, %v20_v10  ;;  %1123 = vmatmul.mubr.msk.f32.gmra.mxu1 %vm92_vm0, %v52_v11  ;;  %v67_v41 = vld [vmem:[%s1986_s0 + $0x190] sm:$0xff]  ;;  %v68_v43 = vld [vmem:[%s1986_s0 + $0x198] sm:$0xff]  ;;  %v37_v44 = vld [vmem:[%s1986_s0 + $0xa0] sm:$0xff] }
  0x10   :  { %1077 = vmatprep.mubr.msk.f32.mxu0 %vm92_vm0, %v21_v12  ;;  %1125 = vmatprep.mubr.msk.f32.mxu1 %vm92_vm0, %v53_v13  ;;  %v69_v45 = vld [vmem:[%s1986_s0 + $0x1a0] sm:$0xff]  ;;  %v38_v46 = vld [vmem:[%s1986_s0 + $0xa8] sm:$0xff]  ;;  %v39_v48 = vld [vmem:[%s1986_s0 + $0xb0] sm:$0xff] }
  0x11   :  { %v70_v47 = vld [vmem:[%s1986_s0 + $0x1a8] sm:$0xff]  ;;  %v71_v49 = vld [vmem:[%s1986_s0 + $0x1b0] sm:$0xff]  ;;  %v40_v50 = vld [vmem:[%s1986_s0 + $0xb8] sm:$0xff] }
  0x12   :  { %v72_v51 = vld [vmem:[%s1986_s0 + $0x1b8] sm:$0xff]  ;;  %v41_v52 = vld [vmem:[%s1986_s0 + $0xc0] sm:$0xff]  ;;  %v42_v54 = vld [vmem:[%s1986_s0 + $0xc8] sm:$0xff] }
  0x13   :  { %1078 = vmatmul.mubr.msk.f32.gmra.mxu0 %vm92_vm0, %v22_v14  ;;  %1126 = vmatmul.mubr.msk.f32.gmra.mxu1 %vm92_vm0, %v54_v15  ;;  %v73_v53 = vld [vmem:[%s1986_s0 + $0x1c0] sm:$0xff]  ;;  %v74_v55 = vld [vmem:[%s1986_s0 + $0x1c8] sm:$0xff]  ;;  %v43_v56 = vld [vmem:[%s1986_s0 + $0xd0] sm:$0xff] }
  0x14   :  { %1080 = vmatprep.mubr.msk.f32.mxu0 %vm92_vm0, %v23_v16  ;;  %1128 = vmatprep.mubr.msk.f32.mxu1 %vm92_vm0, %v55_v17  ;;  %v75_v57 = vld [vmem:[%s1986_s0 + $0x1d0] sm:$0xff]  ;;  %v44_v58 = vld [vmem:[%s1986_s0 + $0xd8] sm:$0xff]  ;;  %v45_v60 = vld [vmem:[%s1986_s0 + $0xe0] sm:$0xff] }
  0x15   :  { %v76_v59 = vld [vmem:[%s1986_s0 + $0x1d8] sm:$0xff]  ;;  %v77_v61 = vld [vmem:[%s1986_s0 + $0x1e0] sm:$0xff]  ;;  %v46_v62 = vld [vmem:[%s1986_s0 + $0xe8] sm:$0xff] }
  0x16   :  { %v78_v63 = vld [vmem:[%s1986_s0 + $0x1e8] sm:$0xff]  ;;  %v47_v0 = vld [vmem:[%s1986_s0 + $0xf0] sm:$0xff]  ;;  %v48_v2 = vld [vmem:[%s1986_s0 + $0xf8] sm:$0xff] }
  0x17   :  { %1081 = vmatmul.mubr.msk.f32.gmra.mxu0 %vm92_vm0, %v24_v18  ;;  %1129 = vmatmul.mubr.msk.f32.gmra.mxu1 %vm92_vm0, %v56_v19  ;;  %v79_v1 = vld [vmem:[%s1986_s0 + $0x1f0] sm:$0xff]  ;;  %v80_v3 = vld [vmem:[%s1986_s0 + $0x1f8] sm:$0xff]  ;;  %v1471_v4 = vld [vmem:[%s1987_s2] ss:$0 sm:$0xff] }
  0x18   :  { %1083 = vmatprep.mubr.msk.f32.mxu0 %vm92_vm0, %v25_v20  ;;  %1131 = vmatprep.mubr.msk.f32.mxu1 %vm92_vm0, %v57_v21  ;;  %v671_v6 = vld [vmem:[%s1988_s3 + $0x8] sm:$0xff]  ;;  %v670_v12 = vld [vmem:[%s1988_s3] sm:$0xff] }
  0x19   :  { %v703_v8 = vld [vmem:[%s1988_s3 + $0x108] sm:$0xff]  ;;  %v702_v14 = vld [vmem:[%s1988_s3 + $0x100] sm:$0xff] }
  0x1b   :  { %1084 = vmatmul.mubr.msk.f32.gmra.mxu0 %vm92_vm0, %v26_v22  ;;  %1132 = vmatmul.mubr.msk.f32.gmra.mxu1 %vm92_vm0, %v58_v23 }
  0x1c   :  { %1086 = vmatprep.mubr.msk.f32.mxu0 %vm92_vm0, %v27_v24  ;;  %1134 = vmatprep.mubr.msk.f32.mxu1 %vm92_vm0, %v59_v25  ;;  %v673_v25 = vld [vmem:[%s1988_s3 + $0x18] sm:$0xff] }
  0x1f   :  { %1087 = vmatmul.mubr.msk.f32.gmra.mxu0 %vm92_vm0, %v28_v26  ;;  %1135 = vmatmul.mubr.msk.f32.gmra.mxu1 %vm92_vm0, %v60_v27  ;;  %v705_v26 = vld [vmem:[%s1988_s3 + $0x118] sm:$0xff] }
  0x20   :  { %1089 = vmatprep.mubr.msk.f32.mxu0 %vm92_vm0, %v29_v28  ;;  %1137 = vmatprep.mubr.msk.f32.mxu1 %vm92_vm0, %v61_v29 }
  0x23   :  { %1090 = vmatmul.mubr.msk.f32.gmra.mxu0 %vm92_vm0, %v30_v30  ;;  %1138 = vmatmul.mubr.msk.f32.gmra.mxu1 %vm92_vm0, %v62_v31  ;;  %v672_v30 = vld [vmem:[%s1988_s3 + $0x10] sm:$0xff] }
  0x24   :  { %1092 = vmatprep.mubr.msk.f32.mxu0 %vm92_vm0, %v31_v32  ;;  %1140 = vmatprep.mubr.msk.f32.mxu1 %vm92_vm0, %v63_v33  ;;  %v704_v32 = vld [vmem:[%s1988_s3 + $0x110] sm:$0xff] }
  0x27   :  { %1093 = vmatmul.mubr.msk.f32.gmra.mxu0 %vm92_vm0, %v32_v34  ;;  %1141 = vmatmul.mubr.msk.f32.gmra.mxu1 %vm92_vm0, %v64_v35 }
  0x28   :  { %1095 = vmatprep.mubr.msk.f32.mxu0 %vm92_vm0, %v33_v36  ;;  %1143 = vmatprep.mubr.msk.f32.mxu1 %vm92_vm0, %v65_v37 }
  0x2b   :  { %1096 = vmatmul.mubr.msk.f32.gmra.mxu0 %vm92_vm0, %v34_v38  ;;  %1144 = vmatmul.mubr.msk.f32.gmra.mxu1 %vm92_vm0, %v66_v39 }
  0x2c   :  { %1098 = vmatprep.mubr.msk.f32.mxu0 %vm92_vm0, %v35_v40  ;;  %1146 = vmatprep.mubr.msk.f32.mxu1 %vm92_vm0, %v67_v41  ;;  %v675_v40 = vld [vmem:[%s1988_s3 + $0x28] sm:$0xff] }
  0x2f   :  { %1099 = vmatmul.mubr.msk.f32.gmra.mxu0 %vm92_vm0, %v36_v42  ;;  %1147 = vmatmul.mubr.msk.f32.gmra.mxu1 %vm92_vm0, %v68_v43  ;;  %v707_v42 = vld [vmem:[%s1988_s3 + $0x128] sm:$0xff] }
  0x30   :  { %1101 = vmatprep.mubr.msk.f32.mxu0 %vm92_vm0, %v37_v44  ;;  %1149 = vmatprep.mubr.msk.f32.mxu1 %vm92_vm0, %v69_v45 }
  0x33   :  { %1102 = vmatmul.mubr.msk.f32.gmra.mxu0 %vm92_vm0, %v38_v46  ;;  %1150 = vmatmul.mubr.msk.f32.gmra.mxu1 %vm92_vm0, %v70_v47 }
  0x34   :  { %1104 = vmatprep.mubr.msk.f32.mxu0 %vm92_vm0, %v39_v48  ;;  %1152 = vmatprep.mubr.msk.f32.mxu1 %vm92_vm0, %v71_v49 }
  0x37   :  { %1105 = vmatmul.mubr.msk.f32.gmra.mxu0 %vm92_vm0, %v40_v50  ;;  %1153 = vmatmul.mubr.msk.f32.gmra.mxu1 %vm92_vm0, %v72_v51 }
  0x38   :  { %1107 = vmatprep.mubr.msk.f32.mxu0 %vm92_vm0, %v41_v52  ;;  %1155 = vmatprep.mubr.msk.f32.mxu1 %vm92_vm0, %v73_v53 }
  0x3b   :  { %1108 = vmatmul.mubr.msk.f32.gmra.mxu0 %vm92_vm0, %v42_v54  ;;  %1156 = vmatmul.mubr.msk.f32.gmra.mxu1 %vm92_vm0, %v74_v55  ;;  %v674_v55 = vld [vmem:[%s1988_s3 + $0x20] sm:$0xff] }
  0x3c   :  { %1110 = vmatprep.mubr.msk.f32.mxu0 %vm92_vm0, %v43_v56  ;;  %1158 = vmatprep.mubr.msk.f32.mxu1 %vm92_vm0, %v75_v57  ;;  %v706_v56 = vld [vmem:[%s1988_s3 + $0x120] sm:$0xff] }
  0x3f   :  { %1111 = vmatmul.mubr.msk.f32.gmra.mxu0 %vm92_vm0, %v44_v58  ;;  %1159 = vmatmul.mubr.msk.f32.gmra.mxu1 %vm92_vm0, %v76_v59 }
  0x40   :  { %1113 = vmatprep.mubr.msk.f32.mxu0 %vm92_vm0, %v45_v60  ;;  %1161 = vmatprep.mubr.msk.f32.mxu1 %vm92_vm0, %v77_v61  ;;  %v677_v60 = vld [vmem:[%s1988_s3 + $0x38] sm:$0xff] }
  0x43   :  { %1114 = vmatmul.mubr.msk.f32.gmra.mxu0 %vm92_vm0, %v46_v62  ;;  %1162 = vmatmul.mubr.msk.f32.gmra.mxu1 %vm92_vm0, %v78_v63  ;;  %v709_v62 = vld [vmem:[%s1988_s3 + $0x138] sm:$0xff] }
  0x44   :  { %1116 = vmatprep.mubr.msk.f32.mxu0 %vm92_vm0, %v47_v0  ;;  %1164 = vmatprep.mubr.msk.f32.mxu1 %vm92_vm0, %v79_v1 }
  0x47   :  { %1117 = vmatmul.mubr.msk.f32.gmra.mxu0 %vm92_vm0, %v48_v2  ;;  %1165 = vmatmul.mubr.msk.f32.gmra.mxu1 %vm92_vm0, %v80_v3 }
  0xcb   :  { %v1073_v5 = vpop.f32.mrf.mxu0  ;;  %v1121_v7 = vpop.f32.mrf.mxu1 }
  0xcc   :  { %v357_v9 = vadd.f32 %v1073_v5, %v1471_v4  ;;  %v517_v10 = vadd.f32 %v1121_v7, %v1471_v4  ;;  %v676_v7 = vld [vmem:[%s1988_s3 + $0x30] sm:$0xff] }
  0xcd   :  { %v351_v11 = vpop.f32.mrf.mxu0  ;;  %v511_v13 = vpop.f32.mrf.mxu1 }
  0xce   :  { %v735_v15 = vadd.f32 %v671_v6, %v357_v9  ;;  %v767_v16 = vadd.f32 %v703_v8, %v517_v10  ;;  %v352_v17 = vadd.f32 %v1471_v4, %v351_v11  ;;  %v512_v18 = vadd.f32 %v1471_v4, %v511_v13  ;;  %v708_v9 = vld [vmem:[%s1988_s3 + $0x130] sm:$0xff] }
  0xcf   :  { %v1076_v19 = vpop.f32.mrf.mxu0  ;;  %v1124_v20 = vpop.f32.mrf.mxu1 }
  0xd0   :  { %v799_v21 = vmax.f32 %v735_v15, 0.0  ;;  %v831_v22 = vmax.f32 %v767_v16, 0.0  ;;  %v734_v23 = vadd.f32 %v670_v12, %v352_v17  ;;  %v766_v24 = vadd.f32 %v702_v14, %v512_v18 }
  0xd1   :  { %v367_v27 = vadd.f32 %v1076_v19, %v1471_v4  ;;  %v527_v28 = vadd.f32 %v1124_v20, %v1471_v4  ;;  %v361_v29 = vpop.f32.mrf.mxu0  ;;  %v521_v31 = vpop.f32.mrf.mxu1 }
  0xd2   :  { %863 = vst.msk [vmem:[%s1989_s4 + $0x8] sm:$0xff] %vm92_vm0, %v799_v21  ;;  %895 = vst.msk [vmem:[%s1989_s4 + $0x108] sm:$0xff] %vm92_vm0, %v831_v22  ;;  %v798_v33 = vmax.f32 %v734_v23, 0.0  ;;  %v830_v34 = vmax.f32 %v766_v24, 0.0  ;;  %v362_v35 = vadd.f32 %v1471_v4, %v361_v29  ;;  %v522_v36 = vadd.f32 %v1471_v4, %v521_v31  ;;  %v679_v22 = vld [vmem:[%s1988_s3 + $0x48] sm:$0xff]  ;;  %v710_v29 = vld [vmem:[%s1988_s3 + $0x140] sm:$0xff] }
  0xd3   :  { %v737_v37 = vadd.f32 %v673_v25, %v367_v27  ;;  %v769_v38 = vadd.f32 %v705_v26, %v527_v28  ;;  %v1079_v39 = vpop.f32.mrf.mxu0  ;;  %v1127_v41 = vpop.f32.mrf.mxu1  ;;  %v711_v23 = vld [vmem:[%s1988_s3 + $0x148] sm:$0xff]  ;;  %v678_v27 = vld [vmem:[%s1988_s3 + $0x40] sm:$0xff] }
  0xd4   :  { %862 = vst.msk [vmem:[%s1989_s4] sm:$0xff] %vm92_vm0, %v798_v33  ;;  %894 = vst.msk [vmem:[%s1989_s4 + $0x100] sm:$0xff] %vm92_vm0, %v830_v34  ;;  %v736_v43 = vadd.f32 %v672_v30, %v362_v35  ;;  %v768_v44 = vadd.f32 %v704_v32, %v522_v36  ;;  %v377_v45 = vadd.f32 %v1079_v39, %v1471_v4  ;;  %v713_v39 = vld [vmem:[%s1988_s3 + $0x158] sm:$0xff] }
  0xd5   :  { %v537_v46 = vadd.f32 %v1127_v41, %v1471_v4  ;;  %v801_v47 = vmax.f32 %v737_v37, 0.0  ;;  %v833_v48 = vmax.f32 %v769_v38, 0.0  ;;  %v371_v49 = vpop.f32.mrf.mxu0  ;;  %v531_v50 = vpop.f32.mrf.mxu1  ;;  %v681_v37 = vld [vmem:[%s1988_s3 + $0x58] sm:$0xff] }
  0xd6   :  { %v800_v51 = vmax.f32 %v736_v43, 0.0  ;;  %v832_v52 = vmax.f32 %v768_v44, 0.0  ;;  %v739_v53 = vadd.f32 %v675_v40, %v377_v45  ;;  %v372_v57 = vadd.f32 %v1471_v4, %v371_v49 }
  0xd7   :  { %v771_v54 = vadd.f32 %v707_v42, %v537_v46  ;;  %865 = vst.msk [vmem:[%s1989_s4 + $0x18] sm:$0xff] %vm92_vm0, %v801_v47  ;;  %897 = vst.msk [vmem:[%s1989_s4 + $0x118] sm:$0xff] %vm92_vm0, %v833_v48  ;;  %v532_v58 = vadd.f32 %v1471_v4, %v531_v50  ;;  %v1082_v59 = vpop.f32.mrf.mxu0  ;;  %v1130_v61 = vpop.f32.mrf.mxu1 }
  0xd8   :  { %864 = vst.msk [vmem:[%s1989_s4 + $0x10] sm:$0xff] %vm92_vm0, %v800_v51  ;;  %896 = vst.msk [vmem:[%s1989_s4 + $0x110] sm:$0xff] %vm92_vm0, %v832_v52  ;;  %v803_v63 = vmax.f32 %v739_v53, 0.0  ;;  %v387_v1 = vadd.f32 %v1082_v59, %v1471_v4  ;;  %v547_v2 = vadd.f32 %v1130_v61, %v1471_v4  ;;  %v738_v3 = vadd.f32 %v674_v55, %v372_v57  ;;  %v680_v52 = vld [vmem:[%s1988_s3 + $0x50] sm:$0xff]  ;;  %v683_v57 = vld [vmem:[%s1988_s3 + $0x68] sm:$0xff] }
  0xd9   :  { %v835_v0 = vmax.f32 %v771_v54, 0.0  ;;  %v770_v5 = vadd.f32 %v706_v56, %v532_v58  ;;  %v381_v6 = vpop.f32.mrf.mxu0  ;;  %v541_v8 = vpop.f32.mrf.mxu1  ;;  %v712_v53 = vld [vmem:[%s1988_s3 + $0x150] sm:$0xff]  ;;  %v715_v59 = vld [vmem:[%s1988_s3 + $0x168] sm:$0xff] }
  0xda   :  { %867 = vst.msk [vmem:[%s1989_s4 + $0x28] sm:$0xff] %vm92_vm0, %v803_v63  ;;  %v741_v10 = vadd.f32 %v677_v60, %v387_v1  ;;  %v773_v11 = vadd.f32 %v709_v62, %v547_v2  ;;  %v382_v12 = vadd.f32 %v1471_v4, %v381_v6  ;;  %v542_v13 = vadd.f32 %v1471_v4, %v541_v8  ;;  %v714_v6 = vld [vmem:[%s1988_s3 + $0x160] sm:$0xff] }
  0xdb   :  { %899 = vst.msk [vmem:[%s1989_s4 + $0x128] sm:$0xff] %vm92_vm0, %v835_v0  ;;  %v802_v14 = vmax.f32 %v738_v3, 0.0  ;;  %v834_v15 = vmax.f32 %v770_v5, 0.0  ;;  %v1085_v16 = vpop.f32.mrf.mxu0  ;;  %v1133_v17 = vpop.f32.mrf.mxu1  ;;  %v682_v3 = vld [vmem:[%s1988_s3 + $0x60] sm:$0xff] }
  0xdc   :  { %v805_v18 = vmax.f32 %v741_v10, 0.0  ;;  %v837_v19 = vmax.f32 %v773_v11, 0.0  ;;  %v740_v20 = vadd.f32 %v676_v7, %v382_v12  ;;  %v772_v21 = vadd.f32 %v708_v9, %v542_v13 }
  0xdd   :  { %866 = vst.msk [vmem:[%s1989_s4 + $0x20] sm:$0xff] %vm92_vm0, %v802_v14  ;;  %898 = vst.msk [vmem:[%s1989_s4 + $0x120] sm:$0xff] %vm92_vm0, %v834_v15  ;;  %v397_v24 = vadd.f32 %v1085_v16, %v1471_v4  ;;  %v557_v25 = vadd.f32 %v1133_v17, %v1471_v4  ;;  %v391_v26 = vpop.f32.mrf.mxu0  ;;  %v551_v28 = vpop.f32.mrf.mxu1 }
  0xde   :  { %869 = vst.msk [vmem:[%s1989_s4 + $0x38] sm:$0xff] %vm92_vm0, %v805_v18  ;;  %901 = vst.msk [vmem:[%s1989_s4 + $0x138] sm:$0xff] %vm92_vm0, %v837_v19  ;;  %v804_v30 = vmax.f32 %v740_v20, 0.0  ;;  %v836_v31 = vmax.f32 %v772_v21, 0.0  ;;  %v392_v32 = vadd.f32 %v1471_v4, %v391_v26  ;;  %v552_v33 = vadd.f32 %v1471_v4, %v551_v28  ;;  %v685_v19 = vld [vmem:[%s1988_s3 + $0x78] sm:$0xff]  ;;  %v716_v26 = vld [vmem:[%s1988_s3 + $0x170] sm:$0xff] }
  0xdf   :  { %v743_v34 = vadd.f32 %v679_v22, %v397_v24  ;;  %v775_v35 = vadd.f32 %v711_v23, %v557_v25  ;;  %v1088_v36 = vpop.f32.mrf.mxu0  ;;  %v1136_v38 = vpop.f32.mrf.mxu1  ;;  %v717_v20 = vld [vmem:[%s1988_s3 + $0x178] sm:$0xff]  ;;  %v684_v24 = vld [vmem:[%s1988_s3 + $0x70] sm:$0xff] }
  0xe0   :  { %868 = vst.msk [vmem:[%s1989_s4 + $0x30] sm:$0xff] %vm92_vm0, %v804_v30  ;;  %900 = vst.msk [vmem:[%s1989_s4 + $0x130] sm:$0xff] %vm92_vm0, %v836_v31  ;;  %v742_v40 = vadd.f32 %v678_v27, %v392_v32  ;;  %v774_v41 = vadd.f32 %v710_v29, %v552_v33  ;;  %v407_v42 = vadd.f32 %v1088_v36, %v1471_v4  ;;  %v719_v36 = vld [vmem:[%s1988_s3 + $0x188] sm:$0xff] }
  0xe1   :  { %v567_v43 = vadd.f32 %v1136_v38, %v1471_v4  ;;  %v807_v44 = vmax.f32 %v743_v34, 0.0  ;;  %v839_v45 = vmax.f32 %v775_v35, 0.0  ;;  %v401_v46 = vpop.f32.mrf.mxu0  ;;  %v561_v47 = vpop.f32.mrf.mxu1  ;;  %v687_v34 = vld [vmem:[%s1988_s3 + $0x88] sm:$0xff] }
  0xe2   :  { %v806_v48 = vmax.f32 %v742_v40, 0.0  ;;  %v838_v49 = vmax.f32 %v774_v41, 0.0  ;;  %v745_v50 = vadd.f32 %v681_v37, %v407_v42  ;;  %v402_v54 = vadd.f32 %v1471_v4, %v401_v46 }
  0xe3   :  { %v777_v51 = vadd.f32 %v713_v39, %v567_v43  ;;  %871 = vst.msk [vmem:[%s1989_s4 + $0x48] sm:$0xff] %vm92_vm0, %v807_v44  ;;  %903 = vst.msk [vmem:[%s1989_s4 + $0x148] sm:$0xff] %vm92_vm0, %v839_v45  ;;  %v562_v55 = vadd.f32 %v1471_v4, %v561_v47  ;;  %v1091_v56 = vpop.f32.mrf.mxu0  ;;  %v1139_v58 = vpop.f32.mrf.mxu1 }
  0xe4   :  { %870 = vst.msk [vmem:[%s1989_s4 + $0x40] sm:$0xff] %vm92_vm0, %v806_v48  ;;  %902 = vst.msk [vmem:[%s1989_s4 + $0x140] sm:$0xff] %vm92_vm0, %v838_v49  ;;  %v809_v60 = vmax.f32 %v745_v50, 0.0  ;;  %v417_v62 = vadd.f32 %v1091_v56, %v1471_v4  ;;  %v577_v63 = vadd.f32 %v1139_v58, %v1471_v4  ;;  %v744_v0 = vadd.f32 %v680_v52, %v402_v54  ;;  %v686_v49 = vld [vmem:[%s1988_s3 + $0x80] sm:$0xff]  ;;  %v689_v54 = vld [vmem:[%s1988_s3 + $0x98] sm:$0xff] }
  0xe5   :  { %v841_v61 = vmax.f32 %v777_v51, 0.0  ;;  %v776_v1 = vadd.f32 %v712_v53, %v562_v55  ;;  %v411_v2 = vpop.f32.mrf.mxu0  ;;  %v571_v5 = vpop.f32.mrf.mxu1  ;;  %v718_v50 = vld [vmem:[%s1988_s3 + $0x180] sm:$0xff]  ;;  %v721_v56 = vld [vmem:[%s1988_s3 + $0x198] sm:$0xff] }
  0xe6   :  { %873 = vst.msk [vmem:[%s1989_s4 + $0x58] sm:$0xff] %vm92_vm0, %v809_v60  ;;  %v747_v7 = vadd.f32 %v683_v57, %v417_v62  ;;  %v779_v8 = vadd.f32 %v715_v59, %v577_v63  ;;  %v412_v9 = vadd.f32 %v1471_v4, %v411_v2  ;;  %v572_v10 = vadd.f32 %v1471_v4, %v571_v5  ;;  %v720_v2 = vld [vmem:[%s1988_s3 + $0x190] sm:$0xff] }
  0xe7   :  { %905 = vst.msk [vmem:[%s1989_s4 + $0x158] sm:$0xff] %vm92_vm0, %v841_v61  ;;  %v808_v11 = vmax.f32 %v744_v0, 0.0  ;;  %v840_v12 = vmax.f32 %v776_v1, 0.0  ;;  %v1094_v13 = vpop.f32.mrf.mxu0  ;;  %v1142_v14 = vpop.f32.mrf.mxu1  ;;  %v688_v0 = vld [vmem:[%s1988_s3 + $0x90] sm:$0xff] }
  0xe8   :  { %v811_v15 = vmax.f32 %v747_v7, 0.0  ;;  %v843_v16 = vmax.f32 %v779_v8, 0.0  ;;  %v746_v17 = vadd.f32 %v682_v3, %v412_v9  ;;  %v778_v18 = vadd.f32 %v714_v6, %v572_v10 }
  0xe9   :  { %872 = vst.msk [vmem:[%s1989_s4 + $0x50] sm:$0xff] %vm92_vm0, %v808_v11  ;;  %904 = vst.msk [vmem:[%s1989_s4 + $0x150] sm:$0xff] %vm92_vm0, %v840_v12  ;;  %v427_v21 = vadd.f32 %v1094_v13, %v1471_v4  ;;  %v587_v22 = vadd.f32 %v1142_v14, %v1471_v4  ;;  %v421_v23 = vpop.f32.mrf.mxu0  ;;  %v581_v25 = vpop.f32.mrf.mxu1 }
  0xea   :  { %875 = vst.msk [vmem:[%s1989_s4 + $0x68] sm:$0xff] %vm92_vm0, %v811_v15  ;;  %907 = vst.msk [vmem:[%s1989_s4 + $0x168] sm:$0xff] %vm92_vm0, %v843_v16  ;;  %v810_v27 = vmax.f32 %v746_v17, 0.0  ;;  %v842_v28 = vmax.f32 %v778_v18, 0.0  ;;  %v422_v29 = vadd.f32 %v1471_v4, %v421_v23  ;;  %v582_v30 = vadd.f32 %v1471_v4, %v581_v25  ;;  %v691_v16 = vld [vmem:[%s1988_s3 + $0xa8] sm:$0xff]  ;;  %v722_v23 = vld [vmem:[%s1988_s3 + $0x1a0] sm:$0xff] }
  0xeb   :  { %v749_v31 = vadd.f32 %v685_v19, %v427_v21  ;;  %v781_v32 = vadd.f32 %v717_v20, %v587_v22  ;;  %v1097_v33 = vpop.f32.mrf.mxu0  ;;  %v1145_v35 = vpop.f32.mrf.mxu1  ;;  %v723_v17 = vld [vmem:[%s1988_s3 + $0x1a8] sm:$0xff]  ;;  %v690_v21 = vld [vmem:[%s1988_s3 + $0xa0] sm:$0xff] }
  0xec   :  { %874 = vst.msk [vmem:[%s1989_s4 + $0x60] sm:$0xff] %vm92_vm0, %v810_v27  ;;  %906 = vst.msk [vmem:[%s1989_s4 + $0x160] sm:$0xff] %vm92_vm0, %v842_v28  ;;  %v748_v37 = vadd.f32 %v684_v24, %v422_v29  ;;  %v780_v38 = vadd.f32 %v716_v26, %v582_v30  ;;  %v437_v39 = vadd.f32 %v1097_v33, %v1471_v4  ;;  %v725_v33 = vld [vmem:[%s1988_s3 + $0x1b8] sm:$0xff] }
  0xed   :  { %v597_v40 = vadd.f32 %v1145_v35, %v1471_v4  ;;  %v813_v41 = vmax.f32 %v749_v31, 0.0  ;;  %v845_v42 = vmax.f32 %v781_v32, 0.0  ;;  %v431_v43 = vpop.f32.mrf.mxu0  ;;  %v591_v44 = vpop.f32.mrf.mxu1  ;;  %v693_v31 = vld [vmem:[%s1988_s3 + $0xb8] sm:$0xff] }
  0xee   :  { %v812_v45 = vmax.f32 %v748_v37, 0.0  ;;  %v844_v46 = vmax.f32 %v780_v38, 0.0  ;;  %v751_v47 = vadd.f32 %v687_v34, %v437_v39  ;;  %v432_v51 = vadd.f32 %v1471_v4, %v431_v43 }
  0xef   :  { %v783_v48 = vadd.f32 %v719_v36, %v597_v40  ;;  %877 = vst.msk [vmem:[%s1989_s4 + $0x78] sm:$0xff] %vm92_vm0, %v813_v41  ;;  %909 = vst.msk [vmem:[%s1989_s4 + $0x178] sm:$0xff] %vm92_vm0, %v845_v42  ;;  %v592_v52 = vadd.f32 %v1471_v4, %v591_v44  ;;  %v1100_v53 = vpop.f32.mrf.mxu0  ;;  %v1148_v55 = vpop.f32.mrf.mxu1 }
  0xf0   :  { %876 = vst.msk [vmem:[%s1989_s4 + $0x70] sm:$0xff] %vm92_vm0, %v812_v45  ;;  %908 = vst.msk [vmem:[%s1989_s4 + $0x170] sm:$0xff] %vm92_vm0, %v844_v46  ;;  %v815_v57 = vmax.f32 %v751_v47, 0.0  ;;  %v447_v59 = vadd.f32 %v1100_v53, %v1471_v4  ;;  %v607_v60 = vadd.f32 %v1148_v55, %v1471_v4  ;;  %v750_v61 = vadd.f32 %v686_v49, %v432_v51  ;;  %v692_v46 = vld [vmem:[%s1988_s3 + $0xb0] sm:$0xff]  ;;  %v695_v51 = vld [vmem:[%s1988_s3 + $0xc8] sm:$0xff] }
  0xf1   :  { %v847_v58 = vmax.f32 %v783_v48, 0.0  ;;  %v782_v62 = vadd.f32 %v718_v50, %v592_v52  ;;  %v441_v63 = vpop.f32.mrf.mxu0  ;;  %v601_v1 = vpop.f32.mrf.mxu1  ;;  %v724_v47 = vld [vmem:[%s1988_s3 + $0x1b0] sm:$0xff]  ;;  %v727_v53 = vld [vmem:[%s1988_s3 + $0x1c8] sm:$0xff] }
  0xf2   :  { %879 = vst.msk [vmem:[%s1989_s4 + $0x88] sm:$0xff] %vm92_vm0, %v815_v57  ;;  %v753_v3 = vadd.f32 %v689_v54, %v447_v59  ;;  %v785_v5 = vadd.f32 %v721_v56, %v607_v60  ;;  %v442_v6 = vadd.f32 %v1471_v4, %v441_v63  ;;  %v602_v7 = vadd.f32 %v1471_v4, %v601_v1  ;;  %v726_v63 = vld [vmem:[%s1988_s3 + $0x1c0] sm:$0xff] }
  0xf3   :  { %911 = vst.msk [vmem:[%s1989_s4 + $0x188] sm:$0xff] %vm92_vm0, %v847_v58  ;;  %v814_v8 = vmax.f32 %v750_v61, 0.0  ;;  %v846_v9 = vmax.f32 %v782_v62, 0.0  ;;  %v1103_v10 = vpop.f32.mrf.mxu0  ;;  %v1151_v11 = vpop.f32.mrf.mxu1  ;;  %v694_v61 = vld [vmem:[%s1988_s3 + $0xc0] sm:$0xff] }
  0xf4   :  { %v817_v12 = vmax.f32 %v753_v3, 0.0  ;;  %v849_v13 = vmax.f32 %v785_v5, 0.0  ;;  %v752_v14 = vadd.f32 %v688_v0, %v442_v6  ;;  %v784_v15 = vadd.f32 %v720_v2, %v602_v7 }
  0xf5   :  { %878 = vst.msk [vmem:[%s1989_s4 + $0x80] sm:$0xff] %vm92_vm0, %v814_v8  ;;  %910 = vst.msk [vmem:[%s1989_s4 + $0x180] sm:$0xff] %vm92_vm0, %v846_v9  ;;  %v457_v18 = vadd.f32 %v1103_v10, %v1471_v4  ;;  %v617_v19 = vadd.f32 %v1151_v11, %v1471_v4  ;;  %v451_v20 = vpop.f32.mrf.mxu0  ;;  %v611_v22 = vpop.f32.mrf.mxu1 }
  0xf6   :  { %881 = vst.msk [vmem:[%s1989_s4 + $0x98] sm:$0xff] %vm92_vm0, %v817_v12  ;;  %913 = vst.msk [vmem:[%s1989_s4 + $0x198] sm:$0xff] %vm92_vm0, %v849_v13  ;;  %v816_v24 = vmax.f32 %v752_v14, 0.0  ;;  %v848_v25 = vmax.f32 %v784_v15, 0.0  ;;  %v452_v26 = vadd.f32 %v1471_v4, %v451_v20  ;;  %v612_v27 = vadd.f32 %v1471_v4, %v611_v22  ;;  %v697_v13 = vld [vmem:[%s1988_s3 + $0xd8] sm:$0xff]  ;;  %v728_v20 = vld [vmem:[%s1988_s3 + $0x1d0] sm:$0xff] }
  0xf7   :  { %v755_v28 = vadd.f32 %v691_v16, %v457_v18  ;;  %v787_v29 = vadd.f32 %v723_v17, %v617_v19  ;;  %v1106_v30 = vpop.f32.mrf.mxu0  ;;  %v1154_v32 = vpop.f32.mrf.mxu1  ;;  %v729_v14 = vld [vmem:[%s1988_s3 + $0x1d8] sm:$0xff]  ;;  %v696_v18 = vld [vmem:[%s1988_s3 + $0xd0] sm:$0xff] }
  0xf8   :  { %880 = vst.msk [vmem:[%s1989_s4 + $0x90] sm:$0xff] %vm92_vm0, %v816_v24  ;;  %912 = vst.msk [vmem:[%s1989_s4 + $0x190] sm:$0xff] %vm92_vm0, %v848_v25  ;;  %v754_v34 = vadd.f32 %v690_v21, %v452_v26  ;;  %v786_v35 = vadd.f32 %v722_v23, %v612_v27  ;;  %v467_v36 = vadd.f32 %v1106_v30, %v1471_v4  ;;  %v731_v30 = vld [vmem:[%s1988_s3 + $0x1e8] sm:$0xff] }
  0xf9   :  { %v627_v37 = vadd.f32 %v1154_v32, %v1471_v4  ;;  %v819_v38 = vmax.f32 %v755_v28, 0.0  ;;  %v851_v39 = vmax.f32 %v787_v29, 0.0  ;;  %v461_v40 = vpop.f32.mrf.mxu0  ;;  %v621_v41 = vpop.f32.mrf.mxu1  ;;  %v699_v28 = vld [vmem:[%s1988_s3 + $0xe8] sm:$0xff] }
  0xfa   :  { %v818_v42 = vmax.f32 %v754_v34, 0.0  ;;  %v850_v43 = vmax.f32 %v786_v35, 0.0  ;;  %v757_v44 = vadd.f32 %v693_v31, %v467_v36  ;;  %v462_v48 = vadd.f32 %v1471_v4, %v461_v40 }
  0xfb   :  { %v789_v45 = vadd.f32 %v725_v33, %v627_v37  ;;  %883 = vst.msk [vmem:[%s1989_s4 + $0xa8] sm:$0xff] %vm92_vm0, %v819_v38  ;;  %915 = vst.msk [vmem:[%s1989_s4 + $0x1a8] sm:$0xff] %vm92_vm0, %v851_v39  ;;  %v622_v49 = vadd.f32 %v1471_v4, %v621_v41  ;;  %v1109_v50 = vpop.f32.mrf.mxu0  ;;  %v1157_v52 = vpop.f32.mrf.mxu1 }
  0xfc   :  { %882 = vst.msk [vmem:[%s1989_s4 + $0xa0] sm:$0xff] %vm92_vm0, %v818_v42  ;;  %914 = vst.msk [vmem:[%s1989_s4 + $0x1a0] sm:$0xff] %vm92_vm0, %v850_v43  ;;  %v821_v54 = vmax.f32 %v757_v44, 0.0  ;;  %v477_v56 = vadd.f32 %v1109_v50, %v1471_v4  ;;  %v637_v57 = vadd.f32 %v1157_v52, %v1471_v4  ;;  %v756_v58 = vadd.f32 %v692_v46, %v462_v48  ;;  %v698_v43 = vld [vmem:[%s1988_s3 + $0xe0] sm:$0xff]  ;;  %v701_v48 = vld [vmem:[%s1988_s3 + $0xf8] sm:$0xff] }
  0xfd   :  { %v853_v55 = vmax.f32 %v789_v45, 0.0  ;;  %v788_v59 = vadd.f32 %v724_v47, %v622_v49  ;;  %v471_v60 = vpop.f32.mrf.mxu0  ;;  %v631_v62 = vpop.f32.mrf.mxu1  ;;  %v730_v44 = vld [vmem:[%s1988_s3 + $0x1e0] sm:$0xff]  ;;  %v733_v50 = vld [vmem:[%s1988_s3 + $0x1f8] sm:$0xff] }
  0xfe   :  { %885 = vst.msk [vmem:[%s1989_s4 + $0xb8] sm:$0xff] %vm92_vm0, %v821_v54  ;;  %v759_v0 = vadd.f32 %v695_v51, %v477_v56  ;;  %v791_v1 = vadd.f32 %v727_v53, %v637_v57  ;;  %v472_v2 = vadd.f32 %v1471_v4, %v471_v60  ;;  %v632_v3 = vadd.f32 %v1471_v4, %v631_v62  ;;  %v732_v60 = vld [vmem:[%s1988_s3 + $0x1f0] sm:$0xff] }
  0xff   :  { %917 = vst.msk [vmem:[%s1989_s4 + $0x1b8] sm:$0xff] %vm92_vm0, %v853_v55  ;;  %v820_v5 = vmax.f32 %v756_v58, 0.0  ;;  %v852_v6 = vmax.f32 %v788_v59, 0.0  ;;  %v1112_v7 = vpop.f32.mrf.mxu0  ;;  %v1160_v8 = vpop.f32.mrf.mxu1  ;;  %v700_v58 = vld [vmem:[%s1988_s3 + $0xf0] sm:$0xff] }
 0x100   :  { %v823_v9 = vmax.f32 %v759_v0, 0.0  ;;  %v855_v10 = vmax.f32 %v791_v1, 0.0  ;;  %v758_v11 = vadd.f32 %v694_v61, %v472_v2  ;;  %v790_v12 = vadd.f32 %v726_v63, %v632_v3 }
 0x101   :  { %884 = vst.msk [vmem:[%s1989_s4 + $0xb0] sm:$0xff] %vm92_vm0, %v820_v5  ;;  %916 = vst.msk [vmem:[%s1989_s4 + $0x1b0] sm:$0xff] %vm92_vm0, %v852_v6  ;;  %v487_v15 = vadd.f32 %v1112_v7, %v1471_v4  ;;  %v647_v16 = vadd.f32 %v1160_v8, %v1471_v4  ;;  %v481_v17 = vpop.f32.mrf.mxu0  ;;  %v641_v19 = vpop.f32.mrf.mxu1 }
 0x102   :  { %887 = vst.msk [vmem:[%s1989_s4 + $0xc8] sm:$0xff] %vm92_vm0, %v823_v9  ;;  %919 = vst.msk [vmem:[%s1989_s4 + $0x1c8] sm:$0xff] %vm92_vm0, %v855_v10  ;;  %v822_v21 = vmax.f32 %v758_v11, 0.0  ;;  %v854_v22 = vmax.f32 %v790_v12, 0.0  ;;  %v482_v23 = vadd.f32 %v1471_v4, %v481_v17  ;;  %v642_v24 = vadd.f32 %v1471_v4, %v641_v19 }
 0x103   :  { %v761_v25 = vadd.f32 %v697_v13, %v487_v15  ;;  %v793_v26 = vadd.f32 %v729_v14, %v647_v16  ;;  %v1115_v27 = vpop.f32.mrf.mxu0  ;;  %v1163_v29 = vpop.f32.mrf.mxu1 }
 0x104   :  { %886 = vst.msk [vmem:[%s1989_s4 + $0xc0] sm:$0xff] %vm92_vm0, %v822_v21  ;;  %918 = vst.msk [vmem:[%s1989_s4 + $0x1c0] sm:$0xff] %vm92_vm0, %v854_v22  ;;  %v760_v31 = vadd.f32 %v696_v18, %v482_v23  ;;  %v792_v32 = vadd.f32 %v728_v20, %v642_v24  ;;  %v497_v33 = vadd.f32 %v1115_v27, %v1471_v4 }
 0x105   :  { %v657_v34 = vadd.f32 %v1163_v29, %v1471_v4  ;;  %v825_v35 = vmax.f32 %v761_v25, 0.0  ;;  %v857_v36 = vmax.f32 %v793_v26, 0.0  ;;  %v491_v37 = vpop.f32.mrf.mxu0  ;;  %v651_v38 = vpop.f32.mrf.mxu1 }
 0x106   :  { %v824_v39 = vmax.f32 %v760_v31, 0.0  ;;  %v856_v40 = vmax.f32 %v792_v32, 0.0  ;;  %v763_v41 = vadd.f32 %v699_v28, %v497_v33  ;;  %v492_v45 = vadd.f32 %v1471_v4, %v491_v37 }
 0x107   :  { %v795_v42 = vadd.f32 %v731_v30, %v657_v34  ;;  %889 = vst.msk [vmem:[%s1989_s4 + $0xd8] sm:$0xff] %vm92_vm0, %v825_v35  ;;  %921 = vst.msk [vmem:[%s1989_s4 + $0x1d8] sm:$0xff] %vm92_vm0, %v857_v36  ;;  %v652_v46 = vadd.f32 %v1471_v4, %v651_v38  ;;  %v1118_v47 = vpop.f32.mrf.mxu0  ;;  %v1166_v49 = vpop.f32.mrf.mxu1 }
 0x108   :  { %888 = vst.msk [vmem:[%s1989_s4 + $0xd0] sm:$0xff] %vm92_vm0, %v824_v39  ;;  %920 = vst.msk [vmem:[%s1989_s4 + $0x1d0] sm:$0xff] %vm92_vm0, %v856_v40  ;;  %v827_v51 = vmax.f32 %v763_v41, 0.0  ;;  %v507_v53 = vadd.f32 %v1118_v47, %v1471_v4  ;;  %v667_v54 = vadd.f32 %v1166_v49, %v1471_v4  ;;  %v762_v55 = vadd.f32 %v698_v43, %v492_v45 }
 0x109   :  { %v859_v52 = vmax.f32 %v795_v42, 0.0  ;;  %v794_v56 = vadd.f32 %v730_v44, %v652_v46  ;;  %v501_v57 = vpop.f32.mrf.mxu0  ;;  %v661_v59 = vpop.f32.mrf.mxu1 }
 0x10a   :  { %891 = vst.msk [vmem:[%s1989_s4 + $0xe8] sm:$0xff] %vm92_vm0, %v827_v51  ;;  %v765_v61 = vadd.f32 %v701_v48, %v507_v53  ;;  %v797_v62 = vadd.f32 %v733_v50, %v667_v54  ;;  %v502_v63 = vadd.f32 %v1471_v4, %v501_v57  ;;  %v662_v0 = vadd.f32 %v1471_v4, %v661_v59 }
 0x10b   :  { %923 = vst.msk [vmem:[%s1989_s4 + $0x1e8] sm:$0xff] %vm92_vm0, %v859_v52  ;;  %v826_v1 = vmax.f32 %v762_v55, 0.0  ;;  %v858_v2 = vmax.f32 %v794_v56, 0.0 }
 0x10c   :  { %v829_v3 = vmax.f32 %v765_v61, 0.0  ;;  %v861_v5 = vmax.f32 %v797_v62, 0.0  ;;  %v764_v6 = vadd.f32 %v700_v58, %v502_v63  ;;  %v796_v7 = vadd.f32 %v732_v60, %v662_v0 }
 0x10d   :  { %890 = vst.msk [vmem:[%s1989_s4 + $0xe0] sm:$0xff] %vm92_vm0, %v826_v1  ;;  %922 = vst.msk [vmem:[%s1989_s4 + $0x1e0] sm:$0xff] %vm92_vm0, %v858_v2 }
 0x10e   :  { %893 = vst.msk [vmem:[%s1989_s4 + $0xf8] sm:$0xff] %vm92_vm0, %v829_v3  ;;  %925 = vst.msk [vmem:[%s1989_s4 + $0x1f8] sm:$0xff] %vm92_vm0, %v861_v5  ;;  %v828_v4 = vmax.f32 %v764_v6, 0.0  ;;  %v860_v8 = vmax.f32 %v796_v7, 0.0 }
 0x110   :  { %892 = vst.msk [vmem:[%s1989_s4 + $0xf0] sm:$0xff] %vm92_vm0, %v828_v4  ;;  %924 = vst.msk [vmem:[%s1989_s4 + $0x1f0] sm:$0xff] %vm92_vm0, %v860_v8 }

// kernel: reverse.12
= control target key start
LH: loop header
LB: loop body
LE: loop exit
PB: predicated region body
PF: predicated region fallthrough
CT: control target
= control target key end

     0   :  { %s680_s0 = inlined_call_operand.vmem [shape: f32[2,2,32,16,7], index: 0, kind: input, shape index: {}]   ;;  %s681_s1 = inlined_call_operand.vmem [shape: f32[2,2,32,16,7], index: 1, kind: output, shape index: {}]  }
   0x1   :  { %v224_v0 = vld [vmem:[%s680_s0 + $0x60] sm:$0xff]  ;;  %v227_v2 = vld [vmem:[%s680_s0 + $0xd0] sm:$0xff]  ;;  %v278_v28 = vld [vmem:[%s680_s0 + $0x68] sm:$0xff] }
   0x2   :  { %v225_v1 = vld [vmem:[%s680_s0 + $0x140] sm:$0xff]  ;;  %4 = vst [vmem:[%s681_s1] sm:$0xff] %v224_v0  ;;  %228 = vst [vmem:[%s681_s1 + $0x70] sm:$0xff] %v227_v2  ;;  %v229_v3 = vld [vmem:[%s680_s0 + $0x1b0] sm:$0xff] }
   0x3   :  { %226 = vst [vmem:[%s681_s1 + $0xe0] sm:$0xff] %v225_v1  ;;  %v231_v4 = vld [vmem:[%s680_s0 + $0x50] sm:$0xff]  ;;  %230 = vst [vmem:[%s681_s1 + $0x150] sm:$0xff] %v229_v3  ;;  %v235_v6 = vld [vmem:[%s680_s0 + $0xc0] sm:$0xff] }
   0x4   :  { %v233_v5 = vld [vmem:[%s680_s0 + $0x130] sm:$0xff]  ;;  %232 = vst [vmem:[%s681_s1 + $0x10] sm:$0xff] %v231_v4  ;;  %v237_v7 = vld [vmem:[%s680_s0 + $0x1a0] sm:$0xff]  ;;  %236 = vst [vmem:[%s681_s1 + $0x80] sm:$0xff] %v235_v6 }
   0x5   :  { %234 = vst [vmem:[%s681_s1 + $0xf0] sm:$0xff] %v233_v5  ;;  %v239_v8 = vld [vmem:[%s680_s0 + $0x40] sm:$0xff]  ;;  %238 = vst [vmem:[%s681_s1 + $0x160] sm:$0xff] %v237_v7  ;;  %v243_v10 = vld [vmem:[%s680_s0 + $0xb0] sm:$0xff] }
   0x6   :  { %240 = vst [vmem:[%s681_s1 + $0x20] sm:$0xff] %v239_v8  ;;  %v241_v9 = vld [vmem:[%s680_s0 + $0x120] sm:$0xff]  ;;  %v245_v11 = vld [vmem:[%s680_s0 + $0x190] sm:$0xff]  ;;  %244 = vst [vmem:[%s681_s1 + $0x90] sm:$0xff] %v243_v10 }
   0x7   :  { %242 = vst [vmem:[%s681_s1 + $0x100] sm:$0xff] %v241_v9  ;;  %246 = vst [vmem:[%s681_s1 + $0x170] sm:$0xff] %v245_v11  ;;  %v247_v12 = vld [vmem:[%s680_s0 + $0x30] sm:$0xff]  ;;  %v251_v14 = vld [vmem:[%s680_s0 + $0xa0] sm:$0xff] }
   0x8   :  { %v249_v13 = vld [vmem:[%s680_s0 + $0x110] sm:$0xff]  ;;  %248 = vst [vmem:[%s681_s1 + $0x30] sm:$0xff] %v247_v12  ;;  %252 = vst [vmem:[%s681_s1 + $0xa0] sm:$0xff] %v251_v14  ;;  %v253_v15 = vld [vmem:[%s680_s0 + $0x180] sm:$0xff] }
   0x9   :  { %250 = vst [vmem:[%s681_s1 + $0x110] sm:$0xff] %v249_v13  ;;  %v255_v16 = vld [vmem:[%s680_s0 + $0x20] sm:$0xff]  ;;  %254 = vst [vmem:[%s681_s1 + $0x180] sm:$0xff] %v253_v15  ;;  %v259_v18 = vld [vmem:[%s680_s0 + $0x90] sm:$0xff] }
   0xa   :  { %v257_v17 = vld [vmem:[%s680_s0 + $0x100] sm:$0xff]  ;;  %256 = vst [vmem:[%s681_s1 + $0x40] sm:$0xff] %v255_v16  ;;  %v261_v19 = vld [vmem:[%s680_s0 + $0x170] sm:$0xff]  ;;  %260 = vst [vmem:[%s681_s1 + $0xb0] sm:$0xff] %v259_v18 }
   0xb   :  { %258 = vst [vmem:[%s681_s1 + $0x120] sm:$0xff] %v257_v17  ;;  %v263_v20 = vld [vmem:[%s680_s0 + $0x10] sm:$0xff]  ;;  %262 = vst [vmem:[%s681_s1 + $0x190] sm:$0xff] %v261_v19  ;;  %v267_v22 = vld [vmem:[%s680_s0 + $0x80] sm:$0xff] }
   0xc   :  { %264 = vst [vmem:[%s681_s1 + $0x50] sm:$0xff] %v263_v20  ;;  %v265_v21 = vld [vmem:[%s680_s0 + $0xf0] sm:$0xff]  ;;  %v269_v23 = vld [vmem:[%s680_s0 + $0x160] sm:$0xff]  ;;  %268 = vst [vmem:[%s681_s1 + $0xc0] sm:$0xff] %v267_v22 }
   0xd   :  { %266 = vst [vmem:[%s681_s1 + $0x130] sm:$0xff] %v265_v21  ;;  %270 = vst [vmem:[%s681_s1 + $0x1a0] sm:$0xff] %v269_v23  ;;  %v97_v24 = vld [vmem:[%s680_s0] sm:$0xff]  ;;  %v274_v26 = vld [vmem:[%s680_s0 + $0x70] sm:$0xff] }
   0xe   :  { %v272_v25 = vld [vmem:[%s680_s0 + $0xe0] sm:$0xff]  ;;  %271 = vst [vmem:[%s681_s1 + $0x60] sm:$0xff] %v97_v24  ;;  %275 = vst [vmem:[%s681_s1 + $0xd0] sm:$0xff] %v274_v26  ;;  %v276_v27 = vld [vmem:[%s680_s0 + $0x150] sm:$0xff] }
   0xf   :  { %273 = vst [vmem:[%s681_s1 + $0x140] sm:$0xff] %v272_v25  ;;  %v280_v29 = vld [vmem:[%s680_s0 + $0x148] sm:$0xff]  ;;  %277 = vst [vmem:[%s681_s1 + $0x1b0] sm:$0xff] %v276_v27  ;;  %v282_v30 = vld [vmem:[%s680_s0 + $0xd8] sm:$0xff] }
  0x10   :  { %279 = vst [vmem:[%s681_s1 + $0x8] sm:$0xff] %v278_v28  ;;  %281 = vst [vmem:[%s681_s1 + $0xe8] sm:$0xff] %v280_v29  ;;  %v284_v31 = vld [vmem:[%s680_s0 + $0x1b8] sm:$0xff]  ;;  %v290_v34 = vld [vmem:[%s680_s0 + $0xc8] sm:$0xff] }
  0x11   :  { %v286_v32 = vld [vmem:[%s680_s0 + $0x58] sm:$0xff]  ;;  %283 = vst [vmem:[%s681_s1 + $0x78] sm:$0xff] %v282_v30  ;;  %285 = vst [vmem:[%s681_s1 + $0x158] sm:$0xff] %v284_v31  ;;  %v292_v35 = vld [vmem:[%s680_s0 + $0x1a8] sm:$0xff] }
  0x12   :  { %287 = vst [vmem:[%s681_s1 + $0x18] sm:$0xff] %v286_v32  ;;  %v288_v33 = vld [vmem:[%s680_s0 + $0x138] sm:$0xff]  ;;  %291 = vst [vmem:[%s681_s1 + $0x88] sm:$0xff] %v290_v34  ;;  %v294_v36 = vld [vmem:[%s680_s0 + $0x48] sm:$0xff] }
  0x13   :  { %289 = vst [vmem:[%s681_s1 + $0xf8] sm:$0xff] %v288_v33  ;;  %293 = vst [vmem:[%s681_s1 + $0x168] sm:$0xff] %v292_v35  ;;  %v296_v37 = vld [vmem:[%s680_s0 + $0x128] sm:$0xff]  ;;  %v298_v38 = vld [vmem:[%s680_s0 + $0xb8] sm:$0xff] }
  0x14   :  { %295 = vst [vmem:[%s681_s1 + $0x28] sm:$0xff] %v294_v36  ;;  %297 = vst [vmem:[%s681_s1 + $0x108] sm:$0xff] %v296_v37  ;;  %v300_v39 = vld [vmem:[%s680_s0 + $0x198] sm:$0xff]  ;;  %v306_v42 = vld [vmem:[%s680_s0 + $0xa8] sm:$0xff] }
  0x15   :  { %299 = vst [vmem:[%s681_s1 + $0x98] sm:$0xff] %v298_v38  ;;  %v302_v40 = vld [vmem:[%s680_s0 + $0x38] sm:$0xff]  ;;  %301 = vst [vmem:[%s681_s1 + $0x178] sm:$0xff] %v300_v39  ;;  %v308_v43 = vld [vmem:[%s680_s0 + $0x188] sm:$0xff] }
  0x16   :  { %v304_v41 = vld [vmem:[%s680_s0 + $0x118] sm:$0xff]  ;;  %303 = vst [vmem:[%s681_s1 + $0x38] sm:$0xff] %v302_v40  ;;  %v310_v44 = vld [vmem:[%s680_s0 + $0x28] sm:$0xff]  ;;  %307 = vst [vmem:[%s681_s1 + $0xa8] sm:$0xff] %v306_v42 }
  0x17   :  { %305 = vst [vmem:[%s681_s1 + $0x118] sm:$0xff] %v304_v41  ;;  %309 = vst [vmem:[%s681_s1 + $0x188] sm:$0xff] %v308_v43  ;;  %v312_v45 = vld [vmem:[%s680_s0 + $0x108] sm:$0xff]  ;;  %v314_v46 = vld [vmem:[%s680_s0 + $0x98] sm:$0xff] }
  0x18   :  { %311 = vst [vmem:[%s681_s1 + $0x48] sm:$0xff] %v310_v44  ;;  %v316_v47 = vld [vmem:[%s680_s0 + $0x178] sm:$0xff]  ;;  %313 = vst [vmem:[%s681_s1 + $0x128] sm:$0xff] %v312_v45  ;;  %v322_v50 = vld [vmem:[%s680_s0 + $0x88] sm:$0xff] }
  0x19   :  { %315 = vst [vmem:[%s681_s1 + $0xb8] sm:$0xff] %v314_v46  ;;  %317 = vst [vmem:[%s681_s1 + $0x198] sm:$0xff] %v316_v47  ;;  %v318_v48 = vld [vmem:[%s680_s0 + $0x18] sm:$0xff]  ;;  %v324_v51 = vld [vmem:[%s680_s0 + $0x168] sm:$0xff] }
  0x1a   :  { %v320_v49 = vld [vmem:[%s680_s0 + $0xf8] sm:$0xff]  ;;  %319 = vst [vmem:[%s681_s1 + $0x58] sm:$0xff] %v318_v48  ;;  %323 = vst [vmem:[%s681_s1 + $0xc8] sm:$0xff] %v322_v50  ;;  %v326_v52 = vld [vmem:[%s680_s0 + $0x8] sm:$0xff] }
  0x1b   :  { %321 = vst [vmem:[%s681_s1 + $0x138] sm:$0xff] %v320_v49  ;;  %v328_v53 = vld [vmem:[%s680_s0 + $0xe8] sm:$0xff]  ;;  %325 = vst [vmem:[%s681_s1 + $0x1a8] sm:$0xff] %v324_v51  ;;  %v330_v54 = vld [vmem:[%s680_s0 + $0x78] sm:$0xff] }
  0x1c   :  { %327 = vst [vmem:[%s681_s1 + $0x68] sm:$0xff] %v326_v52  ;;  %329 = vst [vmem:[%s681_s1 + $0x148] sm:$0xff] %v328_v53  ;;  %v332_v55 = vld [vmem:[%s680_s0 + $0x158] sm:$0xff] }
  0x1d   :  { %331 = vst [vmem:[%s681_s1 + $0xd8] sm:$0xff] %v330_v54  ;;  %333 = vst [vmem:[%s681_s1 + $0x1b8] sm:$0xff] %v332_v55 }

// kernel: fno_forward.15
= control target key start
LH: loop header
LB: loop body
LE: loop exit
PB: predicated region body
PF: predicated region fallthrough
CT: control target
= control target key end

     0   :  { %v7187_v0 = vmov 0.0   ;;  %vm587_vm0 = vcmask 523264   ;;  %vm7188_vm1 = vmmov 0   ;;  %vm5260_vm2 = vcmask 517120   ;;  %s9892_s1 = inlined_call_operand.vmem [shape: f32[64,64,64], index: 1, kind: input, shape index: {}]   ;;  %s9893_s0 = inlined_call_operand.vmem [shape: f32[64,2,64], index: 0, kind: input, shape index: {}]   ;;  %s9894_s2 = inlined_call_operand.vmem [shape: f32[64,2,64], index: 2, kind: output, shape index: {}]  }
   0x1   :  { %5969 = vmatprep.subr.mxu0 %v7187_v0  ;;  %5988 = vmatprep.subr.mxu1 %v7187_v0  ;;  %v82_v1 = vld [vmem:[%s9892_s1 + $0x38] sm:$0xff]  ;;  %v81_v3 = vld [vmem:[%s9892_s1 + $0x30] sm:$0xff]  ;;  %v80_v5 = vld [vmem:[%s9892_s1 + $0x28] sm:$0xff] }
   0x2   :  { %v90_v2 = vld [vmem:[%s9892_s1 + $0x78] sm:$0xff]  ;;  %5970 = vmatpush3.msra.mxu0 %v82_v1  ;;  %v89_v4 = vld [vmem:[%s9892_s1 + $0x70] sm:$0xff]  ;;  %v88_v6 = vld [vmem:[%s9892_s1 + $0x68] sm:$0xff]  ;;  %5985 = vmatprep.mubr.msk.f32.mxu0 %vm7188_vm1, %v7187_v0 }
   0x3   :  { %5989 = vmatpush3.msra.mxu1 %v90_v2  ;;  %5971 = vmatprep.subr.mxu0 %v7187_v0  ;;  %v79_v7 = vld [vmem:[%s9892_s1 + $0x20] sm:$0xff]  ;;  %v78_v9 = vld [vmem:[%s9892_s1 + $0x18] sm:$0xff]  ;;  %v77_v11 = vld [vmem:[%s9892_s1 + $0x10] sm:$0xff] }
   0x4   :  { %5990 = vmatprep.subr.mxu1 %v7187_v0  ;;  %5972 = vmatpush3.msra.mxu0 %v81_v3  ;;  %v87_v8 = vld [vmem:[%s9892_s1 + $0x60] sm:$0xff]  ;;  %v86_v10 = vld [vmem:[%s9892_s1 + $0x58] sm:$0xff]  ;;  %v85_v12 = vld [vmem:[%s9892_s1 + $0x50] sm:$0xff] }
   0x5   :  { %5991 = vmatpush3.msra.mxu1 %v89_v4  ;;  %5973 = vmatprep.subr.mxu0 %v7187_v0  ;;  %v76_v13 = vld [vmem:[%s9892_s1 + $0x8] sm:$0xff]  ;;  %v75_v15 = vld [vmem:[%s9892_s1] sm:$0xff]  ;;  %v98_v19 = vld [vmem:[%s9892_s1 + $0xb8] sm:$0xff] }
   0x6   :  { %5992 = vmatprep.subr.mxu1 %v7187_v0  ;;  %5974 = vmatpush3.msra.mxu0 %v80_v5  ;;  %v84_v14 = vld [vmem:[%s9892_s1 + $0x48] sm:$0xff]  ;;  %v83_v16 = vld [vmem:[%s9892_s1 + $0x40] sm:$0xff]  ;;  %v106_v20 = vld [vmem:[%s9892_s1 + $0xf8] sm:$0xff] }
   0x7   :  { %5993 = vmatpush3.msra.mxu1 %v88_v6  ;;  %5975 = vmatprep.subr.mxu0 %v7187_v0  ;;  %v11_v17 = vld [vmem:[%s9893_s0] sm:$0x3]  ;;  %v12_v18 = vld [vmem:[%s9893_s0 + $0x2] sm:$0x3]  ;;  %v97_v21 = vld [vmem:[%s9892_s1 + $0xb0] sm:$0xff] }
   0x8   :  { %5994 = vmatprep.subr.mxu1 %v7187_v0  ;;  %5976 = vmatpush3.msra.mxu0 %v79_v7  ;;  %v105_v22 = vld [vmem:[%s9892_s1 + $0xf0] sm:$0xff]  ;;  %v96_v23 = vld [vmem:[%s9892_s1 + $0xa8] sm:$0xff]  ;;  %v95_v25 = vld [vmem:[%s9892_s1 + $0xa0] sm:$0xff] }
   0x9   :  { %5995 = vmatpush3.msra.mxu1 %v87_v8  ;;  %5977 = vmatprep.subr.mxu0 %v7187_v0  ;;  %v104_v24 = vld [vmem:[%s9892_s1 + $0xe8] sm:$0xff]  ;;  %v103_v26 = vld [vmem:[%s9892_s1 + $0xe0] sm:$0xff]  ;;  %v94_v27 = vld [vmem:[%s9892_s1 + $0x98] sm:$0xff] }
   0xa   :  { %5996 = vmatprep.subr.mxu1 %v7187_v0  ;;  %5978 = vmatpush3.msra.mxu0 %v78_v9  ;;  %v102_v28 = vld [vmem:[%s9892_s1 + $0xd8] sm:$0xff]  ;;  %v93_v29 = vld [vmem:[%s9892_s1 + $0x90] sm:$0xff]  ;;  %v92_v31 = vld [vmem:[%s9892_s1 + $0x88] sm:$0xff] }
   0xb   :  { %5997 = vmatpush3.msra.mxu1 %v86_v10  ;;  %5979 = vmatprep.subr.mxu0 %v7187_v0  ;;  %v101_v30 = vld [vmem:[%s9892_s1 + $0xd0] sm:$0xff]  ;;  %v100_v32 = vld [vmem:[%s9892_s1 + $0xc8] sm:$0xff]  ;;  %v91_v33 = vld [vmem:[%s9892_s1 + $0x80] sm:$0xff] }
   0xc   :  { %5998 = vmatprep.subr.mxu1 %v7187_v0  ;;  %5980 = vmatpush3.msra.mxu0 %v77_v11  ;;  %v99_v34 = vld [vmem:[%s9892_s1 + $0xc0] sm:$0xff]  ;;  %v114_v37 = vld [vmem:[%s9892_s1 + $0x138] sm:$0xff]  ;;  %v113_v39 = vld [vmem:[%s9892_s1 + $0x130] sm:$0xff] }
   0xd   :  { %5999 = vmatpush3.msra.mxu1 %v85_v12  ;;  %5981 = vmatprep.subr.mxu0 %v7187_v0  ;;  %v13_v35 = vld [vmem:[%s9893_s0 + $0x4] sm:$0x3]  ;;  %v14_v36 = vld [vmem:[%s9893_s0 + $0x6] sm:$0x3]  ;;  %v122_v38 = vld [vmem:[%s9892_s1 + $0x178] sm:$0xff] }
   0xe   :  { %6000 = vmatprep.subr.mxu1 %v7187_v0  ;;  %5982 = vmatpush3.msra.mxu0 %v76_v13  ;;  %v121_v40 = vld [vmem:[%s9892_s1 + $0x170] sm:$0xff]  ;;  %v112_v41 = vld [vmem:[%s9892_s1 + $0x128] sm:$0xff]  ;;  %v111_v43 = vld [vmem:[%s9892_s1 + $0x120] sm:$0xff] }
   0xf   :  { %6001 = vmatpush3.msra.mxu1 %v84_v14  ;;  %5983 = vmatprep.subr.mxu0 %v7187_v0  ;;  %v120_v42 = vld [vmem:[%s9892_s1 + $0x168] sm:$0xff]  ;;  %v119_v44 = vld [vmem:[%s9892_s1 + $0x160] sm:$0xff]  ;;  %v110_v45 = vld [vmem:[%s9892_s1 + $0x118] sm:$0xff] }
  0x10   :  { %6002 = vmatprep.subr.mxu1 %v7187_v0  ;;  %5984 = vmatpush3.msra.mxu0 %v75_v15  ;;  %v118_v46 = vld [vmem:[%s9892_s1 + $0x158] sm:$0xff]  ;;  %v109_v47 = vld [vmem:[%s9892_s1 + $0x110] sm:$0xff]  ;;  %v108_v49 = vld [vmem:[%s9892_s1 + $0x108] sm:$0xff] }
  0x11   :  { %6003 = vmatpush3.msra.mxu1 %v83_v16  ;;  %6004 = vmatprep.mubr.msk.f32.mxu1 %vm7188_vm1, %v7187_v0  ;;  %v117_v48 = vld [vmem:[%s9892_s1 + $0x150] sm:$0xff]  ;;  %v116_v50 = vld [vmem:[%s9892_s1 + $0x148] sm:$0xff]  ;;  %v107_v51 = vld [vmem:[%s9892_s1 + $0x100] sm:$0xff] }
  0x12   :  { %5986 = vmatmul.mubr.msk.f32.vlgmr.msra.gmra.mxu0 %vm587_vm0, %v11_v17  ;;  %6005 = vmatmul.mubr.msk.f32.vlgmr.msra.gmra.mxu1 %vm587_vm0, %v12_v18  ;;  %v115_v52 = vld [vmem:[%s9892_s1 + $0x140] sm:$0xff]  ;;  %v15_v53 = vld [vmem:[%s9893_s0 + $0x8] sm:$0x3]  ;;  %v16_v54 = vld [vmem:[%s9893_s0 + $0xa] sm:$0x3] }
  0x13   :  { %6007 = vmatprep.subr.mxu0 %v7187_v0  ;;  %6026 = vmatprep.subr.mxu1 %v7187_v0  ;;  %v130_v55 = vld [vmem:[%s9892_s1 + $0x1b8] sm:$0xff]  ;;  %v129_v57 = vld [vmem:[%s9892_s1 + $0x1b0] sm:$0xff]  ;;  %v128_v59 = vld [vmem:[%s9892_s1 + $0x1a8] sm:$0xff] }
  0x14   :  { %6008 = vmatpush3.msra.mxu0 %v98_v19  ;;  %6027 = vmatpush3.msra.mxu1 %v106_v20  ;;  %v138_v56 = vld [vmem:[%s9892_s1 + $0x1f8] sm:$0xff]  ;;  %v137_v58 = vld [vmem:[%s9892_s1 + $0x1f0] sm:$0xff]  ;;  %v136_v60 = vld [vmem:[%s9892_s1 + $0x1e8] sm:$0xff] }
  0x15   :  { %6009 = vmatprep.subr.mxu0 %v7187_v0  ;;  %6028 = vmatprep.subr.mxu1 %v7187_v0  ;;  %v127_v61 = vld [vmem:[%s9892_s1 + $0x1a0] sm:$0xff]  ;;  %v126_v63 = vld [vmem:[%s9892_s1 + $0x198] sm:$0xff]  ;;  %v125_v2 = vld [vmem:[%s9892_s1 + $0x190] sm:$0xff] }
  0x16   :  { %6010 = vmatpush3.msra.mxu0 %v97_v21  ;;  %6029 = vmatpush3.msra.mxu1 %v105_v22  ;;  %v135_v62 = vld [vmem:[%s9892_s1 + $0x1e0] sm:$0xff]  ;;  %v134_v1 = vld [vmem:[%s9892_s1 + $0x1d8] sm:$0xff]  ;;  %v133_v3 = vld [vmem:[%s9892_s1 + $0x1d0] sm:$0xff] }
  0x17   :  { %6011 = vmatprep.subr.mxu0 %v7187_v0  ;;  %6030 = vmatprep.subr.mxu1 %v7187_v0  ;;  %v124_v4 = vld [vmem:[%s9892_s1 + $0x188] sm:$0xff]  ;;  %v123_v6 = vld [vmem:[%s9892_s1 + $0x180] sm:$0xff]  ;;  %v146_v10 = vld [vmem:[%s9892_s1 + $0x238] sm:$0xff] }
  0x18   :  { %6012 = vmatpush3.msra.mxu0 %v96_v23  ;;  %6031 = vmatpush3.msra.mxu1 %v104_v24  ;;  %v132_v5 = vld [vmem:[%s9892_s1 + $0x1c8] sm:$0xff]  ;;  %v131_v7 = vld [vmem:[%s9892_s1 + $0x1c0] sm:$0xff]  ;;  %v154_v11 = vld [vmem:[%s9892_s1 + $0x278] sm:$0xff] }
  0x19   :  { %6013 = vmatprep.subr.mxu0 %v7187_v0  ;;  %6032 = vmatprep.subr.mxu1 %v7187_v0  ;;  %v17_v8 = vld [vmem:[%s9893_s0 + $0xc] sm:$0x3]  ;;  %v18_v9 = vld [vmem:[%s9893_s0 + $0xe] sm:$0x3]  ;;  %v145_v12 = vld [vmem:[%s9892_s1 + $0x230] sm:$0xff] }
  0x1a   :  { %6014 = vmatpush3.msra.mxu0 %v95_v25  ;;  %6033 = vmatpush3.msra.mxu1 %v103_v26  ;;  %v153_v13 = vld [vmem:[%s9892_s1 + $0x270] sm:$0xff]  ;;  %v144_v14 = vld [vmem:[%s9892_s1 + $0x228] sm:$0xff]  ;;  %v143_v16 = vld [vmem:[%s9892_s1 + $0x220] sm:$0xff] }
  0x1b   :  { %6015 = vmatprep.subr.mxu0 %v7187_v0  ;;  %6034 = vmatprep.subr.mxu1 %v7187_v0  ;;  %v152_v15 = vld [vmem:[%s9892_s1 + $0x268] sm:$0xff]  ;;  %v151_v17 = vld [vmem:[%s9892_s1 + $0x260] sm:$0xff]  ;;  %v142_v18 = vld [vmem:[%s9892_s1 + $0x218] sm:$0xff] }
  0x1c   :  { %6016 = vmatpush3.msra.mxu0 %v94_v27  ;;  %6035 = vmatpush3.msra.mxu1 %v102_v28  ;;  %v150_v19 = vld [vmem:[%s9892_s1 + $0x258] sm:$0xff]  ;;  %v141_v20 = vld [vmem:[%s9892_s1 + $0x210] sm:$0xff]  ;;  %v140_v22 = vld [vmem:[%s9892_s1 + $0x208] sm:$0xff] }
  0x1d   :  { %6017 = vmatprep.subr.mxu0 %v7187_v0  ;;  %6036 = vmatprep.subr.mxu1 %v7187_v0  ;;  %v149_v21 = vld [vmem:[%s9892_s1 + $0x250] sm:$0xff]  ;;  %v148_v23 = vld [vmem:[%s9892_s1 + $0x248] sm:$0xff]  ;;  %v139_v24 = vld [vmem:[%s9892_s1 + $0x200] sm:$0xff] }
  0x1e   :  { %6018 = vmatpush3.msra.mxu0 %v93_v29  ;;  %6037 = vmatpush3.msra.mxu1 %v101_v30  ;;  %v147_v25 = vld [vmem:[%s9892_s1 + $0x240] sm:$0xff]  ;;  %v19_v26 = vld [vmem:[%s9893_s0 + $0x10] sm:$0x3]  ;;  %v20_v27 = vld [vmem:[%s9893_s0 + $0x12] sm:$0x3] }
  0x1f   :  { %6019 = vmatprep.subr.mxu0 %v7187_v0  ;;  %6038 = vmatprep.subr.mxu1 %v7187_v0  ;;  %v162_v28 = vld [vmem:[%s9892_s1 + $0x2b8] sm:$0xff]  ;;  %v161_v30 = vld [vmem:[%s9892_s1 + $0x2b0] sm:$0xff] }
  0x20   :  { %6020 = vmatpush3.msra.mxu0 %v92_v31  ;;  %6039 = vmatpush3.msra.mxu1 %v100_v32  ;;  %v170_v29 = vld [vmem:[%s9892_s1 + $0x2f8] sm:$0xff]  ;;  %v169_v31 = vld [vmem:[%s9892_s1 + $0x2f0] sm:$0xff]  ;;  %v160_v32 = vld [vmem:[%s9892_s1 + $0x2a8] sm:$0xff] }
  0x21   :  { %6021 = vmatprep.subr.mxu0 %v7187_v0  ;;  %6040 = vmatprep.subr.mxu1 %v7187_v0 }
  0x22   :  { %6022 = vmatpush3.msra.mxu0 %v91_v33  ;;  %6023 = vmatprep.mubr.msk.f32.mxu0 %vm7188_vm1, %v7187_v0  ;;  %v168_v33 = vld [vmem:[%s9892_s1 + $0x2e8] sm:$0xff] }
  0x23   :  { %6041 = vmatpush3.msra.mxu1 %v99_v34  ;;  %6042 = vmatprep.mubr.msk.f32.mxu1 %vm7188_vm1, %v7187_v0  ;;  %v159_v34 = vld [vmem:[%s9892_s1 + $0x2a0] sm:$0xff] }
  0x24   :  { %6024 = vmatmul.mubr.msk.f32.vlgmr.msra.gmra.mxu0 %vm587_vm0, %v13_v35  ;;  %6043 = vmatmul.mubr.msk.f32.vlgmr.msra.gmra.mxu1 %vm587_vm0, %v14_v36  ;;  %v167_v35 = vld [vmem:[%s9892_s1 + $0x2e0] sm:$0xff]  ;;  %v158_v36 = vld [vmem:[%s9892_s1 + $0x298] sm:$0xff] }
  0x25   :  { %6045 = vmatprep.subr.mxu0 %v7187_v0  ;;  %6064 = vmatprep.subr.mxu1 %v7187_v0 }
  0x26   :  { %6046 = vmatpush3.msra.mxu0 %v114_v37  ;;  %6065 = vmatpush3.msra.mxu1 %v122_v38  ;;  %v166_v37 = vld [vmem:[%s9892_s1 + $0x2d8] sm:$0xff]  ;;  %v157_v38 = vld [vmem:[%s9892_s1 + $0x290] sm:$0xff] }
  0x27   :  { %6047 = vmatprep.subr.mxu0 %v7187_v0  ;;  %6066 = vmatprep.subr.mxu1 %v7187_v0 }
  0x28   :  { %6048 = vmatpush3.msra.mxu0 %v113_v39  ;;  %6067 = vmatpush3.msra.mxu1 %v121_v40  ;;  %v165_v39 = vld [vmem:[%s9892_s1 + $0x2d0] sm:$0xff]  ;;  %v156_v40 = vld [vmem:[%s9892_s1 + $0x288] sm:$0xff] }
  0x29   :  { %6049 = vmatprep.subr.mxu0 %v7187_v0  ;;  %6068 = vmatprep.subr.mxu1 %v7187_v0 }
  0x2a   :  { %6050 = vmatpush3.msra.mxu0 %v112_v41  ;;  %6069 = vmatpush3.msra.mxu1 %v120_v42  ;;  %v164_v41 = vld [vmem:[%s9892_s1 + $0x2c8] sm:$0xff]  ;;  %v155_v42 = vld [vmem:[%s9892_s1 + $0x280] sm:$0xff] }
  0x2b   :  { %6051 = vmatprep.subr.mxu0 %v7187_v0  ;;  %6070 = vmatprep.subr.mxu1 %v7187_v0 }
  0x2c   :  { %6052 = vmatpush3.msra.mxu0 %v111_v43  ;;  %6071 = vmatpush3.msra.mxu1 %v119_v44  ;;  %v163_v43 = vld [vmem:[%s9892_s1 + $0x2c0] sm:$0xff]  ;;  %v21_v44 = vld [vmem:[%s9893_s0 + $0x14] sm:$0x3] }
  0x2d   :  { %6053 = vmatprep.subr.mxu0 %v7187_v0  ;;  %6072 = vmatprep.subr.mxu1 %v7187_v0 }
  0x2e   :  { %6054 = vmatpush3.msra.mxu0 %v110_v45  ;;  %6073 = vmatpush3.msra.mxu1 %v118_v46  ;;  %v22_v45 = vld [vmem:[%s9893_s0 + $0x16] sm:$0x3]  ;;  %v178_v46 = vld [vmem:[%s9892_s1 + $0x338] sm:$0xff] }
  0x2f   :  { %6055 = vmatprep.subr.mxu0 %v7187_v0  ;;  %6074 = vmatprep.subr.mxu1 %v7187_v0 }
  0x30   :  { %6056 = vmatpush3.msra.mxu0 %v109_v47  ;;  %6075 = vmatpush3.msra.mxu1 %v117_v48  ;;  %v186_v47 = vld [vmem:[%s9892_s1 + $0x378] sm:$0xff]  ;;  %v177_v48 = vld [vmem:[%s9892_s1 + $0x330] sm:$0xff] }
  0x31   :  { %6057 = vmatprep.subr.mxu0 %v7187_v0  ;;  %6076 = vmatprep.subr.mxu1 %v7187_v0 }
  0x32   :  { %6058 = vmatpush3.msra.mxu0 %v108_v49  ;;  %6077 = vmatpush3.msra.mxu1 %v116_v50  ;;  %v185_v49 = vld [vmem:[%s9892_s1 + $0x370] sm:$0xff]  ;;  %v176_v50 = vld [vmem:[%s9892_s1 + $0x328] sm:$0xff] }
  0x33   :  { %6059 = vmatprep.subr.mxu0 %v7187_v0  ;;  %6078 = vmatprep.subr.mxu1 %v7187_v0 }
  0x34   :  { %6060 = vmatpush3.msra.mxu0 %v107_v51  ;;  %6061 = vmatprep.mubr.msk.f32.mxu0 %vm7188_vm1, %v7187_v0  ;;  %v184_v51 = vld [vmem:[%s9892_s1 + $0x368] sm:$0xff] }
  0x35   :  { %6079 = vmatpush3.msra.mxu1 %v115_v52  ;;  %6080 = vmatprep.mubr.msk.f32.mxu1 %vm7188_vm1, %v7187_v0  ;;  %v175_v52 = vld [vmem:[%s9892_s1 + $0x320] sm:$0xff] }
  0x36   :  { %6062 = vmatmul.mubr.msk.f32.vlgmr.msra.gmra.mxu0 %vm587_vm0, %v15_v53  ;;  %6081 = vmatmul.mubr.msk.f32.vlgmr.msra.gmra.mxu1 %vm587_vm0, %v16_v54  ;;  %v183_v53 = vld [vmem:[%s9892_s1 + $0x360] sm:$0xff]  ;;  %v174_v54 = vld [vmem:[%s9892_s1 + $0x318] sm:$0xff] }
  0x37   :  { %6083 = vmatprep.subr.mxu0 %v7187_v0  ;;  %6102 = vmatprep.subr.mxu1 %v7187_v0 }
  0x38   :  { %6084 = vmatpush3.msra.mxu0 %v130_v55  ;;  %6103 = vmatpush3.msra.mxu1 %v138_v56  ;;  %v182_v55 = vld [vmem:[%s9892_s1 + $0x358] sm:$0xff]  ;;  %v173_v56 = vld [vmem:[%s9892_s1 + $0x310] sm:$0xff] }
  0x39   :  { %6085 = vmatprep.subr.mxu0 %v7187_v0  ;;  %6104 = vmatprep.subr.mxu1 %v7187_v0 }
  0x3a   :  { %6086 = vmatpush3.msra.mxu0 %v129_v57  ;;  %6105 = vmatpush3.msra.mxu1 %v137_v58  ;;  %v181_v57 = vld [vmem:[%s9892_s1 + $0x350] sm:$0xff]  ;;  %v172_v58 = vld [vmem:[%s9892_s1 + $0x308] sm:$0xff] }
  0x3b   :  { %6087 = vmatprep.subr.mxu0 %v7187_v0  ;;  %6106 = vmatprep.subr.mxu1 %v7187_v0 }
  0x3c   :  { %6088 = vmatpush3.msra.mxu0 %v128_v59  ;;  %6107 = vmatpush3.msra.mxu1 %v136_v60  ;;  %v180_v59 = vld [vmem:[%s9892_s1 + $0x348] sm:$0xff]  ;;  %v171_v60 = vld [vmem:[%s9892_s1 + $0x300] sm:$0xff] }
  0x3d   :  { %6089 = vmatprep.subr.mxu0 %v7187_v0  ;;  %6108 = vmatprep.subr.mxu1 %v7187_v0 }
  0x3e   :  { %6090 = vmatpush3.msra.mxu0 %v127_v61  ;;  %6109 = vmatpush3.msra.mxu1 %v135_v62  ;;  %v179_v61 = vld [vmem:[%s9892_s1 + $0x340] sm:$0xff]  ;;  %v23_v62 = vld [vmem:[%s9893_s0 + $0x18] sm:$0x3] }
  0x3f   :  { %6091 = vmatprep.subr.mxu0 %v7187_v0  ;;  %6110 = vmatprep.subr.mxu1 %v7187_v0 }
  0x40   :  { %6092 = vmatpush3.msra.mxu0 %v126_v63  ;;  %6111 = vmatpush3.msra.mxu1 %v134_v1  ;;  %v24_v63 = vld [vmem:[%s9893_s0 + $0x1a] sm:$0x3] }
  0x41   :  { %6093 = vmatprep.subr.mxu0 %v7187_v0  ;;  %6112 = vmatprep.subr.mxu1 %v7187_v0  ;;  %v194_v1 = vld [vmem:[%s9892_s1 + $0x3b8] sm:$0xff] }
  0x42   :  { %6094 = vmatpush3.msra.mxu0 %v125_v2  ;;  %6113 = vmatpush3.msra.mxu1 %v133_v3  ;;  %v202_v2 = vld [vmem:[%s9892_s1 + $0x3f8] sm:$0xff]  ;;  %v193_v3 = vld [vmem:[%s9892_s1 + $0x3b0] sm:$0xff] }
  0x43   :  { %6095 = vmatprep.subr.mxu0 %v7187_v0  ;;  %6114 = vmatprep.subr.mxu1 %v7187_v0 }
  0x44   :  { %6096 = vmatpush3.msra.mxu0 %v124_v4  ;;  %6115 = vmatpush3.msra.mxu1 %v132_v5  ;;  %v201_v4 = vld [vmem:[%s9892_s1 + $0x3f0] sm:$0xff]  ;;  %v192_v5 = vld [vmem:[%s9892_s1 + $0x3a8] sm:$0xff] }
  0x45   :  { %6097 = vmatprep.subr.mxu0 %v7187_v0  ;;  %6116 = vmatprep.subr.mxu1 %v7187_v0 }
  0x46   :  { %6098 = vmatpush3.msra.mxu0 %v123_v6  ;;  %6099 = vmatprep.mubr.msk.f32.mxu0 %vm7188_vm1, %v7187_v0  ;;  %v200_v6 = vld [vmem:[%s9892_s1 + $0x3e8] sm:$0xff] }
  0x47   :  { %6117 = vmatpush3.msra.mxu1 %v131_v7  ;;  %6118 = vmatprep.mubr.msk.f32.mxu1 %vm7188_vm1, %v7187_v0  ;;  %v191_v7 = vld [vmem:[%s9892_s1 + $0x3a0] sm:$0xff] }
  0x48   :  { %6100 = vmatmul.mubr.msk.f32.vlgmr.msra.gmra.mxu0 %vm587_vm0, %v17_v8  ;;  %6119 = vmatmul.mubr.msk.f32.vlgmr.msra.gmra.mxu1 %vm587_vm0, %v18_v9  ;;  %v199_v8 = vld [vmem:[%s9892_s1 + $0x3e0] sm:$0xff]  ;;  %v190_v9 = vld [vmem:[%s9892_s1 + $0x398] sm:$0xff] }
  0x49   :  { %6121 = vmatprep.subr.mxu0 %v7187_v0  ;;  %6140 = vmatprep.subr.mxu1 %v7187_v0 }
  0x4a   :  { %6122 = vmatpush3.msra.mxu0 %v146_v10  ;;  %6141 = vmatpush3.msra.mxu1 %v154_v11  ;;  %v198_v10 = vld [vmem:[%s9892_s1 + $0x3d8] sm:$0xff]  ;;  %v189_v11 = vld [vmem:[%s9892_s1 + $0x390] sm:$0xff] }
  0x4b   :  { %6123 = vmatprep.subr.mxu0 %v7187_v0  ;;  %6142 = vmatprep.subr.mxu1 %v7187_v0 }
  0x4c   :  { %6124 = vmatpush3.msra.mxu0 %v145_v12  ;;  %6143 = vmatpush3.msra.mxu1 %v153_v13  ;;  %v197_v12 = vld [vmem:[%s9892_s1 + $0x3d0] sm:$0xff]  ;;  %v188_v13 = vld [vmem:[%s9892_s1 + $0x388] sm:$0xff] }
  0x4d   :  { %6125 = vmatprep.subr.mxu0 %v7187_v0  ;;  %6144 = vmatprep.subr.mxu1 %v7187_v0 }
  0x4e   :  { %6126 = vmatpush3.msra.mxu0 %v144_v14  ;;  %6145 = vmatpush3.msra.mxu1 %v152_v15  ;;  %v196_v14 = vld [vmem:[%s9892_s1 + $0x3c8] sm:$0xff]  ;;  %v187_v15 = vld [vmem:[%s9892_s1 + $0x380] sm:$0xff] }
  0x4f   :  { %6127 = vmatprep.subr.mxu0 %v7187_v0  ;;  %6146 = vmatprep.subr.mxu1 %v7187_v0 }
  0x50   :  { %6128 = vmatpush3.msra.mxu0 %v143_v16  ;;  %6147 = vmatpush3.msra.mxu1 %v151_v17  ;;  %v195_v16 = vld [vmem:[%s9892_s1 + $0x3c0] sm:$0xff]  ;;  %v25_v17 = vld [vmem:[%s9893_s0 + $0x1c] sm:$0x3] }
  0x51   :  { %6129 = vmatprep.subr.mxu0 %v7187_v0  ;;  %6148 = vmatprep.subr.mxu1 %v7187_v0 }
  0x52   :  { %6130 = vmatpush3.msra.mxu0 %v142_v18  ;;  %6149 = vmatpush3.msra.mxu1 %v150_v19  ;;  %v26_v18 = vld [vmem:[%s9893_s0 + $0x1e] sm:$0x3] }
  0x53   :  { %6131 = vmatprep.subr.mxu0 %v7187_v0  ;;  %6150 = vmatprep.subr.mxu1 %v7187_v0  ;;  %v210_v19 = vld [vmem:[%s9892_s1 + $0x438] sm:$0xff] }
  0x54   :  { %6132 = vmatpush3.msra.mxu0 %v141_v20  ;;  %6151 = vmatpush3.msra.mxu1 %v149_v21  ;;  %v218_v20 = vld [vmem:[%s9892_s1 + $0x478] sm:$0xff]  ;;  %v209_v21 = vld [vmem:[%s9892_s1 + $0x430] sm:$0xff] }
  0x55   :  { %6133 = vmatprep.subr.mxu0 %v7187_v0  ;;  %6152 = vmatprep.subr.mxu1 %v7187_v0 }
  0x56   :  { %6134 = vmatpush3.msra.mxu0 %v140_v22  ;;  %6153 = vmatpush3.msra.mxu1 %v148_v23  ;;  %v217_v22 = vld [vmem:[%s9892_s1 + $0x470] sm:$0xff]  ;;  %v208_v23 = vld [vmem:[%s9892_s1 + $0x428] sm:$0xff] }
  0x57   :  { %6135 = vmatprep.subr.mxu0 %v7187_v0  ;;  %6154 = vmatprep.subr.mxu1 %v7187_v0 }
  0x58   :  { %6136 = vmatpush3.msra.mxu0 %v139_v24  ;;  %6137 = vmatprep.mubr.msk.f32.mxu0 %vm7188_vm1, %v7187_v0  ;;  %v216_v24 = vld [vmem:[%s9892_s1 + $0x468] sm:$0xff] }
  0x59   :  { %6155 = vmatpush3.msra.mxu1 %v147_v25  ;;  %6156 = vmatprep.mubr.msk.f32.mxu1 %vm7188_vm1, %v7187_v0  ;;  %v207_v25 = vld [vmem:[%s9892_s1 + $0x420] sm:$0xff] }
  0x5a   :  { %6138 = vmatmul.mubr.msk.f32.vlgmr.msra.gmra.mxu0 %vm587_vm0, %v19_v26  ;;  %6157 = vmatmul.mubr.msk.f32.vlgmr.msra.gmra.mxu1 %vm587_vm0, %v20_v27  ;;  %v215_v26 = vld [vmem:[%s9892_s1 + $0x460] sm:$0xff]  ;;  %v206_v27 = vld [vmem:[%s9892_s1 + $0x418] sm:$0xff] }
  0x5b   :  { %6159 = vmatprep.subr.mxu0 %v7187_v0  ;;  %6178 = vmatprep.subr.mxu1 %v7187_v0 }
  0x5c   :  { %6160 = vmatpush3.msra.mxu0 %v162_v28  ;;  %6179 = vmatpush3.msra.mxu1 %v170_v29  ;;  %v214_v28 = vld [vmem:[%s9892_s1 + $0x458] sm:$0xff]  ;;  %v205_v29 = vld [vmem:[%s9892_s1 + $0x410] sm:$0xff] }
  0x5d   :  { %6161 = vmatprep.subr.mxu0 %v7187_v0  ;;  %6180 = vmatprep.subr.mxu1 %v7187_v0 }
  0x5e   :  { %6162 = vmatpush3.msra.mxu0 %v161_v30  ;;  %6181 = vmatpush3.msra.mxu1 %v169_v31  ;;  %v213_v30 = vld [vmem:[%s9892_s1 + $0x450] sm:$0xff]  ;;  %v204_v31 = vld [vmem:[%s9892_s1 + $0x408] sm:$0xff] }
  0x5f   :  { %6163 = vmatprep.subr.mxu0 %v7187_v0  ;;  %6182 = vmatprep.subr.mxu1 %v7187_v0 }
  0x60   :  { %6164 = vmatpush3.msra.mxu0 %v160_v32  ;;  %6183 = vmatpush3.msra.mxu1 %v168_v33  ;;  %v212_v32 = vld [vmem:[%s9892_s1 + $0x448] sm:$0xff]  ;;  %v203_v33 = vld [vmem:[%s9892_s1 + $0x400] sm:$0xff] }
  0x61   :  { %6165 = vmatprep.subr.mxu0 %v7187_v0  ;;  %6184 = vmatprep.subr.mxu1 %v7187_v0 }
  0x62   :  { %6166 = vmatpush3.msra.mxu0 %v159_v34  ;;  %6185 = vmatpush3.msra.mxu1 %v167_v35  ;;  %v211_v34 = vld [vmem:[%s9892_s1 + $0x440] sm:$0xff] }
  0x63   :  { %6167 = vmatprep.subr.mxu0 %v7187_v0  ;;  %6186 = vmatprep.subr.mxu1 %v7187_v0  ;;  %v27_v35 = vld [vmem:[%s9893_s0 + $0x20] sm:$0x3] }
  0x64   :  { %6168 = vmatpush3.msra.mxu0 %v158_v36  ;;  %6187 = vmatpush3.msra.mxu1 %v166_v37  ;;  %v28_v36 = vld [vmem:[%s9893_s0 + $0x22] sm:$0x3]  ;;  %v226_v37 = vld [vmem:[%s9892_s1 + $0x4b8] sm:$0xff] }
  0x65   :  { %6169 = vmatprep.subr.mxu0 %v7187_v0  ;;  %6188 = vmatprep.subr.mxu1 %v7187_v0 }
  0x66   :  { %6170 = vmatpush3.msra.mxu0 %v157_v38  ;;  %6189 = vmatpush3.msra.mxu1 %v165_v39  ;;  %v234_v38 = vld [vmem:[%s9892_s1 + $0x4f8] sm:$0xff]  ;;  %v225_v39 = vld [vmem:[%s9892_s1 + $0x4b0] sm:$0xff] }
  0x67   :  { %6171 = vmatprep.subr.mxu0 %v7187_v0  ;;  %6190 = vmatprep.subr.mxu1 %v7187_v0 }
  0x68   :  { %6172 = vmatpush3.msra.mxu0 %v156_v40  ;;  %6191 = vmatpush3.msra.mxu1 %v164_v41  ;;  %v233_v40 = vld [vmem:[%s9892_s1 + $0x4f0] sm:$0xff]  ;;  %v224_v41 = vld [vmem:[%s9892_s1 + $0x4a8] sm:$0xff] }
  0x69   :  { %6173 = vmatprep.subr.mxu0 %v7187_v0  ;;  %6192 = vmatprep.subr.mxu1 %v7187_v0 }
  0x6a   :  { %6174 = vmatpush3.msra.mxu0 %v155_v42  ;;  %6175 = vmatprep.mubr.msk.f32.mxu0 %vm7188_vm1, %v7187_v0  ;;  %v232_v42 = vld [vmem:[%s9892_s1 + $0x4e8] sm:$0xff] }
  0x6b   :  { %6193 = vmatpush3.msra.mxu1 %v163_v43  ;;  %6194 = vmatprep.mubr.msk.f32.mxu1 %vm7188_vm1, %v7187_v0  ;;  %v223_v43 = vld [vmem:[%s9892_s1 + $0x4a0] sm:$0xff] }
  0x6c   :  { %6176 = vmatmul.mubr.msk.f32.vlgmr.msra.gmra.mxu0 %vm587_vm0, %v21_v44  ;;  %6195 = vmatmul.mubr.msk.f32.vlgmr.msra.gmra.mxu1 %vm587_vm0, %v22_v45  ;;  %v231_v44 = vld [vmem:[%s9892_s1 + $0x4e0] sm:$0xff]  ;;  %v222_v45 = vld [vmem:[%s9892_s1 + $0x498] sm:$0xff] }
  0x6d   :  { %6197 = vmatprep.subr.mxu0 %v7187_v0  ;;  %6216 = vmatprep.subr.mxu1 %v7187_v0 }
  0x6e   :  { %6198 = vmatpush3.msra.mxu0 %v178_v46  ;;  %6217 = vmatpush3.msra.mxu1 %v186_v47  ;;  %v230_v46 = vld [vmem:[%s9892_s1 + $0x4d8] sm:$0xff]  ;;  %v221_v47 = vld [vmem:[%s9892_s1 + $0x490] sm:$0xff] }
  0x6f   :  { %6199 = vmatprep.subr.mxu0 %v7187_v0  ;;  %6218 = vmatprep.subr.mxu1 %v7187_v0 }
  0x70   :  { %6200 = vmatpush3.msra.mxu0 %v177_v48  ;;  %6219 = vmatpush3.msra.mxu1 %v185_v49  ;;  %v229_v48 = vld [vmem:[%s9892_s1 + $0x4d0] sm:$0xff]  ;;  %v220_v49 = vld [vmem:[%s9892_s1 + $0x488] sm:$0xff] }
  0x71   :  { %6201 = vmatprep.subr.mxu0 %v7187_v0  ;;  %6220 = vmatprep.subr.mxu1 %v7187_v0 }
  0x72   :  { %6202 = vmatpush3.msra.mxu0 %v176_v50  ;;  %6221 = vmatpush3.msra.mxu1 %v184_v51  ;;  %v228_v50 = vld [vmem:[%s9892_s1 + $0x4c8] sm:$0xff]  ;;  %v219_v51 = vld [vmem:[%s9892_s1 + $0x480] sm:$0xff] }
  0x73   :  { %6203 = vmatprep.subr.mxu0 %v7187_v0  ;;  %6222 = vmatprep.subr.mxu1 %v7187_v0 }
  0x74   :  { %6204 = vmatpush3.msra.mxu0 %v175_v52  ;;  %6223 = vmatpush3.msra.mxu1 %v183_v53  ;;  %v227_v52 = vld [vmem:[%s9892_s1 + $0x4c0] sm:$0xff] }
  0x75   :  { %6205 = vmatprep.subr.mxu0 %v7187_v0  ;;  %6224 = vmatprep.subr.mxu1 %v7187_v0  ;;  %v29_v53 = vld [vmem:[%s9893_s0 + $0x24] sm:$0x3] }
  0x76   :  { %6206 = vmatpush3.msra.mxu0 %v174_v54  ;;  %6225 = vmatpush3.msra.mxu1 %v182_v55  ;;  %v30_v54 = vld [vmem:[%s9893_s0 + $0x26] sm:$0x3]  ;;  %v242_v55 = vld [vmem:[%s9892_s1 + $0x538] sm:$0xff] }
  0x77   :  { %6207 = vmatprep.subr.mxu0 %v7187_v0  ;;  %6226 = vmatprep.subr.mxu1 %v7187_v0 }
  0x78   :  { %6208 = vmatpush3.msra.mxu0 %v173_v56  ;;  %6227 = vmatpush3.msra.mxu1 %v181_v57  ;;  %v250_v56 = vld [vmem:[%s9892_s1 + $0x578] sm:$0xff]  ;;  %v241_v57 = vld [vmem:[%s9892_s1 + $0x530] sm:$0xff] }
  0x79   :  { %6209 = vmatprep.subr.mxu0 %v7187_v0  ;;  %6228 = vmatprep.subr.mxu1 %v7187_v0 }
  0x7a   :  { %6210 = vmatpush3.msra.mxu0 %v172_v58  ;;  %6229 = vmatpush3.msra.mxu1 %v180_v59  ;;  %v249_v58 = vld [vmem:[%s9892_s1 + $0x570] sm:$0xff]  ;;  %v240_v59 = vld [vmem:[%s9892_s1 + $0x528] sm:$0xff] }
  0x7b   :  { %6211 = vmatprep.subr.mxu0 %v7187_v0  ;;  %6230 = vmatprep.subr.mxu1 %v7187_v0 }
  0x7c   :  { %6212 = vmatpush3.msra.mxu0 %v171_v60  ;;  %6213 = vmatprep.mubr.msk.f32.mxu0 %vm7188_vm1, %v7187_v0  ;;  %v248_v60 = vld [vmem:[%s9892_s1 + $0x568] sm:$0xff] }
  0x7d   :  { %6231 = vmatpush3.msra.mxu1 %v179_v61  ;;  %6232 = vmatprep.mubr.msk.f32.mxu1 %vm7188_vm1, %v7187_v0  ;;  %v239_v61 = vld [vmem:[%s9892_s1 + $0x520] sm:$0xff] }
  0x7e   :  { %6214 = vmatmul.mubr.msk.f32.vlgmr.msra.gmra.mxu0 %vm587_vm0, %v23_v62  ;;  %6233 = vmatmul.mubr.msk.f32.vlgmr.msra.gmra.mxu1 %vm587_vm0, %v24_v63  ;;  %v247_v62 = vld [vmem:[%s9892_s1 + $0x560] sm:$0xff]  ;;  %v238_v63 = vld [vmem:[%s9892_s1 + $0x518] sm:$0xff] }
  0x7f   :  { %6235 = vmatprep.subr.mxu0 %v7187_v0  ;;  %6254 = vmatprep.subr.mxu1 %v7187_v0 }
  0x80   :  { %6236 = vmatpush3.msra.mxu0 %v194_v1  ;;  %6255 = vmatpush3.msra.mxu1 %v202_v2  ;;  %v246_v1 = vld [vmem:[%s9892_s1 + $0x558] sm:$0xff]  ;;  %v237_v2 = vld [vmem:[%s9892_s1 + $0x510] sm:$0xff] }
  0x81   :  { %6237 = vmatprep.subr.mxu0 %v7187_v0  ;;  %6256 = vmatprep.subr.mxu1 %v7187_v0 }
  0x82   :  { %6238 = vmatpush3.msra.mxu0 %v193_v3  ;;  %6257 = vmatpush3.msra.mxu1 %v201_v4  ;;  %v245_v3 = vld [vmem:[%s9892_s1 + $0x550] sm:$0xff]  ;;  %v236_v4 = vld [vmem:[%s9892_s1 + $0x508] sm:$0xff] }
  0x83   :  { %6239 = vmatprep.subr.mxu0 %v7187_v0  ;;  %6258 = vmatprep.subr.mxu1 %v7187_v0 }
  0x84   :  { %6240 = vmatpush3.msra.mxu0 %v192_v5  ;;  %6259 = vmatpush3.msra.mxu1 %v200_v6  ;;  %v244_v5 = vld [vmem:[%s9892_s1 + $0x548] sm:$0xff]  ;;  %v235_v6 = vld [vmem:[%s9892_s1 + $0x500] sm:$0xff] }
  0x85   :  { %6241 = vmatprep.subr.mxu0 %v7187_v0  ;;  %6260 = vmatprep.subr.mxu1 %v7187_v0 }
  0x86   :  { %6242 = vmatpush3.msra.mxu0 %v191_v7  ;;  %6261 = vmatpush3.msra.mxu1 %v199_v8  ;;  %v243_v7 = vld [vmem:[%s9892_s1 + $0x540] sm:$0xff]  ;;  %v31_v8 = vld [vmem:[%s9893_s0 + $0x28] sm:$0x3] }
  0x87   :  { %6243 = vmatprep.subr.mxu0 %v7187_v0  ;;  %6262 = vmatprep.subr.mxu1 %v7187_v0 }
  0x88   :  { %6244 = vmatpush3.msra.mxu0 %v190_v9  ;;  %6263 = vmatpush3.msra.mxu1 %v198_v10  ;;  %v32_v9 = vld [vmem:[%s9893_s0 + $0x2a] sm:$0x3]  ;;  %v258_v10 = vld [vmem:[%s9892_s1 + $0x5b8] sm:$0xff] }
  0x89   :  { %6245 = vmatprep.subr.mxu0 %v7187_v0  ;;  %6264 = vmatprep.subr.mxu1 %v7187_v0 }
  0x8a   :  { %6246 = vmatpush3.msra.mxu0 %v189_v11  ;;  %6265 = vmatpush3.msra.mxu1 %v197_v12  ;;  %v266_v11 = vld [vmem:[%s9892_s1 + $0x5f8] sm:$0xff]  ;;  %v257_v12 = vld [vmem:[%s9892_s1 + $0x5b0] sm:$0xff] }
  0x8b   :  { %6247 = vmatprep.subr.mxu0 %v7187_v0  ;;  %6266 = vmatprep.subr.mxu1 %v7187_v0 }
  0x8c   :  { %6248 = vmatpush3.msra.mxu0 %v188_v13  ;;  %6267 = vmatpush3.msra.mxu1 %v196_v14  ;;  %v265_v13 = vld [vmem:[%s9892_s1 + $0x5f0] sm:$0xff]  ;;  %v256_v14 = vld [vmem:[%s9892_s1 + $0x5a8] sm:$0xff] }
  0x8d   :  { %6249 = vmatprep.subr.mxu0 %v7187_v0  ;;  %6268 = vmatprep.subr.mxu1 %v7187_v0 }
  0x8e   :  { %6250 = vmatpush3.msra.mxu0 %v187_v15  ;;  %6251 = vmatprep.mubr.msk.f32.mxu0 %vm7188_vm1, %v7187_v0  ;;  %v264_v15 = vld [vmem:[%s9892_s1 + $0x5e8] sm:$0xff] }
  0x8f   :  { %6269 = vmatpush3.msra.mxu1 %v195_v16  ;;  %6270 = vmatprep.mubr.msk.f32.mxu1 %vm7188_vm1, %v7187_v0  ;;  %v255_v16 = vld [vmem:[%s9892_s1 + $0x5a0] sm:$0xff] }
  0x90   :  { %6252 = vmatmul.mubr.msk.f32.vlgmr.msra.gmra.mxu0 %vm587_vm0, %v25_v17  ;;  %6271 = vmatmul.mubr.msk.f32.vlgmr.msra.gmra.mxu1 %vm587_vm0, %v26_v18  ;;  %v263_v17 = vld [vmem:[%s9892_s1 + $0x5e0] sm:$0xff]  ;;  %v254_v18 = vld [vmem:[%s9892_s1 + $0x598] sm:$0xff] }
  0x91   :  { %6273 = vmatprep.subr.mxu0 %v7187_v0  ;;  %6292 = vmatprep.subr.mxu1 %v7187_v0 }
  0x92   :  { %6274 = vmatpush3.msra.mxu0 %v210_v19  ;;  %6293 = vmatpush3.msra.mxu1 %v218_v20  ;;  %v262_v19 = vld [vmem:[%s9892_s1 + $0x5d8] sm:$0xff]  ;;  %v253_v20 = vld [vmem:[%s9892_s1 + $0x590] sm:$0xff] }
  0x93   :  { %6275 = vmatprep.subr.mxu0 %v7187_v0  ;;  %6294 = vmatprep.subr.mxu1 %v7187_v0 }
  0x94   :  { %6276 = vmatpush3.msra.mxu0 %v209_v21  ;;  %6295 = vmatpush3.msra.mxu1 %v217_v22  ;;  %v261_v21 = vld [vmem:[%s9892_s1 + $0x5d0] sm:$0xff]  ;;  %v252_v22 = vld [vmem:[%s9892_s1 + $0x588] sm:$0xff] }
  0x95   :  { %6277 = vmatprep.subr.mxu0 %v7187_v0  ;;  %6296 = vmatprep.subr.mxu1 %v7187_v0 }
  0x96   :  { %6278 = vmatpush3.msra.mxu0 %v208_v23  ;;  %6297 = vmatpush3.msra.mxu1 %v216_v24  ;;  %v260_v23 = vld [vmem:[%s9892_s1 + $0x5c8] sm:$0xff] }
  0x97   :  { %6279 = vmatprep.subr.mxu0 %v7187_v0  ;;  %6298 = vmatprep.subr.mxu1 %v7187_v0 }
  0x98   :  { %6280 = vmatpush3.msra.mxu0 %v207_v25  ;;  %6299 = vmatpush3.msra.mxu1 %v215_v26  ;;  %v251_v26 = vld [vmem:[%s9892_s1 + $0x580] sm:$0xff] }
  0x99   :  { %6281 = vmatprep.subr.mxu0 %v7187_v0  ;;  %6300 = vmatprep.subr.mxu1 %v7187_v0 }
  0x9a   :  { %6282 = vmatpush3.msra.mxu0 %v206_v27  ;;  %6301 = vmatpush3.msra.mxu1 %v214_v28  ;;  %v259_v27 = vld [vmem:[%s9892_s1 + $0x5c0] sm:$0xff] }
  0x9b   :  { %6283 = vmatprep.subr.mxu0 %v7187_v0  ;;  %6302 = vmatprep.subr.mxu1 %v7187_v0 }
  0x9c   :  { %6284 = vmatpush3.msra.mxu0 %v205_v29  ;;  %6303 = vmatpush3.msra.mxu1 %v213_v30  ;;  %v33_v30 = vld [vmem:[%s9893_s0 + $0x2c] sm:$0x3] }
  0x9d   :  { %6285 = vmatprep.subr.mxu0 %v7187_v0  ;;  %6304 = vmatprep.subr.mxu1 %v7187_v0 }
  0x9e   :  { %6286 = vmatpush3.msra.mxu0 %v204_v31  ;;  %6305 = vmatpush3.msra.mxu1 %v212_v32  ;;  %v34_v31 = vld [vmem:[%s9893_s0 + $0x2e] sm:$0x3]  ;;  %v274_v32 = vld [vmem:[%s9892_s1 + $0x638] sm:$0xff] }
  0x9f   :  { %6287 = vmatprep.subr.mxu0 %v7187_v0  ;;  %6306 = vmatprep.subr.mxu1 %v7187_v0 }
  0xa0   :  { %6288 = vmatpush3.msra.mxu0 %v203_v33  ;;  %6289 = vmatprep.mubr.msk.f32.mxu0 %vm7188_vm1, %v7187_v0  ;;  %v282_v33 = vld [vmem:[%s9892_s1 + $0x678] sm:$0xff] }
  0xa1   :  { %6307 = vmatpush3.msra.mxu1 %v211_v34  ;;  %6308 = vmatprep.mubr.msk.f32.mxu1 %vm7188_vm1, %v7187_v0  ;;  %v273_v34 = vld [vmem:[%s9892_s1 + $0x630] sm:$0xff] }
  0xa2   :  { %6290 = vmatmul.mubr.msk.f32.vlgmr.msra.gmra.mxu0 %vm587_vm0, %v27_v35  ;;  %6309 = vmatmul.mubr.msk.f32.vlgmr.msra.gmra.mxu1 %vm587_vm0, %v28_v36  ;;  %v281_v35 = vld [vmem:[%s9892_s1 + $0x670] sm:$0xff]  ;;  %v272_v36 = vld [vmem:[%s9892_s1 + $0x628] sm:$0xff] }
  0xa3   :  { %6311 = vmatprep.subr.mxu0 %v7187_v0  ;;  %6330 = vmatprep.subr.mxu1 %v7187_v0 }
  0xa4   :  { %6312 = vmatpush3.msra.mxu0 %v226_v37  ;;  %6331 = vmatpush3.msra.mxu1 %v234_v38  ;;  %v280_v37 = vld [vmem:[%s9892_s1 + $0x668] sm:$0xff]  ;;  %v271_v38 = vld [vmem:[%s9892_s1 + $0x620] sm:$0xff] }
  0xa5   :  { %6313 = vmatprep.subr.mxu0 %v7187_v0  ;;  %6332 = vmatprep.subr.mxu1 %v7187_v0 }
  0xa6   :  { %6314 = vmatpush3.msra.mxu0 %v225_v39  ;;  %6333 = vmatpush3.msra.mxu1 %v233_v40  ;;  %v279_v39 = vld [vmem:[%s9892_s1 + $0x660] sm:$0xff]  ;;  %v270_v40 = vld [vmem:[%s9892_s1 + $0x618] sm:$0xff] }
  0xa7   :  { %6315 = vmatprep.subr.mxu0 %v7187_v0  ;;  %6334 = vmatprep.subr.mxu1 %v7187_v0 }
  0xa8   :  { %6316 = vmatpush3.msra.mxu0 %v224_v41  ;;  %6335 = vmatpush3.msra.mxu1 %v232_v42  ;;  %v278_v41 = vld [vmem:[%s9892_s1 + $0x658] sm:$0xff]  ;;  %v269_v42 = vld [vmem:[%s9892_s1 + $0x610] sm:$0xff] }
  0xa9   :  { %6317 = vmatprep.subr.mxu0 %v7187_v0  ;;  %6336 = vmatprep.subr.mxu1 %v7187_v0 }
  0xaa   :  { %6318 = vmatpush3.msra.mxu0 %v223_v43  ;;  %6337 = vmatpush3.msra.mxu1 %v231_v44  ;;  %v277_v43 = vld [vmem:[%s9892_s1 + $0x650] sm:$0xff]  ;;  %v268_v44 = vld [vmem:[%s9892_s1 + $0x608] sm:$0xff] }
  0xab   :  { %6319 = vmatprep.subr.mxu0 %v7187_v0  ;;  %6338 = vmatprep.subr.mxu1 %v7187_v0 }
  0xac   :  { %6320 = vmatpush3.msra.mxu0 %v222_v45  ;;  %6339 = vmatpush3.msra.mxu1 %v230_v46  ;;  %v276_v45 = vld [vmem:[%s9892_s1 + $0x648] sm:$0xff] }
  0xad   :  { %6321 = vmatprep.subr.mxu0 %v7187_v0  ;;  %6340 = vmatprep.subr.mxu1 %v7187_v0 }
  0xae   :  { %6322 = vmatpush3.msra.mxu0 %v221_v47  ;;  %6341 = vmatpush3.msra.mxu1 %v229_v48  ;;  %v267_v48 = vld [vmem:[%s9892_s1 + $0x600] sm:$0xff] }
  0xaf   :  { %6323 = vmatprep.subr.mxu0 %v7187_v0  ;;  %6342 = vmatprep.subr.mxu1 %v7187_v0 }
  0xb0   :  { %6324 = vmatpush3.msra.mxu0 %v220_v49  ;;  %6343 = vmatpush3.msra.mxu1 %v228_v50  ;;  %v275_v49 = vld [vmem:[%s9892_s1 + $0x640] sm:$0xff] }
  0xb1   :  { %6325 = vmatprep.subr.mxu0 %v7187_v0  ;;  %6344 = vmatprep.subr.mxu1 %v7187_v0 }
  0xb2   :  { %6326 = vmatpush3.msra.mxu0 %v219_v51  ;;  %6327 = vmatprep.mubr.msk.f32.mxu0 %vm7188_vm1, %v7187_v0 }
  0xb3   :  { %6345 = vmatpush3.msra.mxu1 %v227_v52  ;;  %6346 = vmatprep.mubr.msk.f32.mxu1 %vm7188_vm1, %v7187_v0  ;;  %v35_v52 = vld [vmem:[%s9893_s0 + $0x30] sm:$0x3] }
  0xb4   :  { %6328 = vmatmul.mubr.msk.f32.vlgmr.msra.gmra.mxu0 %vm587_vm0, %v29_v53  ;;  %6347 = vmatmul.mubr.msk.f32.vlgmr.msra.gmra.mxu1 %vm587_vm0, %v30_v54  ;;  %v36_v53 = vld [vmem:[%s9893_s0 + $0x32] sm:$0x3]  ;;  %v290_v54 = vld [vmem:[%s9892_s1 + $0x6b8] sm:$0xff] }
  0xb5   :  { %6349 = vmatprep.subr.mxu0 %v7187_v0  ;;  %6368 = vmatprep.subr.mxu1 %v7187_v0 }
  0xb6   :  { %6350 = vmatpush3.msra.mxu0 %v242_v55  ;;  %6369 = vmatpush3.msra.mxu1 %v250_v56  ;;  %v298_v55 = vld [vmem:[%s9892_s1 + $0x6f8] sm:$0xff]  ;;  %v289_v56 = vld [vmem:[%s9892_s1 + $0x6b0] sm:$0xff] }
  0xb7   :  { %6351 = vmatprep.subr.mxu0 %v7187_v0  ;;  %6370 = vmatprep.subr.mxu1 %v7187_v0 }
  0xb8   :  { %6352 = vmatpush3.msra.mxu0 %v241_v57  ;;  %6371 = vmatpush3.msra.mxu1 %v249_v58  ;;  %v297_v57 = vld [vmem:[%s9892_s1 + $0x6f0] sm:$0xff]  ;;  %v288_v58 = vld [vmem:[%s9892_s1 + $0x6a8] sm:$0xff] }
  0xb9   :  { %6353 = vmatprep.subr.mxu0 %v7187_v0  ;;  %6372 = vmatprep.subr.mxu1 %v7187_v0 }
  0xba   :  { %6354 = vmatpush3.msra.mxu0 %v240_v59  ;;  %6373 = vmatpush3.msra.mxu1 %v248_v60  ;;  %v296_v59 = vld [vmem:[%s9892_s1 + $0x6e8] sm:$0xff]  ;;  %v287_v60 = vld [vmem:[%s9892_s1 + $0x6a0] sm:$0xff] }
  0xbb   :  { %6355 = vmatprep.subr.mxu0 %v7187_v0  ;;  %6374 = vmatprep.subr.mxu1 %v7187_v0 }
  0xbc   :  { %6356 = vmatpush3.msra.mxu0 %v239_v61  ;;  %6375 = vmatpush3.msra.mxu1 %v247_v62  ;;  %v295_v61 = vld [vmem:[%s9892_s1 + $0x6e0] sm:$0xff]  ;;  %v286_v62 = vld [vmem:[%s9892_s1 + $0x698] sm:$0xff] }
  0xbd   :  { %6357 = vmatprep.subr.mxu0 %v7187_v0  ;;  %6376 = vmatprep.subr.mxu1 %v7187_v0 }
  0xbe   :  { %6358 = vmatpush3.msra.mxu0 %v238_v63  ;;  %6377 = vmatpush3.msra.mxu1 %v246_v1  ;;  %v294_v63 = vld [vmem:[%s9892_s1 + $0x6d8] sm:$0xff]  ;;  %v285_v1 = vld [vmem:[%s9892_s1 + $0x690] sm:$0xff] }
  0xbf   :  { %6359 = vmatprep.subr.mxu0 %v7187_v0  ;;  %6378 = vmatprep.subr.mxu1 %v7187_v0 }
  0xc0   :  { %6360 = vmatpush3.msra.mxu0 %v237_v2  ;;  %6379 = vmatpush3.msra.mxu1 %v245_v3  ;;  %v293_v2 = vld [vmem:[%s9892_s1 + $0x6d0] sm:$0xff]  ;;  %v284_v3 = vld [vmem:[%s9892_s1 + $0x688] sm:$0xff] }
  0xc1   :  { %6361 = vmatprep.subr.mxu0 %v7187_v0  ;;  %6380 = vmatprep.subr.mxu1 %v7187_v0 }
  0xc2   :  { %6362 = vmatpush3.msra.mxu0 %v236_v4  ;;  %6381 = vmatpush3.msra.mxu1 %v244_v5  ;;  %v292_v4 = vld [vmem:[%s9892_s1 + $0x6c8] sm:$0xff] }
  0xc3   :  { %6363 = vmatprep.subr.mxu0 %v7187_v0  ;;  %6382 = vmatprep.subr.mxu1 %v7187_v0 }
  0xc4   :  { %6364 = vmatpush3.msra.mxu0 %v235_v6  ;;  %6365 = vmatprep.mubr.msk.f32.mxu0 %vm7188_vm1, %v7187_v0 }
  0xc5   :  { %6383 = vmatpush3.msra.mxu1 %v243_v7  ;;  %6384 = vmatprep.mubr.msk.f32.mxu1 %vm7188_vm1, %v7187_v0  ;;  %v283_v7 = vld [vmem:[%s9892_s1 + $0x680] sm:$0xff] }
  0xc6   :  { %6366 = vmatmul.mubr.msk.f32.vlgmr.msra.gmra.mxu0 %vm587_vm0, %v31_v8  ;;  %6385 = vmatmul.mubr.msk.f32.vlgmr.msra.gmra.mxu1 %vm587_vm0, %v32_v9  ;;  %v291_v8 = vld [vmem:[%s9892_s1 + $0x6c0] sm:$0xff] }
  0xc7   :  { %6387 = vmatprep.subr.mxu0 %v7187_v0  ;;  %6406 = vmatprep.subr.mxu1 %v7187_v0 }
  0xc8   :  { %6388 = vmatpush3.msra.mxu0 %v258_v10  ;;  %6407 = vmatpush3.msra.mxu1 %v266_v11  ;;  %v37_v11 = vld [vmem:[%s9893_s0 + $0x34] sm:$0x3] }
  0xc9   :  { %6389 = vmatprep.subr.mxu0 %v7187_v0  ;;  %6408 = vmatprep.subr.mxu1 %v7187_v0 }
  0xca   :  { %6390 = vmatpush3.msra.mxu0 %v257_v12  ;;  %6409 = vmatpush3.msra.mxu1 %v265_v13  ;;  %v38_v12 = vld [vmem:[%s9893_s0 + $0x36] sm:$0x3]  ;;  %v306_v13 = vld [vmem:[%s9892_s1 + $0x738] sm:$0xff] }
  0xcb   :  { %6391 = vmatprep.subr.mxu0 %v7187_v0  ;;  %6410 = vmatprep.subr.mxu1 %v7187_v0 }
  0xcc   :  { %6392 = vmatpush3.msra.mxu0 %v256_v14  ;;  %6411 = vmatpush3.msra.mxu1 %v264_v15  ;;  %v314_v14 = vld [vmem:[%s9892_s1 + $0x778] sm:$0xff]  ;;  %v305_v15 = vld [vmem:[%s9892_s1 + $0x730] sm:$0xff] }
  0xcd   :  { %6393 = vmatprep.subr.mxu0 %v7187_v0  ;;  %6412 = vmatprep.subr.mxu1 %v7187_v0 }
  0xce   :  { %6394 = vmatpush3.msra.mxu0 %v255_v16  ;;  %6413 = vmatpush3.msra.mxu1 %v263_v17  ;;  %v313_v16 = vld [vmem:[%s9892_s1 + $0x770] sm:$0xff]  ;;  %v304_v17 = vld [vmem:[%s9892_s1 + $0x728] sm:$0xff] }
  0xcf   :  { %6395 = vmatprep.subr.mxu0 %v7187_v0  ;;  %6414 = vmatprep.subr.mxu1 %v7187_v0 }
  0xd0   :  { %6396 = vmatpush3.msra.mxu0 %v254_v18  ;;  %6415 = vmatpush3.msra.mxu1 %v262_v19  ;;  %v312_v18 = vld [vmem:[%s9892_s1 + $0x768] sm:$0xff]  ;;  %v303_v19 = vld [vmem:[%s9892_s1 + $0x720] sm:$0xff] }
  0xd1   :  { %6397 = vmatprep.subr.mxu0 %v7187_v0  ;;  %6416 = vmatprep.subr.mxu1 %v7187_v0 }
  0xd2   :  { %6398 = vmatpush3.msra.mxu0 %v253_v20  ;;  %6417 = vmatpush3.msra.mxu1 %v261_v21  ;;  %v657_v24 = vpop.f32.mrf.mxu0  ;;  %v730_v25 = vpop.f32.mrf.mxu1  ;;  %v311_v20 = vld [vmem:[%s9892_s1 + $0x760] sm:$0xff]  ;;  %v302_v21 = vld [vmem:[%s9892_s1 + $0x718] sm:$0xff] }
  0xd3   :  { %6399 = vmatprep.subr.mxu0 %v7187_v0  ;;  %6418 = vmatprep.subr.mxu1 %v7187_v0  ;;  %5261 = vst.msk [vmem:[%s9894_s2] sm:$0x3] %vm5260_vm2, %v657_v24  ;;  %5262 = vst.msk [vmem:[%s9894_s2 + $0x2] sm:$0x3] %vm5260_vm2, %v730_v25  ;;  %v309_v24 = vld [vmem:[%s9892_s1 + $0x750] sm:$0xff]  ;;  %v300_v25 = vld [vmem:[%s9892_s1 + $0x708] sm:$0xff] }
  0xd4   :  { %6400 = vmatpush3.msra.mxu0 %v252_v22  ;;  %6419 = vmatpush3.msra.mxu1 %v260_v23  ;;  %v5987_v28 = vpop.f32.mrf.mxu0  ;;  %v6006_v29 = vpop.f32.mrf.mxu1  ;;  %v310_v22 = vld [vmem:[%s9892_s1 + $0x758] sm:$0xff]  ;;  %v301_v23 = vld [vmem:[%s9892_s1 + $0x710] sm:$0xff] }
  0xd5   :  { %6401 = vmatprep.subr.mxu0 %v7187_v0  ;;  %6420 = vmatprep.subr.mxu1 %v7187_v0  ;;  %v299_v29 = vld [vmem:[%s9892_s1 + $0x700] sm:$0xff] }
  0xd6   :  { %6402 = vmatpush3.msra.mxu0 %v251_v26  ;;  %6403 = vmatprep.mubr.msk.f32.mxu0 %vm7188_vm1, %v7187_v0  ;;  %v308_v26 = vld [vmem:[%s9892_s1 + $0x748] sm:$0xff] }
  0xd7   :  { %6421 = vmatpush3.msra.mxu1 %v259_v27  ;;  %6422 = vmatprep.mubr.msk.f32.mxu1 %vm7188_vm1, %v7187_v0 }
  0xd8   :  { %6404 = vmatmul.mubr.msk.f32.vlgmr.msra.gmra.mxu0 %vm587_vm0, %v33_v30  ;;  %6423 = vmatmul.mubr.msk.f32.vlgmr.msra.gmra.mxu1 %vm587_vm0, %v34_v31  ;;  %v307_v30 = vld [vmem:[%s9892_s1 + $0x740] sm:$0xff] }
  0xd9   :  { %6425 = vmatprep.subr.mxu0 %v7187_v0  ;;  %6444 = vmatprep.subr.mxu1 %v7187_v0 }
  0xda   :  { %6426 = vmatpush3.msra.mxu0 %v274_v32  ;;  %6445 = vmatpush3.msra.mxu1 %v282_v33  ;;  %v39_v33 = vld [vmem:[%s9893_s0 + $0x38] sm:$0x3] }
  0xdb   :  { %6427 = vmatprep.subr.mxu0 %v7187_v0  ;;  %6446 = vmatprep.subr.mxu1 %v7187_v0 }
  0xdc   :  { %6428 = vmatpush3.msra.mxu0 %v273_v34  ;;  %6447 = vmatpush3.msra.mxu1 %v281_v35  ;;  %v40_v34 = vld [vmem:[%s9893_s0 + $0x3a] sm:$0x3] }
  0xdd   :  { %6429 = vmatprep.subr.mxu0 %v7187_v0  ;;  %6448 = vmatprep.subr.mxu1 %v7187_v0  ;;  %v322_v35 = vld [vmem:[%s9892_s1 + $0x7b8] sm:$0xff] }
  0xde   :  { %6430 = vmatpush3.msra.mxu0 %v272_v36  ;;  %6449 = vmatpush3.msra.mxu1 %v280_v37  ;;  %v330_v36 = vld [vmem:[%s9892_s1 + $0x7f8] sm:$0xff]  ;;  %v321_v37 = vld [vmem:[%s9892_s1 + $0x7b0] sm:$0xff] }
  0xdf   :  { %6431 = vmatprep.subr.mxu0 %v7187_v0  ;;  %6450 = vmatprep.subr.mxu1 %v7187_v0 }
  0xe0   :  { %6432 = vmatpush3.msra.mxu0 %v271_v38  ;;  %6451 = vmatpush3.msra.mxu1 %v279_v39  ;;  %v329_v38 = vld [vmem:[%s9892_s1 + $0x7f0] sm:$0xff]  ;;  %v320_v39 = vld [vmem:[%s9892_s1 + $0x7a8] sm:$0xff] }
  0xe1   :  { %6433 = vmatprep.subr.mxu0 %v7187_v0  ;;  %6452 = vmatprep.subr.mxu1 %v7187_v0 }
  0xe2   :  { %6434 = vmatpush3.msra.mxu0 %v270_v40  ;;  %6453 = vmatpush3.msra.mxu1 %v278_v41  ;;  %v328_v40 = vld [vmem:[%s9892_s1 + $0x7e8] sm:$0xff]  ;;  %v319_v41 = vld [vmem:[%s9892_s1 + $0x7a0] sm:$0xff] }
  0xe3   :  { %6435 = vmatprep.subr.mxu0 %v7187_v0  ;;  %6454 = vmatprep.subr.mxu1 %v7187_v0 }
  0xe4   :  { %6436 = vmatpush3.msra.mxu0 %v269_v42  ;;  %6455 = vmatpush3.msra.mxu1 %v277_v43  ;;  %v803_v46 = vpop.f32.mrf.mxu0  ;;  %v876_v47 = vpop.f32.mrf.mxu1  ;;  %v327_v42 = vld [vmem:[%s9892_s1 + $0x7e0] sm:$0xff]  ;;  %v318_v43 = vld [vmem:[%s9892_s1 + $0x798] sm:$0xff] }
  0xe5   :  { %6437 = vmatprep.subr.mxu0 %v7187_v0  ;;  %6456 = vmatprep.subr.mxu1 %v7187_v0  ;;  %5263 = vst.msk [vmem:[%s9894_s2 + $0x4] sm:$0x3] %vm5260_vm2, %v803_v46  ;;  %5264 = vst.msk [vmem:[%s9894_s2 + $0x6] sm:$0x3] %vm5260_vm2, %v876_v47  ;;  %v325_v46 = vld [vmem:[%s9892_s1 + $0x7d0] sm:$0xff]  ;;  %v316_v47 = vld [vmem:[%s9892_s1 + $0x788] sm:$0xff] }
  0xe6   :  { %6438 = vmatpush3.msra.mxu0 %v268_v44  ;;  %6457 = vmatpush3.msra.mxu1 %v276_v45  ;;  %v6025_v50 = vpop.f32.mrf.mxu0  ;;  %v6044_v51 = vpop.f32.mrf.mxu1  ;;  %v326_v44 = vld [vmem:[%s9892_s1 + $0x7d8] sm:$0xff]  ;;  %v317_v45 = vld [vmem:[%s9892_s1 + $0x790] sm:$0xff] }
  0xe7   :  { %6439 = vmatprep.subr.mxu0 %v7187_v0  ;;  %6458 = vmatprep.subr.mxu1 %v7187_v0  ;;  %v315_v51 = vld [vmem:[%s9892_s1 + $0x780] sm:$0xff] }
  0xe8   :  { %6440 = vmatpush3.msra.mxu0 %v267_v48  ;;  %6441 = vmatprep.mubr.msk.f32.mxu0 %vm7188_vm1, %v7187_v0  ;;  %v324_v48 = vld [vmem:[%s9892_s1 + $0x7c8] sm:$0xff] }
  0xe9   :  { %6459 = vmatpush3.msra.mxu1 %v275_v49  ;;  %6460 = vmatprep.mubr.msk.f32.mxu1 %vm7188_vm1, %v7187_v0 }
  0xea   :  { %6442 = vmatmul.mubr.msk.f32.vlgmr.msra.gmra.mxu0 %vm587_vm0, %v35_v52  ;;  %6461 = vmatmul.mubr.msk.f32.vlgmr.msra.gmra.mxu1 %vm587_vm0, %v36_v53  ;;  %v323_v52 = vld [vmem:[%s9892_s1 + $0x7c0] sm:$0xff] }
  0xeb   :  { %6463 = vmatprep.subr.mxu0 %v7187_v0  ;;  %6482 = vmatprep.subr.mxu1 %v7187_v0 }
  0xec   :  { %6464 = vmatpush3.msra.mxu0 %v290_v54  ;;  %6483 = vmatpush3.msra.mxu1 %v298_v55  ;;  %v41_v55 = vld [vmem:[%s9893_s0 + $0x3c] sm:$0x3] }
  0xed   :  { %6465 = vmatprep.subr.mxu0 %v7187_v0  ;;  %6484 = vmatprep.subr.mxu1 %v7187_v0 }
  0xee   :  { %6466 = vmatpush3.msra.mxu0 %v289_v56  ;;  %6485 = vmatpush3.msra.mxu1 %v297_v57  ;;  %v42_v56 = vld [vmem:[%s9893_s0 + $0x3e] sm:$0x3] }
  0xef   :  { %6467 = vmatprep.subr.mxu0 %v7187_v0  ;;  %6486 = vmatprep.subr.mxu1 %v7187_v0  ;;  %v338_v57 = vld [vmem:[%s9892_s1 + $0x838] sm:$0xff] }
  0xf0   :  { %6468 = vmatpush3.msra.mxu0 %v288_v58  ;;  %6487 = vmatpush3.msra.mxu1 %v296_v59  ;;  %v346_v58 = vld [vmem:[%s9892_s1 + $0x878] sm:$0xff]  ;;  %v337_v59 = vld [vmem:[%s9892_s1 + $0x830] sm:$0xff] }
  0xf1   :  { %6469 = vmatprep.subr.mxu0 %v7187_v0  ;;  %6488 = vmatprep.subr.mxu1 %v7187_v0 }
  0xf2   :  { %6470 = vmatpush3.msra.mxu0 %v287_v60  ;;  %6489 = vmatpush3.msra.mxu1 %v295_v61  ;;  %v345_v60 = vld [vmem:[%s9892_s1 + $0x870] sm:$0xff]  ;;  %v336_v61 = vld [vmem:[%s9892_s1 + $0x828] sm:$0xff] }
  0xf3   :  { %6471 = vmatprep.subr.mxu0 %v7187_v0  ;;  %6490 = vmatprep.subr.mxu1 %v7187_v0 }
  0xf4   :  { %6472 = vmatpush3.msra.mxu0 %v286_v62  ;;  %6491 = vmatpush3.msra.mxu1 %v294_v63  ;;  %v344_v62 = vld [vmem:[%s9892_s1 + $0x868] sm:$0xff]  ;;  %v335_v63 = vld [vmem:[%s9892_s1 + $0x820] sm:$0xff] }
  0xf5   :  { %6473 = vmatprep.subr.mxu0 %v7187_v0  ;;  %6492 = vmatprep.subr.mxu1 %v7187_v0 }
  0xf6   :  { %6474 = vmatpush3.msra.mxu0 %v285_v1  ;;  %6493 = vmatpush3.msra.mxu1 %v293_v2  ;;  %v949_v5 = vpop.f32.mrf.mxu0  ;;  %v1022_v6 = vpop.f32.mrf.mxu1  ;;  %v343_v1 = vld [vmem:[%s9892_s1 + $0x860] sm:$0xff]  ;;  %v334_v2 = vld [vmem:[%s9892_s1 + $0x818] sm:$0xff] }
  0xf7   :  { %6475 = vmatprep.subr.mxu0 %v7187_v0  ;;  %6494 = vmatprep.subr.mxu1 %v7187_v0  ;;  %5265 = vst.msk [vmem:[%s9894_s2 + $0x8] sm:$0x3] %vm5260_vm2, %v949_v5  ;;  %5266 = vst.msk [vmem:[%s9894_s2 + $0xa] sm:$0x3] %vm5260_vm2, %v1022_v6  ;;  %v341_v5 = vld [vmem:[%s9892_s1 + $0x850] sm:$0xff]  ;;  %v332_v6 = vld [vmem:[%s9892_s1 + $0x808] sm:$0xff] }
  0xf8   :  { %6476 = vmatpush3.msra.mxu0 %v284_v3  ;;  %6495 = vmatpush3.msra.mxu1 %v292_v4  ;;  %v6063_v9 = vpop.f32.mrf.mxu0  ;;  %v6082_v10 = vpop.f32.mrf.mxu1  ;;  %v342_v3 = vld [vmem:[%s9892_s1 + $0x858] sm:$0xff]  ;;  %v333_v4 = vld [vmem:[%s9892_s1 + $0x810] sm:$0xff] }
  0xf9   :  { %6477 = vmatprep.subr.mxu0 %v7187_v0  ;;  %6496 = vmatprep.subr.mxu1 %v7187_v0  ;;  %v331_v10 = vld [vmem:[%s9892_s1 + $0x800] sm:$0xff] }
  0xfa   :  { %6478 = vmatpush3.msra.mxu0 %v283_v7  ;;  %6479 = vmatprep.mubr.msk.f32.mxu0 %vm7188_vm1, %v7187_v0  ;;  %v340_v7 = vld [vmem:[%s9892_s1 + $0x848] sm:$0xff] }
  0xfb   :  { %6497 = vmatpush3.msra.mxu1 %v291_v8  ;;  %6498 = vmatprep.mubr.msk.f32.mxu1 %vm7188_vm1, %v7187_v0 }
  0xfc   :  { %6480 = vmatmul.mubr.msk.f32.vlgmr.msra.gmra.mxu0 %vm587_vm0, %v37_v11  ;;  %6499 = vmatmul.mubr.msk.f32.vlgmr.msra.gmra.mxu1 %vm587_vm0, %v38_v12  ;;  %v339_v11 = vld [vmem:[%s9892_s1 + $0x840] sm:$0xff] }
  0xfd   :  { %6501 = vmatprep.subr.mxu0 %v7187_v0  ;;  %6520 = vmatprep.subr.mxu1 %v7187_v0 }
  0xfe   :  { %6502 = vmatpush3.msra.mxu0 %v306_v13  ;;  %6521 = vmatpush3.msra.mxu1 %v314_v14  ;;  %v43_v14 = vld [vmem:[%s9893_s0 + $0x40] sm:$0x3] }
  0xff   :  { %6503 = vmatprep.subr.mxu0 %v7187_v0  ;;  %6522 = vmatprep.subr.mxu1 %v7187_v0 }
 0x100   :  { %6504 = vmatpush3.msra.mxu0 %v305_v15  ;;  %6523 = vmatpush3.msra.mxu1 %v313_v16  ;;  %v44_v15 = vld [vmem:[%s9893_s0 + $0x42] sm:$0x3]  ;;  %v354_v16 = vld [vmem:[%s9892_s1 + $0x8b8] sm:$0xff] }
 0x101   :  { %6505 = vmatprep.subr.mxu0 %v7187_v0  ;;  %6524 = vmatprep.subr.mxu1 %v7187_v0 }
 0x102   :  { %6506 = vmatpush3.msra.mxu0 %v304_v17  ;;  %6525 = vmatpush3.msra.mxu1 %v312_v18  ;;  %v362_v17 = vld [vmem:[%s9892_s1 + $0x8f8] sm:$0xff]  ;;  %v353_v18 = vld [vmem:[%s9892_s1 + $0x8b0] sm:$0xff] }
 0x103   :  { %6507 = vmatprep.subr.mxu0 %v7187_v0  ;;  %6526 = vmatprep.subr.mxu1 %v7187_v0 }
 0x104   :  { %6508 = vmatpush3.msra.mxu0 %v303_v19  ;;  %6527 = vmatpush3.msra.mxu1 %v311_v20  ;;  %v361_v19 = vld [vmem:[%s9892_s1 + $0x8f0] sm:$0xff]  ;;  %v352_v20 = vld [vmem:[%s9892_s1 + $0x8a8] sm:$0xff] }
 0x105   :  { %6509 = vmatprep.subr.mxu0 %v7187_v0  ;;  %6528 = vmatprep.subr.mxu1 %v7187_v0 }
 0x106   :  { %6510 = vmatpush3.msra.mxu0 %v302_v21  ;;  %6529 = vmatpush3.msra.mxu1 %v310_v22  ;;  %v360_v21 = vld [vmem:[%s9892_s1 + $0x8e8] sm:$0xff]  ;;  %v351_v22 = vld [vmem:[%s9892_s1 + $0x8a0] sm:$0xff] }
 0x107   :  { %6511 = vmatprep.subr.mxu0 %v7187_v0  ;;  %6530 = vmatprep.subr.mxu1 %v7187_v0 }
 0x108   :  { %6512 = vmatpush3.msra.mxu0 %v301_v23  ;;  %6531 = vmatpush3.msra.mxu1 %v309_v24  ;;  %v1095_v27 = vpop.f32.mrf.mxu0  ;;  %v1168_v28 = vpop.f32.mrf.mxu1  ;;  %v359_v23 = vld [vmem:[%s9892_s1 + $0x8e0] sm:$0xff]  ;;  %v350_v24 = vld [vmem:[%s9892_s1 + $0x898] sm:$0xff] }
 0x109   :  { %6513 = vmatprep.subr.mxu0 %v7187_v0  ;;  %6532 = vmatprep.subr.mxu1 %v7187_v0  ;;  %5267 = vst.msk [vmem:[%s9894_s2 + $0xc] sm:$0x3] %vm5260_vm2, %v1095_v27  ;;  %5268 = vst.msk [vmem:[%s9894_s2 + $0xe] sm:$0x3] %vm5260_vm2, %v1168_v28  ;;  %v357_v27 = vld [vmem:[%s9892_s1 + $0x8d0] sm:$0xff]  ;;  %v348_v28 = vld [vmem:[%s9892_s1 + $0x888] sm:$0xff] }
 0x10a   :  { %6514 = vmatpush3.msra.mxu0 %v300_v25  ;;  %6533 = vmatpush3.msra.mxu1 %v308_v26  ;;  %v6101_v31 = vpop.f32.mrf.mxu0  ;;  %v6120_v32 = vpop.f32.mrf.mxu1  ;;  %v358_v25 = vld [vmem:[%s9892_s1 + $0x8d8] sm:$0xff]  ;;  %v349_v26 = vld [vmem:[%s9892_s1 + $0x890] sm:$0xff] }
 0x10b   :  { %6515 = vmatprep.subr.mxu0 %v7187_v0  ;;  %6534 = vmatprep.subr.mxu1 %v7187_v0  ;;  %v347_v32 = vld [vmem:[%s9892_s1 + $0x880] sm:$0xff] }
 0x10c   :  { %6516 = vmatpush3.msra.mxu0 %v299_v29  ;;  %6517 = vmatprep.mubr.msk.f32.mxu0 %vm7188_vm1, %v7187_v0  ;;  %v356_v29 = vld [vmem:[%s9892_s1 + $0x8c8] sm:$0xff] }
 0x10d   :  { %6535 = vmatpush3.msra.mxu1 %v307_v30  ;;  %6536 = vmatprep.mubr.msk.f32.mxu1 %vm7188_vm1, %v7187_v0 }
 0x10e   :  { %6518 = vmatmul.mubr.msk.f32.vlgmr.msra.gmra.mxu0 %vm587_vm0, %v39_v33  ;;  %6537 = vmatmul.mubr.msk.f32.vlgmr.msra.gmra.mxu1 %vm587_vm0, %v40_v34  ;;  %v355_v33 = vld [vmem:[%s9892_s1 + $0x8c0] sm:$0xff] }
 0x10f   :  { %6539 = vmatprep.subr.mxu0 %v7187_v0  ;;  %6558 = vmatprep.subr.mxu1 %v7187_v0 }
 0x110   :  { %6540 = vmatpush3.msra.mxu0 %v322_v35  ;;  %6559 = vmatpush3.msra.mxu1 %v330_v36  ;;  %v45_v36 = vld [vmem:[%s9893_s0 + $0x44] sm:$0x3] }
 0x111   :  { %6541 = vmatprep.subr.mxu0 %v7187_v0  ;;  %6560 = vmatprep.subr.mxu1 %v7187_v0 }
 0x112   :  { %6542 = vmatpush3.msra.mxu0 %v321_v37  ;;  %6561 = vmatpush3.msra.mxu1 %v329_v38  ;;  %v46_v37 = vld [vmem:[%s9893_s0 + $0x46] sm:$0x3]  ;;  %v370_v38 = vld [vmem:[%s9892_s1 + $0x938] sm:$0xff] }
 0x113   :  { %6543 = vmatprep.subr.mxu0 %v7187_v0  ;;  %6562 = vmatprep.subr.mxu1 %v7187_v0 }
 0x114   :  { %6544 = vmatpush3.msra.mxu0 %v320_v39  ;;  %6563 = vmatpush3.msra.mxu1 %v328_v40  ;;  %v378_v39 = vld [vmem:[%s9892_s1 + $0x978] sm:$0xff]  ;;  %v369_v40 = vld [vmem:[%s9892_s1 + $0x930] sm:$0xff] }
 0x115   :  { %6545 = vmatprep.subr.mxu0 %v7187_v0  ;;  %6564 = vmatprep.subr.mxu1 %v7187_v0 }
 0x116   :  { %6546 = vmatpush3.msra.mxu0 %v319_v41  ;;  %6565 = vmatpush3.msra.mxu1 %v327_v42  ;;  %v377_v41 = vld [vmem:[%s9892_s1 + $0x970] sm:$0xff]  ;;  %v368_v42 = vld [vmem:[%s9892_s1 + $0x928] sm:$0xff] }
 0x117   :  { %6547 = vmatprep.subr.mxu0 %v7187_v0  ;;  %6566 = vmatprep.subr.mxu1 %v7187_v0 }
 0x118   :  { %6548 = vmatpush3.msra.mxu0 %v318_v43  ;;  %6567 = vmatpush3.msra.mxu1 %v326_v44  ;;  %v376_v43 = vld [vmem:[%s9892_s1 + $0x968] sm:$0xff]  ;;  %v367_v44 = vld [vmem:[%s9892_s1 + $0x920] sm:$0xff] }
 0x119   :  { %6549 = vmatprep.subr.mxu0 %v7187_v0  ;;  %6568 = vmatprep.subr.mxu1 %v7187_v0 }
 0x11a   :  { %6550 = vmatpush3.msra.mxu0 %v317_v45  ;;  %6569 = vmatpush3.msra.mxu1 %v325_v46  ;;  %v1241_v49 = vpop.f32.mrf.mxu0  ;;  %v1314_v50 = vpop.f32.mrf.mxu1  ;;  %v375_v45 = vld [vmem:[%s9892_s1 + $0x960] sm:$0xff]  ;;  %v366_v46 = vld [vmem:[%s9892_s1 + $0x918] sm:$0xff] }
 0x11b   :  { %6551 = vmatprep.subr.mxu0 %v7187_v0  ;;  %6570 = vmatprep.subr.mxu1 %v7187_v0  ;;  %5269 = vst.msk [vmem:[%s9894_s2 + $0x10] sm:$0x3] %vm5260_vm2, %v1241_v49  ;;  %5270 = vst.msk [vmem:[%s9894_s2 + $0x12] sm:$0x3] %vm5260_vm2, %v1314_v50  ;;  %v373_v49 = vld [vmem:[%s9892_s1 + $0x950] sm:$0xff]  ;;  %v364_v50 = vld [vmem:[%s9892_s1 + $0x908] sm:$0xff] }
 0x11c   :  { %6552 = vmatpush3.msra.mxu0 %v316_v47  ;;  %6571 = vmatpush3.msra.mxu1 %v324_v48  ;;  %v6139_v53 = vpop.f32.mrf.mxu0  ;;  %v6158_v54 = vpop.f32.mrf.mxu1  ;;  %v374_v47 = vld [vmem:[%s9892_s1 + $0x958] sm:$0xff]  ;;  %v365_v48 = vld [vmem:[%s9892_s1 + $0x910] sm:$0xff] }
 0x11d   :  { %6553 = vmatprep.subr.mxu0 %v7187_v0  ;;  %6572 = vmatprep.subr.mxu1 %v7187_v0  ;;  %v363_v54 = vld [vmem:[%s9892_s1 + $0x900] sm:$0xff] }
 0x11e   :  { %6554 = vmatpush3.msra.mxu0 %v315_v51  ;;  %6555 = vmatprep.mubr.msk.f32.mxu0 %vm7188_vm1, %v7187_v0  ;;  %v372_v51 = vld [vmem:[%s9892_s1 + $0x948] sm:$0xff] }
 0x11f   :  { %6573 = vmatpush3.msra.mxu1 %v323_v52  ;;  %6574 = vmatprep.mubr.msk.f32.mxu1 %vm7188_vm1, %v7187_v0 }
 0x120   :  { %6556 = vmatmul.mubr.msk.f32.vlgmr.msra.gmra.mxu0 %vm587_vm0, %v41_v55  ;;  %6575 = vmatmul.mubr.msk.f32.vlgmr.msra.gmra.mxu1 %vm587_vm0, %v42_v56  ;;  %v371_v55 = vld [vmem:[%s9892_s1 + $0x940] sm:$0xff] }
 0x121   :  { %6577 = vmatprep.subr.mxu0 %v7187_v0  ;;  %6596 = vmatprep.subr.mxu1 %v7187_v0 }
 0x122   :  { %6578 = vmatpush3.msra.mxu0 %v338_v57  ;;  %6597 = vmatpush3.msra.mxu1 %v346_v58  ;;  %v47_v58 = vld [vmem:[%s9893_s0 + $0x48] sm:$0x3] }
 0x123   :  { %6579 = vmatprep.subr.mxu0 %v7187_v0  ;;  %6598 = vmatprep.subr.mxu1 %v7187_v0 }
 0x124   :  { %6580 = vmatpush3.msra.mxu0 %v337_v59  ;;  %6599 = vmatpush3.msra.mxu1 %v345_v60  ;;  %v48_v59 = vld [vmem:[%s9893_s0 + $0x4a] sm:$0x3]  ;;  %v386_v60 = vld [vmem:[%s9892_s1 + $0x9b8] sm:$0xff] }
 0x125   :  { %6581 = vmatprep.subr.mxu0 %v7187_v0  ;;  %6600 = vmatprep.subr.mxu1 %v7187_v0 }
 0x126   :  { %6582 = vmatpush3.msra.mxu0 %v336_v61  ;;  %6601 = vmatpush3.msra.mxu1 %v344_v62  ;;  %v394_v61 = vld [vmem:[%s9892_s1 + $0x9f8] sm:$0xff]  ;;  %v385_v62 = vld [vmem:[%s9892_s1 + $0x9b0] sm:$0xff] }
 0x127   :  { %6583 = vmatprep.subr.mxu0 %v7187_v0  ;;  %6602 = vmatprep.subr.mxu1 %v7187_v0 }
 0x128   :  { %6584 = vmatpush3.msra.mxu0 %v335_v63  ;;  %6603 = vmatpush3.msra.mxu1 %v343_v1  ;;  %v393_v63 = vld [vmem:[%s9892_s1 + $0x9f0] sm:$0xff]  ;;  %v384_v1 = vld [vmem:[%s9892_s1 + $0x9a8] sm:$0xff] }
 0x129   :  { %6585 = vmatprep.subr.mxu0 %v7187_v0  ;;  %6604 = vmatprep.subr.mxu1 %v7187_v0 }
 0x12a   :  { %6586 = vmatpush3.msra.mxu0 %v334_v2  ;;  %6605 = vmatpush3.msra.mxu1 %v342_v3  ;;  %v392_v2 = vld [vmem:[%s9892_s1 + $0x9e8] sm:$0xff]  ;;  %v383_v3 = vld [vmem:[%s9892_s1 + $0x9a0] sm:$0xff] }
 0x12b   :  { %6587 = vmatprep.subr.mxu0 %v7187_v0  ;;  %6606 = vmatprep.subr.mxu1 %v7187_v0 }
 0x12c   :  { %6588 = vmatpush3.msra.mxu0 %v333_v4  ;;  %6607 = vmatpush3.msra.mxu1 %v341_v5  ;;  %v1387_v8 = vpop.f32.mrf.mxu0  ;;  %v1460_v9 = vpop.f32.mrf.mxu1  ;;  %v391_v4 = vld [vmem:[%s9892_s1 + $0x9e0] sm:$0xff]  ;;  %v382_v5 = vld [vmem:[%s9892_s1 + $0x998] sm:$0xff] }
 0x12d   :  { %6589 = vmatprep.subr.mxu0 %v7187_v0  ;;  %6608 = vmatprep.subr.mxu1 %v7187_v0  ;;  %5271 = vst.msk [vmem:[%s9894_s2 + $0x14] sm:$0x3] %vm5260_vm2, %v1387_v8  ;;  %5272 = vst.msk [vmem:[%s9894_s2 + $0x16] sm:$0x3] %vm5260_vm2, %v1460_v9  ;;  %v389_v8 = vld [vmem:[%s9892_s1 + $0x9d0] sm:$0xff]  ;;  %v380_v9 = vld [vmem:[%s9892_s1 + $0x988] sm:$0xff] }
 0x12e   :  { %6590 = vmatpush3.msra.mxu0 %v332_v6  ;;  %6609 = vmatpush3.msra.mxu1 %v340_v7  ;;  %v6177_v12 = vpop.f32.mrf.mxu0  ;;  %v6196_v13 = vpop.f32.mrf.mxu1  ;;  %v390_v6 = vld [vmem:[%s9892_s1 + $0x9d8] sm:$0xff]  ;;  %v381_v7 = vld [vmem:[%s9892_s1 + $0x990] sm:$0xff] }
 0x12f   :  { %6591 = vmatprep.subr.mxu0 %v7187_v0  ;;  %6610 = vmatprep.subr.mxu1 %v7187_v0  ;;  %v379_v13 = vld [vmem:[%s9892_s1 + $0x980] sm:$0xff] }
 0x130   :  { %6592 = vmatpush3.msra.mxu0 %v331_v10  ;;  %6593 = vmatprep.mubr.msk.f32.mxu0 %vm7188_vm1, %v7187_v0  ;;  %v388_v10 = vld [vmem:[%s9892_s1 + $0x9c8] sm:$0xff] }
 0x131   :  { %6611 = vmatpush3.msra.mxu1 %v339_v11  ;;  %6612 = vmatprep.mubr.msk.f32.mxu1 %vm7188_vm1, %v7187_v0 }
 0x132   :  { %6594 = vmatmul.mubr.msk.f32.vlgmr.msra.gmra.mxu0 %vm587_vm0, %v43_v14  ;;  %6613 = vmatmul.mubr.msk.f32.vlgmr.msra.gmra.mxu1 %vm587_vm0, %v44_v15  ;;  %v387_v14 = vld [vmem:[%s9892_s1 + $0x9c0] sm:$0xff] }
 0x133   :  { %6615 = vmatprep.subr.mxu0 %v7187_v0  ;;  %6634 = vmatprep.subr.mxu1 %v7187_v0 }
 0x134   :  { %6616 = vmatpush3.msra.mxu0 %v354_v16  ;;  %6635 = vmatpush3.msra.mxu1 %v362_v17  ;;  %v49_v17 = vld [vmem:[%s9893_s0 + $0x4c] sm:$0x3] }
 0x135   :  { %6617 = vmatprep.subr.mxu0 %v7187_v0  ;;  %6636 = vmatprep.subr.mxu1 %v7187_v0 }
 0x136   :  { %6618 = vmatpush3.msra.mxu0 %v353_v18  ;;  %6637 = vmatpush3.msra.mxu1 %v361_v19  ;;  %v50_v18 = vld [vmem:[%s9893_s0 + $0x4e] sm:$0x3]  ;;  %v402_v19 = vld [vmem:[%s9892_s1 + $0xa38] sm:$0xff] }
 0x137   :  { %6619 = vmatprep.subr.mxu0 %v7187_v0  ;;  %6638 = vmatprep.subr.mxu1 %v7187_v0 }
 0x138   :  { %6620 = vmatpush3.msra.mxu0 %v352_v20  ;;  %6639 = vmatpush3.msra.mxu1 %v360_v21  ;;  %v410_v20 = vld [vmem:[%s9892_s1 + $0xa78] sm:$0xff]  ;;  %v401_v21 = vld [vmem:[%s9892_s1 + $0xa30] sm:$0xff] }
 0x139   :  { %6621 = vmatprep.subr.mxu0 %v7187_v0  ;;  %6640 = vmatprep.subr.mxu1 %v7187_v0 }
 0x13a   :  { %6622 = vmatpush3.msra.mxu0 %v351_v22  ;;  %6641 = vmatpush3.msra.mxu1 %v359_v23  ;;  %v409_v22 = vld [vmem:[%s9892_s1 + $0xa70] sm:$0xff]  ;;  %v400_v23 = vld [vmem:[%s9892_s1 + $0xa28] sm:$0xff] }
 0x13b   :  { %6623 = vmatprep.subr.mxu0 %v7187_v0  ;;  %6642 = vmatprep.subr.mxu1 %v7187_v0 }
 0x13c   :  { %6624 = vmatpush3.msra.mxu0 %v350_v24  ;;  %6643 = vmatpush3.msra.mxu1 %v358_v25  ;;  %v408_v24 = vld [vmem:[%s9892_s1 + $0xa68] sm:$0xff]  ;;  %v399_v25 = vld [vmem:[%s9892_s1 + $0xa20] sm:$0xff] }
 0x13d   :  { %6625 = vmatprep.subr.mxu0 %v7187_v0  ;;  %6644 = vmatprep.subr.mxu1 %v7187_v0 }
 0x13e   :  { %6626 = vmatpush3.msra.mxu0 %v349_v26  ;;  %6645 = vmatpush3.msra.mxu1 %v357_v27  ;;  %v1533_v30 = vpop.f32.mrf.mxu0  ;;  %v1606_v31 = vpop.f32.mrf.mxu1  ;;  %v407_v26 = vld [vmem:[%s9892_s1 + $0xa60] sm:$0xff]  ;;  %v398_v27 = vld [vmem:[%s9892_s1 + $0xa18] sm:$0xff] }
 0x13f   :  { %6627 = vmatprep.subr.mxu0 %v7187_v0  ;;  %6646 = vmatprep.subr.mxu1 %v7187_v0  ;;  %5273 = vst.msk [vmem:[%s9894_s2 + $0x18] sm:$0x3] %vm5260_vm2, %v1533_v30  ;;  %5274 = vst.msk [vmem:[%s9894_s2 + $0x1a] sm:$0x3] %vm5260_vm2, %v1606_v31  ;;  %v405_v30 = vld [vmem:[%s9892_s1 + $0xa50] sm:$0xff]  ;;  %v396_v31 = vld [vmem:[%s9892_s1 + $0xa08] sm:$0xff] }
 0x140   :  { %6628 = vmatpush3.msra.mxu0 %v348_v28  ;;  %6647 = vmatpush3.msra.mxu1 %v356_v29  ;;  %v6215_v34 = vpop.f32.mrf.mxu0  ;;  %v6234_v35 = vpop.f32.mrf.mxu1  ;;  %v406_v28 = vld [vmem:[%s9892_s1 + $0xa58] sm:$0xff]  ;;  %v397_v29 = vld [vmem:[%s9892_s1 + $0xa10] sm:$0xff] }
 0x141   :  { %6629 = vmatprep.subr.mxu0 %v7187_v0  ;;  %6648 = vmatprep.subr.mxu1 %v7187_v0  ;;  %v395_v35 = vld [vmem:[%s9892_s1 + $0xa00] sm:$0xff] }
 0x142   :  { %6630 = vmatpush3.msra.mxu0 %v347_v32  ;;  %6631 = vmatprep.mubr.msk.f32.mxu0 %vm7188_vm1, %v7187_v0  ;;  %v404_v32 = vld [vmem:[%s9892_s1 + $0xa48] sm:$0xff] }
 0x143   :  { %6649 = vmatpush3.msra.mxu1 %v355_v33  ;;  %6650 = vmatprep.mubr.msk.f32.mxu1 %vm7188_vm1, %v7187_v0 }
 0x144   :  { %6632 = vmatmul.mubr.msk.f32.vlgmr.msra.gmra.mxu0 %vm587_vm0, %v45_v36  ;;  %6651 = vmatmul.mubr.msk.f32.vlgmr.msra.gmra.mxu1 %vm587_vm0, %v46_v37  ;;  %v403_v36 = vld [vmem:[%s9892_s1 + $0xa40] sm:$0xff] }
 0x145   :  { %6653 = vmatprep.subr.mxu0 %v7187_v0  ;;  %6672 = vmatprep.subr.mxu1 %v7187_v0 }
 0x146   :  { %6654 = vmatpush3.msra.mxu0 %v370_v38  ;;  %6673 = vmatpush3.msra.mxu1 %v378_v39  ;;  %v51_v39 = vld [vmem:[%s9893_s0 + $0x50] sm:$0x3] }
 0x147   :  { %6655 = vmatprep.subr.mxu0 %v7187_v0  ;;  %6674 = vmatprep.subr.mxu1 %v7187_v0 }
 0x148   :  { %6656 = vmatpush3.msra.mxu0 %v369_v40  ;;  %6675 = vmatpush3.msra.mxu1 %v377_v41  ;;  %v52_v40 = vld [vmem:[%s9893_s0 + $0x52] sm:$0x3]  ;;  %v418_v41 = vld [vmem:[%s9892_s1 + $0xab8] sm:$0xff] }
 0x149   :  { %6657 = vmatprep.subr.mxu0 %v7187_v0  ;;  %6676 = vmatprep.subr.mxu1 %v7187_v0 }
 0x14a   :  { %6658 = vmatpush3.msra.mxu0 %v368_v42  ;;  %6677 = vmatpush3.msra.mxu1 %v376_v43  ;;  %v426_v42 = vld [vmem:[%s9892_s1 + $0xaf8] sm:$0xff]  ;;  %v417_v43 = vld [vmem:[%s9892_s1 + $0xab0] sm:$0xff] }
 0x14b   :  { %6659 = vmatprep.subr.mxu0 %v7187_v0  ;;  %6678 = vmatprep.subr.mxu1 %v7187_v0 }
 0x14c   :  { %6660 = vmatpush3.msra.mxu0 %v367_v44  ;;  %6679 = vmatpush3.msra.mxu1 %v375_v45  ;;  %v425_v44 = vld [vmem:[%s9892_s1 + $0xaf0] sm:$0xff]  ;;  %v416_v45 = vld [vmem:[%s9892_s1 + $0xaa8] sm:$0xff] }
 0x14d   :  { %6661 = vmatprep.subr.mxu0 %v7187_v0  ;;  %6680 = vmatprep.subr.mxu1 %v7187_v0 }
 0x14e   :  { %6662 = vmatpush3.msra.mxu0 %v366_v46  ;;  %6681 = vmatpush3.msra.mxu1 %v374_v47  ;;  %v424_v46 = vld [vmem:[%s9892_s1 + $0xae8] sm:$0xff]  ;;  %v415_v47 = vld [vmem:[%s9892_s1 + $0xaa0] sm:$0xff] }
 0x14f   :  { %6663 = vmatprep.subr.mxu0 %v7187_v0  ;;  %6682 = vmatprep.subr.mxu1 %v7187_v0 }
 0x150   :  { %6664 = vmatpush3.msra.mxu0 %v365_v48  ;;  %6683 = vmatpush3.msra.mxu1 %v373_v49  ;;  %v1679_v52 = vpop.f32.mrf.mxu0  ;;  %v1752_v53 = vpop.f32.mrf.mxu1  ;;  %v423_v48 = vld [vmem:[%s9892_s1 + $0xae0] sm:$0xff]  ;;  %v414_v49 = vld [vmem:[%s9892_s1 + $0xa98] sm:$0xff] }
 0x151   :  { %6665 = vmatprep.subr.mxu0 %v7187_v0  ;;  %6684 = vmatprep.subr.mxu1 %v7187_v0  ;;  %5275 = vst.msk [vmem:[%s9894_s2 + $0x1c] sm:$0x3] %vm5260_vm2, %v1679_v52  ;;  %5276 = vst.msk [vmem:[%s9894_s2 + $0x1e] sm:$0x3] %vm5260_vm2, %v1752_v53  ;;  %v421_v52 = vld [vmem:[%s9892_s1 + $0xad0] sm:$0xff]  ;;  %v412_v53 = vld [vmem:[%s9892_s1 + $0xa88] sm:$0xff] }
 0x152   :  { %6666 = vmatpush3.msra.mxu0 %v364_v50  ;;  %6685 = vmatpush3.msra.mxu1 %v372_v51  ;;  %v6253_v56 = vpop.f32.mrf.mxu0  ;;  %v6272_v57 = vpop.f32.mrf.mxu1  ;;  %v422_v50 = vld [vmem:[%s9892_s1 + $0xad8] sm:$0xff]  ;;  %v413_v51 = vld [vmem:[%s9892_s1 + $0xa90] sm:$0xff] }
 0x153   :  { %6667 = vmatprep.subr.mxu0 %v7187_v0  ;;  %6686 = vmatprep.subr.mxu1 %v7187_v0  ;;  %v411_v57 = vld [vmem:[%s9892_s1 + $0xa80] sm:$0xff] }
 0x154   :  { %6668 = vmatpush3.msra.mxu0 %v363_v54  ;;  %6669 = vmatprep.mubr.msk.f32.mxu0 %vm7188_vm1, %v7187_v0  ;;  %v420_v54 = vld [vmem:[%s9892_s1 + $0xac8] sm:$0xff] }
 0x155   :  { %6687 = vmatpush3.msra.mxu1 %v371_v55  ;;  %6688 = vmatprep.mubr.msk.f32.mxu1 %vm7188_vm1, %v7187_v0 }
 0x156   :  { %6670 = vmatmul.mubr.msk.f32.vlgmr.msra.gmra.mxu0 %vm587_vm0, %v47_v58  ;;  %6689 = vmatmul.mubr.msk.f32.vlgmr.msra.gmra.mxu1 %vm587_vm0, %v48_v59  ;;  %v419_v58 = vld [vmem:[%s9892_s1 + $0xac0] sm:$0xff] }
 0x157   :  { %6691 = vmatprep.subr.mxu0 %v7187_v0  ;;  %6710 = vmatprep.subr.mxu1 %v7187_v0 }
 0x158   :  { %6692 = vmatpush3.msra.mxu0 %v386_v60  ;;  %6711 = vmatpush3.msra.mxu1 %v394_v61  ;;  %v53_v61 = vld [vmem:[%s9893_s0 + $0x54] sm:$0x3] }
 0x159   :  { %6693 = vmatprep.subr.mxu0 %v7187_v0  ;;  %6712 = vmatprep.subr.mxu1 %v7187_v0 }
 0x15a   :  { %6694 = vmatpush3.msra.mxu0 %v385_v62  ;;  %6713 = vmatpush3.msra.mxu1 %v393_v63  ;;  %v54_v62 = vld [vmem:[%s9893_s0 + $0x56] sm:$0x3]  ;;  %v434_v63 = vld [vmem:[%s9892_s1 + $0xb38] sm:$0xff] }
 0x15b   :  { %6695 = vmatprep.subr.mxu0 %v7187_v0  ;;  %6714 = vmatprep.subr.mxu1 %v7187_v0 }
 0x15c   :  { %6696 = vmatpush3.msra.mxu0 %v384_v1  ;;  %6715 = vmatpush3.msra.mxu1 %v392_v2  ;;  %v442_v1 = vld [vmem:[%s9892_s1 + $0xb78] sm:$0xff]  ;;  %v433_v2 = vld [vmem:[%s9892_s1 + $0xb30] sm:$0xff] }
 0x15d   :  { %6697 = vmatprep.subr.mxu0 %v7187_v0  ;;  %6716 = vmatprep.subr.mxu1 %v7187_v0 }
 0x15e   :  { %6698 = vmatpush3.msra.mxu0 %v383_v3  ;;  %6717 = vmatpush3.msra.mxu1 %v391_v4  ;;  %v441_v3 = vld [vmem:[%s9892_s1 + $0xb70] sm:$0xff]  ;;  %v432_v4 = vld [vmem:[%s9892_s1 + $0xb28] sm:$0xff] }
 0x15f   :  { %6699 = vmatprep.subr.mxu0 %v7187_v0  ;;  %6718 = vmatprep.subr.mxu1 %v7187_v0 }
 0x160   :  { %6700 = vmatpush3.msra.mxu0 %v382_v5  ;;  %6719 = vmatpush3.msra.mxu1 %v390_v6  ;;  %v440_v5 = vld [vmem:[%s9892_s1 + $0xb68] sm:$0xff]  ;;  %v431_v6 = vld [vmem:[%s9892_s1 + $0xb20] sm:$0xff] }
 0x161   :  { %6701 = vmatprep.subr.mxu0 %v7187_v0  ;;  %6720 = vmatprep.subr.mxu1 %v7187_v0 }
 0x162   :  { %6702 = vmatpush3.msra.mxu0 %v381_v7  ;;  %6721 = vmatpush3.msra.mxu1 %v389_v8  ;;  %v1825_v11 = vpop.f32.mrf.mxu0  ;;  %v1898_v12 = vpop.f32.mrf.mxu1  ;;  %v439_v7 = vld [vmem:[%s9892_s1 + $0xb60] sm:$0xff]  ;;  %v430_v8 = vld [vmem:[%s9892_s1 + $0xb18] sm:$0xff] }
 0x163   :  { %6703 = vmatprep.subr.mxu0 %v7187_v0  ;;  %6722 = vmatprep.subr.mxu1 %v7187_v0  ;;  %5277 = vst.msk [vmem:[%s9894_s2 + $0x20] sm:$0x3] %vm5260_vm2, %v1825_v11  ;;  %5278 = vst.msk [vmem:[%s9894_s2 + $0x22] sm:$0x3] %vm5260_vm2, %v1898_v12  ;;  %v437_v11 = vld [vmem:[%s9892_s1 + $0xb50] sm:$0xff]  ;;  %v428_v12 = vld [vmem:[%s9892_s1 + $0xb08] sm:$0xff] }
 0x164   :  { %6704 = vmatpush3.msra.mxu0 %v380_v9  ;;  %6723 = vmatpush3.msra.mxu1 %v388_v10  ;;  %v6291_v15 = vpop.f32.mrf.mxu0  ;;  %v6310_v16 = vpop.f32.mrf.mxu1  ;;  %v438_v9 = vld [vmem:[%s9892_s1 + $0xb58] sm:$0xff]  ;;  %v429_v10 = vld [vmem:[%s9892_s1 + $0xb10] sm:$0xff] }
 0x165   :  { %6705 = vmatprep.subr.mxu0 %v7187_v0  ;;  %6724 = vmatprep.subr.mxu1 %v7187_v0  ;;  %v427_v16 = vld [vmem:[%s9892_s1 + $0xb00] sm:$0xff] }
 0x166   :  { %6706 = vmatpush3.msra.mxu0 %v379_v13  ;;  %6707 = vmatprep.mubr.msk.f32.mxu0 %vm7188_vm1, %v7187_v0  ;;  %v436_v13 = vld [vmem:[%s9892_s1 + $0xb48] sm:$0xff] }
 0x167   :  { %6725 = vmatpush3.msra.mxu1 %v387_v14  ;;  %6726 = vmatprep.mubr.msk.f32.mxu1 %vm7188_vm1, %v7187_v0 }
 0x168   :  { %6708 = vmatmul.mubr.msk.f32.vlgmr.msra.gmra.mxu0 %vm587_vm0, %v49_v17  ;;  %6727 = vmatmul.mubr.msk.f32.vlgmr.msra.gmra.mxu1 %vm587_vm0, %v50_v18  ;;  %v435_v17 = vld [vmem:[%s9892_s1 + $0xb40] sm:$0xff] }
 0x169   :  { %6729 = vmatprep.subr.mxu0 %v7187_v0  ;;  %6748 = vmatprep.subr.mxu1 %v7187_v0 }
 0x16a   :  { %6730 = vmatpush3.msra.mxu0 %v402_v19  ;;  %6749 = vmatpush3.msra.mxu1 %v410_v20  ;;  %v55_v20 = vld [vmem:[%s9893_s0 + $0x58] sm:$0x3] }
 0x16b   :  { %6731 = vmatprep.subr.mxu0 %v7187_v0  ;;  %6750 = vmatprep.subr.mxu1 %v7187_v0 }
 0x16c   :  { %6732 = vmatpush3.msra.mxu0 %v401_v21  ;;  %6751 = vmatpush3.msra.mxu1 %v409_v22  ;;  %v56_v21 = vld [vmem:[%s9893_s0 + $0x5a] sm:$0x3] }
 0x16d   :  { %6733 = vmatprep.subr.mxu0 %v7187_v0  ;;  %6752 = vmatprep.subr.mxu1 %v7187_v0  ;;  %v450_v22 = vld [vmem:[%s9892_s1 + $0xbb8] sm:$0xff] }
 0x16e   :  { %6734 = vmatpush3.msra.mxu0 %v400_v23  ;;  %6753 = vmatpush3.msra.mxu1 %v408_v24  ;;  %v458_v23 = vld [vmem:[%s9892_s1 + $0xbf8] sm:$0xff]  ;;  %v449_v24 = vld [vmem:[%s9892_s1 + $0xbb0] sm:$0xff] }
 0x16f   :  { %6735 = vmatprep.subr.mxu0 %v7187_v0  ;;  %6754 = vmatprep.subr.mxu1 %v7187_v0 }
 0x170   :  { %6736 = vmatpush3.msra.mxu0 %v399_v25  ;;  %6755 = vmatpush3.msra.mxu1 %v407_v26  ;;  %v457_v25 = vld [vmem:[%s9892_s1 + $0xbf0] sm:$0xff]  ;;  %v448_v26 = vld [vmem:[%s9892_s1 + $0xba8] sm:$0xff] }
 0x171   :  { %6737 = vmatprep.subr.mxu0 %v7187_v0  ;;  %6756 = vmatprep.subr.mxu1 %v7187_v0 }
 0x172   :  { %6738 = vmatpush3.msra.mxu0 %v398_v27  ;;  %6757 = vmatpush3.msra.mxu1 %v406_v28  ;;  %v456_v27 = vld [vmem:[%s9892_s1 + $0xbe8] sm:$0xff]  ;;  %v447_v28 = vld [vmem:[%s9892_s1 + $0xba0] sm:$0xff] }
 0x173   :  { %6739 = vmatprep.subr.mxu0 %v7187_v0  ;;  %6758 = vmatprep.subr.mxu1 %v7187_v0 }
 0x174   :  { %6740 = vmatpush3.msra.mxu0 %v397_v29  ;;  %6759 = vmatpush3.msra.mxu1 %v405_v30  ;;  %v1971_v33 = vpop.f32.mrf.mxu0  ;;  %v2044_v34 = vpop.f32.mrf.mxu1  ;;  %v455_v29 = vld [vmem:[%s9892_s1 + $0xbe0] sm:$0xff]  ;;  %v446_v30 = vld [vmem:[%s9892_s1 + $0xb98] sm:$0xff] }
 0x175   :  { %6741 = vmatprep.subr.mxu0 %v7187_v0  ;;  %6760 = vmatprep.subr.mxu1 %v7187_v0  ;;  %5279 = vst.msk [vmem:[%s9894_s2 + $0x24] sm:$0x3] %vm5260_vm2, %v1971_v33  ;;  %5280 = vst.msk [vmem:[%s9894_s2 + $0x26] sm:$0x3] %vm5260_vm2, %v2044_v34  ;;  %v453_v33 = vld [vmem:[%s9892_s1 + $0xbd0] sm:$0xff]  ;;  %v444_v34 = vld [vmem:[%s9892_s1 + $0xb88] sm:$0xff] }
 0x176   :  { %6742 = vmatpush3.msra.mxu0 %v396_v31  ;;  %6761 = vmatpush3.msra.mxu1 %v404_v32  ;;  %v6329_v37 = vpop.f32.mrf.mxu0  ;;  %v6348_v38 = vpop.f32.mrf.mxu1  ;;  %v454_v31 = vld [vmem:[%s9892_s1 + $0xbd8] sm:$0xff]  ;;  %v445_v32 = vld [vmem:[%s9892_s1 + $0xb90] sm:$0xff] }
 0x177   :  { %6743 = vmatprep.subr.mxu0 %v7187_v0  ;;  %6762 = vmatprep.subr.mxu1 %v7187_v0  ;;  %v443_v38 = vld [vmem:[%s9892_s1 + $0xb80] sm:$0xff] }
 0x178   :  { %6744 = vmatpush3.msra.mxu0 %v395_v35  ;;  %6745 = vmatprep.mubr.msk.f32.mxu0 %vm7188_vm1, %v7187_v0  ;;  %v452_v35 = vld [vmem:[%s9892_s1 + $0xbc8] sm:$0xff] }
 0x179   :  { %6763 = vmatpush3.msra.mxu1 %v403_v36  ;;  %6764 = vmatprep.mubr.msk.f32.mxu1 %vm7188_vm1, %v7187_v0 }
 0x17a   :  { %6746 = vmatmul.mubr.msk.f32.vlgmr.msra.gmra.mxu0 %vm587_vm0, %v51_v39  ;;  %6765 = vmatmul.mubr.msk.f32.vlgmr.msra.gmra.mxu1 %vm587_vm0, %v52_v40  ;;  %v451_v39 = vld [vmem:[%s9892_s1 + $0xbc0] sm:$0xff] }
 0x17b   :  { %6767 = vmatprep.subr.mxu0 %v7187_v0  ;;  %6786 = vmatprep.subr.mxu1 %v7187_v0 }
 0x17c   :  { %6768 = vmatpush3.msra.mxu0 %v418_v41  ;;  %6787 = vmatpush3.msra.mxu1 %v426_v42  ;;  %v57_v42 = vld [vmem:[%s9893_s0 + $0x5c] sm:$0x3] }
 0x17d   :  { %6769 = vmatprep.subr.mxu0 %v7187_v0  ;;  %6788 = vmatprep.subr.mxu1 %v7187_v0 }
 0x17e   :  { %6770 = vmatpush3.msra.mxu0 %v417_v43  ;;  %6789 = vmatpush3.msra.mxu1 %v425_v44  ;;  %v58_v43 = vld [vmem:[%s9893_s0 + $0x5e] sm:$0x3] }
 0x17f   :  { %6771 = vmatprep.subr.mxu0 %v7187_v0  ;;  %6790 = vmatprep.subr.mxu1 %v7187_v0  ;;  %v466_v44 = vld [vmem:[%s9892_s1 + $0xc38] sm:$0xff] }
 0x180   :  { %6772 = vmatpush3.msra.mxu0 %v416_v45  ;;  %6791 = vmatpush3.msra.mxu1 %v424_v46  ;;  %v474_v45 = vld [vmem:[%s9892_s1 + $0xc78] sm:$0xff]  ;;  %v465_v46 = vld [vmem:[%s9892_s1 + $0xc30] sm:$0xff] }
 0x181   :  { %6773 = vmatprep.subr.mxu0 %v7187_v0  ;;  %6792 = vmatprep.subr.mxu1 %v7187_v0 }
 0x182   :  { %6774 = vmatpush3.msra.mxu0 %v415_v47  ;;  %6793 = vmatpush3.msra.mxu1 %v423_v48  ;;  %v473_v47 = vld [vmem:[%s9892_s1 + $0xc70] sm:$0xff]  ;;  %v464_v48 = vld [vmem:[%s9892_s1 + $0xc28] sm:$0xff] }
 0x183   :  { %6775 = vmatprep.subr.mxu0 %v7187_v0  ;;  %6794 = vmatprep.subr.mxu1 %v7187_v0 }
 0x184   :  { %6776 = vmatpush3.msra.mxu0 %v414_v49  ;;  %6795 = vmatpush3.msra.mxu1 %v422_v50  ;;  %v472_v49 = vld [vmem:[%s9892_s1 + $0xc68] sm:$0xff]  ;;  %v463_v50 = vld [vmem:[%s9892_s1 + $0xc20] sm:$0xff] }
 0x185   :  { %6777 = vmatprep.subr.mxu0 %v7187_v0  ;;  %6796 = vmatprep.subr.mxu1 %v7187_v0 }
 0x186   :  { %6778 = vmatpush3.msra.mxu0 %v413_v51  ;;  %6797 = vmatpush3.msra.mxu1 %v421_v52  ;;  %v2117_v55 = vpop.f32.mrf.mxu0  ;;  %v2190_v56 = vpop.f32.mrf.mxu1  ;;  %v471_v51 = vld [vmem:[%s9892_s1 + $0xc60] sm:$0xff]  ;;  %v462_v52 = vld [vmem:[%s9892_s1 + $0xc18] sm:$0xff] }
 0x187   :  { %6779 = vmatprep.subr.mxu0 %v7187_v0  ;;  %6798 = vmatprep.subr.mxu1 %v7187_v0  ;;  %5281 = vst.msk [vmem:[%s9894_s2 + $0x28] sm:$0x3] %vm5260_vm2, %v2117_v55  ;;  %5282 = vst.msk [vmem:[%s9894_s2 + $0x2a] sm:$0x3] %vm5260_vm2, %v2190_v56  ;;  %v469_v55 = vld [vmem:[%s9892_s1 + $0xc50] sm:$0xff]  ;;  %v460_v56 = vld [vmem:[%s9892_s1 + $0xc08] sm:$0xff] }
 0x188   :  { %6780 = vmatpush3.msra.mxu0 %v412_v53  ;;  %6799 = vmatpush3.msra.mxu1 %v420_v54  ;;  %v6367_v59 = vpop.f32.mrf.mxu0  ;;  %v6386_v60 = vpop.f32.mrf.mxu1  ;;  %v470_v53 = vld [vmem:[%s9892_s1 + $0xc58] sm:$0xff]  ;;  %v461_v54 = vld [vmem:[%s9892_s1 + $0xc10] sm:$0xff] }
 0x189   :  { %6781 = vmatprep.subr.mxu0 %v7187_v0  ;;  %6800 = vmatprep.subr.mxu1 %v7187_v0  ;;  %v459_v60 = vld [vmem:[%s9892_s1 + $0xc00] sm:$0xff] }
 0x18a   :  { %6782 = vmatpush3.msra.mxu0 %v411_v57  ;;  %6783 = vmatprep.mubr.msk.f32.mxu0 %vm7188_vm1, %v7187_v0  ;;  %v468_v57 = vld [vmem:[%s9892_s1 + $0xc48] sm:$0xff] }
 0x18b   :  { %6801 = vmatpush3.msra.mxu1 %v419_v58  ;;  %6802 = vmatprep.mubr.msk.f32.mxu1 %vm7188_vm1, %v7187_v0 }
 0x18c   :  { %6784 = vmatmul.mubr.msk.f32.vlgmr.msra.gmra.mxu0 %vm587_vm0, %v53_v61  ;;  %6803 = vmatmul.mubr.msk.f32.vlgmr.msra.gmra.mxu1 %vm587_vm0, %v54_v62  ;;  %v467_v61 = vld [vmem:[%s9892_s1 + $0xc40] sm:$0xff] }
 0x18d   :  { %6805 = vmatprep.subr.mxu0 %v7187_v0  ;;  %6824 = vmatprep.subr.mxu1 %v7187_v0 }
 0x18e   :  { %6806 = vmatpush3.msra.mxu0 %v434_v63  ;;  %6825 = vmatpush3.msra.mxu1 %v442_v1  ;;  %v59_v1 = vld [vmem:[%s9893_s0 + $0x60] sm:$0x3] }
 0x18f   :  { %6807 = vmatprep.subr.mxu0 %v7187_v0  ;;  %6826 = vmatprep.subr.mxu1 %v7187_v0 }
 0x190   :  { %6808 = vmatpush3.msra.mxu0 %v433_v2  ;;  %6827 = vmatpush3.msra.mxu1 %v441_v3  ;;  %v60_v2 = vld [vmem:[%s9893_s0 + $0x62] sm:$0x3]  ;;  %v482_v3 = vld [vmem:[%s9892_s1 + $0xcb8] sm:$0xff] }
 0x191   :  { %6809 = vmatprep.subr.mxu0 %v7187_v0  ;;  %6828 = vmatprep.subr.mxu1 %v7187_v0 }
 0x192   :  { %6810 = vmatpush3.msra.mxu0 %v432_v4  ;;  %6829 = vmatpush3.msra.mxu1 %v440_v5  ;;  %v490_v4 = vld [vmem:[%s9892_s1 + $0xcf8] sm:$0xff]  ;;  %v481_v5 = vld [vmem:[%s9892_s1 + $0xcb0] sm:$0xff] }
 0x193   :  { %6811 = vmatprep.subr.mxu0 %v7187_v0  ;;  %6830 = vmatprep.subr.mxu1 %v7187_v0 }
 0x194   :  { %6812 = vmatpush3.msra.mxu0 %v431_v6  ;;  %6831 = vmatpush3.msra.mxu1 %v439_v7  ;;  %v489_v6 = vld [vmem:[%s9892_s1 + $0xcf0] sm:$0xff]  ;;  %v480_v7 = vld [vmem:[%s9892_s1 + $0xca8] sm:$0xff] }
 0x195   :  { %6813 = vmatprep.subr.mxu0 %v7187_v0  ;;  %6832 = vmatprep.subr.mxu1 %v7187_v0 }
 0x196   :  { %6814 = vmatpush3.msra.mxu0 %v430_v8  ;;  %6833 = vmatpush3.msra.mxu1 %v438_v9  ;;  %v488_v8 = vld [vmem:[%s9892_s1 + $0xce8] sm:$0xff]  ;;  %v479_v9 = vld [vmem:[%s9892_s1 + $0xca0] sm:$0xff] }
 0x197   :  { %6815 = vmatprep.subr.mxu0 %v7187_v0  ;;  %6834 = vmatprep.subr.mxu1 %v7187_v0 }
 0x198   :  { %6816 = vmatpush3.msra.mxu0 %v429_v10  ;;  %6835 = vmatpush3.msra.mxu1 %v437_v11  ;;  %v2263_v14 = vpop.f32.mrf.mxu0  ;;  %v2336_v15 = vpop.f32.mrf.mxu1  ;;  %v487_v10 = vld [vmem:[%s9892_s1 + $0xce0] sm:$0xff]  ;;  %v478_v11 = vld [vmem:[%s9892_s1 + $0xc98] sm:$0xff] }
 0x199   :  { %6817 = vmatprep.subr.mxu0 %v7187_v0  ;;  %6836 = vmatprep.subr.mxu1 %v7187_v0  ;;  %5283 = vst.msk [vmem:[%s9894_s2 + $0x2c] sm:$0x3] %vm5260_vm2, %v2263_v14  ;;  %5284 = vst.msk [vmem:[%s9894_s2 + $0x2e] sm:$0x3] %vm5260_vm2, %v2336_v15  ;;  %v485_v14 = vld [vmem:[%s9892_s1 + $0xcd0] sm:$0xff]  ;;  %v476_v15 = vld [vmem:[%s9892_s1 + $0xc88] sm:$0xff] }
 0x19a   :  { %6818 = vmatpush3.msra.mxu0 %v428_v12  ;;  %6837 = vmatpush3.msra.mxu1 %v436_v13  ;;  %v6405_v18 = vpop.f32.mrf.mxu0  ;;  %v6424_v19 = vpop.f32.mrf.mxu1  ;;  %v486_v12 = vld [vmem:[%s9892_s1 + $0xcd8] sm:$0xff]  ;;  %v477_v13 = vld [vmem:[%s9892_s1 + $0xc90] sm:$0xff] }
 0x19b   :  { %6819 = vmatprep.subr.mxu0 %v7187_v0  ;;  %6838 = vmatprep.subr.mxu1 %v7187_v0  ;;  %v475_v19 = vld [vmem:[%s9892_s1 + $0xc80] sm:$0xff] }
 0x19c   :  { %6820 = vmatpush3.msra.mxu0 %v427_v16  ;;  %6821 = vmatprep.mubr.msk.f32.mxu0 %vm7188_vm1, %v7187_v0  ;;  %v484_v16 = vld [vmem:[%s9892_s1 + $0xcc8] sm:$0xff] }
 0x19d   :  { %6839 = vmatpush3.msra.mxu1 %v435_v17  ;;  %6840 = vmatprep.mubr.msk.f32.mxu1 %vm7188_vm1, %v7187_v0 }
 0x19e   :  { %6822 = vmatmul.mubr.msk.f32.vlgmr.msra.gmra.mxu0 %vm587_vm0, %v55_v20  ;;  %6841 = vmatmul.mubr.msk.f32.vlgmr.msra.gmra.mxu1 %vm587_vm0, %v56_v21  ;;  %v483_v20 = vld [vmem:[%s9892_s1 + $0xcc0] sm:$0xff] }
 0x19f   :  { %6843 = vmatprep.subr.mxu0 %v7187_v0  ;;  %6862 = vmatprep.subr.mxu1 %v7187_v0 }
 0x1a0   :  { %6844 = vmatpush3.msra.mxu0 %v450_v22  ;;  %6863 = vmatpush3.msra.mxu1 %v458_v23  ;;  %v61_v23 = vld [vmem:[%s9893_s0 + $0x64] sm:$0x3] }
 0x1a1   :  { %6845 = vmatprep.subr.mxu0 %v7187_v0  ;;  %6864 = vmatprep.subr.mxu1 %v7187_v0 }
 0x1a2   :  { %6846 = vmatpush3.msra.mxu0 %v449_v24  ;;  %6865 = vmatpush3.msra.mxu1 %v457_v25  ;;  %v62_v24 = vld [vmem:[%s9893_s0 + $0x66] sm:$0x3]  ;;  %v498_v25 = vld [vmem:[%s9892_s1 + $0xd38] sm:$0xff] }
 0x1a3   :  { %6847 = vmatprep.subr.mxu0 %v7187_v0  ;;  %6866 = vmatprep.subr.mxu1 %v7187_v0 }
 0x1a4   :  { %6848 = vmatpush3.msra.mxu0 %v448_v26  ;;  %6867 = vmatpush3.msra.mxu1 %v456_v27  ;;  %v506_v26 = vld [vmem:[%s9892_s1 + $0xd78] sm:$0xff]  ;;  %v497_v27 = vld [vmem:[%s9892_s1 + $0xd30] sm:$0xff] }
 0x1a5   :  { %6849 = vmatprep.subr.mxu0 %v7187_v0  ;;  %6868 = vmatprep.subr.mxu1 %v7187_v0 }
 0x1a6   :  { %6850 = vmatpush3.msra.mxu0 %v447_v28  ;;  %6869 = vmatpush3.msra.mxu1 %v455_v29  ;;  %v505_v28 = vld [vmem:[%s9892_s1 + $0xd70] sm:$0xff]  ;;  %v496_v29 = vld [vmem:[%s9892_s1 + $0xd28] sm:$0xff] }
 0x1a7   :  { %6851 = vmatprep.subr.mxu0 %v7187_v0  ;;  %6870 = vmatprep.subr.mxu1 %v7187_v0 }
 0x1a8   :  { %6852 = vmatpush3.msra.mxu0 %v446_v30  ;;  %6871 = vmatpush3.msra.mxu1 %v454_v31  ;;  %v504_v30 = vld [vmem:[%s9892_s1 + $0xd68] sm:$0xff]  ;;  %v495_v31 = vld [vmem:[%s9892_s1 + $0xd20] sm:$0xff] }
 0x1a9   :  { %6853 = vmatprep.subr.mxu0 %v7187_v0  ;;  %6872 = vmatprep.subr.mxu1 %v7187_v0 }
 0x1aa   :  { %6854 = vmatpush3.msra.mxu0 %v445_v32  ;;  %6873 = vmatpush3.msra.mxu1 %v453_v33  ;;  %v2409_v36 = vpop.f32.mrf.mxu0  ;;  %v2482_v37 = vpop.f32.mrf.mxu1  ;;  %v503_v32 = vld [vmem:[%s9892_s1 + $0xd60] sm:$0xff]  ;;  %v494_v33 = vld [vmem:[%s9892_s1 + $0xd18] sm:$0xff] }
 0x1ab   :  { %6855 = vmatprep.subr.mxu0 %v7187_v0  ;;  %6874 = vmatprep.subr.mxu1 %v7187_v0  ;;  %5285 = vst.msk [vmem:[%s9894_s2 + $0x30] sm:$0x3] %vm5260_vm2, %v2409_v36  ;;  %5286 = vst.msk [vmem:[%s9894_s2 + $0x32] sm:$0x3] %vm5260_vm2, %v2482_v37  ;;  %v501_v36 = vld [vmem:[%s9892_s1 + $0xd50] sm:$0xff]  ;;  %v492_v37 = vld [vmem:[%s9892_s1 + $0xd08] sm:$0xff] }
 0x1ac   :  { %6856 = vmatpush3.msra.mxu0 %v444_v34  ;;  %6875 = vmatpush3.msra.mxu1 %v452_v35  ;;  %v6443_v40 = vpop.f32.mrf.mxu0  ;;  %v6462_v41 = vpop.f32.mrf.mxu1  ;;  %v502_v34 = vld [vmem:[%s9892_s1 + $0xd58] sm:$0xff]  ;;  %v493_v35 = vld [vmem:[%s9892_s1 + $0xd10] sm:$0xff] }
 0x1ad   :  { %6857 = vmatprep.subr.mxu0 %v7187_v0  ;;  %6876 = vmatprep.subr.mxu1 %v7187_v0  ;;  %v491_v41 = vld [vmem:[%s9892_s1 + $0xd00] sm:$0xff] }
 0x1ae   :  { %6858 = vmatpush3.msra.mxu0 %v443_v38  ;;  %6859 = vmatprep.mubr.msk.f32.mxu0 %vm7188_vm1, %v7187_v0  ;;  %v500_v38 = vld [vmem:[%s9892_s1 + $0xd48] sm:$0xff] }
 0x1af   :  { %6877 = vmatpush3.msra.mxu1 %v451_v39  ;;  %6878 = vmatprep.mubr.msk.f32.mxu1 %vm7188_vm1, %v7187_v0 }
 0x1b0   :  { %6860 = vmatmul.mubr.msk.f32.vlgmr.msra.gmra.mxu0 %vm587_vm0, %v57_v42  ;;  %6879 = vmatmul.mubr.msk.f32.vlgmr.msra.gmra.mxu1 %vm587_vm0, %v58_v43  ;;  %v499_v42 = vld [vmem:[%s9892_s1 + $0xd40] sm:$0xff] }
 0x1b1   :  { %6881 = vmatprep.subr.mxu0 %v7187_v0  ;;  %6900 = vmatprep.subr.mxu1 %v7187_v0 }
 0x1b2   :  { %6882 = vmatpush3.msra.mxu0 %v466_v44  ;;  %6901 = vmatpush3.msra.mxu1 %v474_v45  ;;  %v63_v45 = vld [vmem:[%s9893_s0 + $0x68] sm:$0x3] }
 0x1b3   :  { %6883 = vmatprep.subr.mxu0 %v7187_v0  ;;  %6902 = vmatprep.subr.mxu1 %v7187_v0 }
 0x1b4   :  { %6884 = vmatpush3.msra.mxu0 %v465_v46  ;;  %6903 = vmatpush3.msra.mxu1 %v473_v47  ;;  %v64_v46 = vld [vmem:[%s9893_s0 + $0x6a] sm:$0x3]  ;;  %v514_v47 = vld [vmem:[%s9892_s1 + $0xdb8] sm:$0xff] }
 0x1b5   :  { %6885 = vmatprep.subr.mxu0 %v7187_v0  ;;  %6904 = vmatprep.subr.mxu1 %v7187_v0 }
 0x1b6   :  { %6886 = vmatpush3.msra.mxu0 %v464_v48  ;;  %6905 = vmatpush3.msra.mxu1 %v472_v49  ;;  %v522_v48 = vld [vmem:[%s9892_s1 + $0xdf8] sm:$0xff]  ;;  %v513_v49 = vld [vmem:[%s9892_s1 + $0xdb0] sm:$0xff] }
 0x1b7   :  { %6887 = vmatprep.subr.mxu0 %v7187_v0  ;;  %6906 = vmatprep.subr.mxu1 %v7187_v0 }
 0x1b8   :  { %6888 = vmatpush3.msra.mxu0 %v463_v50  ;;  %6907 = vmatpush3.msra.mxu1 %v471_v51  ;;  %v521_v50 = vld [vmem:[%s9892_s1 + $0xdf0] sm:$0xff]  ;;  %v512_v51 = vld [vmem:[%s9892_s1 + $0xda8] sm:$0xff] }
 0x1b9   :  { %6889 = vmatprep.subr.mxu0 %v7187_v0  ;;  %6908 = vmatprep.subr.mxu1 %v7187_v0 }
 0x1ba   :  { %6890 = vmatpush3.msra.mxu0 %v462_v52  ;;  %6909 = vmatpush3.msra.mxu1 %v470_v53  ;;  %v520_v52 = vld [vmem:[%s9892_s1 + $0xde8] sm:$0xff]  ;;  %v511_v53 = vld [vmem:[%s9892_s1 + $0xda0] sm:$0xff] }
 0x1bb   :  { %6891 = vmatprep.subr.mxu0 %v7187_v0  ;;  %6910 = vmatprep.subr.mxu1 %v7187_v0 }
 0x1bc   :  { %6892 = vmatpush3.msra.mxu0 %v461_v54  ;;  %6911 = vmatpush3.msra.mxu1 %v469_v55  ;;  %v2555_v58 = vpop.f32.mrf.mxu0  ;;  %v2628_v59 = vpop.f32.mrf.mxu1  ;;  %v519_v54 = vld [vmem:[%s9892_s1 + $0xde0] sm:$0xff]  ;;  %v510_v55 = vld [vmem:[%s9892_s1 + $0xd98] sm:$0xff] }
 0x1bd   :  { %6893 = vmatprep.subr.mxu0 %v7187_v0  ;;  %6912 = vmatprep.subr.mxu1 %v7187_v0  ;;  %5287 = vst.msk [vmem:[%s9894_s2 + $0x34] sm:$0x3] %vm5260_vm2, %v2555_v58  ;;  %5288 = vst.msk [vmem:[%s9894_s2 + $0x36] sm:$0x3] %vm5260_vm2, %v2628_v59  ;;  %v517_v58 = vld [vmem:[%s9892_s1 + $0xdd0] sm:$0xff]  ;;  %v508_v59 = vld [vmem:[%s9892_s1 + $0xd88] sm:$0xff] }
 0x1be   :  { %6894 = vmatpush3.msra.mxu0 %v460_v56  ;;  %6913 = vmatpush3.msra.mxu1 %v468_v57  ;;  %v6481_v62 = vpop.f32.mrf.mxu0  ;;  %v6500_v63 = vpop.f32.mrf.mxu1  ;;  %v518_v56 = vld [vmem:[%s9892_s1 + $0xdd8] sm:$0xff]  ;;  %v509_v57 = vld [vmem:[%s9892_s1 + $0xd90] sm:$0xff] }
 0x1bf   :  { %6895 = vmatprep.subr.mxu0 %v7187_v0  ;;  %6914 = vmatprep.subr.mxu1 %v7187_v0  ;;  %v507_v63 = vld [vmem:[%s9892_s1 + $0xd80] sm:$0xff] }
 0x1c0   :  { %6896 = vmatpush3.msra.mxu0 %v459_v60  ;;  %6897 = vmatprep.mubr.msk.f32.mxu0 %vm7188_vm1, %v7187_v0  ;;  %v516_v60 = vld [vmem:[%s9892_s1 + $0xdc8] sm:$0xff] }
 0x1c1   :  { %6915 = vmatpush3.msra.mxu1 %v467_v61  ;;  %6916 = vmatprep.mubr.msk.f32.mxu1 %vm7188_vm1, %v7187_v0 }
 0x1c2   :  { %6898 = vmatmul.mubr.msk.f32.vlgmr.msra.gmra.mxu0 %vm587_vm0, %v59_v1  ;;  %6917 = vmatmul.mubr.msk.f32.vlgmr.msra.gmra.mxu1 %vm587_vm0, %v60_v2  ;;  %v515_v1 = vld [vmem:[%s9892_s1 + $0xdc0] sm:$0xff] }
 0x1c3   :  { %6919 = vmatprep.subr.mxu0 %v7187_v0  ;;  %6938 = vmatprep.subr.mxu1 %v7187_v0 }
 0x1c4   :  { %6920 = vmatpush3.msra.mxu0 %v482_v3  ;;  %6939 = vmatpush3.msra.mxu1 %v490_v4  ;;  %v65_v4 = vld [vmem:[%s9893_s0 + $0x6c] sm:$0x3] }
 0x1c5   :  { %6921 = vmatprep.subr.mxu0 %v7187_v0  ;;  %6940 = vmatprep.subr.mxu1 %v7187_v0 }
 0x1c6   :  { %6922 = vmatpush3.msra.mxu0 %v481_v5  ;;  %6941 = vmatpush3.msra.mxu1 %v489_v6  ;;  %v66_v5 = vld [vmem:[%s9893_s0 + $0x6e] sm:$0x3]  ;;  %v530_v6 = vld [vmem:[%s9892_s1 + $0xe38] sm:$0xff] }
 0x1c7   :  { %6923 = vmatprep.subr.mxu0 %v7187_v0  ;;  %6942 = vmatprep.subr.mxu1 %v7187_v0 }
 0x1c8   :  { %6924 = vmatpush3.msra.mxu0 %v480_v7  ;;  %6943 = vmatpush3.msra.mxu1 %v488_v8  ;;  %v538_v7 = vld [vmem:[%s9892_s1 + $0xe78] sm:$0xff]  ;;  %v529_v8 = vld [vmem:[%s9892_s1 + $0xe30] sm:$0xff] }
 0x1c9   :  { %6925 = vmatprep.subr.mxu0 %v7187_v0  ;;  %6944 = vmatprep.subr.mxu1 %v7187_v0 }
 0x1ca   :  { %6926 = vmatpush3.msra.mxu0 %v479_v9  ;;  %6945 = vmatpush3.msra.mxu1 %v487_v10  ;;  %v537_v9 = vld [vmem:[%s9892_s1 + $0xe70] sm:$0xff]  ;;  %v528_v10 = vld [vmem:[%s9892_s1 + $0xe28] sm:$0xff] }
 0x1cb   :  { %6927 = vmatprep.subr.mxu0 %v7187_v0  ;;  %6946 = vmatprep.subr.mxu1 %v7187_v0 }
 0x1cc   :  { %6928 = vmatpush3.msra.mxu0 %v478_v11  ;;  %6947 = vmatpush3.msra.mxu1 %v486_v12  ;;  %v536_v11 = vld [vmem:[%s9892_s1 + $0xe68] sm:$0xff]  ;;  %v527_v12 = vld [vmem:[%s9892_s1 + $0xe20] sm:$0xff] }
 0x1cd   :  { %6929 = vmatprep.subr.mxu0 %v7187_v0  ;;  %6948 = vmatprep.subr.mxu1 %v7187_v0 }
 0x1ce   :  { %6930 = vmatpush3.msra.mxu0 %v477_v13  ;;  %6949 = vmatpush3.msra.mxu1 %v485_v14  ;;  %v2701_v17 = vpop.f32.mrf.mxu0  ;;  %v2774_v18 = vpop.f32.mrf.mxu1  ;;  %v535_v13 = vld [vmem:[%s9892_s1 + $0xe60] sm:$0xff]  ;;  %v526_v14 = vld [vmem:[%s9892_s1 + $0xe18] sm:$0xff] }
 0x1cf   :  { %6931 = vmatprep.subr.mxu0 %v7187_v0  ;;  %6950 = vmatprep.subr.mxu1 %v7187_v0  ;;  %5289 = vst.msk [vmem:[%s9894_s2 + $0x38] sm:$0x3] %vm5260_vm2, %v2701_v17  ;;  %5290 = vst.msk [vmem:[%s9894_s2 + $0x3a] sm:$0x3] %vm5260_vm2, %v2774_v18  ;;  %v533_v17 = vld [vmem:[%s9892_s1 + $0xe50] sm:$0xff]  ;;  %v524_v18 = vld [vmem:[%s9892_s1 + $0xe08] sm:$0xff] }
 0x1d0   :  { %6932 = vmatpush3.msra.mxu0 %v476_v15  ;;  %6951 = vmatpush3.msra.mxu1 %v484_v16  ;;  %v6519_v21 = vpop.f32.mrf.mxu0  ;;  %v6538_v22 = vpop.f32.mrf.mxu1  ;;  %v534_v15 = vld [vmem:[%s9892_s1 + $0xe58] sm:$0xff]  ;;  %v525_v16 = vld [vmem:[%s9892_s1 + $0xe10] sm:$0xff] }
 0x1d1   :  { %6933 = vmatprep.subr.mxu0 %v7187_v0  ;;  %6952 = vmatprep.subr.mxu1 %v7187_v0  ;;  %v523_v22 = vld [vmem:[%s9892_s1 + $0xe00] sm:$0xff] }
 0x1d2   :  { %6934 = vmatpush3.msra.mxu0 %v475_v19  ;;  %6935 = vmatprep.mubr.msk.f32.mxu0 %vm7188_vm1, %v7187_v0  ;;  %v532_v19 = vld [vmem:[%s9892_s1 + $0xe48] sm:$0xff] }
 0x1d3   :  { %6953 = vmatpush3.msra.mxu1 %v483_v20  ;;  %6954 = vmatprep.mubr.msk.f32.mxu1 %vm7188_vm1, %v7187_v0 }
 0x1d4   :  { %6936 = vmatmul.mubr.msk.f32.vlgmr.msra.gmra.mxu0 %vm587_vm0, %v61_v23  ;;  %6955 = vmatmul.mubr.msk.f32.vlgmr.msra.gmra.mxu1 %vm587_vm0, %v62_v24  ;;  %v531_v23 = vld [vmem:[%s9892_s1 + $0xe40] sm:$0xff] }
 0x1d5   :  { %6957 = vmatprep.subr.mxu0 %v7187_v0  ;;  %6976 = vmatprep.subr.mxu1 %v7187_v0 }
 0x1d6   :  { %6958 = vmatpush3.msra.mxu0 %v498_v25  ;;  %6977 = vmatpush3.msra.mxu1 %v506_v26  ;;  %v67_v26 = vld [vmem:[%s9893_s0 + $0x70] sm:$0x3] }
 0x1d7   :  { %6959 = vmatprep.subr.mxu0 %v7187_v0  ;;  %6978 = vmatprep.subr.mxu1 %v7187_v0 }
 0x1d8   :  { %6960 = vmatpush3.msra.mxu0 %v497_v27  ;;  %6979 = vmatpush3.msra.mxu1 %v505_v28  ;;  %v68_v27 = vld [vmem:[%s9893_s0 + $0x72] sm:$0x3]  ;;  %v546_v28 = vld [vmem:[%s9892_s1 + $0xeb8] sm:$0xff] }
 0x1d9   :  { %6961 = vmatprep.subr.mxu0 %v7187_v0  ;;  %6980 = vmatprep.subr.mxu1 %v7187_v0 }
 0x1da   :  { %6962 = vmatpush3.msra.mxu0 %v496_v29  ;;  %6981 = vmatpush3.msra.mxu1 %v504_v30  ;;  %v554_v29 = vld [vmem:[%s9892_s1 + $0xef8] sm:$0xff]  ;;  %v545_v30 = vld [vmem:[%s9892_s1 + $0xeb0] sm:$0xff] }
 0x1db   :  { %6963 = vmatprep.subr.mxu0 %v7187_v0  ;;  %6982 = vmatprep.subr.mxu1 %v7187_v0 }
 0x1dc   :  { %6964 = vmatpush3.msra.mxu0 %v495_v31  ;;  %6983 = vmatpush3.msra.mxu1 %v503_v32  ;;  %v553_v31 = vld [vmem:[%s9892_s1 + $0xef0] sm:$0xff]  ;;  %v544_v32 = vld [vmem:[%s9892_s1 + $0xea8] sm:$0xff] }
 0x1dd   :  { %6965 = vmatprep.subr.mxu0 %v7187_v0  ;;  %6984 = vmatprep.subr.mxu1 %v7187_v0 }
 0x1de   :  { %6966 = vmatpush3.msra.mxu0 %v494_v33  ;;  %6985 = vmatpush3.msra.mxu1 %v502_v34  ;;  %v552_v33 = vld [vmem:[%s9892_s1 + $0xee8] sm:$0xff]  ;;  %v543_v34 = vld [vmem:[%s9892_s1 + $0xea0] sm:$0xff] }
 0x1df   :  { %6967 = vmatprep.subr.mxu0 %v7187_v0  ;;  %6986 = vmatprep.subr.mxu1 %v7187_v0 }
 0x1e0   :  { %6968 = vmatpush3.msra.mxu0 %v493_v35  ;;  %6987 = vmatpush3.msra.mxu1 %v501_v36  ;;  %v2847_v39 = vpop.f32.mrf.mxu0  ;;  %v2920_v40 = vpop.f32.mrf.mxu1  ;;  %v551_v35 = vld [vmem:[%s9892_s1 + $0xee0] sm:$0xff]  ;;  %v542_v36 = vld [vmem:[%s9892_s1 + $0xe98] sm:$0xff] }
 0x1e1   :  { %6969 = vmatprep.subr.mxu0 %v7187_v0  ;;  %6988 = vmatprep.subr.mxu1 %v7187_v0  ;;  %5291 = vst.msk [vmem:[%s9894_s2 + $0x3c] sm:$0x3] %vm5260_vm2, %v2847_v39  ;;  %5292 = vst.msk [vmem:[%s9894_s2 + $0x3e] sm:$0x3] %vm5260_vm2, %v2920_v40  ;;  %v549_v39 = vld [vmem:[%s9892_s1 + $0xed0] sm:$0xff]  ;;  %v540_v40 = vld [vmem:[%s9892_s1 + $0xe88] sm:$0xff] }
 0x1e2   :  { %6970 = vmatpush3.msra.mxu0 %v492_v37  ;;  %6989 = vmatpush3.msra.mxu1 %v500_v38  ;;  %v6557_v43 = vpop.f32.mrf.mxu0  ;;  %v6576_v44 = vpop.f32.mrf.mxu1  ;;  %v550_v37 = vld [vmem:[%s9892_s1 + $0xed8] sm:$0xff]  ;;  %v541_v38 = vld [vmem:[%s9892_s1 + $0xe90] sm:$0xff] }
 0x1e3   :  { %6971 = vmatprep.subr.mxu0 %v7187_v0  ;;  %6990 = vmatprep.subr.mxu1 %v7187_v0  ;;  %v539_v44 = vld [vmem:[%s9892_s1 + $0xe80] sm:$0xff] }
 0x1e4   :  { %6972 = vmatpush3.msra.mxu0 %v491_v41  ;;  %6973 = vmatprep.mubr.msk.f32.mxu0 %vm7188_vm1, %v7187_v0  ;;  %v548_v41 = vld [vmem:[%s9892_s1 + $0xec8] sm:$0xff] }
 0x1e5   :  { %6991 = vmatpush3.msra.mxu1 %v499_v42  ;;  %6992 = vmatprep.mubr.msk.f32.mxu1 %vm7188_vm1, %v7187_v0 }
 0x1e6   :  { %6974 = vmatmul.mubr.msk.f32.vlgmr.msra.gmra.mxu0 %vm587_vm0, %v63_v45  ;;  %6993 = vmatmul.mubr.msk.f32.vlgmr.msra.gmra.mxu1 %vm587_vm0, %v64_v46  ;;  %v547_v45 = vld [vmem:[%s9892_s1 + $0xec0] sm:$0xff] }
 0x1e7   :  { %6995 = vmatprep.subr.mxu0 %v7187_v0  ;;  %7014 = vmatprep.subr.mxu1 %v7187_v0 }
 0x1e8   :  { %6996 = vmatpush3.msra.mxu0 %v514_v47  ;;  %7015 = vmatpush3.msra.mxu1 %v522_v48  ;;  %v69_v48 = vld [vmem:[%s9893_s0 + $0x74] sm:$0x3] }
 0x1e9   :  { %6997 = vmatprep.subr.mxu0 %v7187_v0  ;;  %7016 = vmatprep.subr.mxu1 %v7187_v0 }
 0x1ea   :  { %6998 = vmatpush3.msra.mxu0 %v513_v49  ;;  %7017 = vmatpush3.msra.mxu1 %v521_v50  ;;  %v70_v49 = vld [vmem:[%s9893_s0 + $0x76] sm:$0x3]  ;;  %v562_v50 = vld [vmem:[%s9892_s1 + $0xf38] sm:$0xff] }
 0x1eb   :  { %6999 = vmatprep.subr.mxu0 %v7187_v0  ;;  %7018 = vmatprep.subr.mxu1 %v7187_v0 }
 0x1ec   :  { %7000 = vmatpush3.msra.mxu0 %v512_v51  ;;  %7019 = vmatpush3.msra.mxu1 %v520_v52  ;;  %v570_v51 = vld [vmem:[%s9892_s1 + $0xf78] sm:$0xff]  ;;  %v561_v52 = vld [vmem:[%s9892_s1 + $0xf30] sm:$0xff] }
 0x1ed   :  { %7001 = vmatprep.subr.mxu0 %v7187_v0  ;;  %7020 = vmatprep.subr.mxu1 %v7187_v0 }
 0x1ee   :  { %7002 = vmatpush3.msra.mxu0 %v511_v53  ;;  %7021 = vmatpush3.msra.mxu1 %v519_v54  ;;  %v569_v53 = vld [vmem:[%s9892_s1 + $0xf70] sm:$0xff]  ;;  %v560_v54 = vld [vmem:[%s9892_s1 + $0xf28] sm:$0xff] }
 0x1ef   :  { %7003 = vmatprep.subr.mxu0 %v7187_v0  ;;  %7022 = vmatprep.subr.mxu1 %v7187_v0 }
 0x1f0   :  { %7004 = vmatpush3.msra.mxu0 %v510_v55  ;;  %7023 = vmatpush3.msra.mxu1 %v518_v56  ;;  %v568_v55 = vld [vmem:[%s9892_s1 + $0xf68] sm:$0xff]  ;;  %v559_v56 = vld [vmem:[%s9892_s1 + $0xf20] sm:$0xff] }
 0x1f1   :  { %7005 = vmatprep.subr.mxu0 %v7187_v0  ;;  %7024 = vmatprep.subr.mxu1 %v7187_v0 }
 0x1f2   :  { %7006 = vmatpush3.msra.mxu0 %v509_v57  ;;  %7025 = vmatpush3.msra.mxu1 %v517_v58  ;;  %v2993_v61 = vpop.f32.mrf.mxu0  ;;  %v3066_v62 = vpop.f32.mrf.mxu1  ;;  %v567_v57 = vld [vmem:[%s9892_s1 + $0xf60] sm:$0xff]  ;;  %v558_v58 = vld [vmem:[%s9892_s1 + $0xf18] sm:$0xff] }
 0x1f3   :  { %7007 = vmatprep.subr.mxu0 %v7187_v0  ;;  %7026 = vmatprep.subr.mxu1 %v7187_v0  ;;  %5293 = vst.msk [vmem:[%s9894_s2 + $0x40] sm:$0x3] %vm5260_vm2, %v2993_v61  ;;  %5294 = vst.msk [vmem:[%s9894_s2 + $0x42] sm:$0x3] %vm5260_vm2, %v3066_v62  ;;  %v565_v61 = vld [vmem:[%s9892_s1 + $0xf50] sm:$0xff]  ;;  %v556_v62 = vld [vmem:[%s9892_s1 + $0xf08] sm:$0xff] }
 0x1f4   :  { %7008 = vmatpush3.msra.mxu0 %v508_v59  ;;  %7027 = vmatpush3.msra.mxu1 %v516_v60  ;;  %v6595_v2 = vpop.f32.mrf.mxu0  ;;  %v6614_v3 = vpop.f32.mrf.mxu1  ;;  %v566_v59 = vld [vmem:[%s9892_s1 + $0xf58] sm:$0xff]  ;;  %v557_v60 = vld [vmem:[%s9892_s1 + $0xf10] sm:$0xff] }
 0x1f5   :  { %7009 = vmatprep.subr.mxu0 %v7187_v0  ;;  %7028 = vmatprep.subr.mxu1 %v7187_v0  ;;  %v555_v3 = vld [vmem:[%s9892_s1 + $0xf00] sm:$0xff] }
 0x1f6   :  { %7010 = vmatpush3.msra.mxu0 %v507_v63  ;;  %7011 = vmatprep.mubr.msk.f32.mxu0 %vm7188_vm1, %v7187_v0  ;;  %v564_v63 = vld [vmem:[%s9892_s1 + $0xf48] sm:$0xff] }
 0x1f7   :  { %7029 = vmatpush3.msra.mxu1 %v515_v1  ;;  %7030 = vmatprep.mubr.msk.f32.mxu1 %vm7188_vm1, %v7187_v0 }
 0x1f8   :  { %7012 = vmatmul.mubr.msk.f32.vlgmr.msra.gmra.mxu0 %vm587_vm0, %v65_v4  ;;  %7031 = vmatmul.mubr.msk.f32.vlgmr.msra.gmra.mxu1 %vm587_vm0, %v66_v5  ;;  %v563_v4 = vld [vmem:[%s9892_s1 + $0xf40] sm:$0xff] }
 0x1f9   :  { %7033 = vmatprep.subr.mxu0 %v7187_v0  ;;  %7052 = vmatprep.subr.mxu1 %v7187_v0 }
 0x1fa   :  { %7034 = vmatpush3.msra.mxu0 %v530_v6  ;;  %7053 = vmatpush3.msra.mxu1 %v538_v7  ;;  %v71_v7 = vld [vmem:[%s9893_s0 + $0x78] sm:$0x3] }
 0x1fb   :  { %7035 = vmatprep.subr.mxu0 %v7187_v0  ;;  %7054 = vmatprep.subr.mxu1 %v7187_v0 }
 0x1fc   :  { %7036 = vmatpush3.msra.mxu0 %v529_v8  ;;  %7055 = vmatpush3.msra.mxu1 %v537_v9  ;;  %v72_v8 = vld [vmem:[%s9893_s0 + $0x7a] sm:$0x3] }
 0x1fd   :  { %7037 = vmatprep.subr.mxu0 %v7187_v0  ;;  %7056 = vmatprep.subr.mxu1 %v7187_v0  ;;  %v578_v9 = vld [vmem:[%s9892_s1 + $0xfb8] sm:$0xff] }
 0x1fe   :  { %7038 = vmatpush3.msra.mxu0 %v528_v10  ;;  %7057 = vmatpush3.msra.mxu1 %v536_v11  ;;  %v586_v10 = vld [vmem:[%s9892_s1 + $0xff8] sm:$0xff]  ;;  %v577_v11 = vld [vmem:[%s9892_s1 + $0xfb0] sm:$0xff] }
 0x1ff   :  { %7039 = vmatprep.subr.mxu0 %v7187_v0  ;;  %7058 = vmatprep.subr.mxu1 %v7187_v0 }
 0x200   :  { %7040 = vmatpush3.msra.mxu0 %v527_v12  ;;  %7059 = vmatpush3.msra.mxu1 %v535_v13  ;;  %v585_v12 = vld [vmem:[%s9892_s1 + $0xff0] sm:$0xff]  ;;  %v576_v13 = vld [vmem:[%s9892_s1 + $0xfa8] sm:$0xff] }
 0x201   :  { %7041 = vmatprep.subr.mxu0 %v7187_v0  ;;  %7060 = vmatprep.subr.mxu1 %v7187_v0 }
 0x202   :  { %7042 = vmatpush3.msra.mxu0 %v526_v14  ;;  %7061 = vmatpush3.msra.mxu1 %v534_v15  ;;  %v584_v14 = vld [vmem:[%s9892_s1 + $0xfe8] sm:$0xff]  ;;  %v575_v15 = vld [vmem:[%s9892_s1 + $0xfa0] sm:$0xff] }
 0x203   :  { %7043 = vmatprep.subr.mxu0 %v7187_v0  ;;  %7062 = vmatprep.subr.mxu1 %v7187_v0 }
 0x204   :  { %7044 = vmatpush3.msra.mxu0 %v525_v16  ;;  %7063 = vmatpush3.msra.mxu1 %v533_v17  ;;  %v3139_v20 = vpop.f32.mrf.mxu0  ;;  %v3212_v21 = vpop.f32.mrf.mxu1  ;;  %v583_v16 = vld [vmem:[%s9892_s1 + $0xfe0] sm:$0xff]  ;;  %v574_v17 = vld [vmem:[%s9892_s1 + $0xf98] sm:$0xff] }
 0x205   :  { %7045 = vmatprep.subr.mxu0 %v7187_v0  ;;  %7064 = vmatprep.subr.mxu1 %v7187_v0  ;;  %5295 = vst.msk [vmem:[%s9894_s2 + $0x44] sm:$0x3] %vm5260_vm2, %v3139_v20  ;;  %5296 = vst.msk [vmem:[%s9894_s2 + $0x46] sm:$0x3] %vm5260_vm2, %v3212_v21  ;;  %v581_v20 = vld [vmem:[%s9892_s1 + $0xfd0] sm:$0xff]  ;;  %v572_v21 = vld [vmem:[%s9892_s1 + $0xf88] sm:$0xff] }
 0x206   :  { %7046 = vmatpush3.msra.mxu0 %v524_v18  ;;  %7065 = vmatpush3.msra.mxu1 %v532_v19  ;;  %v6633_v24 = vpop.f32.mrf.mxu0  ;;  %v6652_v25 = vpop.f32.mrf.mxu1  ;;  %v582_v18 = vld [vmem:[%s9892_s1 + $0xfd8] sm:$0xff]  ;;  %v573_v19 = vld [vmem:[%s9892_s1 + $0xf90] sm:$0xff] }
 0x207   :  { %7047 = vmatprep.subr.mxu0 %v7187_v0  ;;  %7066 = vmatprep.subr.mxu1 %v7187_v0  ;;  %v571_v25 = vld [vmem:[%s9892_s1 + $0xf80] sm:$0xff] }
 0x208   :  { %7048 = vmatpush3.msra.mxu0 %v523_v22  ;;  %7049 = vmatprep.mubr.msk.f32.mxu0 %vm7188_vm1, %v7187_v0  ;;  %v580_v22 = vld [vmem:[%s9892_s1 + $0xfc8] sm:$0xff] }
 0x209   :  { %7067 = vmatpush3.msra.mxu1 %v531_v23  ;;  %7068 = vmatprep.mubr.msk.f32.mxu1 %vm7188_vm1, %v7187_v0 }
 0x20a   :  { %7050 = vmatmul.mubr.msk.f32.vlgmr.msra.gmra.mxu0 %vm587_vm0, %v67_v26  ;;  %7069 = vmatmul.mubr.msk.f32.vlgmr.msra.gmra.mxu1 %vm587_vm0, %v68_v27  ;;  %v579_v26 = vld [vmem:[%s9892_s1 + $0xfc0] sm:$0xff] }
 0x20b   :  { %7071 = vmatprep.subr.mxu0 %v7187_v0  ;;  %7090 = vmatprep.subr.mxu1 %v7187_v0 }
 0x20c   :  { %7072 = vmatpush3.msra.mxu0 %v546_v28  ;;  %7091 = vmatpush3.msra.mxu1 %v554_v29  ;;  %v73_v29 = vld [vmem:[%s9893_s0 + $0x7c] sm:$0x3] }
 0x20d   :  { %7073 = vmatprep.subr.mxu0 %v7187_v0  ;;  %7092 = vmatprep.subr.mxu1 %v7187_v0 }
 0x20e   :  { %7074 = vmatpush3.msra.mxu0 %v545_v30  ;;  %7093 = vmatpush3.msra.mxu1 %v553_v31  ;;  %v74_v30 = vld [vmem:[%s9893_s0 + $0x7e] sm:$0x3] }
 0x20f   :  { %7075 = vmatprep.subr.mxu0 %v7187_v0  ;;  %7094 = vmatprep.subr.mxu1 %v7187_v0 }
 0x210   :  { %7076 = vmatpush3.msra.mxu0 %v544_v32  ;;  %7095 = vmatpush3.msra.mxu1 %v552_v33 }
 0x211   :  { %7077 = vmatprep.subr.mxu0 %v7187_v0  ;;  %7096 = vmatprep.subr.mxu1 %v7187_v0 }
 0x212   :  { %7078 = vmatpush3.msra.mxu0 %v543_v34  ;;  %7097 = vmatpush3.msra.mxu1 %v551_v35 }
 0x213   :  { %7079 = vmatprep.subr.mxu0 %v7187_v0  ;;  %7098 = vmatprep.subr.mxu1 %v7187_v0 }
 0x214   :  { %7080 = vmatpush3.msra.mxu0 %v542_v36  ;;  %7099 = vmatpush3.msra.mxu1 %v550_v37 }
 0x215   :  { %7081 = vmatprep.subr.mxu0 %v7187_v0  ;;  %7100 = vmatprep.subr.mxu1 %v7187_v0 }
 0x216   :  { %7082 = vmatpush3.msra.mxu0 %v541_v38  ;;  %7101 = vmatpush3.msra.mxu1 %v549_v39  ;;  %v3285_v42 = vpop.f32.mrf.mxu0  ;;  %v3358_v43 = vpop.f32.mrf.mxu1 }
 0x217   :  { %7083 = vmatprep.subr.mxu0 %v7187_v0  ;;  %7102 = vmatprep.subr.mxu1 %v7187_v0  ;;  %5297 = vst.msk [vmem:[%s9894_s2 + $0x48] sm:$0x3] %vm5260_vm2, %v3285_v42  ;;  %5298 = vst.msk [vmem:[%s9894_s2 + $0x4a] sm:$0x3] %vm5260_vm2, %v3358_v43 }
 0x218   :  { %7084 = vmatpush3.msra.mxu0 %v540_v40  ;;  %7103 = vmatpush3.msra.mxu1 %v548_v41  ;;  %v6671_v46 = vpop.f32.mrf.mxu0  ;;  %v6690_v47 = vpop.f32.mrf.mxu1 }
 0x219   :  { %7085 = vmatprep.subr.mxu0 %v7187_v0  ;;  %7104 = vmatprep.subr.mxu1 %v7187_v0 }
 0x21a   :  { %7086 = vmatpush3.msra.mxu0 %v539_v44  ;;  %7087 = vmatprep.mubr.msk.f32.mxu0 %vm7188_vm1, %v7187_v0 }
 0x21b   :  { %7105 = vmatpush3.msra.mxu1 %v547_v45  ;;  %7106 = vmatprep.mubr.msk.f32.mxu1 %vm7188_vm1, %v7187_v0 }
 0x21c   :  { %7088 = vmatmul.mubr.msk.f32.vlgmr.msra.gmra.mxu0 %vm587_vm0, %v69_v48  ;;  %7107 = vmatmul.mubr.msk.f32.vlgmr.msra.gmra.mxu1 %vm587_vm0, %v70_v49 }
 0x21d   :  { %7109 = vmatprep.subr.mxu0 %v7187_v0  ;;  %7128 = vmatprep.subr.mxu1 %v7187_v0 }
 0x21e   :  { %7110 = vmatpush3.msra.mxu0 %v562_v50  ;;  %7129 = vmatpush3.msra.mxu1 %v570_v51 }
 0x21f   :  { %7111 = vmatprep.subr.mxu0 %v7187_v0  ;;  %7130 = vmatprep.subr.mxu1 %v7187_v0 }
 0x220   :  { %7112 = vmatpush3.msra.mxu0 %v561_v52  ;;  %7131 = vmatpush3.msra.mxu1 %v569_v53 }
 0x221   :  { %7113 = vmatprep.subr.mxu0 %v7187_v0  ;;  %7132 = vmatprep.subr.mxu1 %v7187_v0 }
 0x222   :  { %7114 = vmatpush3.msra.mxu0 %v560_v54  ;;  %7133 = vmatpush3.msra.mxu1 %v568_v55 }
 0x223   :  { %7115 = vmatprep.subr.mxu0 %v7187_v0  ;;  %7134 = vmatprep.subr.mxu1 %v7187_v0 }
 0x224   :  { %7116 = vmatpush3.msra.mxu0 %v559_v56  ;;  %7135 = vmatpush3.msra.mxu1 %v567_v57 }
 0x225   :  { %7117 = vmatprep.subr.mxu0 %v7187_v0  ;;  %7136 = vmatprep.subr.mxu1 %v7187_v0 }
 0x226   :  { %7118 = vmatpush3.msra.mxu0 %v558_v58  ;;  %7137 = vmatpush3.msra.mxu1 %v566_v59 }
 0x227   :  { %7119 = vmatprep.subr.mxu0 %v7187_v0  ;;  %7138 = vmatprep.subr.mxu1 %v7187_v0 }
 0x228   :  { %7120 = vmatpush3.msra.mxu0 %v557_v60  ;;  %7139 = vmatpush3.msra.mxu1 %v565_v61  ;;  %v3431_v1 = vpop.f32.mrf.mxu0  ;;  %v3504_v2 = vpop.f32.mrf.mxu1 }
 0x229   :  { %7121 = vmatprep.subr.mxu0 %v7187_v0  ;;  %7140 = vmatprep.subr.mxu1 %v7187_v0  ;;  %5299 = vst.msk [vmem:[%s9894_s2 + $0x4c] sm:$0x3] %vm5260_vm2, %v3431_v1  ;;  %5300 = vst.msk [vmem:[%s9894_s2 + $0x4e] sm:$0x3] %vm5260_vm2, %v3504_v2 }
 0x22a   :  { %7122 = vmatpush3.msra.mxu0 %v556_v62  ;;  %7141 = vmatpush3.msra.mxu1 %v564_v63  ;;  %v6709_v5 = vpop.f32.mrf.mxu0  ;;  %v6728_v6 = vpop.f32.mrf.mxu1 }
 0x22b   :  { %7123 = vmatprep.subr.mxu0 %v7187_v0  ;;  %7142 = vmatprep.subr.mxu1 %v7187_v0 }
 0x22c   :  { %7124 = vmatpush3.msra.mxu0 %v555_v3  ;;  %7125 = vmatprep.mubr.msk.f32.mxu0 %vm7188_vm1, %v7187_v0 }
 0x22d   :  { %7143 = vmatpush3.msra.mxu1 %v563_v4  ;;  %7144 = vmatprep.mubr.msk.f32.mxu1 %vm7188_vm1, %v7187_v0 }
 0x22e   :  { %7126 = vmatmul.mubr.msk.f32.vlgmr.msra.gmra.mxu0 %vm587_vm0, %v71_v7  ;;  %7145 = vmatmul.mubr.msk.f32.vlgmr.msra.gmra.mxu1 %vm587_vm0, %v72_v8 }
 0x22f   :  { %7147 = vmatprep.subr.mxu0 %v7187_v0  ;;  %7166 = vmatprep.subr.mxu1 %v7187_v0 }
 0x230   :  { %7148 = vmatpush3.msra.mxu0 %v578_v9  ;;  %7167 = vmatpush3.msra.mxu1 %v586_v10 }
 0x231   :  { %7149 = vmatprep.subr.mxu0 %v7187_v0  ;;  %7168 = vmatprep.subr.mxu1 %v7187_v0 }
 0x232   :  { %7150 = vmatpush3.msra.mxu0 %v577_v11  ;;  %7169 = vmatpush3.msra.mxu1 %v585_v12 }
 0x233   :  { %7151 = vmatprep.subr.mxu0 %v7187_v0  ;;  %7170 = vmatprep.subr.mxu1 %v7187_v0 }
 0x234   :  { %7152 = vmatpush3.msra.mxu0 %v576_v13  ;;  %7171 = vmatpush3.msra.mxu1 %v584_v14 }
 0x235   :  { %7153 = vmatprep.subr.mxu0 %v7187_v0  ;;  %7172 = vmatprep.subr.mxu1 %v7187_v0 }
 0x236   :  { %7154 = vmatpush3.msra.mxu0 %v575_v15  ;;  %7173 = vmatpush3.msra.mxu1 %v583_v16 }
 0x237   :  { %7155 = vmatprep.subr.mxu0 %v7187_v0  ;;  %7174 = vmatprep.subr.mxu1 %v7187_v0 }
 0x238   :  { %7156 = vmatpush3.msra.mxu0 %v574_v17  ;;  %7175 = vmatpush3.msra.mxu1 %v582_v18 }
 0x239   :  { %7157 = vmatprep.subr.mxu0 %v7187_v0  ;;  %7176 = vmatprep.subr.mxu1 %v7187_v0 }
 0x23a   :  { %7158 = vmatpush3.msra.mxu0 %v573_v19  ;;  %7177 = vmatpush3.msra.mxu1 %v581_v20  ;;  %v3577_v23 = vpop.f32.mrf.mxu0  ;;  %v3650_v24 = vpop.f32.mrf.mxu1 }
 0x23b   :  { %7159 = vmatprep.subr.mxu0 %v7187_v0  ;;  %7178 = vmatprep.subr.mxu1 %v7187_v0  ;;  %5301 = vst.msk [vmem:[%s9894_s2 + $0x50] sm:$0x3] %vm5260_vm2, %v3577_v23  ;;  %5302 = vst.msk [vmem:[%s9894_s2 + $0x52] sm:$0x3] %vm5260_vm2, %v3650_v24 }
 0x23c   :  { %7160 = vmatpush3.msra.mxu0 %v572_v21  ;;  %7179 = vmatpush3.msra.mxu1 %v580_v22  ;;  %v6747_v27 = vpop.f32.mrf.mxu0  ;;  %v6766_v28 = vpop.f32.mrf.mxu1 }
 0x23d   :  { %7161 = vmatprep.subr.mxu0 %v7187_v0  ;;  %7180 = vmatprep.subr.mxu1 %v7187_v0 }
 0x23e   :  { %7162 = vmatpush3.msra.mxu0 %v571_v25  ;;  %7163 = vmatprep.mubr.msk.f32.mxu0 %vm7188_vm1, %v7187_v0 }
 0x23f   :  { %7181 = vmatpush3.msra.mxu1 %v579_v26  ;;  %7182 = vmatprep.mubr.msk.f32.mxu1 %vm7188_vm1, %v7187_v0 }
 0x240   :  { %7164 = vmatmul.mubr.msk.f32.vlgmr.msra.gmra.mxu0 %vm587_vm0, %v73_v29  ;;  %7183 = vmatmul.mubr.msk.f32.vlgmr.msra.gmra.mxu1 %vm587_vm0, %v74_v30 }
 0x24c   :  { %v3723_v31 = vpop.f32.mrf.mxu0  ;;  %v3796_v32 = vpop.f32.mrf.mxu1 }
 0x24d   :  { %5303 = vst.msk [vmem:[%s9894_s2 + $0x54] sm:$0x3] %vm5260_vm2, %v3723_v31  ;;  %5304 = vst.msk [vmem:[%s9894_s2 + $0x56] sm:$0x3] %vm5260_vm2, %v3796_v32 }
 0x24e   :  { %v6785_v33 = vpop.f32.mrf.mxu0  ;;  %v6804_v34 = vpop.f32.mrf.mxu1 }
 0x25e   :  { %v3869_v35 = vpop.f32.mrf.mxu0  ;;  %v3942_v0 = vpop.f32.mrf.mxu1 }
 0x25f   :  { %5305 = vst.msk [vmem:[%s9894_s2 + $0x58] sm:$0x3] %vm5260_vm2, %v3869_v35  ;;  %5306 = vst.msk [vmem:[%s9894_s2 + $0x5a] sm:$0x3] %vm5260_vm2, %v3942_v0 }
 0x260   :  { %v6823_v36 = vpop.f32.mrf.mxu0  ;;  %v6842_v37 = vpop.f32.mrf.mxu1 }
 0x270   :  { %v4015_v38 = vpop.f32.mrf.mxu0  ;;  %v4088_v39 = vpop.f32.mrf.mxu1 }
 0x271   :  { %5307 = vst.msk [vmem:[%s9894_s2 + $0x5c] sm:$0x3] %vm5260_vm2, %v4015_v38  ;;  %5308 = vst.msk [vmem:[%s9894_s2 + $0x5e] sm:$0x3] %vm5260_vm2, %v4088_v39 }
 0x272   :  { %v6861_v40 = vpop.f32.mrf.mxu0  ;;  %v6880_v41 = vpop.f32.mrf.mxu1 }
 0x282   :  { %v4161_v42 = vpop.f32.mrf.mxu0  ;;  %v4234_v43 = vpop.f32.mrf.mxu1 }
 0x283   :  { %5309 = vst.msk [vmem:[%s9894_s2 + $0x60] sm:$0x3] %vm5260_vm2, %v4161_v42  ;;  %5310 = vst.msk [vmem:[%s9894_s2 + $0x62] sm:$0x3] %vm5260_vm2, %v4234_v43 }
 0x284   :  { %v6899_v44 = vpop.f32.mrf.mxu0  ;;  %v6918_v45 = vpop.f32.mrf.mxu1 }
 0x294   :  { %v4307_v46 = vpop.f32.mrf.mxu0  ;;  %v4380_v47 = vpop.f32.mrf.mxu1 }
 0x295   :  { %5311 = vst.msk [vmem:[%s9894_s2 + $0x64] sm:$0x3] %vm5260_vm2, %v4307_v46  ;;  %5312 = vst.msk [vmem:[%s9894_s2 + $0x66] sm:$0x3] %vm5260_vm2, %v4380_v47 }
 0x296   :  { %v6937_v48 = vpop.f32.mrf.mxu0  ;;  %v6956_v49 = vpop.f32.mrf.mxu1 }
 0x2a6   :  { %v4453_v50 = vpop.f32.mrf.mxu0  ;;  %v4526_v51 = vpop.f32.mrf.mxu1 }
 0x2a7   :  { %5313 = vst.msk [vmem:[%s9894_s2 + $0x68] sm:$0x3] %vm5260_vm2, %v4453_v50  ;;  %5314 = vst.msk [vmem:[%s9894_s2 + $0x6a] sm:$0x3] %vm5260_vm2, %v4526_v51 }
 0x2a8   :  { %v6975_v52 = vpop.f32.mrf.mxu0  ;;  %v6994_v53 = vpop.f32.mrf.mxu1 }
 0x2b8   :  { %v4599_v54 = vpop.f32.mrf.mxu0  ;;  %v4672_v55 = vpop.f32.mrf.mxu1 }
 0x2b9   :  { %5315 = vst.msk [vmem:[%s9894_s2 + $0x6c] sm:$0x3] %vm5260_vm2, %v4599_v54  ;;  %5316 = vst.msk [vmem:[%s9894_s2 + $0x6e] sm:$0x3] %vm5260_vm2, %v4672_v55 }
 0x2ba   :  { %v7013_v56 = vpop.f32.mrf.mxu0  ;;  %v7032_v57 = vpop.f32.mrf.mxu1 }
 0x2ca   :  { %v4745_v58 = vpop.f32.mrf.mxu0  ;;  %v4818_v59 = vpop.f32.mrf.mxu1 }
 0x2cb   :  { %5317 = vst.msk [vmem:[%s9894_s2 + $0x70] sm:$0x3] %vm5260_vm2, %v4745_v58  ;;  %5318 = vst.msk [vmem:[%s9894_s2 + $0x72] sm:$0x3] %vm5260_vm2, %v4818_v59 }
 0x2cc   :  { %v7051_v60 = vpop.f32.mrf.mxu0  ;;  %v7070_v61 = vpop.f32.mrf.mxu1 }
 0x2dc   :  { %v4891_v62 = vpop.f32.mrf.mxu0  ;;  %v4964_v63 = vpop.f32.mrf.mxu1 }
 0x2dd   :  { %5319 = vst.msk [vmem:[%s9894_s2 + $0x74] sm:$0x3] %vm5260_vm2, %v4891_v62  ;;  %5320 = vst.msk [vmem:[%s9894_s2 + $0x76] sm:$0x3] %vm5260_vm2, %v4964_v63 }
 0x2de   :  { %v7089_v1 = vpop.f32.mrf.mxu0  ;;  %v7108_v2 = vpop.f32.mrf.mxu1 }
 0x2ee   :  { %v5037_v3 = vpop.f32.mrf.mxu0  ;;  %v5110_v4 = vpop.f32.mrf.mxu1 }
 0x2ef   :  { %5321 = vst.msk [vmem:[%s9894_s2 + $0x78] sm:$0x3] %vm5260_vm2, %v5037_v3  ;;  %5322 = vst.msk [vmem:[%s9894_s2 + $0x7a] sm:$0x3] %vm5260_vm2, %v5110_v4 }
 0x2f0   :  { %v7127_v5 = vpop.f32.mrf.mxu0  ;;  %v7146_v6 = vpop.f32.mrf.mxu1 }
 0x300   :  { %v5183_v7 = vpop.f32.mrf.mxu0  ;;  %v5256_v8 = vpop.f32.mrf.mxu1 }
 0x301   :  { %5323 = vst.msk [vmem:[%s9894_s2 + $0x7c] sm:$0x3] %vm5260_vm2, %v5183_v7  ;;  %5324 = vst.msk [vmem:[%s9894_s2 + $0x7e] sm:$0x3] %vm5260_vm2, %v5256_v8 }
 0x302   :  { %v7165_v9 = vpop.f32.mrf.mxu0  ;;  %v7184_v10 = vpop.f32.mrf.mxu1 }

// kernel: fno_forward.16
= control target key start
LH: loop header
LB: loop body
LE: loop exit
PB: predicated region body
PF: predicated region fallthrough
CT: control target
= control target key end

     0   :  { %s1660_s15 = smov 0   ;;  %s1662_s16 = smov 0   ;;  %s2222_s0 = inlined_call_operand.vmem [shape: f32[512,32], index: 0, kind: input, shape index: {}]   ;;  %s2223_s1 = inlined_call_operand.vmem [shape: f32[2,32,32], index: 1, kind: input, shape index: {}]   ;;  %s2224_s2 = inlined_call_operand.vmem [shape: f32[2,1,32], index: 2, kind: input, shape index: {}]   ;;  %s2225_s3 = inlined_call_operand.vmem [shape: f32[2,512,32], index: 3, kind: input, shape index: {}]   ;;  %s2226_s4 = inlined_call_operand.vmem [shape: f32[2,512,32], index: 4, kind: output, shape index: {}]  }
   0x1   :  { %s1664_s17 = smov 0  }
   0x2 LB: > { %s26_s18 = sadd.s32 1, %s1629_s16  ;;  %p1330_p0 = scmp.ge.s32.totalorder %s1633_s17, 1  ;;  %s1633_s17 = sphi %s1664_s17, %s14_s17   ;;  %s1629_s16 = sphi %s1662_s16, %s2228_s16   ;;  %s1625_s15 = sphi %s1660_s15, %s2227_s15  }
   0x3   : > { %p28_p1 = scmp.ge.s32.totalorder %s26_s18, 2  ;;  %p212_p2 = scmp.lt.s32.totalorder %s1633_s17, 3 }
   0x5   : > { %s2230_s18 = smov (%p28_p1, %s26_s18), 0  ;;  %p213_p3 = pnand %p1330_p0, %p212_p2 }
   0x6   : > { %p265_p4 = scmp.lt.s32.totalorder (!%p213_p3), %s1625_s15, 1 }
   0x7   : > { %216 = sbr.rel (%p213_p3) target bundleno = 286 (0x11e), region = 36 }
   0xc   : > { %v293_v0 = vld [vmem:[%s2222_s0] sm:$0xff]  ;;  %vm368_vm0 = vcmask 261120   ;;  %s2232_s15 = smov (!%p265_p4, %s1625_s15), 1  ;;  %v294_v6 = vld [vmem:[%s2222_s0 + $0x8] sm:$0xff]  ;;  %v295_v8 = vld [vmem:[%s2222_s0 + $0x10] sm:$0xff] }
   0xd   : > { %v325_v1 = vld [vmem:[%s2222_s0 + $0x100] sm:$0xff]  ;;  %1483 = vmatprep.mubr.msk.f32.mxu0 %vm368_vm0, %v293_v0  ;;  %s1404_s23 = sshll.u32 %s2232_s15, 5  ;;  %v326_v7 = vld [vmem:[%s2222_s0 + $0x108] sm:$0xff]  ;;  %v327_v9 = vld [vmem:[%s2222_s0 + $0x110] sm:$0xff]  ;;  %s1405_s19 = sshll.u32 %s2232_s15, 9 }
   0xe   : > { %1531 = vmatprep.mubr.msk.f32.mxu1 %vm368_vm0, %v325_v1  ;;  %s269_s26 = scalar_lea.vmem %s2223_s1, %s1404_s23  ;;  %v296_v10 = vld [vmem:[%s2222_s0 + $0x18] sm:$0xff]  ;;  %v297_v12 = vld [vmem:[%s2222_s0 + $0x20] sm:$0xff]  ;;  %v298_v14 = vld [vmem:[%s2222_s0 + $0x28] sm:$0xff]  ;;  %s272_s22 = scalar_lea.vmem %s2224_s2, %s2232_s15 }
   0xf   : > { %v360_v2 = vld [vmem:[%s269_s26 + $0x18] sm:$0xff]  ;;  %v359_v3 = vld [vmem:[%s269_s26 + $0x10] sm:$0xff]  ;;  %v358_v4 = vld [vmem:[%s269_s26 + $0x8] sm:$0xff]  ;;  %s1948_s25 = scalar_lea.vmem %s2225_s3, %s1405_s19  ;;  %s1963_s27 = scalar_lea.vmem %s2226_s4, %s1405_s19 }
  0x10   : > { %1475 = vmatprep.subr.mxu0 %v360_v2  ;;  %1579 = vmatprep.subr.mxu1 %v360_v2  ;;  %v357_v5 = vld [vmem:[%s269_s26] sm:$0xff]  ;;  %v328_v11 = vld [vmem:[%s2222_s0 + $0x118] sm:$0xff]  ;;  %v330_v15 = vld [vmem:[%s2222_s0 + $0x128] sm:$0xff] }
  0x11   : > { %1476 = vmatpush3.msra.mxu0 %v360_v2  ;;  %1583 = vmatpush3.msra.mxu1 %v360_v2  ;;  %v329_v13 = vld [vmem:[%s2222_s0 + $0x120] sm:$0xff]  ;;  %v299_v16 = vld [vmem:[%s2222_s0 + $0x30] sm:$0xff]  ;;  %v300_v18 = vld [vmem:[%s2222_s0 + $0x38] sm:$0xff] }
  0x12   : > { %1477 = vmatprep.subr.mxu0 %v359_v3  ;;  %1580 = vmatprep.subr.mxu1 %v359_v3  ;;  %v331_v17 = vld [vmem:[%s2222_s0 + $0x130] sm:$0xff]  ;;  %v332_v19 = vld [vmem:[%s2222_s0 + $0x138] sm:$0xff]  ;;  %v301_v20 = vld [vmem:[%s2222_s0 + $0x40] sm:$0xff] }
  0x13   : > { %1478 = vmatpush3.msra.mxu0 %v359_v3  ;;  %1584 = vmatpush3.msra.mxu1 %v359_v3  ;;  %v333_v21 = vld [vmem:[%s2222_s0 + $0x140] sm:$0xff]  ;;  %v302_v22 = vld [vmem:[%s2222_s0 + $0x48] sm:$0xff]  ;;  %v303_v24 = vld [vmem:[%s2222_s0 + $0x50] sm:$0xff] }
  0x14   : > { %1479 = vmatprep.subr.mxu0 %v358_v4  ;;  %1581 = vmatprep.subr.mxu1 %v358_v4  ;;  %v334_v23 = vld [vmem:[%s2222_s0 + $0x148] sm:$0xff]  ;;  %v335_v25 = vld [vmem:[%s2222_s0 + $0x150] sm:$0xff]  ;;  %v304_v26 = vld [vmem:[%s2222_s0 + $0x58] sm:$0xff] }
  0x15   : > { %1480 = vmatpush3.msra.mxu0 %v358_v4  ;;  %1585 = vmatpush3.msra.mxu1 %v358_v4  ;;  %v336_v27 = vld [vmem:[%s2222_s0 + $0x158] sm:$0xff]  ;;  %v305_v28 = vld [vmem:[%s2222_s0 + $0x60] sm:$0xff]  ;;  %v306_v30 = vld [vmem:[%s2222_s0 + $0x68] sm:$0xff] }
  0x16   : > { %1481 = vmatprep.subr.mxu0 %v357_v5  ;;  %1582 = vmatprep.subr.mxu1 %v357_v5  ;;  %v337_v29 = vld [vmem:[%s2222_s0 + $0x160] sm:$0xff]  ;;  %v338_v31 = vld [vmem:[%s2222_s0 + $0x168] sm:$0xff]  ;;  %v307_v32 = vld [vmem:[%s2222_s0 + $0x70] sm:$0xff] }
  0x17   : > { %1482 = vmatpush3.msra.mxu0 %v357_v5  ;;  %1586 = vmatpush3.msra.mxu1 %v357_v5  ;;  %v339_v33 = vld [vmem:[%s2222_s0 + $0x170] sm:$0xff]  ;;  %v308_v34 = vld [vmem:[%s2222_s0 + $0x78] sm:$0xff]  ;;  %v309_v36 = vld [vmem:[%s2222_s0 + $0x80] sm:$0xff] }
  0x18   : > { %1484 = vmatmul.mubr.msk.f32.vlgmr.msra.gmra.mxu0 %vm368_vm0, %v294_v6  ;;  %1532 = vmatmul.mubr.msk.f32.vlgmr.msra.gmra.mxu1 %vm368_vm0, %v326_v7  ;;  %v340_v35 = vld [vmem:[%s2222_s0 + $0x178] sm:$0xff]  ;;  %v341_v37 = vld [vmem:[%s2222_s0 + $0x180] sm:$0xff]  ;;  %v310_v38 = vld [vmem:[%s2222_s0 + $0x88] sm:$0xff] }
  0x19   : > { %1486 = vmatprep.mubr.msk.f32.mxu0 %vm368_vm0, %v295_v8  ;;  %1534 = vmatprep.mubr.msk.f32.mxu1 %vm368_vm0, %v327_v9  ;;  %v342_v39 = vld [vmem:[%s2222_s0 + $0x188] sm:$0xff]  ;;  %v311_v40 = vld [vmem:[%s2222_s0 + $0x90] sm:$0xff]  ;;  %v312_v42 = vld [vmem:[%s2222_s0 + $0x98] sm:$0xff] }
  0x1a   : > { %v343_v41 = vld [vmem:[%s2222_s0 + $0x190] sm:$0xff]  ;;  %v344_v43 = vld [vmem:[%s2222_s0 + $0x198] sm:$0xff]  ;;  %v313_v44 = vld [vmem:[%s2222_s0 + $0xa0] sm:$0xff] }
  0x1b   : > { %v345_v45 = vld [vmem:[%s2222_s0 + $0x1a0] sm:$0xff]  ;;  %v314_v46 = vld [vmem:[%s2222_s0 + $0xa8] sm:$0xff]  ;;  %v315_v48 = vld [vmem:[%s2222_s0 + $0xb0] sm:$0xff] }
  0x1c   : > { %1487 = vmatmul.mubr.msk.f32.gmra.mxu0 %vm368_vm0, %v296_v10  ;;  %1535 = vmatmul.mubr.msk.f32.gmra.mxu1 %vm368_vm0, %v328_v11  ;;  %v346_v47 = vld [vmem:[%s2222_s0 + $0x1a8] sm:$0xff]  ;;  %v347_v49 = vld [vmem:[%s2222_s0 + $0x1b0] sm:$0xff]  ;;  %v316_v50 = vld [vmem:[%s2222_s0 + $0xb8] sm:$0xff] }
  0x1d   : > { %1489 = vmatprep.mubr.msk.f32.mxu0 %vm368_vm0, %v297_v12  ;;  %1537 = vmatprep.mubr.msk.f32.mxu1 %vm368_vm0, %v329_v13  ;;  %v348_v51 = vld [vmem:[%s2222_s0 + $0x1b8] sm:$0xff]  ;;  %v317_v52 = vld [vmem:[%s2222_s0 + $0xc0] sm:$0xff]  ;;  %v318_v54 = vld [vmem:[%s2222_s0 + $0xc8] sm:$0xff] }
  0x1e   : > { %v349_v53 = vld [vmem:[%s2222_s0 + $0x1c0] sm:$0xff]  ;;  %v350_v55 = vld [vmem:[%s2222_s0 + $0x1c8] sm:$0xff]  ;;  %v319_v56 = vld [vmem:[%s2222_s0 + $0xd0] sm:$0xff] }
  0x1f   : > { %v351_v57 = vld [vmem:[%s2222_s0 + $0x1d0] sm:$0xff]  ;;  %v320_v58 = vld [vmem:[%s2222_s0 + $0xd8] sm:$0xff]  ;;  %v321_v60 = vld [vmem:[%s2222_s0 + $0xe0] sm:$0xff] }
  0x20   : > { %1490 = vmatmul.mubr.msk.f32.gmra.mxu0 %vm368_vm0, %v298_v14  ;;  %1538 = vmatmul.mubr.msk.f32.gmra.mxu1 %vm368_vm0, %v330_v15  ;;  %v352_v59 = vld [vmem:[%s2222_s0 + $0x1d8] sm:$0xff]  ;;  %v353_v61 = vld [vmem:[%s2222_s0 + $0x1e0] sm:$0xff]  ;;  %v322_v62 = vld [vmem:[%s2222_s0 + $0xe8] sm:$0xff] }
  0x21   : > { %1492 = vmatprep.mubr.msk.f32.mxu0 %vm368_vm0, %v299_v16  ;;  %1540 = vmatprep.mubr.msk.f32.mxu1 %vm368_vm0, %v331_v17  ;;  %v354_v63 = vld [vmem:[%s2222_s0 + $0x1e8] sm:$0xff]  ;;  %v323_v0 = vld [vmem:[%s2222_s0 + $0xf0] sm:$0xff]  ;;  %v324_v2 = vld [vmem:[%s2222_s0 + $0xf8] sm:$0xff] }
  0x22   : > { %v355_v1 = vld [vmem:[%s2222_s0 + $0x1f0] sm:$0xff]  ;;  %v356_v3 = vld [vmem:[%s2222_s0 + $0x1f8] sm:$0xff]  ;;  %v1950_v4 = vld [vmem:[%s272_s22] ss:$0 sm:$0xff] }
  0x23   : > { %v947_v6 = vld [vmem:[%s1948_s25 + $0x8] sm:$0xff]  ;;  %v946_v12 = vld [vmem:[%s1948_s25] sm:$0xff] }
  0x24   : > { %1493 = vmatmul.mubr.msk.f32.gmra.mxu0 %vm368_vm0, %v300_v18  ;;  %1541 = vmatmul.mubr.msk.f32.gmra.mxu1 %vm368_vm0, %v332_v19  ;;  %v979_v8 = vld [vmem:[%s1948_s25 + $0x108] sm:$0xff]  ;;  %v978_v14 = vld [vmem:[%s1948_s25 + $0x100] sm:$0xff] }
  0x25   : > { %1495 = vmatprep.mubr.msk.f32.mxu0 %vm368_vm0, %v301_v20  ;;  %1543 = vmatprep.mubr.msk.f32.mxu1 %vm368_vm0, %v333_v21 }
  0x28   : > { %1496 = vmatmul.mubr.msk.f32.gmra.mxu0 %vm368_vm0, %v302_v22  ;;  %1544 = vmatmul.mubr.msk.f32.gmra.mxu1 %vm368_vm0, %v334_v23 }
  0x29   : > { %1498 = vmatprep.mubr.msk.f32.mxu0 %vm368_vm0, %v303_v24  ;;  %1546 = vmatprep.mubr.msk.f32.mxu1 %vm368_vm0, %v335_v25  ;;  %v949_v25 = vld [vmem:[%s1948_s25 + $0x18] sm:$0xff] }
  0x2c   : > { %1499 = vmatmul.mubr.msk.f32.gmra.mxu0 %vm368_vm0, %v304_v26  ;;  %1547 = vmatmul.mubr.msk.f32.gmra.mxu1 %vm368_vm0, %v336_v27  ;;  %v981_v26 = vld [vmem:[%s1948_s25 + $0x118] sm:$0xff] }
  0x2d   : > { %1501 = vmatprep.mubr.msk.f32.mxu0 %vm368_vm0, %v305_v28  ;;  %1549 = vmatprep.mubr.msk.f32.mxu1 %vm368_vm0, %v337_v29 }
  0x30   : > { %1502 = vmatmul.mubr.msk.f32.gmra.mxu0 %vm368_vm0, %v306_v30  ;;  %1550 = vmatmul.mubr.msk.f32.gmra.mxu1 %vm368_vm0, %v338_v31  ;;  %v948_v30 = vld [vmem:[%s1948_s25 + $0x10] sm:$0xff] }
  0x31   : > { %1504 = vmatprep.mubr.msk.f32.mxu0 %vm368_vm0, %v307_v32  ;;  %1552 = vmatprep.mubr.msk.f32.mxu1 %vm368_vm0, %v339_v33  ;;  %v980_v32 = vld [vmem:[%s1948_s25 + $0x110] sm:$0xff] }
  0x34   : > { %1505 = vmatmul.mubr.msk.f32.gmra.mxu0 %vm368_vm0, %v308_v34  ;;  %1553 = vmatmul.mubr.msk.f32.gmra.mxu1 %vm368_vm0, %v340_v35 }
  0x35   : > { %1507 = vmatprep.mubr.msk.f32.mxu0 %vm368_vm0, %v309_v36  ;;  %1555 = vmatprep.mubr.msk.f32.mxu1 %vm368_vm0, %v341_v37 }
  0x38   : > { %1508 = vmatmul.mubr.msk.f32.gmra.mxu0 %vm368_vm0, %v310_v38  ;;  %1556 = vmatmul.mubr.msk.f32.gmra.mxu1 %vm368_vm0, %v342_v39 }
  0x39   : > { %1510 = vmatprep.mubr.msk.f32.mxu0 %vm368_vm0, %v311_v40  ;;  %1558 = vmatprep.mubr.msk.f32.mxu1 %vm368_vm0, %v343_v41  ;;  %v951_v40 = vld [vmem:[%s1948_s25 + $0x28] sm:$0xff] }
  0x3c   : > { %1511 = vmatmul.mubr.msk.f32.gmra.mxu0 %vm368_vm0, %v312_v42  ;;  %1559 = vmatmul.mubr.msk.f32.gmra.mxu1 %vm368_vm0, %v344_v43  ;;  %v983_v42 = vld [vmem:[%s1948_s25 + $0x128] sm:$0xff] }
  0x3d   : > { %1513 = vmatprep.mubr.msk.f32.mxu0 %vm368_vm0, %v313_v44  ;;  %1561 = vmatprep.mubr.msk.f32.mxu1 %vm368_vm0, %v345_v45 }
  0x40   : > { %1514 = vmatmul.mubr.msk.f32.gmra.mxu0 %vm368_vm0, %v314_v46  ;;  %1562 = vmatmul.mubr.msk.f32.gmra.mxu1 %vm368_vm0, %v346_v47 }
  0x41   : > { %1516 = vmatprep.mubr.msk.f32.mxu0 %vm368_vm0, %v315_v48  ;;  %1564 = vmatprep.mubr.msk.f32.mxu1 %vm368_vm0, %v347_v49 }
  0x44   : > { %1517 = vmatmul.mubr.msk.f32.gmra.mxu0 %vm368_vm0, %v316_v50  ;;  %1565 = vmatmul.mubr.msk.f32.gmra.mxu1 %vm368_vm0, %v348_v51 }
  0x45   : > { %1519 = vmatprep.mubr.msk.f32.mxu0 %vm368_vm0, %v317_v52  ;;  %1567 = vmatprep.mubr.msk.f32.mxu1 %vm368_vm0, %v349_v53 }
  0x48   : > { %1520 = vmatmul.mubr.msk.f32.gmra.mxu0 %vm368_vm0, %v318_v54  ;;  %1568 = vmatmul.mubr.msk.f32.gmra.mxu1 %vm368_vm0, %v350_v55  ;;  %v950_v55 = vld [vmem:[%s1948_s25 + $0x20] sm:$0xff] }
  0x49   : > { %1522 = vmatprep.mubr.msk.f32.mxu0 %vm368_vm0, %v319_v56  ;;  %1570 = vmatprep.mubr.msk.f32.mxu1 %vm368_vm0, %v351_v57  ;;  %v982_v56 = vld [vmem:[%s1948_s25 + $0x120] sm:$0xff] }
  0x4c   : > { %1523 = vmatmul.mubr.msk.f32.gmra.mxu0 %vm368_vm0, %v320_v58  ;;  %1571 = vmatmul.mubr.msk.f32.gmra.mxu1 %vm368_vm0, %v352_v59 }
  0x4d   : > { %1525 = vmatprep.mubr.msk.f32.mxu0 %vm368_vm0, %v321_v60  ;;  %1573 = vmatprep.mubr.msk.f32.mxu1 %vm368_vm0, %v353_v61  ;;  %v953_v60 = vld [vmem:[%s1948_s25 + $0x38] sm:$0xff] }
  0x50   : > { %1526 = vmatmul.mubr.msk.f32.gmra.mxu0 %vm368_vm0, %v322_v62  ;;  %1574 = vmatmul.mubr.msk.f32.gmra.mxu1 %vm368_vm0, %v354_v63  ;;  %v985_v62 = vld [vmem:[%s1948_s25 + $0x138] sm:$0xff] }
  0x51   : > { %1528 = vmatprep.mubr.msk.f32.mxu0 %vm368_vm0, %v323_v0  ;;  %1576 = vmatprep.mubr.msk.f32.mxu1 %vm368_vm0, %v355_v1 }
  0x54   : > { %1529 = vmatmul.mubr.msk.f32.gmra.mxu0 %vm368_vm0, %v324_v2  ;;  %1577 = vmatmul.mubr.msk.f32.gmra.mxu1 %vm368_vm0, %v356_v3 }
  0xd8   : > { %v1485_v5 = vpop.f32.mrf.mxu0  ;;  %v1533_v7 = vpop.f32.mrf.mxu1 }
  0xd9   : > { %v633_v9 = vadd.f32 %v1485_v5, %v1950_v4  ;;  %v793_v10 = vadd.f32 %v1533_v7, %v1950_v4  ;;  %v952_v7 = vld [vmem:[%s1948_s25 + $0x30] sm:$0xff] }
  0xda   : > { %v627_v11 = vpop.f32.mrf.mxu0  ;;  %v787_v13 = vpop.f32.mrf.mxu1 }
  0xdb   : > { %v1011_v15 = vadd.f32 %v947_v6, %v633_v9  ;;  %v1043_v16 = vadd.f32 %v979_v8, %v793_v10  ;;  %v628_v17 = vadd.f32 %v1950_v4, %v627_v11  ;;  %v788_v18 = vadd.f32 %v1950_v4, %v787_v13  ;;  %v984_v9 = vld [vmem:[%s1948_s25 + $0x130] sm:$0xff] }
  0xdc   : > { %v1488_v19 = vpop.f32.mrf.mxu0  ;;  %v1536_v20 = vpop.f32.mrf.mxu1 }
  0xdd   : > { %v1075_v21 = vmax.f32 %v1011_v15, 0.0  ;;  %v1107_v22 = vmax.f32 %v1043_v16, 0.0  ;;  %v1010_v23 = vadd.f32 %v946_v12, %v628_v17  ;;  %v1042_v24 = vadd.f32 %v978_v14, %v788_v18 }
  0xde   : > { %v643_v27 = vadd.f32 %v1488_v19, %v1950_v4  ;;  %v803_v28 = vadd.f32 %v1536_v20, %v1950_v4  ;;  %v637_v29 = vpop.f32.mrf.mxu0  ;;  %v797_v31 = vpop.f32.mrf.mxu1 }
  0xdf   : > { %1139 = vst.msk [vmem:[%s1963_s27 + $0x8] sm:$0xff] %vm368_vm0, %v1075_v21  ;;  %1171 = vst.msk [vmem:[%s1963_s27 + $0x108] sm:$0xff] %vm368_vm0, %v1107_v22  ;;  %v1074_v33 = vmax.f32 %v1010_v23, 0.0  ;;  %v1106_v34 = vmax.f32 %v1042_v24, 0.0  ;;  %v638_v35 = vadd.f32 %v1950_v4, %v637_v29  ;;  %v798_v36 = vadd.f32 %v1950_v4, %v797_v31  ;;  %v955_v22 = vld [vmem:[%s1948_s25 + $0x48] sm:$0xff]  ;;  %v986_v29 = vld [vmem:[%s1948_s25 + $0x140] sm:$0xff] }
  0xe0   : > { %v1013_v37 = vadd.f32 %v949_v25, %v643_v27  ;;  %v1045_v38 = vadd.f32 %v981_v26, %v803_v28  ;;  %v1491_v39 = vpop.f32.mrf.mxu0  ;;  %v1539_v41 = vpop.f32.mrf.mxu1  ;;  %v987_v23 = vld [vmem:[%s1948_s25 + $0x148] sm:$0xff]  ;;  %v954_v27 = vld [vmem:[%s1948_s25 + $0x40] sm:$0xff] }
  0xe1   : > { %1138 = vst.msk [vmem:[%s1963_s27] sm:$0xff] %vm368_vm0, %v1074_v33  ;;  %1170 = vst.msk [vmem:[%s1963_s27 + $0x100] sm:$0xff] %vm368_vm0, %v1106_v34  ;;  %v1012_v43 = vadd.f32 %v948_v30, %v638_v35  ;;  %v1044_v44 = vadd.f32 %v980_v32, %v798_v36  ;;  %v653_v45 = vadd.f32 %v1491_v39, %v1950_v4  ;;  %v989_v39 = vld [vmem:[%s1948_s25 + $0x158] sm:$0xff] }
  0xe2   : > { %v813_v46 = vadd.f32 %v1539_v41, %v1950_v4  ;;  %v1077_v47 = vmax.f32 %v1013_v37, 0.0  ;;  %v1109_v48 = vmax.f32 %v1045_v38, 0.0  ;;  %v647_v49 = vpop.f32.mrf.mxu0  ;;  %v807_v50 = vpop.f32.mrf.mxu1  ;;  %v957_v37 = vld [vmem:[%s1948_s25 + $0x58] sm:$0xff] }
  0xe3   : > { %v1076_v51 = vmax.f32 %v1012_v43, 0.0  ;;  %v1108_v52 = vmax.f32 %v1044_v44, 0.0  ;;  %v1015_v53 = vadd.f32 %v951_v40, %v653_v45  ;;  %v648_v57 = vadd.f32 %v1950_v4, %v647_v49 }
  0xe4   : > { %v1047_v54 = vadd.f32 %v983_v42, %v813_v46  ;;  %1141 = vst.msk [vmem:[%s1963_s27 + $0x18] sm:$0xff] %vm368_vm0, %v1077_v47  ;;  %1173 = vst.msk [vmem:[%s1963_s27 + $0x118] sm:$0xff] %vm368_vm0, %v1109_v48  ;;  %v808_v58 = vadd.f32 %v1950_v4, %v807_v50  ;;  %v1494_v59 = vpop.f32.mrf.mxu0  ;;  %v1542_v61 = vpop.f32.mrf.mxu1 }
  0xe5   : > { %1140 = vst.msk [vmem:[%s1963_s27 + $0x10] sm:$0xff] %vm368_vm0, %v1076_v51  ;;  %1172 = vst.msk [vmem:[%s1963_s27 + $0x110] sm:$0xff] %vm368_vm0, %v1108_v52  ;;  %v1079_v63 = vmax.f32 %v1015_v53, 0.0  ;;  %v663_v1 = vadd.f32 %v1494_v59, %v1950_v4  ;;  %v823_v2 = vadd.f32 %v1542_v61, %v1950_v4  ;;  %v1014_v3 = vadd.f32 %v950_v55, %v648_v57  ;;  %v956_v52 = vld [vmem:[%s1948_s25 + $0x50] sm:$0xff]  ;;  %v959_v57 = vld [vmem:[%s1948_s25 + $0x68] sm:$0xff] }
  0xe6   : > { %v1111_v0 = vmax.f32 %v1047_v54, 0.0  ;;  %v1046_v5 = vadd.f32 %v982_v56, %v808_v58  ;;  %v657_v6 = vpop.f32.mrf.mxu0  ;;  %v817_v8 = vpop.f32.mrf.mxu1  ;;  %v988_v53 = vld [vmem:[%s1948_s25 + $0x150] sm:$0xff]  ;;  %v991_v59 = vld [vmem:[%s1948_s25 + $0x168] sm:$0xff] }
  0xe7   : > { %1143 = vst.msk [vmem:[%s1963_s27 + $0x28] sm:$0xff] %vm368_vm0, %v1079_v63  ;;  %v1017_v10 = vadd.f32 %v953_v60, %v663_v1  ;;  %v1049_v11 = vadd.f32 %v985_v62, %v823_v2  ;;  %v658_v12 = vadd.f32 %v1950_v4, %v657_v6  ;;  %v818_v13 = vadd.f32 %v1950_v4, %v817_v8  ;;  %v990_v6 = vld [vmem:[%s1948_s25 + $0x160] sm:$0xff] }
  0xe8   : > { %1175 = vst.msk [vmem:[%s1963_s27 + $0x128] sm:$0xff] %vm368_vm0, %v1111_v0  ;;  %v1078_v14 = vmax.f32 %v1014_v3, 0.0  ;;  %v1110_v15 = vmax.f32 %v1046_v5, 0.0  ;;  %v1497_v16 = vpop.f32.mrf.mxu0  ;;  %v1545_v17 = vpop.f32.mrf.mxu1  ;;  %v958_v3 = vld [vmem:[%s1948_s25 + $0x60] sm:$0xff] }
  0xe9   : > { %v1081_v18 = vmax.f32 %v1017_v10, 0.0  ;;  %v1113_v19 = vmax.f32 %v1049_v11, 0.0  ;;  %v1016_v20 = vadd.f32 %v952_v7, %v658_v12  ;;  %v1048_v21 = vadd.f32 %v984_v9, %v818_v13 }
  0xea   : > { %1142 = vst.msk [vmem:[%s1963_s27 + $0x20] sm:$0xff] %vm368_vm0, %v1078_v14  ;;  %1174 = vst.msk [vmem:[%s1963_s27 + $0x120] sm:$0xff] %vm368_vm0, %v1110_v15  ;;  %v673_v24 = vadd.f32 %v1497_v16, %v1950_v4  ;;  %v833_v25 = vadd.f32 %v1545_v17, %v1950_v4  ;;  %v667_v26 = vpop.f32.mrf.mxu0  ;;  %v827_v28 = vpop.f32.mrf.mxu1 }
  0xeb   : > { %1145 = vst.msk [vmem:[%s1963_s27 + $0x38] sm:$0xff] %vm368_vm0, %v1081_v18  ;;  %1177 = vst.msk [vmem:[%s1963_s27 + $0x138] sm:$0xff] %vm368_vm0, %v1113_v19  ;;  %v1080_v30 = vmax.f32 %v1016_v20, 0.0  ;;  %v1112_v31 = vmax.f32 %v1048_v21, 0.0  ;;  %v668_v32 = vadd.f32 %v1950_v4, %v667_v26  ;;  %v828_v33 = vadd.f32 %v1950_v4, %v827_v28  ;;  %v961_v19 = vld [vmem:[%s1948_s25 + $0x78] sm:$0xff]  ;;  %v992_v26 = vld [vmem:[%s1948_s25 + $0x170] sm:$0xff] }
  0xec   : > { %v1019_v34 = vadd.f32 %v955_v22, %v673_v24  ;;  %v1051_v35 = vadd.f32 %v987_v23, %v833_v25  ;;  %v1500_v36 = vpop.f32.mrf.mxu0  ;;  %v1548_v38 = vpop.f32.mrf.mxu1  ;;  %v993_v20 = vld [vmem:[%s1948_s25 + $0x178] sm:$0xff]  ;;  %v960_v24 = vld [vmem:[%s1948_s25 + $0x70] sm:$0xff] }
  0xed   : > { %1144 = vst.msk [vmem:[%s1963_s27 + $0x30] sm:$0xff] %vm368_vm0, %v1080_v30  ;;  %1176 = vst.msk [vmem:[%s1963_s27 + $0x130] sm:$0xff] %vm368_vm0, %v1112_v31  ;;  %v1018_v40 = vadd.f32 %v954_v27, %v668_v32  ;;  %v1050_v41 = vadd.f32 %v986_v29, %v828_v33  ;;  %v683_v42 = vadd.f32 %v1500_v36, %v1950_v4  ;;  %v995_v36 = vld [vmem:[%s1948_s25 + $0x188] sm:$0xff] }
  0xee   : > { %v843_v43 = vadd.f32 %v1548_v38, %v1950_v4  ;;  %v1083_v44 = vmax.f32 %v1019_v34, 0.0  ;;  %v1115_v45 = vmax.f32 %v1051_v35, 0.0  ;;  %v677_v46 = vpop.f32.mrf.mxu0  ;;  %v837_v47 = vpop.f32.mrf.mxu1  ;;  %v963_v34 = vld [vmem:[%s1948_s25 + $0x88] sm:$0xff] }
  0xef   : > { %v1082_v48 = vmax.f32 %v1018_v40, 0.0  ;;  %v1114_v49 = vmax.f32 %v1050_v41, 0.0  ;;  %v1021_v50 = vadd.f32 %v957_v37, %v683_v42  ;;  %v678_v54 = vadd.f32 %v1950_v4, %v677_v46 }
  0xf0   : > { %v1053_v51 = vadd.f32 %v989_v39, %v843_v43  ;;  %1147 = vst.msk [vmem:[%s1963_s27 + $0x48] sm:$0xff] %vm368_vm0, %v1083_v44  ;;  %1179 = vst.msk [vmem:[%s1963_s27 + $0x148] sm:$0xff] %vm368_vm0, %v1115_v45  ;;  %v838_v55 = vadd.f32 %v1950_v4, %v837_v47  ;;  %v1503_v56 = vpop.f32.mrf.mxu0  ;;  %v1551_v58 = vpop.f32.mrf.mxu1 }
  0xf1   : > { %1146 = vst.msk [vmem:[%s1963_s27 + $0x40] sm:$0xff] %vm368_vm0, %v1082_v48  ;;  %1178 = vst.msk [vmem:[%s1963_s27 + $0x140] sm:$0xff] %vm368_vm0, %v1114_v49  ;;  %v1085_v60 = vmax.f32 %v1021_v50, 0.0  ;;  %v693_v62 = vadd.f32 %v1503_v56, %v1950_v4  ;;  %v853_v63 = vadd.f32 %v1551_v58, %v1950_v4  ;;  %v1020_v0 = vadd.f32 %v956_v52, %v678_v54  ;;  %v962_v49 = vld [vmem:[%s1948_s25 + $0x80] sm:$0xff]  ;;  %v965_v54 = vld [vmem:[%s1948_s25 + $0x98] sm:$0xff] }
  0xf2   : > { %v1117_v61 = vmax.f32 %v1053_v51, 0.0  ;;  %v1052_v1 = vadd.f32 %v988_v53, %v838_v55  ;;  %v687_v2 = vpop.f32.mrf.mxu0  ;;  %v847_v5 = vpop.f32.mrf.mxu1  ;;  %v994_v50 = vld [vmem:[%s1948_s25 + $0x180] sm:$0xff]  ;;  %v997_v56 = vld [vmem:[%s1948_s25 + $0x198] sm:$0xff] }
  0xf3   : > { %1149 = vst.msk [vmem:[%s1963_s27 + $0x58] sm:$0xff] %vm368_vm0, %v1085_v60  ;;  %v1023_v7 = vadd.f32 %v959_v57, %v693_v62  ;;  %v1055_v8 = vadd.f32 %v991_v59, %v853_v63  ;;  %v688_v9 = vadd.f32 %v1950_v4, %v687_v2  ;;  %v848_v10 = vadd.f32 %v1950_v4, %v847_v5  ;;  %v996_v2 = vld [vmem:[%s1948_s25 + $0x190] sm:$0xff] }
  0xf4   : > { %1181 = vst.msk [vmem:[%s1963_s27 + $0x158] sm:$0xff] %vm368_vm0, %v1117_v61  ;;  %v1084_v11 = vmax.f32 %v1020_v0, 0.0  ;;  %v1116_v12 = vmax.f32 %v1052_v1, 0.0  ;;  %v1506_v13 = vpop.f32.mrf.mxu0  ;;  %v1554_v14 = vpop.f32.mrf.mxu1  ;;  %v964_v0 = vld [vmem:[%s1948_s25 + $0x90] sm:$0xff] }
  0xf5   : > { %v1087_v15 = vmax.f32 %v1023_v7, 0.0  ;;  %v1119_v16 = vmax.f32 %v1055_v8, 0.0  ;;  %v1022_v17 = vadd.f32 %v958_v3, %v688_v9  ;;  %v1054_v18 = vadd.f32 %v990_v6, %v848_v10 }
  0xf6   : > { %1148 = vst.msk [vmem:[%s1963_s27 + $0x50] sm:$0xff] %vm368_vm0, %v1084_v11  ;;  %1180 = vst.msk [vmem:[%s1963_s27 + $0x150] sm:$0xff] %vm368_vm0, %v1116_v12  ;;  %v703_v21 = vadd.f32 %v1506_v13, %v1950_v4  ;;  %v863_v22 = vadd.f32 %v1554_v14, %v1950_v4  ;;  %v697_v23 = vpop.f32.mrf.mxu0  ;;  %v857_v25 = vpop.f32.mrf.mxu1 }
  0xf7   : > { %1151 = vst.msk [vmem:[%s1963_s27 + $0x68] sm:$0xff] %vm368_vm0, %v1087_v15  ;;  %1183 = vst.msk [vmem:[%s1963_s27 + $0x168] sm:$0xff] %vm368_vm0, %v1119_v16  ;;  %v1086_v27 = vmax.f32 %v1022_v17, 0.0  ;;  %v1118_v28 = vmax.f32 %v1054_v18, 0.0  ;;  %v698_v29 = vadd.f32 %v1950_v4, %v697_v23  ;;  %v858_v30 = vadd.f32 %v1950_v4, %v857_v25  ;;  %v967_v16 = vld [vmem:[%s1948_s25 + $0xa8] sm:$0xff]  ;;  %v998_v23 = vld [vmem:[%s1948_s25 + $0x1a0] sm:$0xff] }
  0xf8   : > { %v1025_v31 = vadd.f32 %v961_v19, %v703_v21  ;;  %v1057_v32 = vadd.f32 %v993_v20, %v863_v22  ;;  %v1509_v33 = vpop.f32.mrf.mxu0  ;;  %v1557_v35 = vpop.f32.mrf.mxu1  ;;  %v999_v17 = vld [vmem:[%s1948_s25 + $0x1a8] sm:$0xff]  ;;  %v966_v21 = vld [vmem:[%s1948_s25 + $0xa0] sm:$0xff] }
  0xf9   : > { %1150 = vst.msk [vmem:[%s1963_s27 + $0x60] sm:$0xff] %vm368_vm0, %v1086_v27  ;;  %1182 = vst.msk [vmem:[%s1963_s27 + $0x160] sm:$0xff] %vm368_vm0, %v1118_v28  ;;  %v1024_v37 = vadd.f32 %v960_v24, %v698_v29  ;;  %v1056_v38 = vadd.f32 %v992_v26, %v858_v30  ;;  %v713_v39 = vadd.f32 %v1509_v33, %v1950_v4  ;;  %v1001_v33 = vld [vmem:[%s1948_s25 + $0x1b8] sm:$0xff] }
  0xfa   : > { %v873_v40 = vadd.f32 %v1557_v35, %v1950_v4  ;;  %v1089_v41 = vmax.f32 %v1025_v31, 0.0  ;;  %v1121_v42 = vmax.f32 %v1057_v32, 0.0  ;;  %v707_v43 = vpop.f32.mrf.mxu0  ;;  %v867_v44 = vpop.f32.mrf.mxu1  ;;  %v969_v31 = vld [vmem:[%s1948_s25 + $0xb8] sm:$0xff] }
  0xfb   : > { %v1088_v45 = vmax.f32 %v1024_v37, 0.0  ;;  %v1120_v46 = vmax.f32 %v1056_v38, 0.0  ;;  %v1027_v47 = vadd.f32 %v963_v34, %v713_v39  ;;  %v708_v51 = vadd.f32 %v1950_v4, %v707_v43 }
  0xfc   : > { %v1059_v48 = vadd.f32 %v995_v36, %v873_v40  ;;  %1153 = vst.msk [vmem:[%s1963_s27 + $0x78] sm:$0xff] %vm368_vm0, %v1089_v41  ;;  %1185 = vst.msk [vmem:[%s1963_s27 + $0x178] sm:$0xff] %vm368_vm0, %v1121_v42  ;;  %v868_v52 = vadd.f32 %v1950_v4, %v867_v44  ;;  %v1512_v53 = vpop.f32.mrf.mxu0  ;;  %v1560_v55 = vpop.f32.mrf.mxu1 }
  0xfd   : > { %1152 = vst.msk [vmem:[%s1963_s27 + $0x70] sm:$0xff] %vm368_vm0, %v1088_v45  ;;  %1184 = vst.msk [vmem:[%s1963_s27 + $0x170] sm:$0xff] %vm368_vm0, %v1120_v46  ;;  %v1091_v57 = vmax.f32 %v1027_v47, 0.0  ;;  %v723_v59 = vadd.f32 %v1512_v53, %v1950_v4  ;;  %v883_v60 = vadd.f32 %v1560_v55, %v1950_v4  ;;  %v1026_v61 = vadd.f32 %v962_v49, %v708_v51  ;;  %v968_v46 = vld [vmem:[%s1948_s25 + $0xb0] sm:$0xff]  ;;  %v971_v51 = vld [vmem:[%s1948_s25 + $0xc8] sm:$0xff] }
  0xfe   : > { %v1123_v58 = vmax.f32 %v1059_v48, 0.0  ;;  %v1058_v62 = vadd.f32 %v994_v50, %v868_v52  ;;  %v717_v63 = vpop.f32.mrf.mxu0  ;;  %v877_v1 = vpop.f32.mrf.mxu1  ;;  %v1000_v47 = vld [vmem:[%s1948_s25 + $0x1b0] sm:$0xff]  ;;  %v1003_v53 = vld [vmem:[%s1948_s25 + $0x1c8] sm:$0xff] }
  0xff   : > { %1155 = vst.msk [vmem:[%s1963_s27 + $0x88] sm:$0xff] %vm368_vm0, %v1091_v57  ;;  %v1029_v3 = vadd.f32 %v965_v54, %v723_v59  ;;  %v1061_v5 = vadd.f32 %v997_v56, %v883_v60  ;;  %v718_v6 = vadd.f32 %v1950_v4, %v717_v63  ;;  %v878_v7 = vadd.f32 %v1950_v4, %v877_v1  ;;  %v1002_v63 = vld [vmem:[%s1948_s25 + $0x1c0] sm:$0xff] }
 0x100   : > { %1187 = vst.msk [vmem:[%s1963_s27 + $0x188] sm:$0xff] %vm368_vm0, %v1123_v58  ;;  %v1090_v8 = vmax.f32 %v1026_v61, 0.0  ;;  %v1122_v9 = vmax.f32 %v1058_v62, 0.0  ;;  %v1515_v10 = vpop.f32.mrf.mxu0  ;;  %v1563_v11 = vpop.f32.mrf.mxu1  ;;  %v970_v61 = vld [vmem:[%s1948_s25 + $0xc0] sm:$0xff] }
 0x101   : > { %v1093_v12 = vmax.f32 %v1029_v3, 0.0  ;;  %v1125_v13 = vmax.f32 %v1061_v5, 0.0  ;;  %v1028_v14 = vadd.f32 %v964_v0, %v718_v6  ;;  %v1060_v15 = vadd.f32 %v996_v2, %v878_v7 }
 0x102   : > { %1154 = vst.msk [vmem:[%s1963_s27 + $0x80] sm:$0xff] %vm368_vm0, %v1090_v8  ;;  %1186 = vst.msk [vmem:[%s1963_s27 + $0x180] sm:$0xff] %vm368_vm0, %v1122_v9  ;;  %v733_v18 = vadd.f32 %v1515_v10, %v1950_v4  ;;  %v893_v19 = vadd.f32 %v1563_v11, %v1950_v4  ;;  %v727_v20 = vpop.f32.mrf.mxu0  ;;  %v887_v22 = vpop.f32.mrf.mxu1 }
 0x103   : > { %1157 = vst.msk [vmem:[%s1963_s27 + $0x98] sm:$0xff] %vm368_vm0, %v1093_v12  ;;  %1189 = vst.msk [vmem:[%s1963_s27 + $0x198] sm:$0xff] %vm368_vm0, %v1125_v13  ;;  %v1092_v24 = vmax.f32 %v1028_v14, 0.0  ;;  %v1124_v25 = vmax.f32 %v1060_v15, 0.0  ;;  %v728_v26 = vadd.f32 %v1950_v4, %v727_v20  ;;  %v888_v27 = vadd.f32 %v1950_v4, %v887_v22  ;;  %v973_v13 = vld [vmem:[%s1948_s25 + $0xd8] sm:$0xff]  ;;  %v1004_v20 = vld [vmem:[%s1948_s25 + $0x1d0] sm:$0xff] }
 0x104   : > { %v1031_v28 = vadd.f32 %v967_v16, %v733_v18  ;;  %v1063_v29 = vadd.f32 %v999_v17, %v893_v19  ;;  %v1518_v30 = vpop.f32.mrf.mxu0  ;;  %v1566_v32 = vpop.f32.mrf.mxu1  ;;  %v1005_v14 = vld [vmem:[%s1948_s25 + $0x1d8] sm:$0xff]  ;;  %v972_v18 = vld [vmem:[%s1948_s25 + $0xd0] sm:$0xff] }
 0x105   : > { %1156 = vst.msk [vmem:[%s1963_s27 + $0x90] sm:$0xff] %vm368_vm0, %v1092_v24  ;;  %1188 = vst.msk [vmem:[%s1963_s27 + $0x190] sm:$0xff] %vm368_vm0, %v1124_v25  ;;  %v1030_v34 = vadd.f32 %v966_v21, %v728_v26  ;;  %v1062_v35 = vadd.f32 %v998_v23, %v888_v27  ;;  %v743_v36 = vadd.f32 %v1518_v30, %v1950_v4  ;;  %v1007_v30 = vld [vmem:[%s1948_s25 + $0x1e8] sm:$0xff] }
 0x106   : > { %v903_v37 = vadd.f32 %v1566_v32, %v1950_v4  ;;  %v1095_v38 = vmax.f32 %v1031_v28, 0.0  ;;  %v1127_v39 = vmax.f32 %v1063_v29, 0.0  ;;  %v737_v40 = vpop.f32.mrf.mxu0  ;;  %v897_v41 = vpop.f32.mrf.mxu1  ;;  %v975_v28 = vld [vmem:[%s1948_s25 + $0xe8] sm:$0xff] }
 0x107   : > { %v1094_v42 = vmax.f32 %v1030_v34, 0.0  ;;  %v1126_v43 = vmax.f32 %v1062_v35, 0.0  ;;  %v1033_v44 = vadd.f32 %v969_v31, %v743_v36  ;;  %v738_v48 = vadd.f32 %v1950_v4, %v737_v40 }
 0x108   : > { %v1065_v45 = vadd.f32 %v1001_v33, %v903_v37  ;;  %1159 = vst.msk [vmem:[%s1963_s27 + $0xa8] sm:$0xff] %vm368_vm0, %v1095_v38  ;;  %1191 = vst.msk [vmem:[%s1963_s27 + $0x1a8] sm:$0xff] %vm368_vm0, %v1127_v39  ;;  %v898_v49 = vadd.f32 %v1950_v4, %v897_v41  ;;  %v1521_v50 = vpop.f32.mrf.mxu0  ;;  %v1569_v52 = vpop.f32.mrf.mxu1 }
 0x109   : > { %1158 = vst.msk [vmem:[%s1963_s27 + $0xa0] sm:$0xff] %vm368_vm0, %v1094_v42  ;;  %1190 = vst.msk [vmem:[%s1963_s27 + $0x1a0] sm:$0xff] %vm368_vm0, %v1126_v43  ;;  %v1097_v54 = vmax.f32 %v1033_v44, 0.0  ;;  %v753_v56 = vadd.f32 %v1521_v50, %v1950_v4  ;;  %v913_v57 = vadd.f32 %v1569_v52, %v1950_v4  ;;  %v1032_v58 = vadd.f32 %v968_v46, %v738_v48  ;;  %v974_v43 = vld [vmem:[%s1948_s25 + $0xe0] sm:$0xff]  ;;  %v977_v48 = vld [vmem:[%s1948_s25 + $0xf8] sm:$0xff] }
 0x10a   : > { %v1129_v55 = vmax.f32 %v1065_v45, 0.0  ;;  %v1064_v59 = vadd.f32 %v1000_v47, %v898_v49  ;;  %v747_v60 = vpop.f32.mrf.mxu0  ;;  %v907_v62 = vpop.f32.mrf.mxu1  ;;  %v1006_v44 = vld [vmem:[%s1948_s25 + $0x1e0] sm:$0xff]  ;;  %v1009_v50 = vld [vmem:[%s1948_s25 + $0x1f8] sm:$0xff] }
 0x10b   : > { %1161 = vst.msk [vmem:[%s1963_s27 + $0xb8] sm:$0xff] %vm368_vm0, %v1097_v54  ;;  %v1035_v0 = vadd.f32 %v971_v51, %v753_v56  ;;  %v1067_v1 = vadd.f32 %v1003_v53, %v913_v57  ;;  %v748_v2 = vadd.f32 %v1950_v4, %v747_v60  ;;  %v908_v3 = vadd.f32 %v1950_v4, %v907_v62  ;;  %v1008_v60 = vld [vmem:[%s1948_s25 + $0x1f0] sm:$0xff] }
 0x10c   : > { %1193 = vst.msk [vmem:[%s1963_s27 + $0x1b8] sm:$0xff] %vm368_vm0, %v1129_v55  ;;  %v1096_v5 = vmax.f32 %v1032_v58, 0.0  ;;  %v1128_v6 = vmax.f32 %v1064_v59, 0.0  ;;  %v1524_v7 = vpop.f32.mrf.mxu0  ;;  %v1572_v8 = vpop.f32.mrf.mxu1  ;;  %v976_v58 = vld [vmem:[%s1948_s25 + $0xf0] sm:$0xff] }
 0x10d   : > { %v1099_v9 = vmax.f32 %v1035_v0, 0.0  ;;  %v1131_v10 = vmax.f32 %v1067_v1, 0.0  ;;  %v1034_v11 = vadd.f32 %v970_v61, %v748_v2  ;;  %v1066_v12 = vadd.f32 %v1002_v63, %v908_v3 }
 0x10e   : > { %1160 = vst.msk [vmem:[%s1963_s27 + $0xb0] sm:$0xff] %vm368_vm0, %v1096_v5  ;;  %1192 = vst.msk [vmem:[%s1963_s27 + $0x1b0] sm:$0xff] %vm368_vm0, %v1128_v6  ;;  %v763_v15 = vadd.f32 %v1524_v7, %v1950_v4  ;;  %v923_v16 = vadd.f32 %v1572_v8, %v1950_v4  ;;  %v757_v17 = vpop.f32.mrf.mxu0  ;;  %v917_v19 = vpop.f32.mrf.mxu1 }
 0x10f   : > { %1163 = vst.msk [vmem:[%s1963_s27 + $0xc8] sm:$0xff] %vm368_vm0, %v1099_v9  ;;  %1195 = vst.msk [vmem:[%s1963_s27 + $0x1c8] sm:$0xff] %vm368_vm0, %v1131_v10  ;;  %v1098_v21 = vmax.f32 %v1034_v11, 0.0  ;;  %v1130_v22 = vmax.f32 %v1066_v12, 0.0  ;;  %v758_v23 = vadd.f32 %v1950_v4, %v757_v17  ;;  %v918_v24 = vadd.f32 %v1950_v4, %v917_v19 }
 0x110   : > { %v1037_v25 = vadd.f32 %v973_v13, %v763_v15  ;;  %v1069_v26 = vadd.f32 %v1005_v14, %v923_v16  ;;  %v1527_v27 = vpop.f32.mrf.mxu0  ;;  %v1575_v29 = vpop.f32.mrf.mxu1 }
 0x111   : > { %1162 = vst.msk [vmem:[%s1963_s27 + $0xc0] sm:$0xff] %vm368_vm0, %v1098_v21  ;;  %1194 = vst.msk [vmem:[%s1963_s27 + $0x1c0] sm:$0xff] %vm368_vm0, %v1130_v22  ;;  %v1036_v31 = vadd.f32 %v972_v18, %v758_v23  ;;  %v1068_v32 = vadd.f32 %v1004_v20, %v918_v24  ;;  %v773_v33 = vadd.f32 %v1527_v27, %v1950_v4 }
 0x112   : > { %v933_v34 = vadd.f32 %v1575_v29, %v1950_v4  ;;  %v1101_v35 = vmax.f32 %v1037_v25, 0.0  ;;  %v1133_v36 = vmax.f32 %v1069_v26, 0.0  ;;  %v767_v37 = vpop.f32.mrf.mxu0  ;;  %v927_v38 = vpop.f32.mrf.mxu1 }
 0x113   : > { %v1100_v39 = vmax.f32 %v1036_v31, 0.0  ;;  %v1132_v40 = vmax.f32 %v1068_v32, 0.0  ;;  %v1039_v41 = vadd.f32 %v975_v28, %v773_v33  ;;  %v768_v45 = vadd.f32 %v1950_v4, %v767_v37 }
 0x114   : > { %v1071_v42 = vadd.f32 %v1007_v30, %v933_v34  ;;  %1165 = vst.msk [vmem:[%s1963_s27 + $0xd8] sm:$0xff] %vm368_vm0, %v1101_v35  ;;  %1197 = vst.msk [vmem:[%s1963_s27 + $0x1d8] sm:$0xff] %vm368_vm0, %v1133_v36  ;;  %v928_v46 = vadd.f32 %v1950_v4, %v927_v38  ;;  %v1530_v47 = vpop.f32.mrf.mxu0  ;;  %v1578_v49 = vpop.f32.mrf.mxu1 }
 0x115   : > { %1164 = vst.msk [vmem:[%s1963_s27 + $0xd0] sm:$0xff] %vm368_vm0, %v1100_v39  ;;  %1196 = vst.msk [vmem:[%s1963_s27 + $0x1d0] sm:$0xff] %vm368_vm0, %v1132_v40  ;;  %v1103_v51 = vmax.f32 %v1039_v41, 0.0  ;;  %v783_v53 = vadd.f32 %v1530_v47, %v1950_v4  ;;  %v943_v54 = vadd.f32 %v1578_v49, %v1950_v4  ;;  %v1038_v55 = vadd.f32 %v974_v43, %v768_v45 }
 0x116   : > { %v1135_v52 = vmax.f32 %v1071_v42, 0.0  ;;  %v1070_v56 = vadd.f32 %v1006_v44, %v928_v46  ;;  %v777_v57 = vpop.f32.mrf.mxu0  ;;  %v937_v59 = vpop.f32.mrf.mxu1 }
 0x117   : > { %1167 = vst.msk [vmem:[%s1963_s27 + $0xe8] sm:$0xff] %vm368_vm0, %v1103_v51  ;;  %v1041_v61 = vadd.f32 %v977_v48, %v783_v53  ;;  %v1073_v62 = vadd.f32 %v1009_v50, %v943_v54  ;;  %v778_v63 = vadd.f32 %v1950_v4, %v777_v57  ;;  %v938_v0 = vadd.f32 %v1950_v4, %v937_v59 }
 0x118   : > { %1199 = vst.msk [vmem:[%s1963_s27 + $0x1e8] sm:$0xff] %vm368_vm0, %v1135_v52  ;;  %v1102_v1 = vmax.f32 %v1038_v55, 0.0  ;;  %v1134_v2 = vmax.f32 %v1070_v56, 0.0 }
 0x119   : > { %v1105_v3 = vmax.f32 %v1041_v61, 0.0  ;;  %v1137_v5 = vmax.f32 %v1073_v62, 0.0  ;;  %v1040_v6 = vadd.f32 %v976_v58, %v778_v63  ;;  %v1072_v7 = vadd.f32 %v1008_v60, %v938_v0 }
 0x11a   : > { %1166 = vst.msk [vmem:[%s1963_s27 + $0xe0] sm:$0xff] %vm368_vm0, %v1102_v1  ;;  %1198 = vst.msk [vmem:[%s1963_s27 + $0x1e0] sm:$0xff] %vm368_vm0, %v1134_v2 }
 0x11b   : > { %1169 = vst.msk [vmem:[%s1963_s27 + $0xf8] sm:$0xff] %vm368_vm0, %v1105_v3  ;;  %1201 = vst.msk [vmem:[%s1963_s27 + $0x1f8] sm:$0xff] %vm368_vm0, %v1137_v5  ;;  %v1104_v8 = vmax.f32 %v1040_v6, 0.0  ;;  %v1136_v9 = vmax.f32 %v1072_v7, 0.0 }
 0x11d   : > { %1168 = vst.msk [vmem:[%s1963_s27 + $0xf0] sm:$0xff] %vm368_vm0, %v1104_v8  ;;  %1200 = vst.msk [vmem:[%s1963_s27 + $0x1f0] sm:$0xff] %vm368_vm0, %v1136_v9 }
 0x11e PF: > { %s14_s17 = sadd.s32 1, %s1633_s17   ;;  %s2227_s15 = smov %s1629_s16 }
 0x11f   : > { %p11_p5 = scmp.ge.s32.totalorder %s14_s17, 4   ;;  %s2228_s16 = smov %s2230_s18 }
 0x121   :  { %13 = sbr.rel (!%p11_p5) target bundleno = 2 (0x2), region = 75 }

// kernel: fno_forward.18
= control target key start
LH: loop header
LB: loop body
LE: loop exit
PB: predicated region body
PF: predicated region fallthrough
CT: control target
= control target key end

     0   :  { %s1615_s15 = smov 0   ;;  %s1617_s16 = smov 0   ;;  %s2059_s0 = inlined_call_operand.vmem [shape: f32[2,512,32], index: 0, kind: input, shape index: {}]   ;;  %s2060_s1 = inlined_call_operand.vmem [shape: f32[2,32,32], index: 1, kind: input, shape index: {}]   ;;  %s2061_s2 = inlined_call_operand.vmem [shape: f32[2,1,32], index: 2, kind: input, shape index: {}]   ;;  %s2062_s3 = inlined_call_operand.vmem [shape: f32[2,512,32], index: 3, kind: input, shape index: {}]   ;;  %s2063_s4 = inlined_call_operand.vmem [shape: f32[2,512,32], index: 4, kind: output, shape index: {}]  }
   0x1   :  { %s1619_s17 = smov 0  }
   0x2 LB: > { %s26_s18 = sadd.s32 1, %s1584_s16  ;;  %p1282_p0 = scmp.ge.s32.totalorder %s1588_s17, 1  ;;  %s1588_s17 = sphi %s1619_s17, %s14_s17   ;;  %s1584_s16 = sphi %s1617_s16, %s2065_s16   ;;  %s1580_s15 = sphi %s1615_s15, %s2064_s15  }
   0x3   : > { %p28_p1 = scmp.ge.s32.totalorder %s26_s18, 2  ;;  %p218_p2 = scmp.lt.s32.totalorder %s1588_s17, 3 }
   0x5   : > { %s2067_s18 = smov (%p28_p1, %s26_s18), 0  ;;  %p219_p3 = pnand %p1282_p0, %p218_p2 }
   0x6   : > { %p270_p4 = scmp.lt.s32.totalorder (!%p219_p3), %s1580_s15, 1 }
   0x7   : > { %222 = sbr.rel (%p219_p3) target bundleno = 285 (0x11d), region = 36 }
   0xc   : > { %s2069_s15 = smov (!%p270_p4, %s1580_s15), 1  ;;  %vm382_vm0 = vcmask 261120  }
   0xd   : > { %s1359_s19 = sshll.u32 %s2069_s15, 5  ;;  %s1640_s23 = sshll.u32 %s2069_s15, 9 }
   0xe   : > { %s283_s22 = scalar_lea.vmem %s2060_s1, %s1359_s19  ;;  %s1646_s26 = scalar_lea.vmem %s2059_s0, %s1640_s23 }
   0xf   : > { %v374_v0 = vld [vmem:[%s283_s22 + $0x18] sm:$0xff]  ;;  %v373_v1 = vld [vmem:[%s283_s22 + $0x10] sm:$0xff]  ;;  %v372_v2 = vld [vmem:[%s283_s22 + $0x8] sm:$0xff]  ;;  %s286_s29 = scalar_lea.vmem %s2061_s2, %s2069_s15  ;;  %s1784_s6 = scalar_lea.vmem %s2062_s3, %s1640_s23 }
  0x10   : > { %1430 = vmatprep.subr.mxu0 %v374_v0  ;;  %1534 = vmatprep.subr.mxu1 %v374_v0  ;;  %v371_v3 = vld [vmem:[%s283_s22] sm:$0xff]  ;;  %v308_v6 = vld [vmem:[%s1646_s26 + $0x8] sm:$0xff]  ;;  %v309_v8 = vld [vmem:[%s1646_s26 + $0x10] sm:$0xff]  ;;  %s1796_s9 = scalar_lea.vmem %s2063_s4, %s1640_s23 }
  0x11   : > { %1431 = vmatpush3.msra.mxu0 %v374_v0  ;;  %1538 = vmatpush3.msra.mxu1 %v374_v0  ;;  %v307_v4 = vld [vmem:[%s1646_s26] sm:$0xff]  ;;  %v340_v7 = vld [vmem:[%s1646_s26 + $0x108] sm:$0xff]  ;;  %v341_v9 = vld [vmem:[%s1646_s26 + $0x110] sm:$0xff] }
  0x12   : > { %1432 = vmatprep.subr.mxu0 %v373_v1  ;;  %1535 = vmatprep.subr.mxu1 %v373_v1  ;;  %v339_v5 = vld [vmem:[%s1646_s26 + $0x100] sm:$0xff]  ;;  %v310_v10 = vld [vmem:[%s1646_s26 + $0x18] sm:$0xff]  ;;  %v312_v14 = vld [vmem:[%s1646_s26 + $0x28] sm:$0xff] }
  0x13   : > { %1433 = vmatpush3.msra.mxu0 %v373_v1  ;;  %1539 = vmatpush3.msra.mxu1 %v373_v1  ;;  %v342_v11 = vld [vmem:[%s1646_s26 + $0x118] sm:$0xff]  ;;  %v311_v12 = vld [vmem:[%s1646_s26 + $0x20] sm:$0xff]  ;;  %v344_v15 = vld [vmem:[%s1646_s26 + $0x128] sm:$0xff] }
  0x14   : > { %1434 = vmatprep.subr.mxu0 %v372_v2  ;;  %1536 = vmatprep.subr.mxu1 %v372_v2  ;;  %v343_v13 = vld [vmem:[%s1646_s26 + $0x120] sm:$0xff]  ;;  %v313_v16 = vld [vmem:[%s1646_s26 + $0x30] sm:$0xff]  ;;  %v314_v18 = vld [vmem:[%s1646_s26 + $0x38] sm:$0xff] }
  0x15   : > { %1435 = vmatpush3.msra.mxu0 %v372_v2  ;;  %1540 = vmatpush3.msra.mxu1 %v372_v2  ;;  %v345_v17 = vld [vmem:[%s1646_s26 + $0x130] sm:$0xff]  ;;  %v346_v19 = vld [vmem:[%s1646_s26 + $0x138] sm:$0xff]  ;;  %v315_v20 = vld [vmem:[%s1646_s26 + $0x40] sm:$0xff] }
  0x16   : > { %1436 = vmatprep.subr.mxu0 %v371_v3  ;;  %1537 = vmatprep.subr.mxu1 %v371_v3  ;;  %v347_v21 = vld [vmem:[%s1646_s26 + $0x140] sm:$0xff]  ;;  %v316_v22 = vld [vmem:[%s1646_s26 + $0x48] sm:$0xff]  ;;  %v317_v24 = vld [vmem:[%s1646_s26 + $0x50] sm:$0xff] }
  0x17   : > { %1437 = vmatpush3.msra.mxu0 %v371_v3  ;;  %1541 = vmatpush3.msra.mxu1 %v371_v3  ;;  %v348_v23 = vld [vmem:[%s1646_s26 + $0x148] sm:$0xff]  ;;  %v349_v25 = vld [vmem:[%s1646_s26 + $0x150] sm:$0xff]  ;;  %v318_v26 = vld [vmem:[%s1646_s26 + $0x58] sm:$0xff] }
  0x18   : > { %1438 = vmatprep.mubr.msk.f32.mxu0 %vm382_vm0, %v307_v4  ;;  %1486 = vmatprep.mubr.msk.f32.mxu1 %vm382_vm0, %v339_v5  ;;  %v350_v27 = vld [vmem:[%s1646_s26 + $0x158] sm:$0xff]  ;;  %v319_v28 = vld [vmem:[%s1646_s26 + $0x60] sm:$0xff]  ;;  %v320_v30 = vld [vmem:[%s1646_s26 + $0x68] sm:$0xff] }
  0x19   : > { %1439 = vmatmul.mubr.msk.f32.vlgmr.msra.gmra.mxu0 %vm382_vm0, %v308_v6  ;;  %1487 = vmatmul.mubr.msk.f32.vlgmr.msra.gmra.mxu1 %vm382_vm0, %v340_v7  ;;  %v351_v29 = vld [vmem:[%s1646_s26 + $0x160] sm:$0xff]  ;;  %v352_v31 = vld [vmem:[%s1646_s26 + $0x168] sm:$0xff]  ;;  %v321_v32 = vld [vmem:[%s1646_s26 + $0x70] sm:$0xff] }
  0x1a   : > { %1441 = vmatprep.mubr.msk.f32.mxu0 %vm382_vm0, %v309_v8  ;;  %1489 = vmatprep.mubr.msk.f32.mxu1 %vm382_vm0, %v341_v9  ;;  %v353_v33 = vld [vmem:[%s1646_s26 + $0x170] sm:$0xff]  ;;  %v322_v34 = vld [vmem:[%s1646_s26 + $0x78] sm:$0xff]  ;;  %v323_v36 = vld [vmem:[%s1646_s26 + $0x80] sm:$0xff] }
  0x1b   : > { %v354_v35 = vld [vmem:[%s1646_s26 + $0x178] sm:$0xff]  ;;  %v355_v37 = vld [vmem:[%s1646_s26 + $0x180] sm:$0xff]  ;;  %v324_v38 = vld [vmem:[%s1646_s26 + $0x88] sm:$0xff] }
  0x1c   : > { %v356_v39 = vld [vmem:[%s1646_s26 + $0x188] sm:$0xff]  ;;  %v325_v40 = vld [vmem:[%s1646_s26 + $0x90] sm:$0xff]  ;;  %v326_v42 = vld [vmem:[%s1646_s26 + $0x98] sm:$0xff] }
  0x1d   : > { %1442 = vmatmul.mubr.msk.f32.gmra.mxu0 %vm382_vm0, %v310_v10  ;;  %1490 = vmatmul.mubr.msk.f32.gmra.mxu1 %vm382_vm0, %v342_v11  ;;  %v357_v41 = vld [vmem:[%s1646_s26 + $0x190] sm:$0xff]  ;;  %v358_v43 = vld [vmem:[%s1646_s26 + $0x198] sm:$0xff]  ;;  %v327_v44 = vld [vmem:[%s1646_s26 + $0xa0] sm:$0xff] }
  0x1e   : > { %1444 = vmatprep.mubr.msk.f32.mxu0 %vm382_vm0, %v311_v12  ;;  %1492 = vmatprep.mubr.msk.f32.mxu1 %vm382_vm0, %v343_v13  ;;  %v359_v45 = vld [vmem:[%s1646_s26 + $0x1a0] sm:$0xff]  ;;  %v328_v46 = vld [vmem:[%s1646_s26 + $0xa8] sm:$0xff]  ;;  %v329_v48 = vld [vmem:[%s1646_s26 + $0xb0] sm:$0xff] }
  0x1f   : > { %v360_v47 = vld [vmem:[%s1646_s26 + $0x1a8] sm:$0xff]  ;;  %v361_v49 = vld [vmem:[%s1646_s26 + $0x1b0] sm:$0xff]  ;;  %v330_v50 = vld [vmem:[%s1646_s26 + $0xb8] sm:$0xff] }
  0x20   : > { %v362_v51 = vld [vmem:[%s1646_s26 + $0x1b8] sm:$0xff]  ;;  %v331_v52 = vld [vmem:[%s1646_s26 + $0xc0] sm:$0xff]  ;;  %v332_v54 = vld [vmem:[%s1646_s26 + $0xc8] sm:$0xff] }
  0x21   : > { %1445 = vmatmul.mubr.msk.f32.gmra.mxu0 %vm382_vm0, %v312_v14  ;;  %1493 = vmatmul.mubr.msk.f32.gmra.mxu1 %vm382_vm0, %v344_v15  ;;  %v363_v53 = vld [vmem:[%s1646_s26 + $0x1c0] sm:$0xff]  ;;  %v364_v55 = vld [vmem:[%s1646_s26 + $0x1c8] sm:$0xff]  ;;  %v333_v56 = vld [vmem:[%s1646_s26 + $0xd0] sm:$0xff] }
  0x22   : > { %1447 = vmatprep.mubr.msk.f32.mxu0 %vm382_vm0, %v313_v16  ;;  %1495 = vmatprep.mubr.msk.f32.mxu1 %vm382_vm0, %v345_v17  ;;  %v365_v57 = vld [vmem:[%s1646_s26 + $0x1d0] sm:$0xff]  ;;  %v334_v58 = vld [vmem:[%s1646_s26 + $0xd8] sm:$0xff]  ;;  %v335_v60 = vld [vmem:[%s1646_s26 + $0xe0] sm:$0xff] }
  0x23   : > { %v366_v59 = vld [vmem:[%s1646_s26 + $0x1d8] sm:$0xff]  ;;  %v367_v61 = vld [vmem:[%s1646_s26 + $0x1e0] sm:$0xff]  ;;  %v336_v62 = vld [vmem:[%s1646_s26 + $0xe8] sm:$0xff] }
  0x24   : > { %v368_v63 = vld [vmem:[%s1646_s26 + $0x1e8] sm:$0xff]  ;;  %v337_v0 = vld [vmem:[%s1646_s26 + $0xf0] sm:$0xff]  ;;  %v338_v2 = vld [vmem:[%s1646_s26 + $0xf8] sm:$0xff] }
  0x25   : > { %1448 = vmatmul.mubr.msk.f32.gmra.mxu0 %vm382_vm0, %v314_v18  ;;  %1496 = vmatmul.mubr.msk.f32.gmra.mxu1 %vm382_vm0, %v346_v19  ;;  %v369_v1 = vld [vmem:[%s1646_s26 + $0x1f0] sm:$0xff]  ;;  %v370_v3 = vld [vmem:[%s1646_s26 + $0x1f8] sm:$0xff]  ;;  %v1786_v4 = vld [vmem:[%s286_s29] ss:$0 sm:$0xff] }
  0x26   : > { %1450 = vmatprep.mubr.msk.f32.mxu0 %vm382_vm0, %v315_v20  ;;  %1498 = vmatprep.mubr.msk.f32.mxu1 %vm382_vm0, %v347_v21  ;;  %v961_v6 = vld [vmem:[%s1784_s6 + $0x8] sm:$0xff]  ;;  %v960_v12 = vld [vmem:[%s1784_s6] sm:$0xff]  ;;  %v963_v20 = vld [vmem:[%s1784_s6 + $0x18] sm:$0xff] }
  0x27   : > { %v993_v8 = vld [vmem:[%s1784_s6 + $0x108] sm:$0xff]  ;;  %v992_v14 = vld [vmem:[%s1784_s6 + $0x100] sm:$0xff] }
  0x29   : > { %1451 = vmatmul.mubr.msk.f32.gmra.mxu0 %vm382_vm0, %v316_v22  ;;  %1499 = vmatmul.mubr.msk.f32.gmra.mxu1 %vm382_vm0, %v348_v23  ;;  %v995_v22 = vld [vmem:[%s1784_s6 + $0x118] sm:$0xff] }
  0x2a   : > { %1453 = vmatprep.mubr.msk.f32.mxu0 %vm382_vm0, %v317_v24  ;;  %1501 = vmatprep.mubr.msk.f32.mxu1 %vm382_vm0, %v349_v25 }
  0x2d   : > { %1454 = vmatmul.mubr.msk.f32.gmra.mxu0 %vm382_vm0, %v318_v26  ;;  %1502 = vmatmul.mubr.msk.f32.gmra.mxu1 %vm382_vm0, %v350_v27 }
  0x2e   : > { %1456 = vmatprep.mubr.msk.f32.mxu0 %vm382_vm0, %v319_v28  ;;  %1504 = vmatprep.mubr.msk.f32.mxu1 %vm382_vm0, %v351_v29  ;;  %v962_v28 = vld [vmem:[%s1784_s6 + $0x10] sm:$0xff] }
  0x31   : > { %1457 = vmatmul.mubr.msk.f32.gmra.mxu0 %vm382_vm0, %v320_v30  ;;  %1505 = vmatmul.mubr.msk.f32.gmra.mxu1 %vm382_vm0, %v352_v31  ;;  %v994_v30 = vld [vmem:[%s1784_s6 + $0x110] sm:$0xff] }
  0x32   : > { %1459 = vmatprep.mubr.msk.f32.mxu0 %vm382_vm0, %v321_v32  ;;  %1507 = vmatprep.mubr.msk.f32.mxu1 %vm382_vm0, %v353_v33 }
  0x35   : > { %1460 = vmatmul.mubr.msk.f32.gmra.mxu0 %vm382_vm0, %v322_v34  ;;  %1508 = vmatmul.mubr.msk.f32.gmra.mxu1 %vm382_vm0, %v354_v35 }
  0x36   : > { %1462 = vmatprep.mubr.msk.f32.mxu0 %vm382_vm0, %v323_v36  ;;  %1510 = vmatprep.mubr.msk.f32.mxu1 %vm382_vm0, %v355_v37  ;;  %v965_v36 = vld [vmem:[%s1784_s6 + $0x28] sm:$0xff] }
  0x39   : > { %1463 = vmatmul.mubr.msk.f32.gmra.mxu0 %vm382_vm0, %v324_v38  ;;  %1511 = vmatmul.mubr.msk.f32.gmra.mxu1 %vm382_vm0, %v356_v39  ;;  %v997_v38 = vld [vmem:[%s1784_s6 + $0x128] sm:$0xff] }
  0x3a   : > { %1465 = vmatprep.mubr.msk.f32.mxu0 %vm382_vm0, %v325_v40  ;;  %1513 = vmatprep.mubr.msk.f32.mxu1 %vm382_vm0, %v357_v41 }
  0x3d   : > { %1466 = vmatmul.mubr.msk.f32.gmra.mxu0 %vm382_vm0, %v326_v42  ;;  %1514 = vmatmul.mubr.msk.f32.gmra.mxu1 %vm382_vm0, %v358_v43 }
  0x3e   : > { %1468 = vmatprep.mubr.msk.f32.mxu0 %vm382_vm0, %v327_v44  ;;  %1516 = vmatprep.mubr.msk.f32.mxu1 %vm382_vm0, %v359_v45  ;;  %v964_v44 = vld [vmem:[%s1784_s6 + $0x20] sm:$0xff] }
  0x41   : > { %1469 = vmatmul.mubr.msk.f32.gmra.mxu0 %vm382_vm0, %v328_v46  ;;  %1517 = vmatmul.mubr.msk.f32.gmra.mxu1 %vm382_vm0, %v360_v47  ;;  %v996_v46 = vld [vmem:[%s1784_s6 + $0x120] sm:$0xff] }
  0x42   : > { %1471 = vmatprep.mubr.msk.f32.mxu0 %vm382_vm0, %v329_v48  ;;  %1519 = vmatprep.mubr.msk.f32.mxu1 %vm382_vm0, %v361_v49 }
  0x45   : > { %1472 = vmatmul.mubr.msk.f32.gmra.mxu0 %vm382_vm0, %v330_v50  ;;  %1520 = vmatmul.mubr.msk.f32.gmra.mxu1 %vm382_vm0, %v362_v51 }
  0x46   : > { %1474 = vmatprep.mubr.msk.f32.mxu0 %vm382_vm0, %v331_v52  ;;  %1522 = vmatprep.mubr.msk.f32.mxu1 %vm382_vm0, %v363_v53  ;;  %v967_v52 = vld [vmem:[%s1784_s6 + $0x38] sm:$0xff] }
  0x49   : > { %1475 = vmatmul.mubr.msk.f32.gmra.mxu0 %vm382_vm0, %v332_v54  ;;  %1523 = vmatmul.mubr.msk.f32.gmra.mxu1 %vm382_vm0, %v364_v55  ;;  %v999_v54 = vld [vmem:[%s1784_s6 + $0x138] sm:$0xff] }
  0x4a   : > { %1477 = vmatprep.mubr.msk.f32.mxu0 %vm382_vm0, %v333_v56  ;;  %1525 = vmatprep.mubr.msk.f32.mxu1 %vm382_vm0, %v365_v57 }
  0x4d   : > { %1478 = vmatmul.mubr.msk.f32.gmra.mxu0 %vm382_vm0, %v334_v58  ;;  %1526 = vmatmul.mubr.msk.f32.gmra.mxu1 %vm382_vm0, %v366_v59 }
  0x4e   : > { %1480 = vmatprep.mubr.msk.f32.mxu0 %vm382_vm0, %v335_v60  ;;  %1528 = vmatprep.mubr.msk.f32.mxu1 %vm382_vm0, %v367_v61  ;;  %v966_v60 = vld [vmem:[%s1784_s6 + $0x30] sm:$0xff] }
  0x51   : > { %1481 = vmatmul.mubr.msk.f32.gmra.mxu0 %vm382_vm0, %v336_v62  ;;  %1529 = vmatmul.mubr.msk.f32.gmra.mxu1 %vm382_vm0, %v368_v63  ;;  %v998_v62 = vld [vmem:[%s1784_s6 + $0x130] sm:$0xff] }
  0x52   : > { %1483 = vmatprep.mubr.msk.f32.mxu0 %vm382_vm0, %v337_v0  ;;  %1531 = vmatprep.mubr.msk.f32.mxu1 %vm382_vm0, %v369_v1 }
  0x55   : > { %1484 = vmatmul.mubr.msk.f32.gmra.mxu0 %vm382_vm0, %v338_v2  ;;  %1532 = vmatmul.mubr.msk.f32.gmra.mxu1 %vm382_vm0, %v370_v3 }
  0xd9   : > { %v1440_v5 = vpop.f32.mrf.mxu0  ;;  %v1488_v7 = vpop.f32.mrf.mxu1 }
  0xda   : > { %v647_v9 = vadd.f32 %v1440_v5, %v1786_v4  ;;  %v807_v10 = vadd.f32 %v1488_v7, %v1786_v4  ;;  %v969_v5 = vld [vmem:[%s1784_s6 + $0x48] sm:$0xff] }
  0xdb   : > { %v641_v11 = vpop.f32.mrf.mxu0  ;;  %v801_v13 = vpop.f32.mrf.mxu1  ;;  %v1001_v7 = vld [vmem:[%s1784_s6 + $0x148] sm:$0xff] }
  0xdc   : > { %v1025_v15 = vadd.f32 %v961_v6, %v647_v9  ;;  %v1057_v16 = vadd.f32 %v993_v8, %v807_v10  ;;  %v642_v17 = vadd.f32 %v1786_v4, %v641_v11  ;;  %v802_v18 = vadd.f32 %v1786_v4, %v801_v13  ;;  %v968_v13 = vld [vmem:[%s1784_s6 + $0x40] sm:$0xff] }
  0xdd   : > { %v1443_v19 = vpop.f32.mrf.mxu0  ;;  %v1491_v21 = vpop.f32.mrf.mxu1 }
  0xde   : > { %1089 = vst.msk [vmem:[%s1796_s9 + $0x8] sm:$0xff] %vm382_vm0, %v1025_v15  ;;  %1121 = vst.msk [vmem:[%s1796_s9 + $0x108] sm:$0xff] %vm382_vm0, %v1057_v16  ;;  %v1024_v23 = vadd.f32 %v960_v12, %v642_v17  ;;  %v1056_v24 = vadd.f32 %v992_v14, %v802_v18  ;;  %v657_v25 = vadd.f32 %v1443_v19, %v1786_v4  ;;  %v1000_v15 = vld [vmem:[%s1784_s6 + $0x140] sm:$0xff] }
  0xdf   : > { %v817_v26 = vadd.f32 %v1491_v21, %v1786_v4  ;;  %v651_v27 = vpop.f32.mrf.mxu0  ;;  %v811_v29 = vpop.f32.mrf.mxu1  ;;  %v971_v21 = vld [vmem:[%s1784_s6 + $0x58] sm:$0xff] }
  0xe0   : > { %1088 = vst.msk [vmem:[%s1796_s9] sm:$0xff] %vm382_vm0, %v1024_v23  ;;  %1120 = vst.msk [vmem:[%s1796_s9 + $0x100] sm:$0xff] %vm382_vm0, %v1056_v24  ;;  %v1027_v31 = vadd.f32 %v963_v20, %v657_v25  ;;  %v652_v33 = vadd.f32 %v1786_v4, %v651_v27  ;;  %v812_v34 = vadd.f32 %v1786_v4, %v811_v29  ;;  %v1003_v23 = vld [vmem:[%s1784_s6 + $0x158] sm:$0xff]  ;;  %v970_v29 = vld [vmem:[%s1784_s6 + $0x50] sm:$0xff] }
  0xe1   : > { %v1059_v32 = vadd.f32 %v995_v22, %v817_v26  ;;  %v1446_v35 = vpop.f32.mrf.mxu0  ;;  %v1494_v37 = vpop.f32.mrf.mxu1 }
  0xe2   : > { %1091 = vst.msk [vmem:[%s1796_s9 + $0x18] sm:$0xff] %vm382_vm0, %v1027_v31  ;;  %v1026_v39 = vadd.f32 %v962_v28, %v652_v33  ;;  %v1058_v40 = vadd.f32 %v994_v30, %v812_v34  ;;  %v667_v41 = vadd.f32 %v1446_v35, %v1786_v4  ;;  %v827_v42 = vadd.f32 %v1494_v37, %v1786_v4  ;;  %v1002_v31 = vld [vmem:[%s1784_s6 + $0x150] sm:$0xff]  ;;  %v973_v37 = vld [vmem:[%s1784_s6 + $0x68] sm:$0xff] }
  0xe3   : > { %1123 = vst.msk [vmem:[%s1796_s9 + $0x118] sm:$0xff] %vm382_vm0, %v1059_v32  ;;  %v661_v43 = vpop.f32.mrf.mxu0  ;;  %v821_v45 = vpop.f32.mrf.mxu1 }
  0xe4   : > { %1090 = vst.msk [vmem:[%s1796_s9 + $0x10] sm:$0xff] %vm382_vm0, %v1026_v39  ;;  %1122 = vst.msk [vmem:[%s1796_s9 + $0x110] sm:$0xff] %vm382_vm0, %v1058_v40  ;;  %v1029_v47 = vadd.f32 %v965_v36, %v667_v41  ;;  %v1061_v48 = vadd.f32 %v997_v38, %v827_v42  ;;  %v662_v49 = vadd.f32 %v1786_v4, %v661_v43  ;;  %v1005_v39 = vld [vmem:[%s1784_s6 + $0x168] sm:$0xff] }
  0xe5   : > { %v822_v50 = vadd.f32 %v1786_v4, %v821_v45  ;;  %v1449_v51 = vpop.f32.mrf.mxu0  ;;  %v1497_v53 = vpop.f32.mrf.mxu1  ;;  %v972_v45 = vld [vmem:[%s1784_s6 + $0x60] sm:$0xff] }
  0xe6   : > { %1093 = vst.msk [vmem:[%s1796_s9 + $0x28] sm:$0xff] %vm382_vm0, %v1029_v47  ;;  %1125 = vst.msk [vmem:[%s1796_s9 + $0x128] sm:$0xff] %vm382_vm0, %v1061_v48  ;;  %v1028_v55 = vadd.f32 %v964_v44, %v662_v49  ;;  %v677_v57 = vadd.f32 %v1449_v51, %v1786_v4  ;;  %v837_v58 = vadd.f32 %v1497_v53, %v1786_v4  ;;  %v1004_v47 = vld [vmem:[%s1784_s6 + $0x160] sm:$0xff]  ;;  %v975_v53 = vld [vmem:[%s1784_s6 + $0x78] sm:$0xff] }
  0xe7   : > { %v1060_v56 = vadd.f32 %v996_v46, %v822_v50  ;;  %v671_v59 = vpop.f32.mrf.mxu0  ;;  %v831_v61 = vpop.f32.mrf.mxu1 }
  0xe8   : > { %1092 = vst.msk [vmem:[%s1796_s9 + $0x20] sm:$0xff] %vm382_vm0, %v1028_v55  ;;  %v1031_v63 = vadd.f32 %v967_v52, %v677_v57  ;;  %v1063_v0 = vadd.f32 %v999_v54, %v837_v58  ;;  %v672_v1 = vadd.f32 %v1786_v4, %v671_v59  ;;  %v832_v2 = vadd.f32 %v1786_v4, %v831_v61  ;;  %v1007_v55 = vld [vmem:[%s1784_s6 + $0x178] sm:$0xff]  ;;  %v974_v61 = vld [vmem:[%s1784_s6 + $0x70] sm:$0xff] }
  0xe9   : > { %1124 = vst.msk [vmem:[%s1796_s9 + $0x120] sm:$0xff] %vm382_vm0, %v1060_v56  ;;  %v1452_v3 = vpop.f32.mrf.mxu0  ;;  %v1500_v6 = vpop.f32.mrf.mxu1 }
  0xea   : > { %1095 = vst.msk [vmem:[%s1796_s9 + $0x38] sm:$0xff] %vm382_vm0, %v1031_v63  ;;  %1127 = vst.msk [vmem:[%s1796_s9 + $0x138] sm:$0xff] %vm382_vm0, %v1063_v0  ;;  %v1030_v8 = vadd.f32 %v966_v60, %v672_v1  ;;  %v1062_v9 = vadd.f32 %v998_v62, %v832_v2  ;;  %v687_v10 = vadd.f32 %v1452_v3, %v1786_v4  ;;  %v1006_v63 = vld [vmem:[%s1784_s6 + $0x170] sm:$0xff] }
  0xeb   : > { %v847_v11 = vadd.f32 %v1500_v6, %v1786_v4  ;;  %v681_v12 = vpop.f32.mrf.mxu0  ;;  %v841_v14 = vpop.f32.mrf.mxu1  ;;  %v977_v6 = vld [vmem:[%s1784_s6 + $0x88] sm:$0xff] }
  0xec   : > { %1094 = vst.msk [vmem:[%s1796_s9 + $0x30] sm:$0xff] %vm382_vm0, %v1030_v8  ;;  %1126 = vst.msk [vmem:[%s1796_s9 + $0x130] sm:$0xff] %vm382_vm0, %v1062_v9  ;;  %v1033_v16 = vadd.f32 %v969_v5, %v687_v10  ;;  %v682_v18 = vadd.f32 %v1786_v4, %v681_v12  ;;  %v842_v19 = vadd.f32 %v1786_v4, %v841_v14  ;;  %v1009_v8 = vld [vmem:[%s1784_s6 + $0x188] sm:$0xff]  ;;  %v976_v14 = vld [vmem:[%s1784_s6 + $0x80] sm:$0xff] }
  0xed   : > { %v1065_v17 = vadd.f32 %v1001_v7, %v847_v11  ;;  %v1455_v20 = vpop.f32.mrf.mxu0  ;;  %v1503_v22 = vpop.f32.mrf.mxu1 }
  0xee   : > { %1097 = vst.msk [vmem:[%s1796_s9 + $0x48] sm:$0xff] %vm382_vm0, %v1033_v16  ;;  %v1032_v24 = vadd.f32 %v968_v13, %v682_v18  ;;  %v1064_v25 = vadd.f32 %v1000_v15, %v842_v19  ;;  %v697_v26 = vadd.f32 %v1455_v20, %v1786_v4  ;;  %v857_v27 = vadd.f32 %v1503_v22, %v1786_v4  ;;  %v1008_v16 = vld [vmem:[%s1784_s6 + $0x180] sm:$0xff]  ;;  %v979_v22 = vld [vmem:[%s1784_s6 + $0x98] sm:$0xff] }
  0xef   : > { %1129 = vst.msk [vmem:[%s1796_s9 + $0x148] sm:$0xff] %vm382_vm0, %v1065_v17  ;;  %v691_v28 = vpop.f32.mrf.mxu0  ;;  %v851_v30 = vpop.f32.mrf.mxu1 }
  0xf0   : > { %1096 = vst.msk [vmem:[%s1796_s9 + $0x40] sm:$0xff] %vm382_vm0, %v1032_v24  ;;  %1128 = vst.msk [vmem:[%s1796_s9 + $0x140] sm:$0xff] %vm382_vm0, %v1064_v25  ;;  %v1035_v32 = vadd.f32 %v971_v21, %v697_v26  ;;  %v1067_v33 = vadd.f32 %v1003_v23, %v857_v27  ;;  %v692_v34 = vadd.f32 %v1786_v4, %v691_v28  ;;  %v1011_v24 = vld [vmem:[%s1784_s6 + $0x198] sm:$0xff] }
  0xf1   : > { %v852_v35 = vadd.f32 %v1786_v4, %v851_v30  ;;  %v1458_v36 = vpop.f32.mrf.mxu0  ;;  %v1506_v38 = vpop.f32.mrf.mxu1  ;;  %v978_v30 = vld [vmem:[%s1784_s6 + $0x90] sm:$0xff] }
  0xf2   : > { %1099 = vst.msk [vmem:[%s1796_s9 + $0x58] sm:$0xff] %vm382_vm0, %v1035_v32  ;;  %1131 = vst.msk [vmem:[%s1796_s9 + $0x158] sm:$0xff] %vm382_vm0, %v1067_v33  ;;  %v1034_v40 = vadd.f32 %v970_v29, %v692_v34  ;;  %v707_v42 = vadd.f32 %v1458_v36, %v1786_v4  ;;  %v867_v43 = vadd.f32 %v1506_v38, %v1786_v4  ;;  %v1010_v32 = vld [vmem:[%s1784_s6 + $0x190] sm:$0xff]  ;;  %v981_v38 = vld [vmem:[%s1784_s6 + $0xa8] sm:$0xff] }
  0xf3   : > { %v1066_v41 = vadd.f32 %v1002_v31, %v852_v35  ;;  %v701_v44 = vpop.f32.mrf.mxu0  ;;  %v861_v46 = vpop.f32.mrf.mxu1 }
  0xf4   : > { %1098 = vst.msk [vmem:[%s1796_s9 + $0x50] sm:$0xff] %vm382_vm0, %v1034_v40  ;;  %v1037_v48 = vadd.f32 %v973_v37, %v707_v42  ;;  %v1069_v49 = vadd.f32 %v1005_v39, %v867_v43  ;;  %v702_v50 = vadd.f32 %v1786_v4, %v701_v44  ;;  %v862_v51 = vadd.f32 %v1786_v4, %v861_v46  ;;  %v1013_v40 = vld [vmem:[%s1784_s6 + $0x1a8] sm:$0xff]  ;;  %v980_v46 = vld [vmem:[%s1784_s6 + $0xa0] sm:$0xff] }
  0xf5   : > { %1130 = vst.msk [vmem:[%s1796_s9 + $0x150] sm:$0xff] %vm382_vm0, %v1066_v41  ;;  %v1461_v52 = vpop.f32.mrf.mxu0  ;;  %v1509_v54 = vpop.f32.mrf.mxu1 }
  0xf6   : > { %1101 = vst.msk [vmem:[%s1796_s9 + $0x68] sm:$0xff] %vm382_vm0, %v1037_v48  ;;  %1133 = vst.msk [vmem:[%s1796_s9 + $0x168] sm:$0xff] %vm382_vm0, %v1069_v49  ;;  %v1036_v56 = vadd.f32 %v972_v45, %v702_v50  ;;  %v1068_v57 = vadd.f32 %v1004_v47, %v862_v51  ;;  %v717_v58 = vadd.f32 %v1461_v52, %v1786_v4  ;;  %v1012_v48 = vld [vmem:[%s1784_s6 + $0x1a0] sm:$0xff] }
  0xf7   : > { %v877_v59 = vadd.f32 %v1509_v54, %v1786_v4  ;;  %v711_v60 = vpop.f32.mrf.mxu0  ;;  %v871_v62 = vpop.f32.mrf.mxu1  ;;  %v983_v54 = vld [vmem:[%s1784_s6 + $0xb8] sm:$0xff] }
  0xf8   : > { %1100 = vst.msk [vmem:[%s1796_s9 + $0x60] sm:$0xff] %vm382_vm0, %v1036_v56  ;;  %1132 = vst.msk [vmem:[%s1796_s9 + $0x160] sm:$0xff] %vm382_vm0, %v1068_v57  ;;  %v1039_v0 = vadd.f32 %v975_v53, %v717_v58  ;;  %v712_v2 = vadd.f32 %v1786_v4, %v711_v60  ;;  %v872_v3 = vadd.f32 %v1786_v4, %v871_v62  ;;  %v1015_v56 = vld [vmem:[%s1784_s6 + $0x1b8] sm:$0xff]  ;;  %v982_v62 = vld [vmem:[%s1784_s6 + $0xb0] sm:$0xff] }
  0xf9   : > { %v1071_v1 = vadd.f32 %v1007_v55, %v877_v59  ;;  %v1464_v5 = vpop.f32.mrf.mxu0  ;;  %v1512_v7 = vpop.f32.mrf.mxu1 }
  0xfa   : > { %1103 = vst.msk [vmem:[%s1796_s9 + $0x78] sm:$0xff] %vm382_vm0, %v1039_v0  ;;  %v1038_v9 = vadd.f32 %v974_v61, %v712_v2  ;;  %v1070_v10 = vadd.f32 %v1006_v63, %v872_v3  ;;  %v727_v11 = vadd.f32 %v1464_v5, %v1786_v4  ;;  %v887_v12 = vadd.f32 %v1512_v7, %v1786_v4  ;;  %v1014_v0 = vld [vmem:[%s1784_s6 + $0x1b0] sm:$0xff]  ;;  %v985_v7 = vld [vmem:[%s1784_s6 + $0xc8] sm:$0xff] }
  0xfb   : > { %1135 = vst.msk [vmem:[%s1796_s9 + $0x178] sm:$0xff] %vm382_vm0, %v1071_v1  ;;  %v721_v13 = vpop.f32.mrf.mxu0  ;;  %v881_v15 = vpop.f32.mrf.mxu1 }
  0xfc   : > { %1102 = vst.msk [vmem:[%s1796_s9 + $0x70] sm:$0xff] %vm382_vm0, %v1038_v9  ;;  %1134 = vst.msk [vmem:[%s1796_s9 + $0x170] sm:$0xff] %vm382_vm0, %v1070_v10  ;;  %v1041_v17 = vadd.f32 %v977_v6, %v727_v11  ;;  %v1073_v18 = vadd.f32 %v1009_v8, %v887_v12  ;;  %v722_v19 = vadd.f32 %v1786_v4, %v721_v13  ;;  %v1017_v9 = vld [vmem:[%s1784_s6 + $0x1c8] sm:$0xff] }
  0xfd   : > { %v882_v20 = vadd.f32 %v1786_v4, %v881_v15  ;;  %v1467_v21 = vpop.f32.mrf.mxu0  ;;  %v1515_v23 = vpop.f32.mrf.mxu1  ;;  %v984_v15 = vld [vmem:[%s1784_s6 + $0xc0] sm:$0xff] }
  0xfe   : > { %1105 = vst.msk [vmem:[%s1796_s9 + $0x88] sm:$0xff] %vm382_vm0, %v1041_v17  ;;  %1137 = vst.msk [vmem:[%s1796_s9 + $0x188] sm:$0xff] %vm382_vm0, %v1073_v18  ;;  %v1040_v25 = vadd.f32 %v976_v14, %v722_v19  ;;  %v737_v27 = vadd.f32 %v1467_v21, %v1786_v4  ;;  %v897_v28 = vadd.f32 %v1515_v23, %v1786_v4  ;;  %v1016_v17 = vld [vmem:[%s1784_s6 + $0x1c0] sm:$0xff]  ;;  %v987_v23 = vld [vmem:[%s1784_s6 + $0xd8] sm:$0xff] }
  0xff   : > { %v1072_v26 = vadd.f32 %v1008_v16, %v882_v20  ;;  %v731_v29 = vpop.f32.mrf.mxu0  ;;  %v891_v31 = vpop.f32.mrf.mxu1 }
 0x100   : > { %1104 = vst.msk [vmem:[%s1796_s9 + $0x80] sm:$0xff] %vm382_vm0, %v1040_v25  ;;  %v1043_v33 = vadd.f32 %v979_v22, %v737_v27  ;;  %v1075_v34 = vadd.f32 %v1011_v24, %v897_v28  ;;  %v732_v35 = vadd.f32 %v1786_v4, %v731_v29  ;;  %v892_v36 = vadd.f32 %v1786_v4, %v891_v31  ;;  %v1019_v25 = vld [vmem:[%s1784_s6 + $0x1d8] sm:$0xff]  ;;  %v986_v31 = vld [vmem:[%s1784_s6 + $0xd0] sm:$0xff] }
 0x101   : > { %1136 = vst.msk [vmem:[%s1796_s9 + $0x180] sm:$0xff] %vm382_vm0, %v1072_v26  ;;  %v1470_v37 = vpop.f32.mrf.mxu0  ;;  %v1518_v39 = vpop.f32.mrf.mxu1 }
 0x102   : > { %1107 = vst.msk [vmem:[%s1796_s9 + $0x98] sm:$0xff] %vm382_vm0, %v1043_v33  ;;  %1139 = vst.msk [vmem:[%s1796_s9 + $0x198] sm:$0xff] %vm382_vm0, %v1075_v34  ;;  %v1042_v41 = vadd.f32 %v978_v30, %v732_v35  ;;  %v1074_v42 = vadd.f32 %v1010_v32, %v892_v36  ;;  %v747_v43 = vadd.f32 %v1470_v37, %v1786_v4  ;;  %v1018_v33 = vld [vmem:[%s1784_s6 + $0x1d0] sm:$0xff] }
 0x103   : > { %v907_v44 = vadd.f32 %v1518_v39, %v1786_v4  ;;  %v741_v45 = vpop.f32.mrf.mxu0  ;;  %v901_v47 = vpop.f32.mrf.mxu1  ;;  %v989_v39 = vld [vmem:[%s1784_s6 + $0xe8] sm:$0xff] }
 0x104   : > { %1106 = vst.msk [vmem:[%s1796_s9 + $0x90] sm:$0xff] %vm382_vm0, %v1042_v41  ;;  %1138 = vst.msk [vmem:[%s1796_s9 + $0x190] sm:$0xff] %vm382_vm0, %v1074_v42  ;;  %v1045_v49 = vadd.f32 %v981_v38, %v747_v43  ;;  %v742_v51 = vadd.f32 %v1786_v4, %v741_v45  ;;  %v902_v52 = vadd.f32 %v1786_v4, %v901_v47  ;;  %v1021_v41 = vld [vmem:[%s1784_s6 + $0x1e8] sm:$0xff]  ;;  %v988_v47 = vld [vmem:[%s1784_s6 + $0xe0] sm:$0xff] }
 0x105   : > { %v1077_v50 = vadd.f32 %v1013_v40, %v907_v44  ;;  %v1473_v53 = vpop.f32.mrf.mxu0  ;;  %v1521_v55 = vpop.f32.mrf.mxu1 }
 0x106   : > { %1109 = vst.msk [vmem:[%s1796_s9 + $0xa8] sm:$0xff] %vm382_vm0, %v1045_v49  ;;  %v1044_v57 = vadd.f32 %v980_v46, %v742_v51  ;;  %v1076_v58 = vadd.f32 %v1012_v48, %v902_v52  ;;  %v757_v59 = vadd.f32 %v1473_v53, %v1786_v4  ;;  %v917_v60 = vadd.f32 %v1521_v55, %v1786_v4  ;;  %v1020_v49 = vld [vmem:[%s1784_s6 + $0x1e0] sm:$0xff]  ;;  %v991_v55 = vld [vmem:[%s1784_s6 + $0xf8] sm:$0xff] }
 0x107   : > { %1141 = vst.msk [vmem:[%s1796_s9 + $0x1a8] sm:$0xff] %vm382_vm0, %v1077_v50  ;;  %v751_v61 = vpop.f32.mrf.mxu0  ;;  %v911_v63 = vpop.f32.mrf.mxu1 }
 0x108   : > { %1108 = vst.msk [vmem:[%s1796_s9 + $0xa0] sm:$0xff] %vm382_vm0, %v1044_v57  ;;  %1140 = vst.msk [vmem:[%s1796_s9 + $0x1a0] sm:$0xff] %vm382_vm0, %v1076_v58  ;;  %v1047_v1 = vadd.f32 %v983_v54, %v757_v59  ;;  %v1079_v2 = vadd.f32 %v1015_v56, %v917_v60  ;;  %v752_v3 = vadd.f32 %v1786_v4, %v751_v61  ;;  %v1023_v57 = vld [vmem:[%s1784_s6 + $0x1f8] sm:$0xff] }
 0x109   : > { %v912_v5 = vadd.f32 %v1786_v4, %v911_v63  ;;  %v1476_v6 = vpop.f32.mrf.mxu0  ;;  %v1524_v8 = vpop.f32.mrf.mxu1  ;;  %v990_v63 = vld [vmem:[%s1784_s6 + $0xf0] sm:$0xff] }
 0x10a   : > { %1111 = vst.msk [vmem:[%s1796_s9 + $0xb8] sm:$0xff] %vm382_vm0, %v1047_v1  ;;  %1143 = vst.msk [vmem:[%s1796_s9 + $0x1b8] sm:$0xff] %vm382_vm0, %v1079_v2  ;;  %v1046_v10 = vadd.f32 %v982_v62, %v752_v3  ;;  %v767_v12 = vadd.f32 %v1476_v6, %v1786_v4  ;;  %v927_v13 = vadd.f32 %v1524_v8, %v1786_v4  ;;  %v1022_v1 = vld [vmem:[%s1784_s6 + $0x1f0] sm:$0xff] }
 0x10b   : > { %v1078_v11 = vadd.f32 %v1014_v0, %v912_v5  ;;  %v761_v14 = vpop.f32.mrf.mxu0  ;;  %v921_v16 = vpop.f32.mrf.mxu1 }
 0x10c   : > { %1110 = vst.msk [vmem:[%s1796_s9 + $0xb0] sm:$0xff] %vm382_vm0, %v1046_v10  ;;  %v1049_v18 = vadd.f32 %v985_v7, %v767_v12  ;;  %v1081_v19 = vadd.f32 %v1017_v9, %v927_v13  ;;  %v762_v20 = vadd.f32 %v1786_v4, %v761_v14  ;;  %v922_v21 = vadd.f32 %v1786_v4, %v921_v16 }
 0x10d   : > { %1142 = vst.msk [vmem:[%s1796_s9 + $0x1b0] sm:$0xff] %vm382_vm0, %v1078_v11  ;;  %v1479_v22 = vpop.f32.mrf.mxu0  ;;  %v1527_v24 = vpop.f32.mrf.mxu1 }
 0x10e   : > { %1113 = vst.msk [vmem:[%s1796_s9 + $0xc8] sm:$0xff] %vm382_vm0, %v1049_v18  ;;  %1145 = vst.msk [vmem:[%s1796_s9 + $0x1c8] sm:$0xff] %vm382_vm0, %v1081_v19  ;;  %v1048_v26 = vadd.f32 %v984_v15, %v762_v20  ;;  %v1080_v27 = vadd.f32 %v1016_v17, %v922_v21  ;;  %v777_v28 = vadd.f32 %v1479_v22, %v1786_v4 }
 0x10f   : > { %v937_v29 = vadd.f32 %v1527_v24, %v1786_v4  ;;  %v771_v30 = vpop.f32.mrf.mxu0  ;;  %v931_v32 = vpop.f32.mrf.mxu1 }
 0x110   : > { %1112 = vst.msk [vmem:[%s1796_s9 + $0xc0] sm:$0xff] %vm382_vm0, %v1048_v26  ;;  %1144 = vst.msk [vmem:[%s1796_s9 + $0x1c0] sm:$0xff] %vm382_vm0, %v1080_v27  ;;  %v1051_v34 = vadd.f32 %v987_v23, %v777_v28  ;;  %v772_v36 = vadd.f32 %v1786_v4, %v771_v30  ;;  %v932_v37 = vadd.f32 %v1786_v4, %v931_v32 }
 0x111   : > { %v1083_v35 = vadd.f32 %v1019_v25, %v937_v29  ;;  %v1482_v38 = vpop.f32.mrf.mxu0  ;;  %v1530_v40 = vpop.f32.mrf.mxu1 }
 0x112   : > { %1115 = vst.msk [vmem:[%s1796_s9 + $0xd8] sm:$0xff] %vm382_vm0, %v1051_v34  ;;  %v1050_v42 = vadd.f32 %v986_v31, %v772_v36  ;;  %v1082_v43 = vadd.f32 %v1018_v33, %v932_v37  ;;  %v787_v44 = vadd.f32 %v1482_v38, %v1786_v4  ;;  %v947_v45 = vadd.f32 %v1530_v40, %v1786_v4 }
 0x113   : > { %1147 = vst.msk [vmem:[%s1796_s9 + $0x1d8] sm:$0xff] %vm382_vm0, %v1083_v35  ;;  %v781_v46 = vpop.f32.mrf.mxu0  ;;  %v941_v48 = vpop.f32.mrf.mxu1 }
 0x114   : > { %1114 = vst.msk [vmem:[%s1796_s9 + $0xd0] sm:$0xff] %vm382_vm0, %v1050_v42  ;;  %1146 = vst.msk [vmem:[%s1796_s9 + $0x1d0] sm:$0xff] %vm382_vm0, %v1082_v43  ;;  %v1053_v50 = vadd.f32 %v989_v39, %v787_v44  ;;  %v1085_v51 = vadd.f32 %v1021_v41, %v947_v45  ;;  %v782_v52 = vadd.f32 %v1786_v4, %v781_v46 }
 0x115   : > { %v942_v53 = vadd.f32 %v1786_v4, %v941_v48  ;;  %v1485_v54 = vpop.f32.mrf.mxu0  ;;  %v1533_v56 = vpop.f32.mrf.mxu1 }
 0x116   : > { %1117 = vst.msk [vmem:[%s1796_s9 + $0xe8] sm:$0xff] %vm382_vm0, %v1053_v50  ;;  %1149 = vst.msk [vmem:[%s1796_s9 + $0x1e8] sm:$0xff] %vm382_vm0, %v1085_v51  ;;  %v1052_v58 = vadd.f32 %v988_v47, %v782_v52  ;;  %v797_v60 = vadd.f32 %v1485_v54, %v1786_v4  ;;  %v957_v61 = vadd.f32 %v1533_v56, %v1786_v4 }
 0x117   : > { %v1084_v59 = vadd.f32 %v1020_v49, %v942_v53  ;;  %v791_v62 = vpop.f32.mrf.mxu0  ;;  %v951_v0 = vpop.f32.mrf.mxu1 }
 0x118   : > { %1116 = vst.msk [vmem:[%s1796_s9 + $0xe0] sm:$0xff] %vm382_vm0, %v1052_v58  ;;  %v1055_v2 = vadd.f32 %v991_v55, %v797_v60  ;;  %v1087_v3 = vadd.f32 %v1023_v57, %v957_v61  ;;  %v792_v5 = vadd.f32 %v1786_v4, %v791_v62  ;;  %v952_v6 = vadd.f32 %v1786_v4, %v951_v0 }
 0x119   : > { %1148 = vst.msk [vmem:[%s1796_s9 + $0x1e0] sm:$0xff] %vm382_vm0, %v1084_v59 }
 0x11a   : > { %1119 = vst.msk [vmem:[%s1796_s9 + $0xf8] sm:$0xff] %vm382_vm0, %v1055_v2  ;;  %1151 = vst.msk [vmem:[%s1796_s9 + $0x1f8] sm:$0xff] %vm382_vm0, %v1087_v3  ;;  %v1054_v7 = vadd.f32 %v990_v63, %v792_v5  ;;  %v1086_v8 = vadd.f32 %v1022_v1, %v952_v6 }
 0x11c   : > { %1118 = vst.msk [vmem:[%s1796_s9 + $0xf0] sm:$0xff] %vm382_vm0, %v1054_v7  ;;  %1150 = vst.msk [vmem:[%s1796_s9 + $0x1f0] sm:$0xff] %vm382_vm0, %v1086_v8 }
 0x11d PF: > { %s14_s17 = sadd.s32 1, %s1588_s17   ;;  %s2064_s15 = smov %s1584_s16 }
 0x11e   : > { %p11_p5 = scmp.ge.s32.totalorder %s14_s17, 4   ;;  %s2065_s16 = smov %s2067_s18 }
 0x120   :  { %13 = sbr.rel (!%p11_p5) target bundleno = 2 (0x2), region = 75 }

// kernel: fno_forward.19
= control target key start
LH: loop header
LB: loop body
LE: loop exit
PB: predicated region body
PF: predicated region fallthrough
CT: control target
= control target key end

     0   :  { %vm95_vm0 = vcmask 261120   ;;  %v2558_v18 = vmov 0.0   ;;  %vm1880_vm1 = vcmask 15360   ;;  %s3862_s1 = inlined_call_operand.vmem [shape: f32[2,32,128], index: 1, kind: input, shape index: {}]   ;;  %s3863_s0 = inlined_call_operand.vmem [shape: f32[2,512,32], index: 0, kind: input, shape index: {}]   ;;  %s3864_s3 = inlined_call_operand.vmem [shape: f32[256,2], index: 3, kind: input, shape index: {}]   ;;  %s3865_s2 = inlined_call_operand.vmem [shape: f32[2,1,128], index: 2, kind: input, shape index: {}]   ;;  %s3866_s4 = inlined_call_operand.vmem [shape: f32[1,2], index: 4, kind: input, shape index: {}]   ;;  %s3867_s5 = inlined_call_operand.vmem [shape: f32[512,2], index: 5, kind: output, shape index: {}]  }
   0x1   :  { %v87_v0 = vld [vmem:[%s3862_s1 + $0x18] sm:$0xff]  ;;  %v86_v2 = vld [vmem:[%s3862_s1 + $0x10] sm:$0xff]  ;;  %v85_v4 = vld [vmem:[%s3862_s1 + $0x8] sm:$0xff] }
   0x2   :  { %v2081_v1 = vld [vmem:[%s3862_s1 + $0x38] sm:$0xff]  ;;  %2285 = vmatprep.subr.mxu0 %v87_v0  ;;  %v2080_v3 = vld [vmem:[%s3862_s1 + $0x30] sm:$0xff]  ;;  %v2079_v5 = vld [vmem:[%s3862_s1 + $0x28] sm:$0xff] }
   0x3   :  { %2389 = vmatprep.subr.mxu1 %v2081_v1  ;;  %2286 = vmatpush3.msra.mxu0 %v87_v0  ;;  %v84_v6 = vld [vmem:[%s3862_s1] sm:$0xff]  ;;  %v21_v10 = vld [vmem:[%s3863_s0 + $0x8] sm:$0xff]  ;;  %v22_v12 = vld [vmem:[%s3863_s0 + $0x10] sm:$0xff] }
   0x4   :  { %2390 = vmatpush3.msra.mxu1 %v2081_v1  ;;  %2287 = vmatprep.subr.mxu0 %v86_v2  ;;  %v2078_v7 = vld [vmem:[%s3862_s1 + $0x20] sm:$0xff]  ;;  %v2015_v11 = vld [vmem:[%s3863_s0 + $0x208] sm:$0xff]  ;;  %v2016_v13 = vld [vmem:[%s3863_s0 + $0x210] sm:$0xff] }
   0x5   :  { %2391 = vmatprep.subr.mxu1 %v2080_v3  ;;  %2288 = vmatpush3.msra.mxu0 %v86_v2  ;;  %v20_v8 = vld [vmem:[%s3863_s0] sm:$0xff]  ;;  %v23_v14 = vld [vmem:[%s3863_s0 + $0x18] sm:$0xff]  ;;  %v25_v19 = vld [vmem:[%s3863_s0 + $0x28] sm:$0xff] }
   0x6   :  { %2392 = vmatpush3.msra.mxu1 %v2080_v3  ;;  %2289 = vmatprep.subr.mxu0 %v85_v4  ;;  %v2014_v9 = vld [vmem:[%s3863_s0 + $0x200] sm:$0xff]  ;;  %v2017_v15 = vld [vmem:[%s3863_s0 + $0x218] sm:$0xff]  ;;  %v2019_v20 = vld [vmem:[%s3863_s0 + $0x228] sm:$0xff] }
   0x7   :  { %2393 = vmatprep.subr.mxu1 %v2079_v5  ;;  %2290 = vmatpush3.msra.mxu0 %v85_v4  ;;  %v24_v16 = vld [vmem:[%s3863_s0 + $0x20] sm:$0xff]  ;;  %v26_v21 = vld [vmem:[%s3863_s0 + $0x30] sm:$0xff]  ;;  %v27_v23 = vld [vmem:[%s3863_s0 + $0x38] sm:$0xff] }
   0x8   :  { %2394 = vmatpush3.msra.mxu1 %v2079_v5  ;;  %2291 = vmatprep.subr.mxu0 %v84_v6  ;;  %v2018_v17 = vld [vmem:[%s3863_s0 + $0x220] sm:$0xff]  ;;  %v2020_v22 = vld [vmem:[%s3863_s0 + $0x230] sm:$0xff]  ;;  %v2021_v24 = vld [vmem:[%s3863_s0 + $0x238] sm:$0xff] }
   0x9   :  { %2395 = vmatprep.subr.mxu1 %v2078_v7  ;;  %2292 = vmatpush3.msra.mxu0 %v84_v6  ;;  %v28_v25 = vld [vmem:[%s3863_s0 + $0x40] sm:$0xff]  ;;  %v29_v27 = vld [vmem:[%s3863_s0 + $0x48] sm:$0xff]  ;;  %v30_v29 = vld [vmem:[%s3863_s0 + $0x50] sm:$0xff] }
   0xa   :  { %2293 = vmatprep.mubr.msk.f32.mxu0 %vm95_vm0, %v20_v8  ;;  %2396 = vmatpush3.msra.mxu1 %v2078_v7  ;;  %v2022_v26 = vld [vmem:[%s3863_s0 + $0x240] sm:$0xff]  ;;  %v2023_v28 = vld [vmem:[%s3863_s0 + $0x248] sm:$0xff]  ;;  %v2024_v30 = vld [vmem:[%s3863_s0 + $0x250] sm:$0xff] }
   0xb   :  { %2397 = vmatprep.mubr.msk.f32.mxu1 %vm95_vm0, %v2014_v9  ;;  %2294 = vmatmul.mubr.msk.f32.vlgmr.msra.gmra.mxu0 %vm95_vm0, %v21_v10  ;;  %v31_v31 = vld [vmem:[%s3863_s0 + $0x58] sm:$0xff]  ;;  %v32_v33 = vld [vmem:[%s3863_s0 + $0x60] sm:$0xff]  ;;  %v33_v35 = vld [vmem:[%s3863_s0 + $0x68] sm:$0xff] }
   0xc   :  { %2398 = vmatmul.mubr.msk.f32.vlgmr.msra.gmra.mxu1 %vm95_vm0, %v2015_v11  ;;  %2296 = vmatprep.mubr.msk.f32.mxu0 %vm95_vm0, %v22_v12  ;;  %v2025_v32 = vld [vmem:[%s3863_s0 + $0x258] sm:$0xff]  ;;  %v2026_v34 = vld [vmem:[%s3863_s0 + $0x260] sm:$0xff]  ;;  %v2027_v36 = vld [vmem:[%s3863_s0 + $0x268] sm:$0xff] }
   0xd   :  { %2400 = vmatprep.mubr.msk.f32.mxu1 %vm95_vm0, %v2016_v13  ;;  %1495 = vmatprep.subr.mxu0 %v2558_v18  ;;  %v34_v37 = vld [vmem:[%s3863_s0 + $0x70] sm:$0xff]  ;;  %v35_v39 = vld [vmem:[%s3863_s0 + $0x78] sm:$0xff]  ;;  %v36_v41 = vld [vmem:[%s3863_s0 + $0x80] sm:$0xff] }
   0xe   :  { %2493 = vmatprep.subr.mxu1 %v2558_v18  ;;  %v2028_v38 = vld [vmem:[%s3863_s0 + $0x270] sm:$0xff]  ;;  %v2029_v40 = vld [vmem:[%s3863_s0 + $0x278] sm:$0xff]  ;;  %v2030_v42 = vld [vmem:[%s3863_s0 + $0x280] sm:$0xff] }
   0xf   :  { %2297 = vmatmul.mubr.msk.f32.gmra.mxu0 %vm95_vm0, %v23_v14  ;;  %v1471_v43 = vld [vmem:[%s3864_s3 + $0x78] sm:$0xff]  ;;  %v37_v44 = vld [vmem:[%s3863_s0 + $0x88] sm:$0xff]  ;;  %v38_v46 = vld [vmem:[%s3863_s0 + $0x90] sm:$0xff] }
  0x10   :  { %2401 = vmatmul.mubr.msk.f32.gmra.mxu1 %vm95_vm0, %v2017_v15  ;;  %2299 = vmatprep.mubr.msk.f32.mxu0 %vm95_vm0, %v24_v16  ;;  %v2031_v45 = vld [vmem:[%s3863_s0 + $0x288] sm:$0xff]  ;;  %v2032_v47 = vld [vmem:[%s3863_s0 + $0x290] sm:$0xff]  ;;  %v39_v49 = vld [vmem:[%s3863_s0 + $0x98] sm:$0xff] }
  0x11   :  { %2403 = vmatprep.mubr.msk.f32.mxu1 %vm95_vm0, %v2018_v17  ;;  %1496 = vmatpush1.msra.mxu0 %v1471_v43  ;;  %v1470_v48 = vld [vmem:[%s3864_s3 + $0x70] sm:$0xff]  ;;  %v2033_v50 = vld [vmem:[%s3863_s0 + $0x298] sm:$0xff]  ;;  %v40_v51 = vld [vmem:[%s3863_s0 + $0xa0] sm:$0xff] }
  0x12   :  { %2525 = vmatpush1.msra.mxu1 %v1471_v43  ;;  %1497 = vmatprep.subr.mxu0 %v2558_v18  ;;  %v2034_v52 = vld [vmem:[%s3863_s0 + $0x2a0] sm:$0xff]  ;;  %v1469_v53 = vld [vmem:[%s3864_s3 + $0x68] sm:$0xff]  ;;  %v42_v56 = vld [vmem:[%s3863_s0 + $0xb0] sm:$0xff] }
  0x13   :  { %2300 = vmatmul.mubr.msk.f32.gmra.mxu0 %vm95_vm0, %v25_v19  ;;  %2494 = vmatprep.subr.mxu1 %v2558_v18  ;;  %v41_v54 = vld [vmem:[%s3863_s0 + $0xa8] sm:$0xff]  ;;  %v2036_v57 = vld [vmem:[%s3863_s0 + $0x2b0] sm:$0xff]  ;;  %v1468_v58 = vld [vmem:[%s3864_s3 + $0x60] sm:$0xff] }
  0x14   :  { %2404 = vmatmul.mubr.msk.f32.gmra.mxu1 %vm95_vm0, %v2019_v20  ;;  %2302 = vmatprep.mubr.msk.f32.mxu0 %vm95_vm0, %v26_v21  ;;  %v2035_v55 = vld [vmem:[%s3863_s0 + $0x2a8] sm:$0xff]  ;;  %v43_v59 = vld [vmem:[%s3863_s0 + $0xb8] sm:$0xff]  ;;  %v44_v61 = vld [vmem:[%s3863_s0 + $0xc0] sm:$0xff] }
  0x15   :  { %2406 = vmatprep.mubr.msk.f32.mxu1 %vm95_vm0, %v2020_v22  ;;  %1498 = vmatpush1.msra.mxu0 %v1470_v48  ;;  %v2037_v60 = vld [vmem:[%s3863_s0 + $0x2b8] sm:$0xff]  ;;  %v2038_v62 = vld [vmem:[%s3863_s0 + $0x2c0] sm:$0xff]  ;;  %v45_v0 = vld [vmem:[%s3863_s0 + $0xc8] sm:$0xff] }
  0x16   :  { %2526 = vmatpush1.msra.mxu1 %v1470_v48  ;;  %1499 = vmatprep.subr.mxu0 %v2558_v18  ;;  %v1467_v63 = vld [vmem:[%s3864_s3 + $0x58] sm:$0xff]  ;;  %v2039_v1 = vld [vmem:[%s3863_s0 + $0x2c8] sm:$0xff]  ;;  %v46_v2 = vld [vmem:[%s3863_s0 + $0xd0] sm:$0xff] }
  0x17   :  { %2303 = vmatmul.mubr.msk.f32.gmra.mxu0 %vm95_vm0, %v27_v23  ;;  %2495 = vmatprep.subr.mxu1 %v2558_v18  ;;  %v2040_v3 = vld [vmem:[%s3863_s0 + $0x2d0] sm:$0xff]  ;;  %v47_v5 = vld [vmem:[%s3863_s0 + $0xd8] sm:$0xff]  ;;  %v48_v7 = vld [vmem:[%s3863_s0 + $0xe0] sm:$0xff] }
  0x18   :  { %2407 = vmatmul.mubr.msk.f32.gmra.mxu1 %vm95_vm0, %v2021_v24  ;;  %2305 = vmatprep.mubr.msk.f32.mxu0 %vm95_vm0, %v28_v25  ;;  %v1466_v4 = vld [vmem:[%s3864_s3 + $0x50] sm:$0xff]  ;;  %v2041_v6 = vld [vmem:[%s3863_s0 + $0x2d8] sm:$0xff]  ;;  %v2042_v8 = vld [vmem:[%s3863_s0 + $0x2e0] sm:$0xff] }
  0x19   :  { %2409 = vmatprep.mubr.msk.f32.mxu1 %vm95_vm0, %v2022_v26  ;;  %1500 = vmatpush1.msra.mxu0 %v1469_v53  ;;  %v1465_v9 = vld [vmem:[%s3864_s3 + $0x48] sm:$0xff]  ;;  %v50_v12 = vld [vmem:[%s3863_s0 + $0xf0] sm:$0xff]  ;;  %v1464_v14 = vld [vmem:[%s3864_s3 + $0x40] sm:$0xff] }
  0x1a   :  { %2527 = vmatpush1.msra.mxu1 %v1469_v53  ;;  %1501 = vmatprep.subr.mxu0 %v2558_v18  ;;  %v49_v10 = vld [vmem:[%s3863_s0 + $0xe8] sm:$0xff]  ;;  %v2044_v13 = vld [vmem:[%s3863_s0 + $0x2f0] sm:$0xff]  ;;  %v51_v15 = vld [vmem:[%s3863_s0 + $0xf8] sm:$0xff] }
  0x1b   :  { %2306 = vmatmul.mubr.msk.f32.gmra.mxu0 %vm95_vm0, %v29_v27  ;;  %2496 = vmatprep.subr.mxu1 %v2558_v18  ;;  %v2043_v11 = vld [vmem:[%s3863_s0 + $0x2e8] sm:$0xff]  ;;  %v2045_v16 = vld [vmem:[%s3863_s0 + $0x2f8] sm:$0xff]  ;;  %v52_v17 = vld [vmem:[%s3863_s0 + $0x100] sm:$0xff] }
  0x1c   :  { %2410 = vmatmul.mubr.msk.f32.gmra.mxu1 %vm95_vm0, %v2023_v28  ;;  %2308 = vmatprep.mubr.msk.f32.mxu0 %vm95_vm0, %v30_v29  ;;  %v2046_v19 = vld [vmem:[%s3863_s0 + $0x300] sm:$0xff]  ;;  %v1463_v20 = vld [vmem:[%s3864_s3 + $0x38] sm:$0xff]  ;;  %v53_v21 = vld [vmem:[%s3863_s0 + $0x108] sm:$0xff] }
  0x1d   :  { %2412 = vmatprep.mubr.msk.f32.mxu1 %vm95_vm0, %v2024_v30  ;;  %1502 = vmatpush1.msra.mxu0 %v1468_v58  ;;  %v2047_v22 = vld [vmem:[%s3863_s0 + $0x308] sm:$0xff]  ;;  %v2048_v23 = vld [vmem:[%s3863_s0 + $0x310] sm:$0xff]  ;;  %v2049_v26 = vld [vmem:[%s3863_s0 + $0x318] sm:$0xff] }
  0x1e   :  { %2528 = vmatpush1.msra.mxu1 %v1468_v58  ;;  %1503 = vmatprep.subr.mxu0 %v2558_v18  ;;  %v54_v24 = vld [vmem:[%s3863_s0 + $0x110] sm:$0xff]  ;;  %v55_v27 = vld [vmem:[%s3863_s0 + $0x118] sm:$0xff]  ;;  %v2050_v28 = vld [vmem:[%s3863_s0 + $0x320] sm:$0xff] }
  0x1f   :  { %2309 = vmatmul.mubr.msk.f32.gmra.mxu0 %vm95_vm0, %v31_v31  ;;  %2497 = vmatprep.subr.mxu1 %v2558_v18  ;;  %v1462_v25 = vld [vmem:[%s3864_s3 + $0x30] sm:$0xff]  ;;  %v56_v29 = vld [vmem:[%s3863_s0 + $0x120] sm:$0xff]  ;;  %v1461_v30 = vld [vmem:[%s3864_s3 + $0x28] sm:$0xff] }
  0x20   :  { %2413 = vmatmul.mubr.msk.f32.gmra.mxu1 %vm95_vm0, %v2025_v32  ;;  %2311 = vmatprep.mubr.msk.f32.mxu0 %vm95_vm0, %v32_v33  ;;  %v2051_v31 = vld [vmem:[%s3863_s0 + $0x328] sm:$0xff]  ;;  %v2052_v33 = vld [vmem:[%s3863_s0 + $0x330] sm:$0xff]  ;;  %v2058_v48 = vld [vmem:[%s3863_s0 + $0x360] sm:$0xff] }
  0x21   :  { %2415 = vmatprep.mubr.msk.f32.mxu1 %vm95_vm0, %v2026_v34  ;;  %1504 = vmatpush1.msra.mxu0 %v1467_v63  ;;  %v57_v32 = vld [vmem:[%s3863_s0 + $0x128] sm:$0xff]  ;;  %v58_v34 = vld [vmem:[%s3863_s0 + $0x130] sm:$0xff]  ;;  %v2062_v58 = vld [vmem:[%s3863_s0 + $0x380] sm:$0xff] }
  0x22   :  { %2529 = vmatpush1.msra.mxu1 %v1467_v63  ;;  %1505 = vmatprep.subr.mxu0 %v2558_v18  ;;  %v2056_v43 = vld [vmem:[%s3863_s0 + $0x350] sm:$0xff] }
  0x23   :  { %2312 = vmatmul.mubr.msk.f32.gmra.mxu0 %vm95_vm0, %v33_v35  ;;  %2498 = vmatprep.subr.mxu1 %v2558_v18  ;;  %v1460_v35 = vld [vmem:[%s3864_s3 + $0x20] sm:$0xff]  ;;  %v2060_v53 = vld [vmem:[%s3863_s0 + $0x370] sm:$0xff] }
  0x24   :  { %2416 = vmatmul.mubr.msk.f32.gmra.mxu1 %vm95_vm0, %v2027_v36  ;;  %2314 = vmatprep.mubr.msk.f32.mxu0 %vm95_vm0, %v34_v37  ;;  %v2053_v36 = vld [vmem:[%s3863_s0 + $0x338] sm:$0xff]  ;;  %v2064_v63 = vld [vmem:[%s3863_s0 + $0x390] sm:$0xff] }
  0x25   :  { %2418 = vmatprep.mubr.msk.f32.mxu1 %vm95_vm0, %v2028_v38  ;;  %1506 = vmatpush1.msra.mxu0 %v1466_v4  ;;  %v59_v37 = vld [vmem:[%s3863_s0 + $0x138] sm:$0xff]  ;;  %v2054_v38 = vld [vmem:[%s3863_s0 + $0x340] sm:$0xff] }
  0x26   :  { %2530 = vmatpush1.msra.mxu1 %v1466_v4  ;;  %1507 = vmatprep.subr.mxu0 %v2558_v18  ;;  %v2066_v4 = vld [vmem:[%s3863_s0 + $0x3a0] sm:$0xff] }
  0x27   :  { %2315 = vmatmul.mubr.msk.f32.gmra.mxu0 %vm95_vm0, %v35_v39  ;;  %2499 = vmatprep.subr.mxu1 %v2558_v18  ;;  %v60_v39 = vld [vmem:[%s3863_s0 + $0x140] sm:$0xff] }
  0x28   :  { %2419 = vmatmul.mubr.msk.f32.gmra.mxu1 %vm95_vm0, %v2029_v40  ;;  %2317 = vmatprep.mubr.msk.f32.mxu0 %vm95_vm0, %v36_v41  ;;  %v1459_v40 = vld [vmem:[%s3864_s3 + $0x18] sm:$0xff]  ;;  %v2055_v41 = vld [vmem:[%s3863_s0 + $0x348] sm:$0xff] }
  0x29   :  { %2421 = vmatprep.mubr.msk.f32.mxu1 %vm95_vm0, %v2030_v42  ;;  %1508 = vmatpush1.msra.mxu0 %v1465_v9  ;;  %v61_v42 = vld [vmem:[%s3863_s0 + $0x148] sm:$0xff] }
  0x2a   :  { %2531 = vmatpush1.msra.mxu1 %v1465_v9  ;;  %1509 = vmatprep.subr.mxu0 %v2558_v18  ;;  %v2068_v9 = vld [vmem:[%s3863_s0 + $0x3b0] sm:$0xff] }
  0x2b   :  { %2318 = vmatmul.mubr.msk.f32.gmra.mxu0 %vm95_vm0, %v37_v44  ;;  %2500 = vmatprep.subr.mxu1 %v2558_v18  ;;  %v62_v44 = vld [vmem:[%s3863_s0 + $0x150] sm:$0xff] }
  0x2c   :  { %2422 = vmatmul.mubr.msk.f32.gmra.mxu1 %vm95_vm0, %v2031_v45  ;;  %2320 = vmatprep.mubr.msk.f32.mxu0 %vm95_vm0, %v38_v46  ;;  %v1458_v45 = vld [vmem:[%s3864_s3 + $0x10] sm:$0xff]  ;;  %v2057_v46 = vld [vmem:[%s3863_s0 + $0x358] sm:$0xff] }
  0x2d   :  { %2424 = vmatprep.mubr.msk.f32.mxu1 %vm95_vm0, %v2032_v47  ;;  %1510 = vmatpush1.msra.mxu0 %v1464_v14  ;;  %v63_v47 = vld [vmem:[%s3863_s0 + $0x158] sm:$0xff] }
  0x2e   :  { %2532 = vmatpush1.msra.mxu1 %v1464_v14  ;;  %1511 = vmatprep.subr.mxu0 %v2558_v18  ;;  %v2070_v14 = vld [vmem:[%s3863_s0 + $0x3c0] sm:$0xff] }
  0x2f   :  { %2321 = vmatmul.mubr.msk.f32.gmra.mxu0 %vm95_vm0, %v39_v49  ;;  %2501 = vmatprep.subr.mxu1 %v2558_v18  ;;  %v64_v49 = vld [vmem:[%s3863_s0 + $0x160] sm:$0xff] }
  0x30   :  { %2425 = vmatmul.mubr.msk.f32.gmra.mxu1 %vm95_vm0, %v2033_v50  ;;  %2323 = vmatprep.mubr.msk.f32.mxu0 %vm95_vm0, %v40_v51  ;;  %v1457_v50 = vld [vmem:[%s3864_s3 + $0x8] sm:$0xff] }
  0x31   :  { %2427 = vmatprep.mubr.msk.f32.mxu1 %vm95_vm0, %v2034_v52  ;;  %1512 = vmatpush1.msra.mxu0 %v1463_v20  ;;  %v2059_v51 = vld [vmem:[%s3863_s0 + $0x368] sm:$0xff] }
  0x32   :  { %2533 = vmatpush1.msra.mxu1 %v1463_v20  ;;  %1513 = vmatprep.subr.mxu0 %v2558_v18  ;;  %v65_v52 = vld [vmem:[%s3863_s0 + $0x168] sm:$0xff]  ;;  %v2072_v20 = vld [vmem:[%s3863_s0 + $0x3d0] sm:$0xff] }
  0x33   :  { %2324 = vmatmul.mubr.msk.f32.gmra.mxu0 %vm95_vm0, %v41_v54  ;;  %2502 = vmatprep.subr.mxu1 %v2558_v18  ;;  %v66_v54 = vld [vmem:[%s3863_s0 + $0x170] sm:$0xff] }
  0x34   :  { %2428 = vmatmul.mubr.msk.f32.gmra.mxu1 %vm95_vm0, %v2035_v55  ;;  %2326 = vmatprep.mubr.msk.f32.mxu0 %vm95_vm0, %v42_v56  ;;  %v1456_v55 = vld [vmem:[%s3864_s3] sm:$0xff]  ;;  %v2061_v56 = vld [vmem:[%s3863_s0 + $0x378] sm:$0xff] }
  0x35   :  { %2430 = vmatprep.mubr.msk.f32.mxu1 %vm95_vm0, %v2036_v57  ;;  %1514 = vmatpush1.msra.mxu0 %v1462_v25  ;;  %v67_v57 = vld [vmem:[%s3863_s0 + $0x178] sm:$0xff] }
  0x36   :  { %2534 = vmatpush1.msra.mxu1 %v1462_v25  ;;  %1515 = vmatprep.subr.mxu0 %v2558_v18  ;;  %v2074_v25 = vld [vmem:[%s3863_s0 + $0x3e0] sm:$0xff] }
  0x37   :  { %2327 = vmatmul.mubr.msk.f32.gmra.mxu0 %vm95_vm0, %v43_v59  ;;  %2503 = vmatprep.subr.mxu1 %v2558_v18  ;;  %v68_v59 = vld [vmem:[%s3863_s0 + $0x180] sm:$0xff] }
  0x38   :  { %2431 = vmatmul.mubr.msk.f32.gmra.mxu1 %vm95_vm0, %v2037_v60  ;;  %2329 = vmatprep.mubr.msk.f32.mxu0 %vm95_vm0, %v44_v61  ;;  %v1487_v60 = vld [vmem:[%s3864_s3 + $0xf8] sm:$0xff]  ;;  %v2063_v61 = vld [vmem:[%s3863_s0 + $0x388] sm:$0xff] }
  0x39   :  { %2433 = vmatprep.mubr.msk.f32.mxu1 %vm95_vm0, %v2038_v62  ;;  %1516 = vmatpush1.msra.mxu0 %v1461_v30  ;;  %v69_v62 = vld [vmem:[%s3863_s0 + $0x188] sm:$0xff] }
  0x3a   :  { %2535 = vmatpush1.msra.mxu1 %v1461_v30  ;;  %1517 = vmatprep.subr.mxu0 %v2558_v18  ;;  %v2076_v30 = vld [vmem:[%s3863_s0 + $0x3f0] sm:$0xff] }
  0x3b   :  { %2330 = vmatmul.mubr.msk.f32.gmra.mxu0 %vm95_vm0, %v45_v0  ;;  %2504 = vmatprep.subr.mxu1 %v2558_v18  ;;  %v70_v0 = vld [vmem:[%s3863_s0 + $0x190] sm:$0xff] }
  0x3c   :  { %2434 = vmatmul.mubr.msk.f32.gmra.mxu1 %vm95_vm0, %v2039_v1  ;;  %2332 = vmatprep.mubr.msk.f32.mxu0 %vm95_vm0, %v46_v2  ;;  %v1486_v1 = vld [vmem:[%s3864_s3 + $0xf0] sm:$0xff]  ;;  %v2065_v2 = vld [vmem:[%s3863_s0 + $0x398] sm:$0xff] }
  0x3d   :  { %2436 = vmatprep.mubr.msk.f32.mxu1 %vm95_vm0, %v2040_v3  ;;  %1518 = vmatpush1.msra.mxu0 %v1460_v35  ;;  %v71_v3 = vld [vmem:[%s3863_s0 + $0x198] sm:$0xff] }
  0x3e   :  { %2536 = vmatpush1.msra.mxu1 %v1460_v35  ;;  %1519 = vmatprep.subr.mxu0 %v2558_v18  ;;  %v1479_v35 = vld [vmem:[%s3864_s3 + $0xb8] sm:$0xff] }
  0x3f   :  { %2333 = vmatmul.mubr.msk.f32.gmra.mxu0 %vm95_vm0, %v47_v5  ;;  %2505 = vmatprep.subr.mxu1 %v2558_v18  ;;  %v72_v5 = vld [vmem:[%s3863_s0 + $0x1a0] sm:$0xff] }
  0x40   :  { %2437 = vmatmul.mubr.msk.f32.gmra.mxu1 %vm95_vm0, %v2041_v6  ;;  %2335 = vmatprep.mubr.msk.f32.mxu0 %vm95_vm0, %v48_v7  ;;  %v1485_v6 = vld [vmem:[%s3864_s3 + $0xe8] sm:$0xff] }
  0x41   :  { %2439 = vmatprep.mubr.msk.f32.mxu1 %vm95_vm0, %v2042_v8  ;;  %1520 = vmatpush1.msra.mxu0 %v1459_v40  ;;  %v2067_v7 = vld [vmem:[%s3863_s0 + $0x3a8] sm:$0xff] }
  0x42   :  { %2537 = vmatpush1.msra.mxu1 %v1459_v40  ;;  %1521 = vmatprep.subr.mxu0 %v2558_v18  ;;  %v73_v8 = vld [vmem:[%s3863_s0 + $0x1a8] sm:$0xff]  ;;  %v1474_v40 = vld [vmem:[%s3864_s3 + $0x90] sm:$0xff] }
  0x43   :  { %2336 = vmatmul.mubr.msk.f32.gmra.mxu0 %vm95_vm0, %v49_v10  ;;  %2506 = vmatprep.subr.mxu1 %v2558_v18  ;;  %v74_v10 = vld [vmem:[%s3863_s0 + $0x1b0] sm:$0xff] }
  0x44   :  { %2440 = vmatmul.mubr.msk.f32.gmra.mxu1 %vm95_vm0, %v2043_v11  ;;  %2338 = vmatprep.mubr.msk.f32.mxu0 %vm95_vm0, %v50_v12  ;;  %v1484_v11 = vld [vmem:[%s3864_s3 + $0xe0] sm:$0xff]  ;;  %v2069_v12 = vld [vmem:[%s3863_s0 + $0x3b8] sm:$0xff] }
  0x45   :  { %2442 = vmatprep.mubr.msk.f32.mxu1 %vm95_vm0, %v2044_v13  ;;  %1522 = vmatpush1.msra.mxu0 %v1458_v45  ;;  %v75_v13 = vld [vmem:[%s3863_s0 + $0x1b8] sm:$0xff] }
  0x46   :  { %2538 = vmatpush1.msra.mxu1 %v1458_v45  ;;  %1523 = vmatprep.subr.mxu0 %v2558_v18 }
  0x47   :  { %2339 = vmatmul.mubr.msk.f32.gmra.mxu0 %vm95_vm0, %v51_v15  ;;  %2507 = vmatprep.subr.mxu1 %v2558_v18  ;;  %v76_v15 = vld [vmem:[%s3863_s0 + $0x1c0] sm:$0xff] }
  0x48   :  { %2443 = vmatmul.mubr.msk.f32.gmra.mxu1 %vm95_vm0, %v2045_v16  ;;  %2341 = vmatprep.mubr.msk.f32.mxu0 %vm95_vm0, %v52_v17  ;;  %v1483_v16 = vld [vmem:[%s3864_s3 + $0xd8] sm:$0xff]  ;;  %v2071_v17 = vld [vmem:[%s3863_s0 + $0x3c8] sm:$0xff] }
  0x49   :  { %2445 = vmatprep.mubr.msk.f32.mxu1 %vm95_vm0, %v2046_v19  ;;  %1524 = vmatpush1.msra.mxu0 %v1457_v50  ;;  %v77_v19 = vld [vmem:[%s3863_s0 + $0x1c8] sm:$0xff] }
  0x4a   :  { %2539 = vmatpush1.msra.mxu1 %v1457_v50  ;;  %1525 = vmatprep.subr.mxu0 %v2558_v18 }
  0x4b   :  { %2342 = vmatmul.mubr.msk.f32.gmra.mxu0 %vm95_vm0, %v53_v21  ;;  %2508 = vmatprep.subr.mxu1 %v2558_v18  ;;  %v78_v21 = vld [vmem:[%s3863_s0 + $0x1d0] sm:$0xff] }
  0x4c   :  { %2446 = vmatmul.mubr.msk.f32.gmra.mxu1 %vm95_vm0, %v2047_v22  ;;  %2344 = vmatprep.mubr.msk.f32.mxu0 %vm95_vm0, %v54_v24  ;;  %v1482_v22 = vld [vmem:[%s3864_s3 + $0xd0] sm:$0xff]  ;;  %v79_v24 = vld [vmem:[%s3863_s0 + $0x1d8] sm:$0xff] }
  0x4d   :  { %2448 = vmatprep.mubr.msk.f32.mxu1 %vm95_vm0, %v2048_v23  ;;  %1526 = vmatpush1.msra.mxu0 %v1456_v55  ;;  %v2073_v23 = vld [vmem:[%s3863_s0 + $0x3d8] sm:$0xff] }
  0x4e   :  { %2540 = vmatpush1.msra.mxu1 %v1456_v55  ;;  %1527 = vmatprep.subr.mxu0 %v2558_v18 }
  0x4f   :  { %2345 = vmatmul.mubr.msk.f32.gmra.mxu0 %vm95_vm0, %v55_v27  ;;  %2509 = vmatprep.subr.mxu1 %v2558_v18  ;;  %v1481_v27 = vld [vmem:[%s3864_s3 + $0xc8] sm:$0xff] }
  0x50   :  { %2449 = vmatmul.mubr.msk.f32.gmra.mxu1 %vm95_vm0, %v2049_v26  ;;  %2347 = vmatprep.mubr.msk.f32.mxu0 %vm95_vm0, %v56_v29  ;;  %v80_v26 = vld [vmem:[%s3863_s0 + $0x1e0] sm:$0xff]  ;;  %v81_v29 = vld [vmem:[%s3863_s0 + $0x1e8] sm:$0xff] }
  0x51   :  { %2451 = vmatprep.mubr.msk.f32.mxu1 %vm95_vm0, %v2050_v28  ;;  %1528 = vmatpush2.msra.mxu0 %v1487_v60  ;;  %v2075_v28 = vld [vmem:[%s3863_s0 + $0x3e8] sm:$0xff] }
  0x52   :  { %2541 = vmatpush2.msra.mxu1 %v1487_v60  ;;  %1529 = vmatprep.subr.mxu0 %v2558_v18 }
  0x53   :  { %2348 = vmatmul.mubr.msk.f32.gmra.mxu0 %vm95_vm0, %v57_v32  ;;  %2510 = vmatprep.subr.mxu1 %v2558_v18  ;;  %v1480_v32 = vld [vmem:[%s3864_s3 + $0xc0] sm:$0xff] }
  0x54   :  { %2452 = vmatmul.mubr.msk.f32.gmra.mxu1 %vm95_vm0, %v2051_v31  ;;  %2350 = vmatprep.mubr.msk.f32.mxu0 %vm95_vm0, %v58_v34  ;;  %v82_v31 = vld [vmem:[%s3863_s0 + $0x1f0] sm:$0xff]  ;;  %v83_v34 = vld [vmem:[%s3863_s0 + $0x1f8] sm:$0xff] }
  0x55   :  { %2454 = vmatprep.mubr.msk.f32.mxu1 %vm95_vm0, %v2052_v33  ;;  %1530 = vmatpush2.msra.mxu0 %v1486_v1  ;;  %v2077_v33 = vld [vmem:[%s3863_s0 + $0x3f8] sm:$0xff] }
  0x56   :  { %2542 = vmatpush2.msra.mxu1 %v1486_v1  ;;  %1531 = vmatprep.subr.mxu0 %v2558_v18 }
  0x57   :  { %2351 = vmatmul.mubr.msk.f32.gmra.mxu0 %vm95_vm0, %v59_v37  ;;  %2511 = vmatprep.subr.mxu1 %v2558_v18  ;;  %v1477_v37 = vld [vmem:[%s3864_s3 + $0xa8] sm:$0xff] }
  0x58   :  { %2455 = vmatmul.mubr.msk.f32.gmra.mxu1 %vm95_vm0, %v2053_v36  ;;  %2353 = vmatprep.mubr.msk.f32.mxu0 %vm95_vm0, %v60_v39  ;;  %v1478_v36 = vld [vmem:[%s3864_s3 + $0xb0] sm:$0xff]  ;;  %v1475_v39 = vld [vmem:[%s3864_s3 + $0x98] sm:$0xff] }
  0x59   :  { %2457 = vmatprep.mubr.msk.f32.mxu1 %vm95_vm0, %v2054_v38  ;;  %1532 = vmatpush2.msra.mxu0 %v1485_v6  ;;  %v1476_v38 = vld [vmem:[%s3864_s3 + $0xa0] sm:$0xff] }
  0x5a   :  { %2543 = vmatpush2.msra.mxu1 %v1485_v6  ;;  %1533 = vmatprep.subr.mxu0 %v2558_v18 }
  0x5b   :  { %2354 = vmatmul.mubr.msk.f32.gmra.mxu0 %vm95_vm0, %v61_v42  ;;  %2512 = vmatprep.subr.mxu1 %v2558_v18  ;;  %v1472_v42 = vld [vmem:[%s3864_s3 + $0x80] sm:$0xff] }
  0x5c   :  { %2458 = vmatmul.mubr.msk.f32.gmra.mxu1 %vm95_vm0, %v2055_v41  ;;  %2356 = vmatprep.mubr.msk.f32.mxu0 %vm95_vm0, %v62_v44  ;;  %v1473_v41 = vld [vmem:[%s3864_s3 + $0x88] sm:$0xff]  ;;  %v3288_v44 = vld [vmem:[%s3865_s2] ss:$0 sm:$0xff] }
  0x5d   :  { %2460 = vmatprep.mubr.msk.f32.mxu1 %vm95_vm0, %v2056_v43  ;;  %1534 = vmatpush2.msra.mxu0 %v1484_v11 }
  0x5e   :  { %2544 = vmatpush2.msra.mxu1 %v1484_v11  ;;  %1535 = vmatprep.subr.mxu0 %v2558_v18 }
  0x5f   :  { %2357 = vmatmul.mubr.msk.f32.gmra.mxu0 %vm95_vm0, %v63_v47  ;;  %2513 = vmatprep.subr.mxu1 %v2558_v18 }
  0x60   :  { %2461 = vmatmul.mubr.msk.f32.gmra.mxu1 %vm95_vm0, %v2057_v46  ;;  %2359 = vmatprep.mubr.msk.f32.mxu0 %vm95_vm0, %v64_v49  ;;  %v3293_v46 = vld [vmem:[%s3865_s2 + $0x1] ss:$0 sm:$0xff] }
  0x61   :  { %2463 = vmatprep.mubr.msk.f32.mxu1 %vm95_vm0, %v2058_v48  ;;  %1536 = vmatpush2.msra.mxu0 %v1483_v16 }
  0x62   :  { %2545 = vmatpush2.msra.mxu1 %v1483_v16  ;;  %1537 = vmatprep.subr.mxu0 %v2558_v18 }
  0x63   :  { %2360 = vmatmul.mubr.msk.f32.gmra.mxu0 %vm95_vm0, %v65_v52  ;;  %2514 = vmatprep.subr.mxu1 %v2558_v18 }
  0x64   :  { %2464 = vmatmul.mubr.msk.f32.gmra.mxu1 %vm95_vm0, %v2059_v51  ;;  %2362 = vmatprep.mubr.msk.f32.mxu0 %vm95_vm0, %v66_v54 }
  0x65   :  { %2466 = vmatprep.mubr.msk.f32.mxu1 %vm95_vm0, %v2060_v53  ;;  %1538 = vmatpush2.msra.mxu0 %v1482_v22 }
  0x66   :  { %2546 = vmatpush2.msra.mxu1 %v1482_v22  ;;  %1539 = vmatprep.subr.mxu0 %v2558_v18 }
  0x67   :  { %2363 = vmatmul.mubr.msk.f32.gmra.mxu0 %vm95_vm0, %v67_v57  ;;  %2515 = vmatprep.subr.mxu1 %v2558_v18 }
  0x68   :  { %2467 = vmatmul.mubr.msk.f32.gmra.mxu1 %vm95_vm0, %v2061_v56  ;;  %2365 = vmatprep.mubr.msk.f32.mxu0 %vm95_vm0, %v68_v59 }
  0x69   :  { %2469 = vmatprep.mubr.msk.f32.mxu1 %vm95_vm0, %v2062_v58  ;;  %1540 = vmatpush2.msra.mxu0 %v1481_v27 }
  0x6a   :  { %2547 = vmatpush2.msra.mxu1 %v1481_v27  ;;  %1541 = vmatprep.subr.mxu0 %v2558_v18 }
  0x6b   :  { %2366 = vmatmul.mubr.msk.f32.gmra.mxu0 %vm95_vm0, %v69_v62  ;;  %2516 = vmatprep.subr.mxu1 %v2558_v18 }
  0x6c   :  { %2470 = vmatmul.mubr.msk.f32.gmra.mxu1 %vm95_vm0, %v2063_v61  ;;  %2368 = vmatprep.mubr.msk.f32.mxu0 %vm95_vm0, %v70_v0 }
  0x6d   :  { %2472 = vmatprep.mubr.msk.f32.mxu1 %vm95_vm0, %v2064_v63  ;;  %1542 = vmatpush2.msra.mxu0 %v1480_v32 }
  0x6e   :  { %2548 = vmatpush2.msra.mxu1 %v1480_v32  ;;  %1543 = vmatprep.subr.mxu0 %v2558_v18 }
  0x6f   :  { %2369 = vmatmul.mubr.msk.f32.gmra.mxu0 %vm95_vm0, %v71_v3  ;;  %2517 = vmatprep.subr.mxu1 %v2558_v18 }
  0x70   :  { %2473 = vmatmul.mubr.msk.f32.gmra.mxu1 %vm95_vm0, %v2065_v2  ;;  %2371 = vmatprep.mubr.msk.f32.mxu0 %vm95_vm0, %v72_v5 }
  0x71   :  { %2475 = vmatprep.mubr.msk.f32.mxu1 %vm95_vm0, %v2066_v4  ;;  %1544 = vmatpush2.msra.mxu0 %v1479_v35 }
  0x72   :  { %2549 = vmatpush2.msra.mxu1 %v1479_v35  ;;  %1545 = vmatprep.subr.mxu0 %v2558_v18 }
  0x73   :  { %2372 = vmatmul.mubr.msk.f32.gmra.mxu0 %vm95_vm0, %v73_v8  ;;  %2518 = vmatprep.subr.mxu1 %v2558_v18 }
  0x74   :  { %2476 = vmatmul.mubr.msk.f32.gmra.mxu1 %vm95_vm0, %v2067_v7  ;;  %2374 = vmatprep.mubr.msk.f32.mxu0 %vm95_vm0, %v74_v10 }
  0x75   :  { %2478 = vmatprep.mubr.msk.f32.mxu1 %vm95_vm0, %v2068_v9  ;;  %1546 = vmatpush2.msra.mxu0 %v1478_v36 }
  0x76   :  { %2550 = vmatpush2.msra.mxu1 %v1478_v36  ;;  %1547 = vmatprep.subr.mxu0 %v2558_v18 }
  0x77   :  { %2375 = vmatmul.mubr.msk.f32.gmra.mxu0 %vm95_vm0, %v75_v13  ;;  %2519 = vmatprep.subr.mxu1 %v2558_v18 }
  0x78   :  { %2479 = vmatmul.mubr.msk.f32.gmra.mxu1 %vm95_vm0, %v2069_v12  ;;  %2377 = vmatprep.mubr.msk.f32.mxu0 %vm95_vm0, %v76_v15 }
  0x79   :  { %2481 = vmatprep.mubr.msk.f32.mxu1 %vm95_vm0, %v2070_v14  ;;  %1548 = vmatpush2.msra.mxu0 %v1477_v37 }
  0x7a   :  { %2551 = vmatpush2.msra.mxu1 %v1477_v37  ;;  %1549 = vmatprep.subr.mxu0 %v2558_v18 }
  0x7b   :  { %2378 = vmatmul.mubr.msk.f32.gmra.mxu0 %vm95_vm0, %v77_v19  ;;  %2520 = vmatprep.subr.mxu1 %v2558_v18 }
  0x7c   :  { %2482 = vmatmul.mubr.msk.f32.gmra.mxu1 %vm95_vm0, %v2071_v17  ;;  %2380 = vmatprep.mubr.msk.f32.mxu0 %vm95_vm0, %v78_v21 }
  0x7d   :  { %2484 = vmatprep.mubr.msk.f32.mxu1 %vm95_vm0, %v2072_v20  ;;  %1550 = vmatpush2.msra.mxu0 %v1476_v38 }
  0x7e   :  { %2552 = vmatpush2.msra.mxu1 %v1476_v38  ;;  %1551 = vmatprep.subr.mxu0 %v2558_v18 }
  0x7f   :  { %2381 = vmatmul.mubr.msk.f32.gmra.mxu0 %vm95_vm0, %v79_v24  ;;  %2521 = vmatprep.subr.mxu1 %v2558_v18 }
  0x80   :  { %2485 = vmatmul.mubr.msk.f32.gmra.mxu1 %vm95_vm0, %v2073_v23  ;;  %2383 = vmatprep.mubr.msk.f32.mxu0 %vm95_vm0, %v80_v26 }
  0x81   :  { %2487 = vmatprep.mubr.msk.f32.mxu1 %vm95_vm0, %v2074_v25  ;;  %1552 = vmatpush2.msra.mxu0 %v1475_v39 }
  0x82   :  { %2553 = vmatpush2.msra.mxu1 %v1475_v39  ;;  %1553 = vmatprep.subr.mxu0 %v2558_v18 }
  0x83   :  { %2384 = vmatmul.mubr.msk.f32.gmra.mxu0 %vm95_vm0, %v81_v29  ;;  %2522 = vmatprep.subr.mxu1 %v2558_v18 }
  0x84   :  { %2488 = vmatmul.mubr.msk.f32.gmra.mxu1 %vm95_vm0, %v2075_v28  ;;  %2386 = vmatprep.mubr.msk.f32.mxu0 %vm95_vm0, %v82_v31 }
  0x85   :  { %2490 = vmatprep.mubr.msk.f32.mxu1 %vm95_vm0, %v2076_v30  ;;  %1554 = vmatpush2.msra.mxu0 %v1474_v40 }
  0x86   :  { %2554 = vmatpush2.msra.mxu1 %v1474_v40  ;;  %1555 = vmatprep.subr.mxu0 %v2558_v18 }
  0x87   :  { %2387 = vmatmul.mubr.msk.f32.gmra.mxu0 %vm95_vm0, %v83_v34  ;;  %2523 = vmatprep.subr.mxu1 %v2558_v18 }
  0x88   :  { %2491 = vmatmul.mubr.msk.f32.gmra.mxu1 %vm95_vm0, %v2077_v33  ;;  %1556 = vmatpush2.msra.mxu0 %v1473_v41 }
  0x89   :  { %2555 = vmatpush2.msra.mxu1 %v1473_v41  ;;  %1557 = vmatprep.subr.mxu0 %v2558_v18 }
  0x8a   :  { %2524 = vmatprep.subr.mxu1 %v2558_v18  ;;  %1558 = vmatpush2.msra.mxu0 %v1472_v42 }
  0x8b   :  { %2556 = vmatpush2.msra.mxu1 %v1472_v42 }
  0xcb   :  { %v2295_v43 = vpop.f32.mrf.mxu0 }
  0xcc   :  { %v2399_v45 = vpop.f32.mrf.mxu1  ;;  %v360_v55 = vadd.f32 %v2295_v43, %v3288_v44 }
  0xcd   :  { %v354_v47 = vpop.f32.mrf.mxu0  ;;  %v1079_v49 = vadd.f32 %v2399_v45, %v3293_v46 }
  0xce   :  { %v1073_v48 = vpop.f32.mrf.mxu1  ;;  %v355_v18 = vadd.f32 %v3288_v44, %v354_v47  ;;  %v674_v62 = vmax.f32 %v360_v55, 0.0 }
  0xcf   :  { %v1074_v50 = vadd.f32 %v3293_v46, %v1073_v48  ;;  %v2298_v51 = vpop.f32.mrf.mxu0  ;;  %v1393_v58 = vmax.f32 %v1079_v49, 0.0 }
  0xd0   :  { %v2402_v52 = vpop.f32.mrf.mxu1  ;;  %v673_v53 = vmax.f32 %v355_v18, 0.0  ;;  %v370_v6 = vadd.f32 %v2298_v51, %v3288_v44 }
  0xd1   :  { %v1392_v54 = vmax.f32 %v1074_v50, 0.0  ;;  %v364_v56 = vpop.f32.mrf.mxu0  ;;  %v1089_v2 = vadd.f32 %v2402_v52, %v3293_v46 }
  0xd2   :  { %v1083_v57 = vpop.f32.mrf.mxu1  ;;  %v365_v63 = vadd.f32 %v3288_v44, %v364_v56  ;;  %v676_v14 = vmax.f32 %v370_v6, 0.0 }
  0xd3   :  { %v1084_v59 = vadd.f32 %v3293_v46, %v1083_v57  ;;  %1559 = vmatprep.mubr.f32.mxu0 %v1392_v54  ;;  %v2301_v60 = vpop.f32.mrf.mxu0  ;;  %v1395_v10 = vmax.f32 %v1089_v2, 0.0 }
  0xd4   :  { %v2405_v61 = vpop.f32.mrf.mxu1  ;;  %1560 = vmatmul.mubr.f32.vlgmr.msra.gmra.mxu0 %v673_v53  ;;  %v675_v7 = vmax.f32 %v365_v63, 0.0  ;;  %v380_v23 = vadd.f32 %v2301_v60, %v3288_v44 }
  0xd5   :  { %1564 = vmatprep.mubr.f32.mxu0 %v1393_v58  ;;  %v374_v0 = vpop.f32.mrf.mxu0  ;;  %v1394_v3 = vmax.f32 %v1084_v59, 0.0  ;;  %v1099_v19 = vadd.f32 %v2405_v61, %v3293_v46 }
  0xd6   :  { %v1093_v1 = vpop.f32.mrf.mxu1  ;;  %v375_v15 = vadd.f32 %v3288_v44, %v374_v0  ;;  %v678_v31 = vmax.f32 %v380_v23, 0.0 }
  0xd7   :  { %v2304_v4 = vpop.f32.mrf.mxu0  ;;  %v1094_v11 = vadd.f32 %v3293_v46, %v1093_v1  ;;  %v1397_v27 = vmax.f32 %v1099_v19, 0.0 }
  0xd8   :  { %v2408_v5 = vpop.f32.mrf.mxu1  ;;  %1565 = vmatmul.mubr.f32.gmra.mxu0 %v674_v62  ;;  %v677_v24 = vmax.f32 %v375_v15, 0.0  ;;  %v390_v39 = vadd.f32 %v2304_v4, %v3288_v44 }
  0xd9   :  { %1569 = vmatprep.mubr.f32.mxu0 %v1394_v3  ;;  %v384_v8 = vpop.f32.mrf.mxu0  ;;  %v1396_v20 = vmax.f32 %v1094_v11, 0.0  ;;  %v1109_v35 = vadd.f32 %v2408_v5, %v3293_v46 }
  0xda   :  { %v1103_v9 = vpop.f32.mrf.mxu1  ;;  %v385_v32 = vadd.f32 %v3288_v44, %v384_v8  ;;  %v680_v49 = vmax.f32 %v390_v39, 0.0 }
  0xdb   :  { %v2307_v12 = vpop.f32.mrf.mxu0  ;;  %v1104_v28 = vadd.f32 %v3293_v46, %v1103_v9  ;;  %v1399_v43 = vmax.f32 %v1109_v35, 0.0 }
  0xdc   :  { %v2411_v13 = vpop.f32.mrf.mxu1  ;;  %1570 = vmatmul.mubr.f32.gmra.mxu0 %v675_v7  ;;  %v679_v40 = vmax.f32 %v385_v32, 0.0  ;;  %v400_v56 = vadd.f32 %v2307_v12, %v3288_v44 }
  0xdd   :  { %1574 = vmatprep.mubr.f32.mxu0 %v1395_v10  ;;  %v394_v16 = vpop.f32.mrf.mxu0  ;;  %v1398_v36 = vmax.f32 %v1104_v28, 0.0  ;;  %v1119_v52 = vadd.f32 %v2411_v13, %v3293_v46 }
  0xde   :  { %v1113_v17 = vpop.f32.mrf.mxu1  ;;  %v395_v18 = vadd.f32 %v3288_v44, %v394_v16  ;;  %v682_v0 = vmax.f32 %v400_v56, 0.0 }
  0xdf   :  { %v3306_v21 = vpop.f32.mrf.mxu0  ;;  %v1114_v45 = vadd.f32 %v3293_v46, %v1113_v17  ;;  %v1401_v60 = vmax.f32 %v1119_v52, 0.0 }
  0xe0   :  { %v2414_v22 = vpop.f32.mrf.mxu1  ;;  %1575 = vmatmul.mubr.f32.gmra.mxu0 %v676_v14  ;;  %v681_v57 = vmax.f32 %v395_v18, 0.0  ;;  %v410_v8 = vadd.f32 %v3306_v21, %v3288_v44 }
  0xe1   :  { %1579 = vmatprep.mubr.f32.mxu0 %v1396_v20  ;;  %v404_v25 = vpop.f32.mrf.mxu0  ;;  %v1400_v53 = vmax.f32 %v1114_v45, 0.0  ;;  %v1129_v4 = vadd.f32 %v2414_v22, %v3293_v46 }
  0xe2   :  { %v1123_v26 = vpop.f32.mrf.mxu1  ;;  %v405_v1 = vadd.f32 %v3288_v44, %v404_v25  ;;  %v684_v16 = vmax.f32 %v410_v8, 0.0 }
  0xe3   :  { %v3310_v29 = vpop.f32.mrf.mxu0  ;;  %v1124_v61 = vadd.f32 %v3293_v46, %v1123_v26  ;;  %v1403_v12 = vmax.f32 %v1129_v4, 0.0 }
  0xe4   :  { %v3312_v30 = vpop.f32.mrf.mxu1  ;;  %1580 = vmatmul.mubr.f32.gmra.mxu0 %v677_v24  ;;  %v683_v9 = vmax.f32 %v405_v1, 0.0  ;;  %v420_v25 = vadd.f32 %v3310_v29, %v3288_v44 }
  0xe5   :  { %1584 = vmatprep.mubr.f32.mxu0 %v1397_v27  ;;  %v414_v33 = vpop.f32.mrf.mxu0  ;;  %v1402_v5 = vmax.f32 %v1124_v61, 0.0  ;;  %v1139_v21 = vadd.f32 %v3312_v30, %v3293_v46 }
  0xe6   :  { %v1133_v34 = vpop.f32.mrf.mxu1  ;;  %v415_v17 = vadd.f32 %v3288_v44, %v414_v33 }
  0xe7   :  { %v3316_v37 = vpop.f32.mrf.mxu0  ;;  %v1134_v13 = vadd.f32 %v3293_v46, %v1133_v34  ;;  %v686_v34 = vmax.f32 %v420_v25, 0.0 }
  0xe8   :  { %v3318_v38 = vpop.f32.mrf.mxu1  ;;  %1585 = vmatmul.mubr.f32.gmra.mxu0 %v678_v31  ;;  %v685_v26 = vmax.f32 %v415_v17, 0.0  ;;  %v1405_v31 = vmax.f32 %v1139_v21, 0.0  ;;  %v430_v45 = vadd.f32 %v3316_v37, %v3288_v44 }
  0xe9   :  { %1589 = vmatprep.mubr.f32.mxu0 %v1398_v36  ;;  %v3321_v41 = vpop.f32.mrf.mxu0  ;;  %v1404_v22 = vmax.f32 %v1134_v13, 0.0  ;;  %v1149_v39 = vadd.f32 %v3318_v38, %v3293_v46 }
  0xea   :  { %v1143_v42 = vpop.f32.mrf.mxu1  ;;  %v425_v35 = vadd.f32 %v3288_v44, %v3321_v41 }
  0xeb   :  { %v3324_v47 = vpop.f32.mrf.mxu0  ;;  %v1144_v32 = vadd.f32 %v3293_v46, %v1143_v42  ;;  %v1407_v52 = vmax.f32 %v1149_v39, 0.0 }
  0xec   :  { %v3326_v48 = vpop.f32.mrf.mxu1  ;;  %1590 = vmatmul.mubr.f32.gmra.mxu0 %v679_v40 }
  0xed   :  { %1594 = vmatprep.mubr.f32.mxu0 %v1399_v43  ;;  %v3329_v50 = vpop.f32.mrf.mxu0  ;;  %v1406_v40 = vmax.f32 %v1144_v32, 0.0 }
  0xee   :  { %v3331_v51 = vpop.f32.mrf.mxu1  ;;  %v435_v37 = vadd.f32 %v3288_v44, %v3329_v50 }
  0xef   :  { %v3334_v54 = vpop.f32.mrf.mxu0 }
  0xf0   :  { %v3336_v55 = vpop.f32.mrf.mxu1  ;;  %1595 = vmatmul.mubr.f32.gmra.mxu0 %v680_v49  ;;  %v687_v49 = vmax.f32 %v425_v35, 0.0 }
  0xf1   :  { %1599 = vmatprep.mubr.f32.mxu0 %v1400_v53  ;;  %v3339_v58 = vpop.f32.mrf.mxu0  ;;  %v1154_v53 = vadd.f32 %v3293_v46, %v3331_v51 }
  0xf2   :  { %v3341_v59 = vpop.f32.mrf.mxu1  ;;  %v445_v35 = vadd.f32 %v3288_v44, %v3339_v58  ;;  %v450_v58 = vadd.f32 %v3334_v54, %v3288_v44 }
  0xf3   :  { %v3344_v62 = vpop.f32.mrf.mxu0  ;;  %v1408_v1 = vmax.f32 %v1154_v53, 0.0 }
  0xf4   :  { %v3346_v63 = vpop.f32.mrf.mxu1  ;;  %1600 = vmatmul.mubr.f32.gmra.mxu0 %v681_v57  ;;  %v688_v57 = vmax.f32 %v430_v45, 0.0 }
  0xf5   :  { %1604 = vmatprep.mubr.f32.mxu0 %v1401_v60  ;;  %v3349_v2 = vpop.f32.mrf.mxu0  ;;  %v1159_v60 = vadd.f32 %v3326_v48, %v3293_v46  ;;  %v440_v48 = vadd.f32 %v3324_v47, %v3288_v44 }
  0xf6   :  { %v3351_v3 = vpop.f32.mrf.mxu1  ;;  %v455_v54 = vadd.f32 %v3288_v44, %v3349_v2  ;;  %v460_v2 = vadd.f32 %v3344_v62, %v3288_v44 }
  0xf7   :  { %v3354_v6 = vpop.f32.mrf.mxu0  ;;  %v1409_v21 = vmax.f32 %v1159_v60, 0.0  ;;  %v690_v47 = vmax.f32 %v440_v48, 0.0 }
  0xf8   :  { %v3356_v7 = vpop.f32.mrf.mxu1  ;;  %1605 = vmatmul.mubr.f32.gmra.mxu0 %v682_v0 }
  0xf9   :  { %1609 = vmatprep.mubr.f32.mxu0 %v1402_v5  ;;  %v3360_v10 = vpop.f32.mrf.mxu0 }
  0xfa   :  { %v3362_v11 = vpop.f32.mrf.mxu1  ;;  %v465_v62 = vadd.f32 %v3288_v44, %v3360_v10  ;;  %v470_v10 = vadd.f32 %v3354_v6, %v3288_v44 }
  0xfb   :  { %v3365_v14 = vpop.f32.mrf.mxu0 }
  0xfc   :  { %v3367_v15 = vpop.f32.mrf.mxu1  ;;  %1610 = vmatmul.mubr.f32.gmra.mxu0 %v683_v9 }
  0xfd   :  { %1614 = vmatprep.mubr.f32.mxu0 %v1403_v12  ;;  %v3370_v19 = vpop.f32.mrf.mxu0 }
  0xfe   :  { %v3372_v20 = vpop.f32.mrf.mxu1  ;;  %v475_v6 = vadd.f32 %v3288_v44, %v3370_v19  ;;  %v480_v19 = vadd.f32 %v3365_v14, %v3288_v44 }
  0xff   :  { %v3376_v23 = vpop.f32.mrf.mxu0 }
 0x100   :  { %v3378_v24 = vpop.f32.mrf.mxu1  ;;  %1615 = vmatmul.mubr.f32.gmra.mxu0 %v684_v16  ;;  %v689_v16 = vmax.f32 %v435_v37, 0.0 }
 0x101   :  { %1619 = vmatprep.mubr.f32.mxu0 %v1404_v22  ;;  %v3382_v27 = vpop.f32.mrf.mxu0  ;;  %v1164_v22 = vadd.f32 %v3293_v46, %v3341_v59  ;;  %v1169_v59 = vadd.f32 %v3336_v55, %v3293_v46  ;;  %v1174_v55 = vadd.f32 %v3293_v46, %v3351_v3 }
 0x102   :  { %v3384_v28 = vpop.f32.mrf.mxu1  ;;  %v485_v14 = vadd.f32 %v3288_v44, %v3382_v27  ;;  %v490_v27 = vadd.f32 %v3376_v23, %v3288_v44 }
 0x103   :  { %v3387_v33 = vpop.f32.mrf.mxu0 }
 0x104   :  { %v3389_v30 = vpop.f32.mrf.mxu1  ;;  %1620 = vmatmul.mubr.f32.gmra.mxu0 %v685_v26 }
 0x105   :  { %1624 = vmatprep.mubr.f32.mxu0 %v1405_v31  ;;  %v3393_v36 = vpop.f32.mrf.mxu0 }
 0x106   :  { %v3395_v29 = vpop.f32.mrf.mxu1  ;;  %v495_v23 = vadd.f32 %v3288_v44, %v3393_v36  ;;  %v500_v36 = vadd.f32 %v3387_v33, %v3288_v44 }
 0x107   :  { %v3399_v43 = vpop.f32.mrf.mxu0 }
 0x108   :  { %v3401_v42 = vpop.f32.mrf.mxu1  ;;  %1625 = vmatmul.mubr.f32.gmra.mxu0 %v686_v34 }
 0x109   :  { %1629 = vmatprep.mubr.f32.mxu0 %v1406_v40  ;;  %v3405_v18 = vpop.f32.mrf.mxu0 }
 0x10a   :  { %v3407_v41 = vpop.f32.mrf.mxu1  ;;  %v505_v33 = vadd.f32 %v3288_v44, %v3405_v18  ;;  %v510_v18 = vadd.f32 %v3399_v43, %v3288_v44 }
 0x10b   :  { %v2343_v38 = vpop.f32.mrf.mxu0 }
 0x10c   :  { %v2447_v56 = vpop.f32.mrf.mxu1  ;;  %1630 = vmatmul.mubr.f32.gmra.mxu0 %v687_v49  ;;  %v520_v50 = vadd.f32 %v2343_v38, %v3288_v44  ;;  %v1410_v49 = vmax.f32 %v1164_v22, 0.0 }
 0x10d   :  { %1634 = vmatprep.mubr.f32.mxu0 %v1407_v52  ;;  %v514_v61 = vpop.f32.mrf.mxu0  ;;  %v1239_v4 = vadd.f32 %v2447_v56, %v3293_v46  ;;  %v691_v56 = vmax.f32 %v445_v35, 0.0 }
 0x10e   :  { %v1233_v0 = vpop.f32.mrf.mxu1  ;;  %v515_v5 = vadd.f32 %v3288_v44, %v514_v61  ;;  %v706_v39 = vmax.f32 %v520_v50, 0.0  ;;  %v1411_v61 = vmax.f32 %v1169_v59, 0.0  ;;  %v693_v50 = vmax.f32 %v455_v54, 0.0 }
 0x10f   :  { %v1234_v51 = vadd.f32 %v3293_v46, %v1233_v0  ;;  %v2346_v9 = vpop.f32.mrf.mxu0  ;;  %v1425_v25 = vmax.f32 %v1239_v4, 0.0 }
 0x110   :  { %1635 = vmatmul.mubr.f32.gmra.mxu0 %v688_v57  ;;  %v2450_v8 = vpop.f32.mrf.mxu1  ;;  %v705_v12 = vmax.f32 %v515_v5, 0.0  ;;  %v530_v57 = vadd.f32 %v2346_v9, %v3288_v44  ;;  %v692_v5 = vmax.f32 %v450_v58, 0.0 }
 0x111   :  { %v1424_v13 = vmax.f32 %v1234_v51, 0.0  ;;  %1639 = vmatprep.mubr.f32.mxu0 %v1408_v1  ;;  %v524_v31 = vpop.f32.mrf.mxu0  ;;  %v1249_v52 = vadd.f32 %v2450_v8, %v3293_v46 }
 0x112   :  { %v1243_v17 = vpop.f32.mrf.mxu1  ;;  %v525_v40 = vadd.f32 %v3288_v44, %v524_v31  ;;  %v708_v51 = vmax.f32 %v530_v57, 0.0 }
 0x113   :  { %1719 = vmatprep.mubr.f32.mxu1 %v1424_v13  ;;  %v1244_v26 = vadd.f32 %v3293_v46, %v1243_v17  ;;  %v2349_v53 = vpop.f32.mrf.mxu0  ;;  %v1427_v0 = vmax.f32 %v1249_v52, 0.0  ;;  %v1412_v13 = vmax.f32 %v1174_v55, 0.0  ;;  %v695_v52 = vmax.f32 %v465_v62, 0.0 }
 0x114   :  { %1640 = vmatmul.mubr.f32.gmra.mxu0 %v689_v16  ;;  %1720 = vmatmul.mubr.f32.vlgmr.msra.gmra.mxu1 %v705_v12  ;;  %v2453_v32 = vpop.f32.mrf.mxu1  ;;  %v707_v60 = vmax.f32 %v525_v40, 0.0  ;;  %v1179_v12 = vadd.f32 %v3346_v63, %v3293_v46  ;;  %v540_v17 = vadd.f32 %v2349_v53, %v3288_v44  ;;  %v1184_v63 = vadd.f32 %v3293_v46, %v3362_v11 }
 0x115   :  { %v1426_v34 = vmax.f32 %v1244_v26, 0.0  ;;  %1644 = vmatprep.mubr.f32.mxu0 %v1409_v21  ;;  %1724 = vmatprep.mubr.f32.mxu1 %v1425_v25  ;;  %v534_v1 = vpop.f32.mrf.mxu0  ;;  %v1259_v3 = vadd.f32 %v2453_v32, %v3293_v46  ;;  %v1189_v40 = vadd.f32 %v3356_v7, %v3293_v46  ;;  %v1194_v7 = vadd.f32 %v3293_v46, %v3372_v20 }
 0x116   :  { %v1253_v45 = vpop.f32.mrf.mxu1  ;;  %v535_v8 = vadd.f32 %v3288_v44, %v534_v1  ;;  %v1413_v25 = vmax.f32 %v1179_v12, 0.0 }
 0x117   :  { %v1254_v38 = vadd.f32 %v3293_v46, %v1253_v45  ;;  %v2352_v48 = vpop.f32.mrf.mxu0  ;;  %v1429_v26 = vmax.f32 %v1259_v3, 0.0  ;;  %v1414_v45 = vmax.f32 %v1184_v63, 0.0 }
 0x118   :  { %1645 = vmatmul.mubr.f32.gmra.mxu0 %v690_v47  ;;  %1725 = vmatmul.mubr.f32.gmra.mxu1 %v706_v39  ;;  %v2456_v37 = vpop.f32.mrf.mxu1  ;;  %v709_v21 = vmax.f32 %v535_v8, 0.0  ;;  %v710_v47 = vmax.f32 %v540_v17, 0.0  ;;  %v550_v53 = vadd.f32 %v2352_v48, %v3288_v44  ;;  %v697_v8 = vmax.f32 %v475_v6, 0.0 }
 0x119   :  { %1649 = vmatprep.mubr.f32.mxu0 %v1410_v49  ;;  %1729 = vmatprep.mubr.f32.mxu1 %v1426_v34  ;;  %v1428_v4 = vmax.f32 %v1254_v38, 0.0  ;;  %v544_v31 = vpop.f32.mrf.mxu0  ;;  %v694_v34 = vmax.f32 %v460_v2, 0.0  ;;  %v1269_v11 = vadd.f32 %v2456_v37, %v3293_v46 }
 0x11a   :  { %v1263_v9 = vpop.f32.mrf.mxu1  ;;  %v545_v35 = vadd.f32 %v3288_v44, %v544_v31  ;;  %v712_v55 = vmax.f32 %v550_v53, 0.0 }
 0x11b   :  { %v1264_v16 = vadd.f32 %v3293_v46, %v1263_v9  ;;  %v2355_v59 = vpop.f32.mrf.mxu0  ;;  %v1431_v57 = vmax.f32 %v1269_v11, 0.0  ;;  %v700_v11 = vmax.f32 %v490_v27, 0.0 }
 0x11c   :  { %1650 = vmatmul.mubr.f32.gmra.mxu0 %v691_v56  ;;  %1730 = vmatmul.mubr.f32.gmra.mxu1 %v707_v60  ;;  %v2459_v22 = vpop.f32.mrf.mxu1  ;;  %v711_v38 = vmax.f32 %v545_v35, 0.0  ;;  %v1415_v56 = vmax.f32 %v1189_v40, 0.0  ;;  %v560_v9 = vadd.f32 %v2355_v59, %v3288_v44 }
 0x11d   :  { %1654 = vmatprep.mubr.f32.mxu0 %v1411_v61  ;;  %1734 = vmatprep.mubr.f32.mxu1 %v1427_v0  ;;  %v1430_v32 = vmax.f32 %v1264_v16, 0.0  ;;  %v554_v60 = vpop.f32.mrf.mxu0  ;;  %v696_v61 = vmax.f32 %v470_v10, 0.0  ;;  %v1279_v20 = vadd.f32 %v2459_v22, %v3293_v46 }
 0x11e   :  { %v1273_v39 = vpop.f32.mrf.mxu1  ;;  %v555_v0 = vadd.f32 %v3288_v44, %v554_v60  ;;  %v714_v17 = vmax.f32 %v560_v9, 0.0 }
 0x11f   :  { %v1274_v49 = vadd.f32 %v3293_v46, %v1273_v39  ;;  %v2358_v54 = vpop.f32.mrf.mxu0  ;;  %v1433_v48 = vmax.f32 %v1279_v20, 0.0  ;;  %v1229_v20 = vadd.f32 %v3401_v42, %v3293_v46 }
 0x120   :  { %1655 = vmatmul.mubr.f32.gmra.mxu0 %v692_v5  ;;  %1735 = vmatmul.mubr.f32.gmra.mxu1 %v708_v51  ;;  %v2462_v58 = vpop.f32.mrf.mxu1  ;;  %v1416_v5 = vmax.f32 %v1194_v7, 0.0  ;;  %v713_v12 = vmax.f32 %v555_v0, 0.0  ;;  %v702_v0 = vmax.f32 %v500_v36, 0.0 }
 0x121   :  { %1659 = vmatprep.mubr.f32.mxu0 %v1412_v13  ;;  %1739 = vmatprep.mubr.f32.mxu1 %v1428_v4  ;;  %v1432_v37 = vmax.f32 %v1274_v49, 0.0  ;;  %v1199_v4 = vadd.f32 %v3367_v15, %v3293_v46  ;;  %v1204_v15 = vadd.f32 %v3293_v46, %v3384_v28  ;;  %v564_v16 = vpop.f32.mrf.mxu0  ;;  %v1289_v28 = vadd.f32 %v2462_v58, %v3293_v46 }
 0x122   :  { %v1283_v1 = vpop.f32.mrf.mxu1 }
 0x123   :  { %v1284_v51 = vadd.f32 %v3293_v46, %v1283_v1  ;;  %v1417_v3 = vmax.f32 %v1199_v4, 0.0  ;;  %v1418_v63 = vmax.f32 %v1204_v15, 0.0  ;;  %v1435_v39 = vmax.f32 %v1289_v28, 0.0 }
 0x124   :  { %1660 = vmatmul.mubr.f32.gmra.mxu0 %v693_v50  ;;  %1740 = vmatmul.mubr.f32.gmra.mxu1 %v709_v21  ;;  %v2465_v13 = vpop.f32.mrf.mxu1  ;;  %v698_v50 = vmax.f32 %v480_v19, 0.0  ;;  %v565_v21 = vadd.f32 %v3288_v44, %v564_v16  ;;  %v704_v16 = vmax.f32 %v510_v18, 0.0 }
 0x125   :  { %1664 = vmatprep.mubr.f32.mxu0 %v1413_v25  ;;  %1744 = vmatprep.mubr.f32.mxu1 %v1429_v26  ;;  %v1434_v2 = vmax.f32 %v1284_v51, 0.0  ;;  %v1209_v25 = vadd.f32 %v3378_v24, %v3293_v46  ;;  %v2361_v26 = vpop.f32.mrf.mxu0  ;;  %v1214_v24 = vadd.f32 %v3293_v46, %v3395_v29  ;;  %v1299_v29 = vadd.f32 %v2465_v13, %v3293_v46 }
 0x126   :  { %v1293_v22 = vpop.f32.mrf.mxu1  ;;  %v715_v62 = vmax.f32 %v565_v21, 0.0  ;;  %v580_v7 = vadd.f32 %v2361_v26, %v3288_v44 }
 0x127   :  { %v1294_v31 = vadd.f32 %v3293_v46, %v1293_v22  ;;  %v1419_v35 = vmax.f32 %v1209_v25, 0.0  ;;  %v574_v40 = vpop.f32.mrf.mxu0  ;;  %v1420_v53 = vmax.f32 %v1214_v24, 0.0 }
 0x128   :  { %1665 = vmatmul.mubr.f32.gmra.mxu0 %v694_v34  ;;  %1745 = vmatmul.mubr.f32.gmra.mxu1 %v710_v47  ;;  %v570_v34 = vadd.f32 %v2358_v54, %v3288_v44  ;;  %v2468_v47 = vpop.f32.mrf.mxu1  ;;  %v575_v49 = vadd.f32 %v3288_v44, %v574_v40  ;;  %v718_v1 = vmax.f32 %v580_v7, 0.0 }
 0x129   :  { %1669 = vmatprep.mubr.f32.mxu0 %v1414_v45  ;;  %1749 = vmatprep.mubr.f32.mxu1 %v1430_v32  ;;  %v699_v32 = vmax.f32 %v485_v14, 0.0  ;;  %v1436_v45 = vmax.f32 %v1294_v31, 0.0 }
 0x12a   :  { %v716_v59 = vmax.f32 %v570_v34, 0.0  ;;  %v1303_v10 = vpop.f32.mrf.mxu1 }
 0x12b   :  { %v1304_v58 = vadd.f32 %v3293_v46, %v1303_v10 }
 0x12c   :  { %1670 = vmatmul.mubr.f32.gmra.mxu0 %v695_v52  ;;  %1750 = vmatmul.mubr.f32.gmra.mxu1 %v711_v38  ;;  %v1219_v52 = vadd.f32 %v3389_v30, %v3293_v46  ;;  %v2364_v38 = vpop.f32.mrf.mxu0  ;;  %v2471_v60 = vpop.f32.mrf.mxu1  ;;  %v1224_v30 = vadd.f32 %v3293_v46, %v3407_v41  ;;  %v1309_v41 = vadd.f32 %v2468_v47, %v3293_v46 }
 0x12d   :  { %1674 = vmatprep.mubr.f32.mxu0 %v1415_v56  ;;  %1754 = vmatprep.mubr.f32.mxu1 %v1431_v57  ;;  %v701_v56 = vmax.f32 %v495_v23, 0.0  ;;  %v717_v57 = vmax.f32 %v575_v49, 0.0  ;;  %v590_v9 = vadd.f32 %v2364_v38, %v3288_v44  ;;  %v1319_v43 = vadd.f32 %v2471_v60, %v3293_v46 }
 0x12e   :  { %v584_v6 = vpop.f32.mrf.mxu0  ;;  %v1422_v54 = vmax.f32 %v1224_v30, 0.0  ;;  %v1439_v42 = vmax.f32 %v1309_v41, 0.0 }
 0x12f   :  { %v585_v4 = vadd.f32 %v3288_v44, %v584_v6  ;;  %v1441_v28 = vmax.f32 %v1319_v43, 0.0 }
 0x130   :  { %1675 = vmatmul.mubr.f32.gmra.mxu0 %v696_v61  ;;  %1755 = vmatmul.mubr.f32.gmra.mxu1 %v712_v55  ;;  %v1437_v61 = vmax.f32 %v1299_v29, 0.0  ;;  %v1438_v55 = vmax.f32 %v1304_v58, 0.0  ;;  %v2367_v51 = vpop.f32.mrf.mxu0 }
 0x131   :  { %1679 = vmatprep.mubr.f32.mxu0 %v1416_v5  ;;  %1759 = vmatprep.mubr.f32.mxu1 %v1432_v37  ;;  %v1421_v37 = vmax.f32 %v1219_v52, 0.0  ;;  %v1313_v5 = vpop.f32.mrf.mxu1  ;;  %v600_v22 = vadd.f32 %v2367_v51, %v3288_v44 }
 0x132   :  { %v1314_v19 = vadd.f32 %v3293_v46, %v1313_v5  ;;  %v594_v15 = vpop.f32.mrf.mxu0 }
 0x133   :  { %v2474_v13 = vpop.f32.mrf.mxu1  ;;  %v722_v27 = vmax.f32 %v600_v22, 0.0 }
 0x134   :  { %1680 = vmatmul.mubr.f32.gmra.mxu0 %v697_v8  ;;  %1760 = vmatmul.mubr.f32.gmra.mxu1 %v713_v12  ;;  %v703_v8 = vmax.f32 %v505_v33, 0.0  ;;  %v719_v12 = vmax.f32 %v585_v4, 0.0 }
 0x135   :  { %1684 = vmatprep.mubr.f32.mxu0 %v1417_v3  ;;  %1764 = vmatprep.mubr.f32.mxu1 %v1433_v48  ;;  %v1423_v3 = vmax.f32 %v1229_v20, 0.0  ;;  %v1440_v48 = vmax.f32 %v1314_v19, 0.0  ;;  %v1323_v14 = vpop.f32.mrf.mxu1 }
 0x136   :  { %v1324_v21 = vadd.f32 %v3293_v46, %v1323_v14 }
 0x138   :  { %1685 = vmatmul.mubr.f32.gmra.mxu0 %v698_v50  ;;  %1765 = vmatmul.mubr.f32.gmra.mxu1 %v714_v17  ;;  %v595_v50 = vadd.f32 %v3288_v44, %v594_v15  ;;  %v2370_v17 = vpop.f32.mrf.mxu0  ;;  %v1442_v31 = vmax.f32 %v1324_v21, 0.0 }
 0x139   :  { %1689 = vmatprep.mubr.f32.mxu0 %v1418_v63  ;;  %1769 = vmatprep.mubr.f32.mxu1 %v1434_v2  ;;  %v720_v2 = vmax.f32 %v590_v9, 0.0  ;;  %v2477_v63 = vpop.f32.mrf.mxu1  ;;  %v610_v24 = vadd.f32 %v2370_v17, %v3288_v44 }
 0x13a   :  { %v721_v25 = vmax.f32 %v595_v50, 0.0  ;;  %v604_v26 = vpop.f32.mrf.mxu0  ;;  %v1339_v52 = vadd.f32 %v2477_v63, %v3293_v46 }
 0x13b   :  { %v1333_v34 = vpop.f32.mrf.mxu1 }
 0x13c   :  { %1690 = vmatmul.mubr.f32.gmra.mxu0 %v699_v32  ;;  %1770 = vmatmul.mubr.f32.gmra.mxu1 %v715_v62  ;;  %v605_v32 = vadd.f32 %v3288_v44, %v604_v26  ;;  %v1329_v62 = vadd.f32 %v2474_v13, %v3293_v46  ;;  %v2373_v47 = vpop.f32.mrf.mxu0 }
 0x13d   :  { %1694 = vmatprep.mubr.f32.mxu0 %v1419_v35  ;;  %1774 = vmatprep.mubr.f32.mxu1 %v1435_v39  ;;  %v1334_v35 = vadd.f32 %v3293_v46, %v1333_v34  ;;  %v2480_v40 = vpop.f32.mrf.mxu1  ;;  %v620_v38 = vadd.f32 %v2373_v47, %v3288_v44 }
 0x13e   :  { %v723_v39 = vmax.f32 %v605_v32, 0.0 }
 0x13f   :  { %v1444_v23 = vmax.f32 %v1334_v35, 0.0  ;;  %v1343_v10 = vpop.f32.mrf.mxu1  ;;  %v726_v60 = vmax.f32 %v620_v38, 0.0 }
 0x140   :  { %1695 = vmatmul.mubr.f32.gmra.mxu0 %v700_v11  ;;  %1775 = vmatmul.mubr.f32.gmra.mxu1 %v716_v59  ;;  %v614_v11 = vpop.f32.mrf.mxu0  ;;  %v724_v59 = vmax.f32 %v610_v24, 0.0  ;;  %v1344_v29 = vadd.f32 %v3293_v46, %v1343_v10 }
 0x141   :  { %1699 = vmatprep.mubr.f32.mxu0 %v1420_v53  ;;  %1779 = vmatprep.mubr.f32.mxu1 %v1436_v45  ;;  %v1443_v45 = vmax.f32 %v1329_v62, 0.0  ;;  %v615_v49 = vadd.f32 %v3288_v44, %v614_v11  ;;  %v2483_v36 = vpop.f32.mrf.mxu1 }
 0x142   :  { %v2376_v53 = vpop.f32.mrf.mxu0  ;;  %v1359_v19 = vadd.f32 %v2483_v36, %v3293_v46 }
 0x143   :  { %v725_v58 = vmax.f32 %v615_v49, 0.0  ;;  %v1353_v30 = vpop.f32.mrf.mxu1 }
 0x144   :  { %1700 = vmatmul.mubr.f32.gmra.mxu0 %v701_v56  ;;  %1780 = vmatmul.mubr.f32.gmra.mxu1 %v717_v57  ;;  %v1445_v56 = vmax.f32 %v1339_v52, 0.0  ;;  %v624_v7 = vpop.f32.mrf.mxu0  ;;  %v1446_v57 = vmax.f32 %v1344_v29, 0.0 }
 0x145   :  { %1704 = vmatprep.mubr.f32.mxu0 %v1421_v37  ;;  %1784 = vmatprep.mubr.f32.mxu1 %v1437_v61  ;;  %v625_v37 = vadd.f32 %v3288_v44, %v624_v7  ;;  %v1349_v61 = vadd.f32 %v2480_v40, %v3293_v46 }
 0x146   :  { %v2379_v6 = vpop.f32.mrf.mxu0 }
 0x147   :  { %v727_v33 = vmax.f32 %v625_v37, 0.0  ;;  %v1447_v4 = vmax.f32 %v1349_v61, 0.0  ;;  %v640_v9 = vadd.f32 %v2379_v6, %v3288_v44 }
 0x148   :  { %1705 = vmatmul.mubr.f32.gmra.mxu0 %v702_v0  ;;  %1785 = vmatmul.mubr.f32.gmra.mxu1 %v718_v1  ;;  %v630_v0 = vadd.f32 %v2376_v53, %v3288_v44  ;;  %v2486_v1 = vpop.f32.mrf.mxu1  ;;  %v634_v5 = vpop.f32.mrf.mxu0  ;;  %v3540_v53 = vld [vmem:[%s3866_s4] ss:$0 sm:$0xff] }
 0x149   :  { %1709 = vmatprep.mubr.f32.mxu0 %v1422_v54  ;;  %1789 = vmatprep.mubr.f32.mxu1 %v1438_v55  ;;  %v1354_v55 = vadd.f32 %v3293_v46, %v1353_v30  ;;  %v635_v41 = vadd.f32 %v3288_v44, %v634_v5  ;;  %v1369_v50 = vadd.f32 %v2486_v1, %v3293_v46 }
 0x14a   :  { %v728_v54 = vmax.f32 %v630_v0, 0.0  ;;  %v1363_v51 = vpop.f32.mrf.mxu1  ;;  %v2382_v18 = vpop.f32.mrf.mxu0 }
 0x14b   :  { %v1448_v20 = vmax.f32 %v1354_v55, 0.0  ;;  %v650_v17 = vadd.f32 %v2382_v18, %v3288_v44 }
 0x14c   :  { %1710 = vmatmul.mubr.f32.gmra.mxu0 %v703_v8  ;;  %1790 = vmatmul.mubr.f32.gmra.mxu1 %v719_v12  ;;  %v1364_v8 = vadd.f32 %v3293_v46, %v1363_v51  ;;  %v729_v12 = vmax.f32 %v635_v41, 0.0  ;;  %v2489_v13 = vpop.f32.mrf.mxu1 }
 0x14d   :  { %1714 = vmatprep.mubr.f32.mxu0 %v1423_v3  ;;  %1794 = vmatprep.mubr.f32.mxu1 %v1439_v42  ;;  %v1449_v3 = vmax.f32 %v1359_v19, 0.0  ;;  %v644_v42 = vpop.f32.mrf.mxu0  ;;  %v732_v26 = vmax.f32 %v650_v17, 0.0  ;;  %v1379_v32 = vadd.f32 %v2489_v13, %v3293_v46 }
 0x14e   :  { %v1450_v15 = vmax.f32 %v1364_v8, 0.0 }
 0x14f   :  { %v2385_v14 = vpop.f32.mrf.mxu0  ;;  %v1453_v24 = vmax.f32 %v1379_v32, 0.0 }
 0x150   :  { %1715 = vmatmul.mubr.f32.gmra.mxu0 %v704_v16  ;;  %1795 = vmatmul.mubr.f32.gmra.mxu1 %v720_v2  ;;  %v645_v16 = vadd.f32 %v3288_v44, %v644_v42  ;;  %v1373_v2 = vpop.f32.mrf.mxu1  ;;  %v660_v47 = vadd.f32 %v2385_v14, %v3288_v44 }
 0x151   :  { %1799 = vmatprep.mubr.f32.mxu1 %v1440_v48  ;;  %v730_v48 = vmax.f32 %v640_v9, 0.0  ;;  %v1374_v43 = vadd.f32 %v3293_v46, %v1373_v2  ;;  %v654_v63 = vpop.f32.mrf.mxu0 }
 0x152   :  { %v731_v21 = vmax.f32 %v645_v16, 0.0  ;;  %v2492_v22 = vpop.f32.mrf.mxu1 }
 0x153   :  { %v2388_v34 = vpop.f32.mrf.mxu0 }
 0x154   :  { %1800 = vmatmul.mubr.f32.gmra.mxu1 %v721_v25  ;;  %v1451_v25 = vmax.f32 %v1369_v50, 0.0 }
 0x155   :  { %1804 = vmatprep.mubr.f32.mxu1 %v1441_v28  ;;  %v1452_v28 = vmax.f32 %v1374_v43, 0.0 }
 0x158   :  { %1805 = vmatmul.mubr.f32.gmra.mxu1 %v722_v27  ;;  %v1383_v27 = vpop.f32.mrf.mxu1 }
 0x159   :  { %1809 = vmatprep.mubr.f32.mxu1 %v1442_v31  ;;  %v655_v31 = vadd.f32 %v3288_v44, %v654_v63  ;;  %v1384_v62 = vadd.f32 %v3293_v46, %v1383_v27 }
 0x15b   :  { %v733_v35 = vmax.f32 %v655_v31, 0.0  ;;  %v1454_v40 = vmax.f32 %v1384_v62, 0.0 }
 0x15c   :  { %1810 = vmatmul.mubr.f32.gmra.mxu1 %v723_v39  ;;  %v664_v39 = vpop.f32.mrf.mxu0 }
 0x15d   :  { %1814 = vmatprep.mubr.f32.mxu1 %v1443_v45  ;;  %v734_v45 = vmax.f32 %v660_v47, 0.0  ;;  %v665_v11 = vadd.f32 %v3288_v44, %v664_v39 }
 0x15f   :  { %v735_v49 = vmax.f32 %v665_v11, 0.0 }
 0x160   :  { %1815 = vmatmul.mubr.f32.gmra.mxu1 %v724_v59  ;;  %v670_v59 = vadd.f32 %v2388_v34, %v3288_v44 }
 0x161   :  { %1819 = vmatprep.mubr.f32.mxu1 %v1444_v23  ;;  %v1389_v23 = vadd.f32 %v2492_v22, %v3293_v46 }
 0x162   :  { %v736_v52 = vmax.f32 %v670_v59, 0.0 }
 0x163   :  { %v1455_v10 = vmax.f32 %v1389_v23, 0.0 }
 0x164   :  { %1820 = vmatmul.mubr.f32.gmra.mxu1 %v725_v58 }
 0x165   :  { %1824 = vmatprep.mubr.f32.mxu1 %v1445_v56 }
 0x168   :  { %1825 = vmatmul.mubr.f32.gmra.mxu1 %v726_v60 }
 0x169   :  { %1829 = vmatprep.mubr.f32.mxu1 %v1446_v57 }
 0x16c   :  { %1830 = vmatmul.mubr.f32.gmra.mxu1 %v727_v33 }
 0x16d   :  { %1834 = vmatprep.mubr.f32.mxu1 %v1447_v4 }
 0x170   :  { %1835 = vmatmul.mubr.f32.gmra.mxu1 %v728_v54 }
 0x171   :  { %1839 = vmatprep.mubr.f32.mxu1 %v1448_v20 }
 0x174   :  { %1840 = vmatmul.mubr.f32.gmra.mxu1 %v729_v12 }
 0x175   :  { %1844 = vmatprep.mubr.f32.mxu1 %v1449_v3 }
 0x178   :  { %1845 = vmatmul.mubr.f32.gmra.mxu1 %v730_v48 }
 0x179   :  { %1849 = vmatprep.mubr.f32.mxu1 %v1450_v15 }
 0x17c   :  { %1850 = vmatmul.mubr.f32.gmra.mxu1 %v731_v21 }
 0x17d   :  { %1854 = vmatprep.mubr.f32.mxu1 %v1451_v25 }
 0x180   :  { %1855 = vmatmul.mubr.f32.gmra.mxu1 %v732_v26 }
 0x181   :  { %1859 = vmatprep.mubr.f32.mxu1 %v1452_v28 }
 0x184   :  { %1860 = vmatmul.mubr.f32.gmra.mxu1 %v733_v35 }
 0x185   :  { %1864 = vmatprep.mubr.f32.mxu1 %v1453_v24 }
 0x188   :  { %1865 = vmatmul.mubr.f32.gmra.mxu1 %v734_v45 }
 0x189   :  { %1869 = vmatprep.mubr.f32.mxu1 %v1454_v40 }
 0x18c   :  { %1870 = vmatmul.mubr.f32.gmra.mxu1 %v735_v49 }
 0x18d   :  { %1874 = vmatprep.mubr.f32.mxu1 %v1455_v10 }
 0x190   :  { %1875 = vmatmul.mubr.f32.gmra.mxu1 %v736_v52 }
 0x194   :  { %v1561_v29 = vpop.f32.mrf.mxu0 }
 0x195   :  { %v1562_v38 = vadd.f32 %v3540_v53, %v1561_v29 }
 0x196   :  { %v1563_v46 = vpop.f32.mrf.mxu0 }
 0x197   :  { %1881 = vst.msk [vmem:[%s3867_s5] sm:$0xff] %vm1880_vm1, %v1562_v38 }
 0x198   :  { %v1566_v44 = vpop.f32.mrf.mxu0 }
 0x199   :  { %v1567_v58 = vadd.f32 %v3540_v53, %v1566_v44 }
 0x19a   :  { %v1568_v36 = vpop.f32.mrf.mxu0 }
 0x19b   :  { %1882 = vst.msk [vmem:[%s3867_s5 + $0x8] sm:$0xff] %vm1880_vm1, %v1567_v58 }
 0x19c   :  { %v1571_v56 = vpop.f32.mrf.mxu0 }
 0x19d   :  { %v1572_v7 = vadd.f32 %v3540_v53, %v1571_v56 }
 0x19e   :  { %v1573_v57 = vpop.f32.mrf.mxu0 }
 0x19f   :  { %1883 = vst.msk [vmem:[%s3867_s5 + $0x10] sm:$0xff] %vm1880_vm1, %v1572_v7 }
 0x1a0   :  { %v1576_v60 = vpop.f32.mrf.mxu0 }
 0x1a1   :  { %v1577_v37 = vadd.f32 %v3540_v53, %v1576_v60 }
 0x1a2   :  { %v1578_v30 = vpop.f32.mrf.mxu0 }
 0x1a3   :  { %1884 = vst.msk [vmem:[%s3867_s5 + $0x18] sm:$0xff] %vm1880_vm1, %v1577_v37 }
 0x1a4   :  { %v1581_v61 = vpop.f32.mrf.mxu0 }
 0x1a5   :  { %v1582_v6 = vadd.f32 %v3540_v53, %v1581_v61 }
 0x1a6   :  { %v1583_v55 = vpop.f32.mrf.mxu0 }
 0x1a7   :  { %1885 = vst.msk [vmem:[%s3867_s5 + $0x20] sm:$0xff] %vm1880_vm1, %v1582_v6 }
 0x1a8   :  { %v1586_v0 = vpop.f32.mrf.mxu0 }
 0x1a9   :  { %v1587_v33 = vadd.f32 %v3540_v53, %v1586_v0 }
 0x1aa   :  { %v1588_v1 = vpop.f32.mrf.mxu0 }
 0x1ab   :  { %1886 = vst.msk [vmem:[%s3867_s5 + $0x28] sm:$0xff] %vm1880_vm1, %v1587_v33 }
 0x1ac   :  { %v1591_v4 = vpop.f32.mrf.mxu0 }
 0x1ad   :  { %v1592_v5 = vadd.f32 %v3540_v53, %v1591_v4 }
 0x1ae   :  { %v1593_v20 = vpop.f32.mrf.mxu0 }
 0x1af   :  { %1887 = vst.msk [vmem:[%s3867_s5 + $0x30] sm:$0xff] %vm1880_vm1, %v1592_v5 }
 0x1b0   :  { %v1596_v54 = vpop.f32.mrf.mxu0 }
 0x1b1   :  { %v1597_v41 = vadd.f32 %v3540_v53, %v1596_v54 }
 0x1b2   :  { %v1598_v51 = vpop.f32.mrf.mxu0 }
 0x1b3   :  { %1888 = vst.msk [vmem:[%s3867_s5 + $0x38] sm:$0xff] %vm1880_vm1, %v1597_v41 }
 0x1b4   :  { %v1601_v19 = vpop.f32.mrf.mxu0 }
 0x1b5   :  { %v1602_v18 = vadd.f32 %v3540_v53, %v1601_v19 }
 0x1b6   :  { %v1603_v8 = vpop.f32.mrf.mxu0 }
 0x1b7   :  { %1889 = vst.msk [vmem:[%s3867_s5 + $0x40] sm:$0xff] %vm1880_vm1, %v1602_v18 }
 0x1b8   :  { %v1606_v9 = vpop.f32.mrf.mxu0 }
 0x1b9   :  { %v1607_v12 = vadd.f32 %v3540_v53, %v1606_v9 }
 0x1ba   :  { %v1608_v13 = vpop.f32.mrf.mxu0 }
 0x1bb   :  { %1890 = vst.msk [vmem:[%s3867_s5 + $0x48] sm:$0xff] %vm1880_vm1, %v1607_v12 }
 0x1bc   :  { %v1611_v3 = vpop.f32.mrf.mxu0 }
 0x1bd   :  { %v1612_v42 = vadd.f32 %v3540_v53, %v1611_v3 }
 0x1be   :  { %v1613_v15 = vpop.f32.mrf.mxu0 }
 0x1bf   :  { %1891 = vst.msk [vmem:[%s3867_s5 + $0x50] sm:$0xff] %vm1880_vm1, %v1612_v42 }
 0x1c0   :  { %v1616_v48 = vpop.f32.mrf.mxu0 }
 0x1c1   :  { %v1617_v16 = vadd.f32 %v3540_v53, %v1616_v48 }
 0x1c2   :  { %v1618_v2 = vpop.f32.mrf.mxu0 }
 0x1c3   :  { %1892 = vst.msk [vmem:[%s3867_s5 + $0x58] sm:$0xff] %vm1880_vm1, %v1617_v16 }
 0x1c4   :  { %v1621_v50 = vpop.f32.mrf.mxu0 }
 0x1c5   :  { %v1622_v14 = vadd.f32 %v3540_v53, %v1621_v50 }
 0x1c6   :  { %v1623_v43 = vpop.f32.mrf.mxu0 }
 0x1c7   :  { %1893 = vst.msk [vmem:[%s3867_s5 + $0x60] sm:$0xff] %vm1880_vm1, %v1622_v14 }
 0x1c8   :  { %v1626_v17 = vpop.f32.mrf.mxu0 }
 0x1c9   :  { %v1627_v21 = vadd.f32 %v3540_v53, %v1626_v17 }
 0x1ca   :  { %v1628_v22 = vpop.f32.mrf.mxu0 }
 0x1cb   :  { %1894 = vst.msk [vmem:[%s3867_s5 + $0x68] sm:$0xff] %vm1880_vm1, %v1627_v21 }
 0x1cc   :  { %v1631_v25 = vpop.f32.mrf.mxu0 }
 0x1cd   :  { %v1632_v63 = vadd.f32 %v3540_v53, %v1631_v25 }
 0x1ce   :  { %v1633_v28 = vpop.f32.mrf.mxu0 }
 0x1cf   :  { %1895 = vst.msk [vmem:[%s3867_s5 + $0x70] sm:$0xff] %vm1880_vm1, %v1632_v63 }
 0x1d0   :  { %v1636_v26 = vpop.f32.mrf.mxu0 }
 0x1d1   :  { %v1637_v31 = vadd.f32 %v3540_v53, %v1636_v26 }
 0x1d2   :  { %v1638_v27 = vpop.f32.mrf.mxu0 }
 0x1d3   :  { %1896 = vst.msk [vmem:[%s3867_s5 + $0x78] sm:$0xff] %vm1880_vm1, %v1637_v31 }
 0x1d4   :  { %v1641_v32 = vpop.f32.mrf.mxu0  ;;  %v1721_v34 = vpop.f32.mrf.mxu1 }
 0x1d5   :  { %v1642_v62 = vadd.f32 %v3540_v53, %v1641_v32  ;;  %v1722_v47 = vadd.f32 %v3540_v53, %v1721_v34 }
 0x1d6   :  { %v1643_v35 = vpop.f32.mrf.mxu0  ;;  %v1723_v24 = vpop.f32.mrf.mxu1 }
 0x1d7   :  { %1897 = vst.msk [vmem:[%s3867_s5 + $0x80] sm:$0xff] %vm1880_vm1, %v1642_v62  ;;  %1913 = vst.msk [vmem:[%s3867_s5 + $0x100] sm:$0xff] %vm1880_vm1, %v1722_v47 }
 0x1d8   :  { %v1646_v39 = vpop.f32.mrf.mxu0  ;;  %v1726_v40 = vpop.f32.mrf.mxu1 }
 0x1d9   :  { %v1647_v45 = vadd.f32 %v3540_v53, %v1646_v39  ;;  %v1727_v11 = vadd.f32 %v3540_v53, %v1726_v40 }
 0x1da   :  { %v1648_v23 = vpop.f32.mrf.mxu0  ;;  %v1728_v59 = vpop.f32.mrf.mxu1 }
 0x1db   :  { %1898 = vst.msk [vmem:[%s3867_s5 + $0x88] sm:$0xff] %vm1880_vm1, %v1647_v45  ;;  %1914 = vst.msk [vmem:[%s3867_s5 + $0x108] sm:$0xff] %vm1880_vm1, %v1727_v11 }
 0x1dc   :  { %v1651_v49 = vpop.f32.mrf.mxu0  ;;  %v1731_v10 = vpop.f32.mrf.mxu1 }
 0x1dd   :  { %v1652_v52 = vadd.f32 %v3540_v53, %v1651_v49  ;;  %v1732_v29 = vadd.f32 %v3540_v53, %v1731_v10 }
 0x1de   :  { %v1653_v38 = vpop.f32.mrf.mxu0  ;;  %v1733_v46 = vpop.f32.mrf.mxu1 }
 0x1df   :  { %1899 = vst.msk [vmem:[%s3867_s5 + $0x90] sm:$0xff] %vm1880_vm1, %v1652_v52  ;;  %1915 = vst.msk [vmem:[%s3867_s5 + $0x110] sm:$0xff] %vm1880_vm1, %v1732_v29 }
 0x1e0   :  { %v1656_v44 = vpop.f32.mrf.mxu0  ;;  %v1736_v58 = vpop.f32.mrf.mxu1 }
 0x1e1   :  { %v1657_v36 = vadd.f32 %v3540_v53, %v1656_v44  ;;  %v1737_v56 = vadd.f32 %v3540_v53, %v1736_v58 }
 0x1e2   :  { %v1658_v7 = vpop.f32.mrf.mxu0  ;;  %v1738_v57 = vpop.f32.mrf.mxu1 }
 0x1e3   :  { %1900 = vst.msk [vmem:[%s3867_s5 + $0x98] sm:$0xff] %vm1880_vm1, %v1657_v36  ;;  %1916 = vst.msk [vmem:[%s3867_s5 + $0x118] sm:$0xff] %vm1880_vm1, %v1737_v56 }
 0x1e4   :  { %v1661_v60 = vpop.f32.mrf.mxu0  ;;  %v1741_v37 = vpop.f32.mrf.mxu1 }
 0x1e5   :  { %v1662_v30 = vadd.f32 %v3540_v53, %v1661_v60  ;;  %v1742_v61 = vadd.f32 %v3540_v53, %v1741_v37 }
 0x1e6   :  { %v1663_v6 = vpop.f32.mrf.mxu0  ;;  %v1743_v55 = vpop.f32.mrf.mxu1 }
 0x1e7   :  { %1901 = vst.msk [vmem:[%s3867_s5 + $0xa0] sm:$0xff] %vm1880_vm1, %v1662_v30  ;;  %1917 = vst.msk [vmem:[%s3867_s5 + $0x120] sm:$0xff] %vm1880_vm1, %v1742_v61 }
 0x1e8   :  { %v1666_v0 = vpop.f32.mrf.mxu0  ;;  %v1746_v33 = vpop.f32.mrf.mxu1 }
 0x1e9   :  { %v1667_v1 = vadd.f32 %v3540_v53, %v1666_v0  ;;  %v1747_v4 = vadd.f32 %v3540_v53, %v1746_v33 }
 0x1ea   :  { %v1668_v5 = vpop.f32.mrf.mxu0  ;;  %v1748_v20 = vpop.f32.mrf.mxu1 }
 0x1eb   :  { %1902 = vst.msk [vmem:[%s3867_s5 + $0xa8] sm:$0xff] %vm1880_vm1, %v1667_v1  ;;  %1918 = vst.msk [vmem:[%s3867_s5 + $0x128] sm:$0xff] %vm1880_vm1, %v1747_v4 }
 0x1ec   :  { %v1671_v54 = vpop.f32.mrf.mxu0  ;;  %v1751_v41 = vpop.f32.mrf.mxu1 }
 0x1ed   :  { %v1672_v51 = vadd.f32 %v3540_v53, %v1671_v54  ;;  %v1752_v19 = vadd.f32 %v3540_v53, %v1751_v41 }
 0x1ee   :  { %v1673_v18 = vpop.f32.mrf.mxu0  ;;  %v1753_v8 = vpop.f32.mrf.mxu1 }
 0x1ef   :  { %1903 = vst.msk [vmem:[%s3867_s5 + $0xb0] sm:$0xff] %vm1880_vm1, %v1672_v51  ;;  %1919 = vst.msk [vmem:[%s3867_s5 + $0x130] sm:$0xff] %vm1880_vm1, %v1752_v19 }
 0x1f0   :  { %v1676_v9 = vpop.f32.mrf.mxu0  ;;  %v1756_v12 = vpop.f32.mrf.mxu1 }
 0x1f1   :  { %v1677_v13 = vadd.f32 %v3540_v53, %v1676_v9  ;;  %v1757_v3 = vadd.f32 %v3540_v53, %v1756_v12 }
 0x1f2   :  { %v1678_v42 = vpop.f32.mrf.mxu0  ;;  %v1758_v15 = vpop.f32.mrf.mxu1 }
 0x1f3   :  { %1904 = vst.msk [vmem:[%s3867_s5 + $0xb8] sm:$0xff] %vm1880_vm1, %v1677_v13  ;;  %1920 = vst.msk [vmem:[%s3867_s5 + $0x138] sm:$0xff] %vm1880_vm1, %v1757_v3 }
 0x1f4   :  { %v1681_v48 = vpop.f32.mrf.mxu0  ;;  %v1761_v16 = vpop.f32.mrf.mxu1 }
 0x1f5   :  { %v1682_v2 = vadd.f32 %v3540_v53, %v1681_v48  ;;  %v1762_v50 = vadd.f32 %v3540_v53, %v1761_v16 }
 0x1f6   :  { %v1683_v14 = vpop.f32.mrf.mxu0  ;;  %v1763_v43 = vpop.f32.mrf.mxu1 }
 0x1f7   :  { %1905 = vst.msk [vmem:[%s3867_s5 + $0xc0] sm:$0xff] %vm1880_vm1, %v1682_v2  ;;  %1921 = vst.msk [vmem:[%s3867_s5 + $0x140] sm:$0xff] %vm1880_vm1, %v1762_v50 }
 0x1f8   :  { %v1686_v17 = vpop.f32.mrf.mxu0  ;;  %v1766_v21 = vpop.f32.mrf.mxu1 }
 0x1f9   :  { %v1687_v22 = vadd.f32 %v3540_v53, %v1686_v17  ;;  %v1767_v25 = vadd.f32 %v3540_v53, %v1766_v21 }
 0x1fa   :  { %v1688_v63 = vpop.f32.mrf.mxu0  ;;  %v1768_v28 = vpop.f32.mrf.mxu1 }
 0x1fb   :  { %1906 = vst.msk [vmem:[%s3867_s5 + $0xc8] sm:$0xff] %vm1880_vm1, %v1687_v22  ;;  %1922 = vst.msk [vmem:[%s3867_s5 + $0x148] sm:$0xff] %vm1880_vm1, %v1767_v25 }
 0x1fc   :  { %v1691_v26 = vpop.f32.mrf.mxu0  ;;  %v1771_v31 = vpop.f32.mrf.mxu1 }
 0x1fd   :  { %v1692_v27 = vadd.f32 %v3540_v53, %v1691_v26  ;;  %v1772_v32 = vadd.f32 %v3540_v53, %v1771_v31 }
 0x1fe   :  { %v1693_v34 = vpop.f32.mrf.mxu0  ;;  %v1773_v62 = vpop.f32.mrf.mxu1 }
 0x1ff   :  { %1907 = vst.msk [vmem:[%s3867_s5 + $0xd0] sm:$0xff] %vm1880_vm1, %v1692_v27  ;;  %1923 = vst.msk [vmem:[%s3867_s5 + $0x150] sm:$0xff] %vm1880_vm1, %v1772_v32 }
 0x200   :  { %v1696_v47 = vpop.f32.mrf.mxu0  ;;  %v1776_v35 = vpop.f32.mrf.mxu1 }
 0x201   :  { %v1697_v24 = vadd.f32 %v3540_v53, %v1696_v47  ;;  %v1777_v39 = vadd.f32 %v3540_v53, %v1776_v35 }
 0x202   :  { %v1698_v40 = vpop.f32.mrf.mxu0  ;;  %v1778_v45 = vpop.f32.mrf.mxu1 }
 0x203   :  { %1908 = vst.msk [vmem:[%s3867_s5 + $0xd8] sm:$0xff] %vm1880_vm1, %v1697_v24  ;;  %1924 = vst.msk [vmem:[%s3867_s5 + $0x158] sm:$0xff] %vm1880_vm1, %v1777_v39 }
 0x204   :  { %v1701_v11 = vpop.f32.mrf.mxu0  ;;  %v1781_v23 = vpop.f32.mrf.mxu1 }
 0x205   :  { %v1702_v59 = vadd.f32 %v3540_v53, %v1701_v11  ;;  %v1782_v49 = vadd.f32 %v3540_v53, %v1781_v23 }
 0x206   :  { %v1703_v10 = vpop.f32.mrf.mxu0  ;;  %v1783_v52 = vpop.f32.mrf.mxu1 }
 0x207   :  { %1909 = vst.msk [vmem:[%s3867_s5 + $0xe0] sm:$0xff] %vm1880_vm1, %v1702_v59  ;;  %1925 = vst.msk [vmem:[%s3867_s5 + $0x160] sm:$0xff] %vm1880_vm1, %v1782_v49 }
 0x208   :  { %v1706_v29 = vpop.f32.mrf.mxu0  ;;  %v1786_v38 = vpop.f32.mrf.mxu1 }
 0x209   :  { %v1707_v46 = vadd.f32 %v3540_v53, %v1706_v29  ;;  %v1787_v44 = vadd.f32 %v3540_v53, %v1786_v38 }
 0x20a   :  { %v1708_v58 = vpop.f32.mrf.mxu0  ;;  %v1788_v36 = vpop.f32.mrf.mxu1 }
 0x20b   :  { %1910 = vst.msk [vmem:[%s3867_s5 + $0xe8] sm:$0xff] %vm1880_vm1, %v1707_v46  ;;  %1926 = vst.msk [vmem:[%s3867_s5 + $0x168] sm:$0xff] %vm1880_vm1, %v1787_v44 }
 0x20c   :  { %v1711_v56 = vpop.f32.mrf.mxu0  ;;  %v1791_v7 = vpop.f32.mrf.mxu1 }
 0x20d   :  { %v1712_v57 = vadd.f32 %v3540_v53, %v1711_v56  ;;  %v1792_v60 = vadd.f32 %v3540_v53, %v1791_v7 }
 0x20e   :  { %v1713_v37 = vpop.f32.mrf.mxu0  ;;  %v1793_v30 = vpop.f32.mrf.mxu1 }
 0x20f   :  { %1911 = vst.msk [vmem:[%s3867_s5 + $0xf0] sm:$0xff] %vm1880_vm1, %v1712_v57  ;;  %1927 = vst.msk [vmem:[%s3867_s5 + $0x170] sm:$0xff] %vm1880_vm1, %v1792_v60 }
 0x210   :  { %v1716_v61 = vpop.f32.mrf.mxu0  ;;  %v1796_v6 = vpop.f32.mrf.mxu1 }
 0x211   :  { %v1717_v55 = vadd.f32 %v3540_v53, %v1716_v61  ;;  %v1797_v0 = vadd.f32 %v3540_v53, %v1796_v6 }
 0x212   :  { %v1718_v33 = vpop.f32.mrf.mxu0  ;;  %v1798_v1 = vpop.f32.mrf.mxu1 }
 0x213   :  { %1912 = vst.msk [vmem:[%s3867_s5 + $0xf8] sm:$0xff] %vm1880_vm1, %v1717_v55  ;;  %1928 = vst.msk [vmem:[%s3867_s5 + $0x178] sm:$0xff] %vm1880_vm1, %v1797_v0 }
 0x214   :  { %v1801_v4 = vpop.f32.mrf.mxu1 }
 0x215   :  { %v1802_v5 = vadd.f32 %v3540_v53, %v1801_v4 }
 0x216   :  { %v1803_v20 = vpop.f32.mrf.mxu1 }
 0x217   :  { %1929 = vst.msk [vmem:[%s3867_s5 + $0x180] sm:$0xff] %vm1880_vm1, %v1802_v5 }
 0x218   :  { %v1806_v54 = vpop.f32.mrf.mxu1 }
 0x219   :  { %v1807_v41 = vadd.f32 %v3540_v53, %v1806_v54 }
 0x21a   :  { %v1808_v51 = vpop.f32.mrf.mxu1 }
 0x21b   :  { %1930 = vst.msk [vmem:[%s3867_s5 + $0x188] sm:$0xff] %vm1880_vm1, %v1807_v41 }
 0x21c   :  { %v1811_v19 = vpop.f32.mrf.mxu1 }
 0x21d   :  { %v1812_v18 = vadd.f32 %v3540_v53, %v1811_v19 }
 0x21e   :  { %v1813_v8 = vpop.f32.mrf.mxu1 }
 0x21f   :  { %1931 = vst.msk [vmem:[%s3867_s5 + $0x190] sm:$0xff] %vm1880_vm1, %v1812_v18 }
 0x220   :  { %v1816_v9 = vpop.f32.mrf.mxu1 }
 0x221   :  { %v1817_v12 = vadd.f32 %v3540_v53, %v1816_v9 }
 0x222   :  { %v1818_v13 = vpop.f32.mrf.mxu1 }
 0x223   :  { %1932 = vst.msk [vmem:[%s3867_s5 + $0x198] sm:$0xff] %vm1880_vm1, %v1817_v12 }
 0x224   :  { %v1821_v3 = vpop.f32.mrf.mxu1 }
 0x225   :  { %v1822_v42 = vadd.f32 %v3540_v53, %v1821_v3 }
 0x226   :  { %v1823_v15 = vpop.f32.mrf.mxu1 }
 0x227   :  { %1933 = vst.msk [vmem:[%s3867_s5 + $0x1a0] sm:$0xff] %vm1880_vm1, %v1822_v42 }
 0x228   :  { %v1826_v48 = vpop.f32.mrf.mxu1 }
 0x229   :  { %v1827_v16 = vadd.f32 %v3540_v53, %v1826_v48 }
 0x22a   :  { %v1828_v2 = vpop.f32.mrf.mxu1 }
 0x22b   :  { %1934 = vst.msk [vmem:[%s3867_s5 + $0x1a8] sm:$0xff] %vm1880_vm1, %v1827_v16 }
 0x22c   :  { %v1831_v50 = vpop.f32.mrf.mxu1 }
 0x22d   :  { %v1832_v14 = vadd.f32 %v3540_v53, %v1831_v50 }
 0x22e   :  { %v1833_v43 = vpop.f32.mrf.mxu1 }
 0x22f   :  { %1935 = vst.msk [vmem:[%s3867_s5 + $0x1b0] sm:$0xff] %vm1880_vm1, %v1832_v14 }
 0x230   :  { %v1836_v17 = vpop.f32.mrf.mxu1 }
 0x231   :  { %v1837_v21 = vadd.f32 %v3540_v53, %v1836_v17 }
 0x232   :  { %v1838_v22 = vpop.f32.mrf.mxu1 }
 0x233   :  { %1936 = vst.msk [vmem:[%s3867_s5 + $0x1b8] sm:$0xff] %vm1880_vm1, %v1837_v21 }
 0x234   :  { %v1841_v25 = vpop.f32.mrf.mxu1 }
 0x235   :  { %v1842_v63 = vadd.f32 %v3540_v53, %v1841_v25 }
 0x236   :  { %v1843_v28 = vpop.f32.mrf.mxu1 }
 0x237   :  { %1937 = vst.msk [vmem:[%s3867_s5 + $0x1c0] sm:$0xff] %vm1880_vm1, %v1842_v63 }
 0x238   :  { %v1846_v26 = vpop.f32.mrf.mxu1 }
 0x239   :  { %v1847_v31 = vadd.f32 %v3540_v53, %v1846_v26 }
 0x23a   :  { %v1848_v27 = vpop.f32.mrf.mxu1 }
 0x23b   :  { %1938 = vst.msk [vmem:[%s3867_s5 + $0x1c8] sm:$0xff] %vm1880_vm1, %v1847_v31 }
 0x23c   :  { %v1851_v32 = vpop.f32.mrf.mxu1 }
 0x23d   :  { %v1852_v34 = vadd.f32 %v3540_v53, %v1851_v32 }
 0x23e   :  { %v1853_v62 = vpop.f32.mrf.mxu1 }
 0x23f   :  { %1939 = vst.msk [vmem:[%s3867_s5 + $0x1d0] sm:$0xff] %vm1880_vm1, %v1852_v34 }
 0x240   :  { %v1856_v47 = vpop.f32.mrf.mxu1 }
 0x241   :  { %v1857_v35 = vadd.f32 %v3540_v53, %v1856_v47 }
 0x242   :  { %v1858_v24 = vpop.f32.mrf.mxu1 }
 0x243   :  { %1940 = vst.msk [vmem:[%s3867_s5 + $0x1d8] sm:$0xff] %vm1880_vm1, %v1857_v35 }
 0x244   :  { %v1861_v39 = vpop.f32.mrf.mxu1 }
 0x245   :  { %v1862_v40 = vadd.f32 %v3540_v53, %v1861_v39 }
 0x246   :  { %v1863_v45 = vpop.f32.mrf.mxu1 }
 0x247   :  { %1941 = vst.msk [vmem:[%s3867_s5 + $0x1e0] sm:$0xff] %vm1880_vm1, %v1862_v40 }
 0x248   :  { %v1866_v11 = vpop.f32.mrf.mxu1 }
 0x249   :  { %v1867_v23 = vadd.f32 %v3540_v53, %v1866_v11 }
 0x24a   :  { %v1868_v59 = vpop.f32.mrf.mxu1 }
 0x24b   :  { %1942 = vst.msk [vmem:[%s3867_s5 + $0x1e8] sm:$0xff] %vm1880_vm1, %v1867_v23 }
 0x24c   :  { %v1871_v49 = vpop.f32.mrf.mxu1 }
 0x24d   :  { %v1872_v10 = vadd.f32 %v3540_v53, %v1871_v49 }
 0x24e   :  { %v1873_v52 = vpop.f32.mrf.mxu1 }
 0x24f   :  { %1943 = vst.msk [vmem:[%s3867_s5 + $0x1f0] sm:$0xff] %vm1880_vm1, %v1872_v10 }
 0x250   :  { %v1876_v29 = vpop.f32.mrf.mxu1 }
 0x251   :  { %v1877_v38 = vadd.f32 %v3540_v53, %v1876_v29 }
 0x252   :  { %v1878_v46 = vpop.f32.mrf.mxu1 }
 0x253   :  { %1944 = vst.msk [vmem:[%s3867_s5 + $0x1f8] sm:$0xff] %vm1880_vm1, %v1877_v38 }

</bundles_post_ra>
